<compile_context>
chip_gen: v5e
topology: v5e:2x2
jax: 0.10.0
libtpu: 0.0.40
codegen_flags: <defaults>
</compile_context>

<pallas_src>
import functools

import jax
import jax.numpy as jnp
from jax.experimental import pallas as pl
from jax.experimental.pallas import tpu as pltpu


# ------------------------- input-projection kernel --------------------------
def _proj_kernel(n_in, *refs):
    """gx_fwd / gx_bwd = sum_i x_i @ W_i + bias   (one M-tile per grid step)."""
    x_refs = refs[:n_in]
    wf_refs = refs[n_in:2 * n_in]
    wb_refs = refs[2 * n_in:3 * n_in]
    bf_ref, bb_ref, gf_ref, gb_ref = refs[3 * n_in:]

    gf = bf_ref[...]                                   # (1, 4H) f32, bias folded in
    gb = bb_ref[...]
    for x_r, wf_r, wb_r in zip(x_refs, wf_refs, wb_refs):
        x = x_r[...]                                   # (tm, K) bf16
        gf = gf + jnp.dot(x, wf_r[...], preferred_element_type=jnp.float32)
        gb = gb + jnp.dot(x, wb_r[...], preferred_element_type=jnp.float32)
    gf_ref[...] = gf
    gb_ref[...] = gb


def _proj_call(xs, wfs, wbs, bf, bb, *, tm=512):
    """xs: list of (M, K_i) bf16 slabs; wfs/wbs: list of (K_i, 4H) bf16 weights."""
    M = xs[0].shape[0]
    h4 = wfs[0].shape[1]

    mp = ((M + 7) // 8) * 8                            # sublane-align M
    tm = min(tm, mp)
    mp = ((mp + tm - 1) // tm) * tm                    # make tm divide padded M
    if mp != M:
        xs = [jnp.pad(x, ((0, mp - M), (0, 0))) for x in xs]

    n = len(xs)
    in_specs = (
        [pl.BlockSpec((tm, x.shape[1]), lambda i: (i, 0)) for x in xs]
        + [pl.BlockSpec(w.shape, lambda i: (0, 0)) for w in wfs]
        + [pl.BlockSpec(w.shape, lambda i: (0, 0)) for w in wbs]
        + [pl.BlockSpec((1, h4), lambda i: (0, 0)),
           pl.BlockSpec((1, h4), lambda i: (0, 0))]
    )
    out_specs = [pl.BlockSpec((tm, h4), lambda i: (i, 0)),
                 pl.BlockSpec((tm, h4), lambda i: (i, 0))]

    gf, gb = pl.pallas_call(
        functools.partial(_proj_kernel, n),
        grid=(mp // tm,),
        in_specs=in_specs,
        out_specs=out_specs,
        out_shape=[jax.ShapeDtypeStruct((mp, h4), jnp.float32),
                   jax.ShapeDtypeStruct((mp, h4), jnp.float32)],
        compiler_params=pltpu.CompilerParams(
            dimension_semantics=("parallel",)),
    )(*xs, *wfs, *wbs, bf, bb)
    return gf[:M], gb[:M]


# ---------------------- fused bidirectional LSTM kernel ----------------------
def _bilstm_rec_kernel(T, TC, H, fc_mode, nvalid_ref, gxf_ref, gxb_ref,
                       whh_f_ref, whh_b_ref, *rest):
    if fc_mode:
        wfc_ref, of_ref, ob_ref, hf_sc, cf_sc, hb_sc, cb_sc = rest
    else:
        of_ref, ob_ref, hf_sc, cf_sc, hb_sc, cb_sc = rest

    c_idx = pl.program_id(0)

    @pl.when(c_idx == 0)
    def _():
        hf_sc[...] = jnp.zeros_like(hf_sc)
        cf_sc[...] = jnp.zeros_like(cf_sc)
        hb_sc[...] = jnp.zeros_like(hb_sc)
        cb_sc[...] = jnp.zeros_like(cb_sc)

    B = hf_sc.shape[0]
    row = jax.lax.broadcasted_iota(jnp.int32, (B, 1), 0)   # batch-row index
    whh_f = whh_f_ref[...]                                  # (H, 4H) bf16, resident
    whh_b = whh_b_ref[...]
    if fc_mode:
        wfc_f = wfc_ref[:, :H]                              # (1, H) f32
        wfc_b = wfc_ref[:, H:]

    def lstm_cell(gates, c_prev):
        i = jax.nn.sigmoid(gates[:, 0 * H:1 * H])
        f = jax.nn.sigmoid(gates[:, 1 * H:2 * H])
        g = jnp.tanh(gates[:, 2 * H:3 * H])
        o = jax.nn.sigmoid(gates[:, 3 * H:4 * H])
        c_new = f * c_prev + i * g
        h_new = o * jnp.tanh(c_new)
        return h_new, c_new

    def step(j, carry):
        hf, cf, hb, cb = carry                               # (B, H) f32 each
        tf = c_idx * TC + j                                  # fwd global time
        tb = (T - 1) - tf                                    # bwd global time

        # per-direction recurrent matmul (bf16 operands, f32 accumulation)
        gf = jnp.dot(hf.astype(whh_f.dtype), whh_f,
                     preferred_element_type=jnp.float32) + gxf_ref[j]
        gb = jnp.dot(hb.astype(whh_b.dtype), whh_b,
                     preferred_element_type=jnp.float32) + gxb_ref[TC - 1 - j]

        hf_new, cf_new = lstm_cell(gf, cf)
        hb_new, cb_new = lstm_cell(gb, cb)

        # validity from SMEM: row b active at time t  <=>  b < nvalid[t]
        mf = row < nvalid_ref[tf]                            # (B, 1) bool
        mb = row < nvalid_ref[tb]

        hf_keep = jnp.where(mf, hf_new, hf)
        cf_keep = jnp.where(mf, cf_new, cf)
        hb_keep = jnp.where(mb, hb_new, hb)
        cb_keep = jnp.where(mb, cb_new, cb)

        hf_out = jnp.where(mf, hf_new, 0.0)                  # pad_packed zero-padding
        hb_out = jnp.where(mb, hb_new, 0.0)

        if fc_mode:
            # fused FC head: per-direction partial of  y = h_f.w_f + h_b.w_b + b
            of_ref[j] = jnp.sum(hf_out * wfc_f, axis=-1, keepdims=True)
            ob_ref[TC - 1 - j] = jnp.sum(hb_out * wfc_b, axis=-1, keepdims=True)
        else:
            of_ref[j] = hf_out.astype(of_ref.dtype)
            ob_ref[TC - 1 - j] = hb_out.astype(ob_ref.dtype)

        return (hf_keep, cf_keep, hb_keep, cb_keep)

    carry0 = (hf_sc[...], cf_sc[...], hb_sc[...], cb_sc[...])
    hfT, cfT, hbT, cbT = jax.lax.fori_loop(0, TC, step, carry0, unroll=True)
    hf_sc[...] = hfT
    cf_sc[...] = cfT
    hb_sc[...] = hbT
    cb_sc[...] = cbT


def _choose_tc(T, max_tc=32):
    """Largest divisor of T not exceeding max_tc (timesteps per grid step)."""
    best = 1
    for cand in range(1, min(T, max_tc) + 1):
        if T % cand == 0:
            best = cand
    return best


def _bilstm_layer(gxf, gxb, whh_f, whh_b, nvalid, *, H, fc_w=None,
                  out_dtype=jnp.bfloat16):
    T, B, _ = gxf.shape
    TC = _choose_tc(T)
    NC = T // TC
    fc_mode = fc_w is not None

    in_specs = [
        pl.BlockSpec((TC, B, 4 * H), lambda c, nv: (c, 0, 0)),            # gx fwd
        pl.BlockSpec((TC, B, 4 * H), lambda c, nv: (NC - 1 - c, 0, 0)),   # gx bwd
        pl.BlockSpec((H, 4 * H), lambda c, nv: (0, 0)),                   # W_hh fwd^T
        pl.BlockSpec((H, 4 * H), lambda c, nv: (0, 0)),                   # W_hh bwd^T
    ]
    inputs = [gxf, gxb, whh_f, whh_b]
    if fc_mode:
        in_specs.append(pl.BlockSpec((1, 2 * H), lambda c, nv: (0, 0)))
        inputs.append(fc_w)
        out_shape = [jax.ShapeDtypeStruct((T, B, 1), jnp.float32),
                     jax.ShapeDtypeStruct((T, B, 1), jnp.float32)]
        out_specs = [pl.BlockSpec((TC, B, 1), lambda c, nv: (c, 0, 0)),
                     pl.BlockSpec((TC, B, 1), lambda c, nv: (NC - 1 - c, 0, 0))]
    else:
        out_shape = [jax.ShapeDtypeStruct((T, B, H), out_dtype),
                     jax.ShapeDtypeStruct((T, B, H), out_dtype)]
        out_specs = [pl.BlockSpec((TC, B, H), lambda c, nv: (c, 0, 0)),
                     pl.BlockSpec((TC, B, H), lambda c, nv: (NC - 1 - c, 0, 0))]

    grid_spec = pltpu.PrefetchScalarGridSpec(
        num_scalar_prefetch=1,                      # nvalid -> SMEM scalars
        grid=(NC,),
        in_specs=in_specs,
        out_specs=out_specs,
        scratch_shapes=[pltpu.VMEM((B, H), jnp.float32),   # h_fwd
                        pltpu.VMEM((B, H), jnp.float32),   # c_fwd
                        pltpu.VMEM((B, H), jnp.float32),   # h_bwd
                        pltpu.VMEM((B, H), jnp.float32)],  # c_bwd
    )
    # NOTE: recurrent weights stay VMEM-resident across the whole time grid; at
    # production D/H this is tiny (2 * H * 4H bf16), well under the scoped limit.
    return pl.pallas_call(
        functools.partial(_bilstm_rec_kernel, T, TC, H, fc_mode),
        grid_spec=grid_spec,
        out_shape=out_shape,
        compiler_params=pltpu.CompilerParams(
            dimension_semantics=("arbitrary",)),    # time recurrence is serial
    )(nvalid, *inputs)


# -------------------------------- full forward -------------------------------
def lstm_clf_forward(params, x, x_lens):
    """x: (B, T, D) batch-first (PyTorch batch_first=True). Returns (B, T, 1)."""
    B, T, D = x.shape
    H = params["hidden_dim"]
    x_lens = x_lens.astype(jnp.int32)

    # pack_padded_sequence (enforce_sorted=True default) => lens sorted descending,
    # so "sequence b active at time t"  <=>  b < nvalid[t].
    nvalid = jnp.sum(
        (jnp.arange(T, dtype=jnp.int32)[:, None] < x_lens[None, :]).astype(jnp.int32),
        axis=1)                                                  # (T,) int32

    x_tm = jnp.transpose(x, (1, 0, 2)).astype(jnp.bfloat16)      # (T, B, D)
    x_flat = x_tm.reshape(T * B, D)

    # ----- layer 0 -----
    p0 = params["layer0"]
    gxf, gxb = _proj_call([x_flat], [p0["wih_fwd_t"]], [p0["wih_bwd_t"]],
                          p0["b_fwd"], p0["b_bwd"])
    hf0, hb0 = _bilstm_layer(gxf.reshape(T, B, 4 * H),
                             gxb.reshape(T, B, 4 * H),
                             p0["whh_fwd_t"], p0["whh_bwd_t"], nvalid, H=H)

    # ----- layer 1 (+ fused FC epilogue) -----
    # TODO(synk): nn.LSTM inter-layer dropout(p=0.5) is train-only; omitted.
    p1 = params["layer1"]
    gxf1, gxb1 = _proj_call(
        [hf0.reshape(T * B, H), hb0.reshape(T * B, H)],
        [p1["wih_fwd_hf"], p1["wih_fwd_hb"]],
        [p1["wih_bwd_hf"], p1["wih_bwd_hb"]],
        p1["b_fwd"], p1["b_bwd"])
    yf, yb = _bilstm_layer(gxf1.reshape(T, B, 4 * H),
                           gxb1.reshape(T, B, 4 * H),
                           p1["whh_fwd_t"], p1["whh_bwd_t"], nvalid, H=H,
                           fc_w=params["fc_w"])

    y = yf + yb + params["fc_b"]                 # (T, B, 1); padded pos == fc bias
    return jnp.transpose(y, (1, 0, 2))           # (B, T, 1)


# ---------------------------- deterministic params ---------------------------
def init_params(key, input_dim, hidden_dim, w_dtype=jnp.bfloat16):
    H = hidden_dim
    bound = 1.0 / (H ** 0.5)

    def unif(kk, shape):
        return jax.random.uniform(kk, shape, jnp.float32, -bound, bound)

    keys = iter(jax.random.split(key, 24))
    params = {"hidden_dim": H}
    for layer in range(2):
        d_in = input_dim if layer == 0 else 2 * H
        wih_f = unif(next(keys), (4 * H, d_in))   # PyTorch weight_ih_l{l}
        whh_f = unif(next(keys), (4 * H, H))      # PyTorch weight_hh_l{l}
        bih_f = unif(next(keys), (4 * H,))
        bhh_f = unif(next(keys), (4 * H,))
        wih_b = unif(next(keys), (4 * H, d_in))   # *_reverse
        whh_b = unif(next(keys), (4 * H, H))
        bih_b = unif(next(keys), (4 * H,))
        bhh_b = unif(next(keys), (4 * H,))

        lp = {
            "b_fwd": (bih_f + bhh_f).reshape(1, 4 * H),
            "b_bwd": (bih_b + bhh_b).reshape(1, 4 * H),
            "whh_fwd_t": whh_f.T.astype(w_dtype),            # (H, 4H)
            "whh_bwd_t": whh_b.T.astype(w_dtype),            # (H, 4H)
        }
        if layer == 0:
            lp["wih_fwd_t"] = wih_f.T.astype(w_dtype)        # (D, 4H)
            lp["wih_bwd_t"] = wih_b.T.astype(w_dtype)
        else:
            wf_t, wb_t = wih_f.T, wih_b.T                    # (2H, 4H)
            lp["wih_fwd_hf"] = wf_t[:H].astype(w_dtype)      # acts on layer-0 h_fwd
            lp["wih_fwd_hb"] = wf_t[H:].astype(w_dtype)      # acts on layer-0 h_bwd
            lp["wih_bwd_hf"] = wb_t[:H].astype(w_dtype)
            lp["wih_bwd_hb"] = wb_t[H:].astype(w_dtype)
        params[f"layer{layer}"] = lp

    fc_w = unif(next(keys), (1, 2 * H))            # nn.Linear(2H, 1) weight
    fc_b = unif(next(keys), (1,))
    params["fc_w"] = fc_w                          # f32, used on the VPU epilogue
    params["fc_b"] = fc_b
    return params


if __name__ == "__main__":
    B, T, D, H = 2, 8, 64, 32                      # small input_dim / hidden_dim
    key = jax.random.PRNGKey(0)
    kx, kp = jax.random.split(key)
    x = jax.random.normal(kx, (B, T, D), jnp.float32)
    # lens sorted descending (pack_padded_sequence default enforce_sorted=True),
    # max length == T so pad_packed returns the same T.
    x_lens = jnp.array([8, 5], jnp.int32)
    params = init_params(kp, input_dim=D, hidden_dim=H)

    fwd = jax.jit(lambda xx, ll: lstm_clf_forward(params, xx, ll))
    y = fwd(x, x_lens)
    jax.block_until_ready(y)
    assert y.shape == (B, T, 1) and y.dtype == jnp.float32
    print("KERNEL_OK")
</pallas_src>

<mosaic_0001>
module attributes {stable_mosaic.version = 11 : i64} {
  func.func @_proj_kernel(%arg0: i32, %arg1: memref<16x64xbf16, #tpu.memory_space<vmem>>, %arg2: memref<64x128xbf16, #tpu.memory_space<vmem>>, %arg3: memref<64x128xbf16, #tpu.memory_space<vmem>>, %arg4: memref<1x128xf32, #tpu.memory_space<vmem>>, %arg5: memref<1x128xf32, #tpu.memory_space<vmem>>, %arg6: memref<16x128xf32, #tpu.memory_space<vmem>>, %arg7: memref<16x128xf32, #tpu.memory_space<vmem>>) attributes {dimension_semantics = [#tpu.dimension_semantics<parallel>], iteration_bounds = array<i64: 1>, scalar_prefetch = 0 : i64, scratch_operands = 0 : i64, tpu.core_type = #tpu.core_type<tc>, window_params = [{transform_indices = @transform_0, window_bounds = array<i64: 16, 64>}, {pipeline_mode = #tpu.pipeline_mode<synchronous>, transform_indices = @transform_1, window_bounds = array<i64: 64, 128>}, {pipeline_mode = #tpu.pipeline_mode<synchronous>, transform_indices = @transform_2, window_bounds = array<i64: 64, 128>}, {pipeline_mode = #tpu.pipeline_mode<synchronous>, transform_indices = @transform_3, window_bounds = array<i64: 1, 128>}, {pipeline_mode = #tpu.pipeline_mode<synchronous>, transform_indices = @transform_4, window_bounds = array<i64: 1, 128>}, {transform_indices = @transform_5, window_bounds = array<i64: 16, 128>}, {transform_indices = @transform_6, window_bounds = array<i64: 16, 128>}]} {
    %c0 = arith.constant 0 : index
    %c0_0 = arith.constant 0 : index
    %0 = vector.load %arg4[%c0, %c0_0] : memref<1x128xf32, #tpu.memory_space<vmem>>, vector<1x128xf32>
    %c0_1 = arith.constant 0 : index
    %c0_2 = arith.constant 0 : index
    %1 = vector.load %arg5[%c0_1, %c0_2] : memref<1x128xf32, #tpu.memory_space<vmem>>, vector<1x128xf32>
    %c0_3 = arith.constant 0 : index
    %c0_4 = arith.constant 0 : index
    %2 = vector.load %arg1[%c0_3, %c0_4] : memref<16x64xbf16, #tpu.memory_space<vmem>>, vector<16x64xbf16>
    %c0_5 = arith.constant 0 : index
    %c0_6 = arith.constant 0 : index
    %3 = vector.load %arg2[%c0_5, %c0_6] : memref<64x128xbf16, #tpu.memory_space<vmem>>, vector<64x128xbf16>
    %cst = arith.constant dense<0.000000e+00> : vector<16x128xf32>
    %4 = tpu.matmul %2, %3, %cst {dimension_numbers = #tpu.dot_dimension_numbers<[1], [0], [0], [1], [0, 0, 1, 1], [], []>} : vector<16x64xbf16>, vector<64x128xbf16>, vector<16x128xf32> -> vector<16x128xf32>
    %5 = vector.broadcast %0 : vector<1x128xf32> to vector<16x128xf32>
    %6 = arith.addf %5, %4 : vector<16x128xf32>
    %c0_7 = arith.constant 0 : index
    %c0_8 = arith.constant 0 : index
    %7 = vector.load %arg3[%c0_7, %c0_8] : memref<64x128xbf16, #tpu.memory_space<vmem>>, vector<64x128xbf16>
    %cst_9 = arith.constant dense<0.000000e+00> : vector<16x128xf32>
    %8 = tpu.matmul %2, %7, %cst_9 {dimension_numbers = #tpu.dot_dimension_numbers<[1], [0], [0], [1], [0, 0, 1, 1], [], []>} : vector<16x64xbf16>, vector<64x128xbf16>, vector<16x128xf32> -> vector<16x128xf32>
    %9 = vector.broadcast %1 : vector<1x128xf32> to vector<16x128xf32>
    %10 = arith.addf %9, %8 : vector<16x128xf32>
    %c0_10 = arith.constant 0 : index
    %c0_11 = arith.constant 0 : index
    %11 = vector.load %arg6[%c0_10, %c0_11] : memref<16x128xf32, #tpu.memory_space<vmem>>, vector<16x128xf32>
    tpu.vector_store %arg6[%c0_10, %c0_11], %6 {strides = array<i32>} : memref<16x128xf32, #tpu.memory_space<vmem>>, vector<16x128xf32>,
    %c0_12 = arith.constant 0 : index
    %c0_13 = arith.constant 0 : index
    %12 = vector.load %arg7[%c0_12, %c0_13] : memref<16x128xf32, #tpu.memory_space<vmem>>, vector<16x128xf32>
    tpu.vector_store %arg7[%c0_12, %c0_13], %10 {strides = array<i32>} : memref<16x128xf32, #tpu.memory_space<vmem>>, vector<16x128xf32>,
    return
  }
  func.func @transform_0(%arg0: i32) -> (i32, i32) {
    %c0_i32 = arith.constant 0 : i32
    %c0_i32_0 = arith.constant 0 : i32
    return %arg0, %c0_i32 : i32, i32
  }
  func.func @transform_1(%arg0: i32) -> (i32, i32) {
    %c0_i32 = arith.constant 0 : i32
    %c0_i32_0 = arith.constant 0 : i32
    %c0_i32_1 = arith.constant 0 : i32
    return %c0_i32, %c0_i32_0 : i32, i32
  }
  func.func @transform_2(%arg0: i32) -> (i32, i32) {
    %c0_i32 = arith.constant 0 : i32
    %c0_i32_0 = arith.constant 0 : i32
    %c0_i32_1 = arith.constant 0 : i32
    return %c0_i32, %c0_i32_0 : i32, i32
  }
  func.func @transform_3(%arg0: i32) -> (i32, i32) {
    %c0_i32 = arith.constant 0 : i32
    %c0_i32_0 = arith.constant 0 : i32
    %c0_i32_1 = arith.constant 0 : i32
    return %c0_i32, %c0_i32_0 : i32, i32
  }
  func.func @transform_4(%arg0: i32) -> (i32, i32) {
    %c0_i32 = arith.constant 0 : i32
    %c0_i32_0 = arith.constant 0 : i32
    %c0_i32_1 = arith.constant 0 : i32
    return %c0_i32, %c0_i32_0 : i32, i32
  }
  func.func @transform_5(%arg0: i32) -> (i32, i32) {
    %c0_i32 = arith.constant 0 : i32
    %c0_i32_0 = arith.constant 0 : i32
    return %arg0, %c0_i32 : i32, i32
  }
  func.func @transform_6(%arg0: i32) -> (i32, i32) {
    %c0_i32 = arith.constant 0 : i32
    %c0_i32_0 = arith.constant 0 : i32
    return %arg0, %c0_i32 : i32, i32
  }
}

module attributes {stable_mosaic.version = 11 : i64} {
  func.func @_proj_kernel(%arg0: i32, %arg1: memref<16x32xbf16, #tpu.memory_space<vmem>>, %arg2: memref<16x32xbf16, #tpu.memory_space<vmem>>, %arg3: memref<32x128xbf16, #tpu.memory_space<vmem>>, %arg4: memref<32x128xbf16, #tpu.memory_space<vmem>>, %arg5: memref<32x128xbf16, #tpu.memory_space<vmem>>, %arg6: memref<32x128xbf16, #tpu.memory_space<vmem>>, %arg7: memref<1x128xf32, #tpu.memory_space<vmem>>, %arg8: memref<1x128xf32, #tpu.memory_space<vmem>>, %arg9: memref<16x128xf32, #tpu.memory_space<vmem>>, %arg10: memref<16x128xf32, #tpu.memory_space<vmem>>) attributes {dimension_semantics = [#tpu.dimension_semantics<parallel>], iteration_bounds = array<i64: 1>, scalar_prefetch = 0 : i64, scratch_operands = 0 : i64, tpu.core_type = #tpu.core_type<tc>, window_params = [{transform_indices = @transform_0, window_bounds = array<i64: 16, 32>}, {transform_indices = @transform_1, window_bounds = array<i64: 16, 32>}, {pipeline_mode = #tpu.pipeline_mode<synchronous>, transform_indices = @transform_2, window_bounds = array<i64: 32, 128>}, {pipeline_mode = #tpu.pipeline_mode<synchronous>, transform_indices = @transform_3, window_bounds = array<i64: 32, 128>}, {pipeline_mode = #tpu.pipeline_mode<synchronous>, transform_indices = @transform_4, window_bounds = array<i64: 32, 128>}, {pipeline_mode = #tpu.pipeline_mode<synchronous>, transform_indices = @transform_5, window_bounds = array<i64: 32, 128>}, {pipeline_mode = #tpu.pipeline_mode<synchronous>, transform_indices = @transform_6, window_bounds = array<i64: 1, 128>}, {pipeline_mode = #tpu.pipeline_mode<synchronous>, transform_indices = @transform_7, window_bounds = array<i64: 1, 128>}, {transform_indices = @transform_8, window_bounds = array<i64: 16, 128>}, {transform_indices = @transform_9, window_bounds = array<i64: 16, 128>}]} {
    %c0 = arith.constant 0 : index
    %c0_0 = arith.constant 0 : index
    %0 = vector.load %arg7[%c0, %c0_0] : memref<1x128xf32, #tpu.memory_space<vmem>>, vector<1x128xf32>
    %c0_1 = arith.constant 0 : index
    %c0_2 = arith.constant 0 : index
    %1 = vector.load %arg8[%c0_1, %c0_2] : memref<1x128xf32, #tpu.memory_space<vmem>>, vector<1x128xf32>
    %c0_3 = arith.constant 0 : index
    %c0_4 = arith.constant 0 : index
    %2 = vector.load %arg1[%c0_3, %c0_4] : memref<16x32xbf16, #tpu.memory_space<vmem>>, vector<16x32xbf16>
    %c0_5 = arith.constant 0 : index
    %c0_6 = arith.constant 0 : index
    %3 = vector.load %arg3[%c0_5, %c0_6] : memref<32x128xbf16, #tpu.memory_space<vmem>>, vector<32x128xbf16>
    %cst = arith.constant dense<0.000000e+00> : vector<16x128xf32>
    %4 = tpu.matmul %2, %3, %cst {dimension_numbers = #tpu.dot_dimension_numbers<[1], [0], [0], [1], [0, 0, 1, 1], [], []>} : vector<16x32xbf16>, vector<32x128xbf16>, vector<16x128xf32> -> vector<16x128xf32>
    %5 = vector.broadcast %0 : vector<1x128xf32> to vector<16x128xf32>
    %6 = arith.addf %5, %4 : vector<16x128xf32>
    %c0_7 = arith.constant 0 : index
    %c0_8 = arith.constant 0 : index
    %7 = vector.load %arg5[%c0_7, %c0_8] : memref<32x128xbf16, #tpu.memory_space<vmem>>, vector<32x128xbf16>
    %cst_9 = arith.constant dense<0.000000e+00> : vector<16x128xf32>
    %8 = tpu.matmul %2, %7, %cst_9 {dimension_numbers = #tpu.dot_dimension_numbers<[1], [0], [0], [1], [0, 0, 1, 1], [], []>} : vector<16x32xbf16>, vector<32x128xbf16>, vector<16x128xf32> -> vector<16x128xf32>
    %9 = vector.broadcast %1 : vector<1x128xf32> to vector<16x128xf32>
    %10 = arith.addf %9, %8 : vector<16x128xf32>
    %c0_10 = arith.constant 0 : index
    %c0_11 = arith.constant 0 : index
    %11 = vector.load %arg2[%c0_10, %c0_11] : memref<16x32xbf16, #tpu.memory_space<vmem>>, vector<16x32xbf16>
    %c0_12 = arith.constant 0 : index
    %c0_13 = arith.constant 0 : index
    %12 = vector.load %arg4[%c0_12, %c0_13] : memref<32x128xbf16, #tpu.memory_space<vmem>>, vector<32x128xbf16>
    %cst_14 = arith.constant dense<0.000000e+00> : vector<16x128xf32>
    %13 = tpu.matmul %11, %12, %cst_14 {dimension_numbers = #tpu.dot_dimension_numbers<[1], [0], [0], [1], [0, 0, 1, 1], [], []>} : vector<16x32xbf16>, vector<32x128xbf16>, vector<16x128xf32> -> vector<16x128xf32>
    %14 = arith.addf %6, %13 : vector<16x128xf32>
    %c0_15 = arith.constant 0 : index
    %c0_16 = arith.constant 0 : index
    %15 = vector.load %arg6[%c0_15, %c0_16] : memref<32x128xbf16, #tpu.memory_space<vmem>>, vector<32x128xbf16>
    %cst_17 = arith.constant dense<0.000000e+00> : vector<16x128xf32>
    %16 = tpu.matmul %11, %15, %cst_17 {dimension_numbers = #tpu.dot_dimension_numbers<[1], [0], [0], [1], [0, 0, 1, 1], [], []>} : vector<16x32xbf16>, vector<32x128xbf16>, vector<16x128xf32> -> vector<16x128xf32>
    %17 = arith.addf %10, %16 : vector<16x128xf32>
    %c0_18 = arith.constant 0 : index
    %c0_19 = arith.constant 0 : index
    %18 = vector.load %arg9[%c0_18, %c0_19] : memref<16x128xf32, #tpu.memory_space<vmem>>, vector<16x128xf32>
    tpu.vector_store %arg9[%c0_18, %c0_19], %14 {strides = array<i32>} : memref<16x128xf32, #tpu.memory_space<vmem>>, vector<16x128xf32>,
    %c0_20 = arith.constant 0 : index
    %c0_21 = arith.constant 0 : index
    %19 = vector.load %arg10[%c0_20, %c0_21] : memref<16x128xf32, #tpu.memory_space<vmem>>, vector<16x128xf32>
    tpu.vector_store %arg10[%c0_20, %c0_21], %17 {strides = array<i32>} : memref<16x128xf32, #tpu.memory_space<vmem>>, vector<16x128xf32>,
    return
  }
  func.func @transform_0(%arg0: i32) -> (i32, i32) {
    %c0_i32 = arith.constant 0 : i32
    %c0_i32_0 = arith.constant 0 : i32
    return %arg0, %c0_i32 : i32, i32
  }
  func.func @transform_1(%arg0: i32) -> (i32, i32) {
    %c0_i32 = arith.constant 0 : i32
    %c0_i32_0 = arith.constant 0 : i32
    return %arg0, %c0_i32 : i32, i32
  }
  func.func @transform_2(%arg0: i32) -> (i32, i32) {
    %c0_i32 = arith.constant 0 : i32
    %c0_i32_0 = arith.constant 0 : i32
    %c0_i32_1 = arith.constant 0 : i32
    return %c0_i32, %c0_i32_0 : i32, i32
  }
  func.func @transform_3(%arg0: i32) -> (i32, i32) {
    %c0_i32 = arith.constant 0 : i32
    %c0_i32_0 = arith.constant 0 : i32
    %c0_i32_1 = arith.constant 0 : i32
    return %c0_i32, %c0_i32_0 : i32, i32
  }
  func.func @transform_4(%arg0: i32) -> (i32, i32) {
    %c0_i32 = arith.constant 0 : i32
    %c0_i32_0 = arith.constant 0 : i32
    %c0_i32_1 = arith.constant 0 : i32
    return %c0_i32, %c0_i32_0 : i32, i32
  }
  func.func @transform_5(%arg0: i32) -> (i32, i32) {
    %c0_i32 = arith.constant 0 : i32
    %c0_i32_0 = arith.constant 0 : i32
    %c0_i32_1 = arith.constant 0 : i32
    return %c0_i32, %c0_i32_0 : i32, i32
  }
  func.func @transform_6(%arg0: i32) -> (i32, i32) {
    %c0_i32 = arith.constant 0 : i32
    %c0_i32_0 = arith.constant 0 : i32
    %c0_i32_1 = arith.constant 0 : i32
    return %c0_i32, %c0_i32_0 : i32, i32
  }
  func.func @transform_7(%arg0: i32) -> (i32, i32) {
    %c0_i32 = arith.constant 0 : i32
    %c0_i32_0 = arith.constant 0 : i32
    %c0_i32_1 = arith.constant 0 : i32
    return %c0_i32, %c0_i32_0 : i32, i32
  }
  func.func @transform_8(%arg0: i32) -> (i32, i32) {
    %c0_i32 = arith.constant 0 : i32
    %c0_i32_0 = arith.constant 0 : i32
    return %arg0, %c0_i32 : i32, i32
  }
  func.func @transform_9(%arg0: i32) -> (i32, i32) {
    %c0_i32 = arith.constant 0 : i32
    %c0_i32_0 = arith.constant 0 : i32
    return %arg0, %c0_i32 : i32, i32
  }
}

module attributes {stable_mosaic.version = 11 : i64} {
  func.func @_bilstm_rec_kernel(%arg0: i32, %arg1: memref<8xi32, #tpu.memory_space<smem>>, %arg2: memref<8x2x128xf32, #tpu.memory_space<vmem>>, %arg3: memref<8x2x128xf32, #tpu.memory_space<vmem>>, %arg4: memref<32x128xbf16, #tpu.memory_space<vmem>>, %arg5: memref<32x128xbf16, #tpu.memory_space<vmem>>, %arg6: memref<8x2x32xbf16, #tpu.memory_space<vmem>>, %arg7: memref<8x2x32xbf16, #tpu.memory_space<vmem>>, %arg8: memref<2x32xf32, #tpu.memory_space<vmem>>, %arg9: memref<2x32xf32, #tpu.memory_space<vmem>>, %arg10: memref<2x32xf32, #tpu.memory_space<vmem>>, %arg11: memref<2x32xf32, #tpu.memory_space<vmem>>) attributes {dimension_semantics = [#tpu.dimension_semantics<arbitrary>], iteration_bounds = array<i64: 1>, scalar_prefetch = 1 : i64, scratch_operands = 4 : i64, tpu.core_type = #tpu.core_type<tc>, window_params = [{transform_indices = @transform_0, window_bounds = array<i64: 8, 2, 128>}, {transform_indices = @transform_1, window_bounds = array<i64: 8, 2, 128>}, {pipeline_mode = #tpu.pipeline_mode<synchronous>, transform_indices = @transform_2, window_bounds = array<i64: 32, 128>}, {pipeline_mode = #tpu.pipeline_mode<synchronous>, transform_indices = @transform_3, window_bounds = array<i64: 32, 128>}, {transform_indices = @transform_4, window_bounds = array<i64: 8, 2, 32>}, {transform_indices = @transform_5, window_bounds = array<i64: 8, 2, 32>}]} {
    %c0_i32 = arith.constant 0 : i32
    %0 = arith.cmpi eq, %arg0, %c0_i32 : i32
    %1 = arith.extui %0 : i1 to i32
    %c0_i32_0 = arith.constant 0 : i32
    %2 = arith.cmpi ne, %1, %c0_i32_0 : i32
    scf.if %2 {
      %cst_196 = arith.constant 0.000000e+00 : f32
      %854 = vector.broadcast %cst_196 : f32 to vector<2x32xf32>
      %c0_197 = arith.constant 0 : index
      %c0_198 = arith.constant 0 : index
      %855 = vector.load %arg8[%c0_197, %c0_198] : memref<2x32xf32, #tpu.memory_space<vmem>>, vector<2x32xf32>
      tpu.vector_store %arg8[%c0_197, %c0_198], %854 {strides = array<i32>} : memref<2x32xf32, #tpu.memory_space<vmem>>, vector<2x32xf32>,
      %cst_199 = arith.constant 0.000000e+00 : f32
      %856 = vector.broadcast %cst_199 : f32 to vector<2x32xf32>
      %c0_200 = arith.constant 0 : index
      %c0_201 = arith.constant 0 : index
      %857 = vector.load %arg9[%c0_200, %c0_201] : memref<2x32xf32, #tpu.memory_space<vmem>>, vector<2x32xf32>
      tpu.vector_store %arg9[%c0_200, %c0_201], %856 {strides = array<i32>} : memref<2x32xf32, #tpu.memory_space<vmem>>, vector<2x32xf32>,
      %cst_202 = arith.constant 0.000000e+00 : f32
      %858 = vector.broadcast %cst_202 : f32 to vector<2x32xf32>
      %c0_203 = arith.constant 0 : index
      %c0_204 = arith.constant 0 : index
      %859 = vector.load %arg10[%c0_203, %c0_204] : memref<2x32xf32, #tpu.memory_space<vmem>>, vector<2x32xf32>
      tpu.vector_store %arg10[%c0_203, %c0_204], %858 {strides = array<i32>} : memref<2x32xf32, #tpu.memory_space<vmem>>, vector<2x32xf32>,
      %cst_205 = arith.constant 0.000000e+00 : f32
      %860 = vector.broadcast %cst_205 : f32 to vector<2x32xf32>
      %c0_206 = arith.constant 0 : index
      %c0_207 = arith.constant 0 : index
      %861 = vector.load %arg11[%c0_206, %c0_207] : memref<2x32xf32, #tpu.memory_space<vmem>>, vector<2x32xf32>
      tpu.vector_store %arg11[%c0_206, %c0_207], %860 {strides = array<i32>} : memref<2x32xf32, #tpu.memory_space<vmem>>, vector<2x32xf32>,
    } else {
    }
    %3 = tpu.iota {dimensions = array<i32: 0>} : vector<2x1xi32>
    %c0 = arith.constant 0 : index
    %c0_1 = arith.constant 0 : index
    %4 = vector.load %arg4[%c0, %c0_1] : memref<32x128xbf16, #tpu.memory_space<vmem>>, vector<32x128xbf16>
    %c0_2 = arith.constant 0 : index
    %c0_3 = arith.constant 0 : index
    %5 = vector.load %arg5[%c0_2, %c0_3] : memref<32x128xbf16, #tpu.memory_space<vmem>>, vector<32x128xbf16>
    %c0_4 = arith.constant 0 : index
    %c0_5 = arith.constant 0 : index
    %6 = vector.load %arg8[%c0_4, %c0_5] : memref<2x32xf32, #tpu.memory_space<vmem>>, vector<2x32xf32>
    %c0_6 = arith.constant 0 : index
    %c0_7 = arith.constant 0 : index
    %7 = vector.load %arg9[%c0_6, %c0_7] : memref<2x32xf32, #tpu.memory_space<vmem>>, vector<2x32xf32>
    %c0_8 = arith.constant 0 : index
    %c0_9 = arith.constant 0 : index
    %8 = vector.load %arg10[%c0_8, %c0_9] : memref<2x32xf32, #tpu.memory_space<vmem>>, vector<2x32xf32>
    %c0_10 = arith.constant 0 : index
    %c0_11 = arith.constant 0 : index
    %9 = vector.load %arg11[%c0_10, %c0_11] : memref<2x32xf32, #tpu.memory_space<vmem>>, vector<2x32xf32>
    %c0_i32_12 = arith.constant 0 : i32
    %c8_i32 = arith.constant 8 : i32
    %10 = arith.muli %arg0, %c8_i32 : i32
    %11 = arith.addi %10, %c0_i32_12 : i32
    %c7_i32 = arith.constant 7 : i32
    %12 = arith.subi %c7_i32, %11 : i32
    %13 = arith.truncf %6 : vector<2x32xf32> to vector<2x32xbf16>
    %cst = arith.constant dense<0.000000e+00> : vector<2x128xf32>
    %14 = tpu.matmul %13, %4, %cst {dimension_numbers = #tpu.dot_dimension_numbers<[1], [0], [0], [1], [0, 0, 1, 1], [], []>} : vector<2x32xbf16>, vector<32x128xbf16>, vector<2x128xf32> -> vector<2x128xf32>
    %15 = arith.index_cast %c0_i32_12 : i32 to index
    %c0_13 = arith.constant 0 : index
    %c0_14 = arith.constant 0 : index
    %16 = vector.load %arg2[%15, %c0_13, %c0_14] : memref<8x2x128xf32, #tpu.memory_space<vmem>>, vector<1x2x128xf32>
    %17 = vector.shape_cast %16 : vector<1x2x128xf32> to vector<2x128xf32>
    %18 = arith.addf %14, %17 : vector<2x128xf32>
    %19 = arith.truncf %8 : vector<2x32xf32> to vector<2x32xbf16>
    %cst_15 = arith.constant dense<0.000000e+00> : vector<2x128xf32>
    %20 = tpu.matmul %19, %5, %cst_15 {dimension_numbers = #tpu.dot_dimension_numbers<[1], [0], [0], [1], [0, 0, 1, 1], [], []>} : vector<2x32xbf16>, vector<32x128xbf16>, vector<2x128xf32> -> vector<2x128xf32>
    %c7_i32_16 = arith.constant 7 : i32
    %21 = arith.subi %c7_i32_16, %c0_i32_12 : i32
    %22 = arith.index_cast %21 : i32 to index
    %c0_17 = arith.constant 0 : index
    %c0_18 = arith.constant 0 : index
    %23 = vector.load %arg3[%22, %c0_17, %c0_18] : memref<8x2x128xf32, #tpu.memory_space<vmem>>, vector<1x2x128xf32>
    %24 = vector.shape_cast %23 : vector<1x2x128xf32> to vector<2x128xf32>
    %25 = arith.addf %20, %24 : vector<2x128xf32>
    %26 = vector.extract_strided_slice %18 {offsets = [0, 0], sizes = [2, 32], strides = [1, 1]} : vector<2x128xf32> to vector<2x32xf32>
    %27 = arith.negf %26 : vector<2x32xf32>
    %28 = math.exp %27 : vector<2x32xf32>
    %cst_19 = arith.constant 1.000000e+00 : f32
    %29 = vector.broadcast %cst_19 : f32 to vector<2x32xf32>
    %30 = arith.addf %29, %28 : vector<2x32xf32>
    %31 = arith.divf %29, %30 : vector<2x32xf32>
    %32 = vector.extract_strided_slice %18 {offsets = [0, 32], sizes = [2, 32], strides = [1, 1]} : vector<2x128xf32> to vector<2x32xf32>
    %33 = arith.negf %32 : vector<2x32xf32>
    %34 = math.exp %33 : vector<2x32xf32>
    %cst_20 = arith.constant 1.000000e+00 : f32
    %35 = vector.broadcast %cst_20 : f32 to vector<2x32xf32>
    %36 = arith.addf %35, %34 : vector<2x32xf32>
    %37 = arith.divf %35, %36 : vector<2x32xf32>
    %38 = vector.extract_strided_slice %18 {offsets = [0, 64], sizes = [2, 32], strides = [1, 1]} : vector<2x128xf32> to vector<2x32xf32>
    %39 = math.tanh %38 : vector<2x32xf32>
    %40 = vector.extract_strided_slice %18 {offsets = [0, 96], sizes = [2, 32], strides = [1, 1]} : vector<2x128xf32> to vector<2x32xf32>
    %41 = arith.negf %40 : vector<2x32xf32>
    %42 = math.exp %41 : vector<2x32xf32>
    %cst_21 = arith.constant 1.000000e+00 : f32
    %43 = vector.broadcast %cst_21 : f32 to vector<2x32xf32>
    %44 = arith.addf %43, %42 : vector<2x32xf32>
    %45 = arith.divf %43, %44 : vector<2x32xf32>
    %46 = arith.mulf %37, %7 : vector<2x32xf32>
    %47 = arith.mulf %31, %39 : vector<2x32xf32>
    %48 = arith.addf %46, %47 : vector<2x32xf32>
    %49 = math.tanh %48 : vector<2x32xf32>
    %50 = arith.mulf %45, %49 : vector<2x32xf32>
    %51 = vector.extract_strided_slice %25 {offsets = [0, 0], sizes = [2, 32], strides = [1, 1]} : vector<2x128xf32> to vector<2x32xf32>
    %52 = arith.negf %51 : vector<2x32xf32>
    %53 = math.exp %52 : vector<2x32xf32>
    %cst_22 = arith.constant 1.000000e+00 : f32
    %54 = vector.broadcast %cst_22 : f32 to vector<2x32xf32>
    %55 = arith.addf %54, %53 : vector<2x32xf32>
    %56 = arith.divf %54, %55 : vector<2x32xf32>
    %57 = vector.extract_strided_slice %25 {offsets = [0, 32], sizes = [2, 32], strides = [1, 1]} : vector<2x128xf32> to vector<2x32xf32>
    %58 = arith.negf %57 : vector<2x32xf32>
    %59 = math.exp %58 : vector<2x32xf32>
    %cst_23 = arith.constant 1.000000e+00 : f32
    %60 = vector.broadcast %cst_23 : f32 to vector<2x32xf32>
    %61 = arith.addf %60, %59 : vector<2x32xf32>
    %62 = arith.divf %60, %61 : vector<2x32xf32>
    %63 = vector.extract_strided_slice %25 {offsets = [0, 64], sizes = [2, 32], strides = [1, 1]} : vector<2x128xf32> to vector<2x32xf32>
    %64 = math.tanh %63 : vector<2x32xf32>
    %65 = vector.extract_strided_slice %25 {offsets = [0, 96], sizes = [2, 32], strides = [1, 1]} : vector<2x128xf32> to vector<2x32xf32>
    %66 = arith.negf %65 : vector<2x32xf32>
    %67 = math.exp %66 : vector<2x32xf32>
    %cst_24 = arith.constant 1.000000e+00 : f32
    %68 = vector.broadcast %cst_24 : f32 to vector<2x32xf32>
    %69 = arith.addf %68, %67 : vector<2x32xf32>
    %70 = arith.divf %68, %69 : vector<2x32xf32>
    %71 = arith.mulf %62, %9 : vector<2x32xf32>
    %72 = arith.mulf %56, %64 : vector<2x32xf32>
    %73 = arith.addf %71, %72 : vector<2x32xf32>
    %74 = math.tanh %73 : vector<2x32xf32>
    %75 = arith.mulf %70, %74 : vector<2x32xf32>
    %76 = arith.index_cast %11 : i32 to index
    %77 = memref.load %arg1[%76] : memref<8xi32, #tpu.memory_space<smem>>
    %78 = vector.broadcast %77 : i32 to vector<2x1xi32>
    %79 = arith.cmpi slt, %3, %78 : vector<2x1xi32>
    %80 = arith.index_cast %12 : i32 to index
    %81 = memref.load %arg1[%80] : memref<8xi32, #tpu.memory_space<smem>>
    %82 = vector.broadcast %81 : i32 to vector<2x1xi32>
    %83 = arith.cmpi slt, %3, %82 : vector<2x1xi32>
    %84 = vector.shape_cast %79 : vector<2x1xi1> to vector<2x1xi1>
    %85 = vector.broadcast %84 : vector<2x1xi1> to vector<2x32xi1>
    %86 = arith.select %85, %50, %6 : vector<2x32xi1>, vector<2x32xf32>
    %87 = vector.shape_cast %79 : vector<2x1xi1> to vector<2x1xi1>
    %88 = vector.broadcast %87 : vector<2x1xi1> to vector<2x32xi1>
    %89 = arith.select %88, %48, %7 : vector<2x32xi1>, vector<2x32xf32>
    %90 = vector.shape_cast %83 : vector<2x1xi1> to vector<2x1xi1>
    %91 = vector.broadcast %90 : vector<2x1xi1> to vector<2x32xi1>
    %92 = arith.select %91, %75, %8 : vector<2x32xi1>, vector<2x32xf32>
    %93 = vector.shape_cast %83 : vector<2x1xi1> to vector<2x1xi1>
    %94 = vector.broadcast %93 : vector<2x1xi1> to vector<2x32xi1>
    %95 = arith.select %94, %73, %9 : vector<2x32xi1>, vector<2x32xf32>
    %cst_25 = arith.constant 0.000000e+00 : f32
    %96 = vector.shape_cast %79 : vector<2x1xi1> to vector<2x1xi1>
    %97 = vector.broadcast %96 : vector<2x1xi1> to vector<2x32xi1>
    %98 = vector.broadcast %cst_25 : f32 to vector<2x32xf32>
    %99 = arith.select %97, %50, %98 : vector<2x32xi1>, vector<2x32xf32>
    %cst_26 = arith.constant 0.000000e+00 : f32
    %100 = vector.shape_cast %83 : vector<2x1xi1> to vector<2x1xi1>
    %101 = vector.broadcast %100 : vector<2x1xi1> to vector<2x32xi1>
    %102 = vector.broadcast %cst_26 : f32 to vector<2x32xf32>
    %103 = arith.select %101, %75, %102 : vector<2x32xi1>, vector<2x32xf32>
    %104 = arith.truncf %99 : vector<2x32xf32> to vector<2x32xbf16>
    %105 = arith.index_cast %c0_i32_12 : i32 to index
    %c0_27 = arith.constant 0 : index
    %c0_28 = arith.constant 0 : index
    %106 = vector.load %arg6[%105, %c0_27, %c0_28] : memref<8x2x32xbf16, #tpu.memory_space<vmem>>, vector<1x2x32xbf16>
    %107 = vector.shape_cast %106 : vector<1x2x32xbf16> to vector<2x32xbf16>
    %108 = vector.shape_cast %104 : vector<2x32xbf16> to vector<1x2x32xbf16>
    tpu.vector_store %arg6[%105, %c0_27, %c0_28], %108 {strides = array<i32>} : memref<8x2x32xbf16, #tpu.memory_space<vmem>>, vector<1x2x32xbf16>,
    %109 = arith.truncf %103 : vector<2x32xf32> to vector<2x32xbf16>
    %c7_i32_29 = arith.constant 7 : i32
    %110 = arith.subi %c7_i32_29, %c0_i32_12 : i32
    %111 = arith.index_cast %110 : i32 to index
    %c0_30 = arith.constant 0 : index
    %c0_31 = arith.constant 0 : index
    %112 = vector.load %arg7[%111, %c0_30, %c0_31] : memref<8x2x32xbf16, #tpu.memory_space<vmem>>, vector<1x2x32xbf16>
    %113 = vector.shape_cast %112 : vector<1x2x32xbf16> to vector<2x32xbf16>
    %114 = vector.shape_cast %109 : vector<2x32xbf16> to vector<1x2x32xbf16>
    tpu.vector_store %arg7[%111, %c0_30, %c0_31], %114 {strides = array<i32>} : memref<8x2x32xbf16, #tpu.memory_space<vmem>>, vector<1x2x32xbf16>,
    %c1_i32 = arith.constant 1 : i32
    %c8_i32_32 = arith.constant 8 : i32
    %115 = arith.muli %arg0, %c8_i32_32 : i32
    %116 = arith.addi %115, %c1_i32 : i32
    %c7_i32_33 = arith.constant 7 : i32
    %117 = arith.subi %c7_i32_33, %116 : i32
    %118 = arith.truncf %86 : vector<2x32xf32> to vector<2x32xbf16>
    %cst_34 = arith.constant dense<0.000000e+00> : vector<2x128xf32>
    %119 = tpu.matmul %118, %4, %cst_34 {dimension_numbers = #tpu.dot_dimension_numbers<[1], [0], [0], [1], [0, 0, 1, 1], [], []>} : vector<2x32xbf16>, vector<32x128xbf16>, vector<2x128xf32> -> vector<2x128xf32>
    %120 = arith.index_cast %c1_i32 : i32 to index
    %c0_35 = arith.constant 0 : index
    %c0_36 = arith.constant 0 : index
    %121 = vector.load %arg2[%120, %c0_35, %c0_36] : memref<8x2x128xf32, #tpu.memory_space<vmem>>, vector<1x2x128xf32>
    %122 = vector.shape_cast %121 : vector<1x2x128xf32> to vector<2x128xf32>
    %123 = arith.addf %119, %122 : vector<2x128xf32>
    %124 = arith.truncf %92 : vector<2x32xf32> to vector<2x32xbf16>
    %cst_37 = arith.constant dense<0.000000e+00> : vector<2x128xf32>
    %125 = tpu.matmul %124, %5, %cst_37 {dimension_numbers = #tpu.dot_dimension_numbers<[1], [0], [0], [1], [0, 0, 1, 1], [], []>} : vector<2x32xbf16>, vector<32x128xbf16>, vector<2x128xf32> -> vector<2x128xf32>
    %c7_i32_38 = arith.constant 7 : i32
    %126 = arith.subi %c7_i32_38, %c1_i32 : i32
    %127 = arith.index_cast %126 : i32 to index
    %c0_39 = arith.constant 0 : index
    %c0_40 = arith.constant 0 : index
    %128 = vector.load %arg3[%127, %c0_39, %c0_40] : memref<8x2x128xf32, #tpu.memory_space<vmem>>, vector<1x2x128xf32>
    %129 = vector.shape_cast %128 : vector<1x2x128xf32> to vector<2x128xf32>
    %130 = arith.addf %125, %129 : vector<2x128xf32>
    %131 = vector.extract_strided_slice %123 {offsets = [0, 0], sizes = [2, 32], strides = [1, 1]} : vector<2x128xf32> to vector<2x32xf32>
    %132 = arith.negf %131 : vector<2x32xf32>
    %133 = math.exp %132 : vector<2x32xf32>
    %cst_41 = arith.constant 1.000000e+00 : f32
    %134 = vector.broadcast %cst_41 : f32 to vector<2x32xf32>
    %135 = arith.addf %134, %133 : vector<2x32xf32>
    %136 = arith.divf %134, %135 : vector<2x32xf32>
    %137 = vector.extract_strided_slice %123 {offsets = [0, 32], sizes = [2, 32], strides = [1, 1]} : vector<2x128xf32> to vector<2x32xf32>
    %138 = arith.negf %137 : vector<2x32xf32>
    %139 = math.exp %138 : vector<2x32xf32>
    %cst_42 = arith.constant 1.000000e+00 : f32
    %140 = vector.broadcast %cst_42 : f32 to vector<2x32xf32>
    %141 = arith.addf %140, %139 : vector<2x32xf32>
    %142 = arith.divf %140, %141 : vector<2x32xf32>
    %143 = vector.extract_strided_slice %123 {offsets = [0, 64], sizes = [2, 32], strides = [1, 1]} : vector<2x128xf32> to vector<2x32xf32>
    %144 = math.tanh %143 : vector<2x32xf32>
    %145 = vector.extract_strided_slice %123 {offsets = [0, 96], sizes = [2, 32], strides = [1, 1]} : vector<2x128xf32> to vector<2x32xf32>
    %146 = arith.negf %145 : vector<2x32xf32>
    %147 = math.exp %146 : vector<2x32xf32>
    %cst_43 = arith.constant 1.000000e+00 : f32
    %148 = vector.broadcast %cst_43 : f32 to vector<2x32xf32>
    %149 = arith.addf %148, %147 : vector<2x32xf32>
    %150 = arith.divf %148, %149 : vector<2x32xf32>
    %151 = arith.mulf %142, %89 : vector<2x32xf32>
    %152 = arith.mulf %136, %144 : vector<2x32xf32>
    %153 = arith.addf %151, %152 : vector<2x32xf32>
    %154 = math.tanh %153 : vector<2x32xf32>
    %155 = arith.mulf %150, %154 : vector<2x32xf32>
    %156 = vector.extract_strided_slice %130 {offsets = [0, 0], sizes = [2, 32], strides = [1, 1]} : vector<2x128xf32> to vector<2x32xf32>
    %157 = arith.negf %156 : vector<2x32xf32>
    %158 = math.exp %157 : vector<2x32xf32>
    %cst_44 = arith.constant 1.000000e+00 : f32
    %159 = vector.broadcast %cst_44 : f32 to vector<2x32xf32>
    %160 = arith.addf %159, %158 : vector<2x32xf32>
    %161 = arith.divf %159, %160 : vector<2x32xf32>
    %162 = vector.extract_strided_slice %130 {offsets = [0, 32], sizes = [2, 32], strides = [1, 1]} : vector<2x128xf32> to vector<2x32xf32>
    %163 = arith.negf %162 : vector<2x32xf32>
    %164 = math.exp %163 : vector<2x32xf32>
    %cst_45 = arith.constant 1.000000e+00 : f32
    %165 = vector.broadcast %cst_45 : f32 to vector<2x32xf32>
    %166 = arith.addf %165, %164 : vector<2x32xf32>
    %167 = arith.divf %165, %166 : vector<2x32xf32>
    %168 = vector.extract_strided_slice %130 {offsets = [0, 64], sizes = [2, 32], strides = [1, 1]} : vector<2x128xf32> to vector<2x32xf32>
    %169 = math.tanh %168 : vector<2x32xf32>
    %170 = vector.extract_strided_slice %130 {offsets = [0, 96], sizes = [2, 32], strides = [1, 1]} : vector<2x128xf32> to vector<2x32xf32>
    %171 = arith.negf %170 : vector<2x32xf32>
    %172 = math.exp %171 : vector<2x32xf32>
    %cst_46 = arith.constant 1.000000e+00 : f32
    %173 = vector.broadcast %cst_46 : f32 to vector<2x32xf32>
    %174 = arith.addf %173, %172 : vector<2x32xf32>
    %175 = arith.divf %173, %174 : vector<2x32xf32>
    %176 = arith.mulf %167, %95 : vector<2x32xf32>
    %177 = arith.mulf %161, %169 : vector<2x32xf32>
    %178 = arith.addf %176, %177 : vector<2x32xf32>
    %179 = math.tanh %178 : vector<2x32xf32>
    %180 = arith.mulf %175, %179 : vector<2x32xf32>
    %181 = arith.index_cast %116 : i32 to index
    %182 = memref.load %arg1[%181] : memref<8xi32, #tpu.memory_space<smem>>
    %183 = vector.broadcast %182 : i32 to vector<2x1xi32>
    %184 = arith.cmpi slt, %3, %183 : vector<2x1xi32>
    %185 = arith.index_cast %117 : i32 to index
    %186 = memref.load %arg1[%185] : memref<8xi32, #tpu.memory_space<smem>>
    %187 = vector.broadcast %186 : i32 to vector<2x1xi32>
    %188 = arith.cmpi slt, %3, %187 : vector<2x1xi32>
    %189 = vector.shape_cast %184 : vector<2x1xi1> to vector<2x1xi1>
    %190 = vector.broadcast %189 : vector<2x1xi1> to vector<2x32xi1>
    %191 = arith.select %190, %155, %86 : vector<2x32xi1>, vector<2x32xf32>
    %192 = vector.shape_cast %184 : vector<2x1xi1> to vector<2x1xi1>
    %193 = vector.broadcast %192 : vector<2x1xi1> to vector<2x32xi1>
    %194 = arith.select %193, %153, %89 : vector<2x32xi1>, vector<2x32xf32>
    %195 = vector.shape_cast %188 : vector<2x1xi1> to vector<2x1xi1>
    %196 = vector.broadcast %195 : vector<2x1xi1> to vector<2x32xi1>
    %197 = arith.select %196, %180, %92 : vector<2x32xi1>, vector<2x32xf32>
    %198 = vector.shape_cast %188 : vector<2x1xi1> to vector<2x1xi1>
    %199 = vector.broadcast %198 : vector<2x1xi1> to vector<2x32xi1>
    %200 = arith.select %199, %178, %95 : vector<2x32xi1>, vector<2x32xf32>
    %cst_47 = arith.constant 0.000000e+00 : f32
    %201 = vector.shape_cast %184 : vector<2x1xi1> to vector<2x1xi1>
    %202 = vector.broadcast %201 : vector<2x1xi1> to vector<2x32xi1>
    %203 = vector.broadcast %cst_47 : f32 to vector<2x32xf32>
    %204 = arith.select %202, %155, %203 : vector<2x32xi1>, vector<2x32xf32>
    %cst_48 = arith.constant 0.000000e+00 : f32
    %205 = vector.shape_cast %188 : vector<2x1xi1> to vector<2x1xi1>
    %206 = vector.broadcast %205 : vector<2x1xi1> to vector<2x32xi1>
    %207 = vector.broadcast %cst_48 : f32 to vector<2x32xf32>
    %208 = arith.select %206, %180, %207 : vector<2x32xi1>, vector<2x32xf32>
    %209 = arith.truncf %204 : vector<2x32xf32> to vector<2x32xbf16>
    %210 = arith.index_cast %c1_i32 : i32 to index
    %c0_49 = arith.constant 0 : index
    %c0_50 = arith.constant 0 : index
    %211 = vector.load %arg6[%210, %c0_49, %c0_50] : memref<8x2x32xbf16, #tpu.memory_space<vmem>>, vector<1x2x32xbf16>
    %212 = vector.shape_cast %211 : vector<1x2x32xbf16> to vector<2x32xbf16>
    %213 = vector.shape_cast %209 : vector<2x32xbf16> to vector<1x2x32xbf16>
    tpu.vector_store %arg6[%210, %c0_49, %c0_50], %213 {strides = array<i32>} : memref<8x2x32xbf16, #tpu.memory_space<vmem>>, vector<1x2x32xbf16>,
    %214 = arith.truncf %208 : vector<2x32xf32> to vector<2x32xbf16>
    %c7_i32_51 = arith.constant 7 : i32
    %215 = arith.subi %c7_i32_51, %c1_i32 : i32
    %216 = arith.index_cast %215 : i32 to index
    %c0_52 = arith.constant 0 : index
    %c0_53 = arith.constant 0 : index
    %217 = vector.load %arg7[%216, %c0_52, %c0_53] : memref<8x2x32xbf16, #tpu.memory_space<vmem>>, vector<1x2x32xbf16>
    %218 = vector.shape_cast %217 : vector<1x2x32xbf16> to vector<2x32xbf16>
    %219 = vector.shape_cast %214 : vector<2x32xbf16> to vector<1x2x32xbf16>
    tpu.vector_store %arg7[%216, %c0_52, %c0_53], %219 {strides = array<i32>} : memref<8x2x32xbf16, #tpu.memory_space<vmem>>, vector<1x2x32xbf16>,
    %c2_i32 = arith.constant 2 : i32
    %c8_i32_54 = arith.constant 8 : i32
    %220 = arith.muli %arg0, %c8_i32_54 : i32
    %221 = arith.addi %220, %c2_i32 : i32
    %c7_i32_55 = arith.constant 7 : i32
    %222 = arith.subi %c7_i32_55, %221 : i32
    %223 = arith.truncf %191 : vector<2x32xf32> to vector<2x32xbf16>
    %cst_56 = arith.constant dense<0.000000e+00> : vector<2x128xf32>
    %224 = tpu.matmul %223, %4, %cst_56 {dimension_numbers = #tpu.dot_dimension_numbers<[1], [0], [0], [1], [0, 0, 1, 1], [], []>} : vector<2x32xbf16>, vector<32x128xbf16>, vector<2x128xf32> -> vector<2x128xf32>
    %225 = arith.index_cast %c2_i32 : i32 to index
    %c0_57 = arith.constant 0 : index
    %c0_58 = arith.constant 0 : index
    %226 = vector.load %arg2[%225, %c0_57, %c0_58] : memref<8x2x128xf32, #tpu.memory_space<vmem>>, vector<1x2x128xf32>
    %227 = vector.shape_cast %226 : vector<1x2x128xf32> to vector<2x128xf32>
    %228 = arith.addf %224, %227 : vector<2x128xf32>
    %229 = arith.truncf %197 : vector<2x32xf32> to vector<2x32xbf16>
    %cst_59 = arith.constant dense<0.000000e+00> : vector<2x128xf32>
    %230 = tpu.matmul %229, %5, %cst_59 {dimension_numbers = #tpu.dot_dimension_numbers<[1], [0], [0], [1], [0, 0, 1, 1], [], []>} : vector<2x32xbf16>, vector<32x128xbf16>, vector<2x128xf32> -> vector<2x128xf32>
    %c7_i32_60 = arith.constant 7 : i32
    %231 = arith.subi %c7_i32_60, %c2_i32 : i32
    %232 = arith.index_cast %231 : i32 to index
    %c0_61 = arith.constant 0 : index
    %c0_62 = arith.constant 0 : index
    %233 = vector.load %arg3[%232, %c0_61, %c0_62] : memref<8x2x128xf32, #tpu.memory_space<vmem>>, vector<1x2x128xf32>
    %234 = vector.shape_cast %233 : vector<1x2x128xf32> to vector<2x128xf32>
    %235 = arith.addf %230, %234 : vector<2x128xf32>
    %236 = vector.extract_strided_slice %228 {offsets = [0, 0], sizes = [2, 32], strides = [1, 1]} : vector<2x128xf32> to vector<2x32xf32>
    %237 = arith.negf %236 : vector<2x32xf32>
    %238 = math.exp %237 : vector<2x32xf32>
    %cst_63 = arith.constant 1.000000e+00 : f32
    %239 = vector.broadcast %cst_63 : f32 to vector<2x32xf32>
    %240 = arith.addf %239, %238 : vector<2x32xf32>
    %241 = arith.divf %239, %240 : vector<2x32xf32>
    %242 = vector.extract_strided_slice %228 {offsets = [0, 32], sizes = [2, 32], strides = [1, 1]} : vector<2x128xf32> to vector<2x32xf32>
    %243 = arith.negf %242 : vector<2x32xf32>
    %244 = math.exp %243 : vector<2x32xf32>
    %cst_64 = arith.constant 1.000000e+00 : f32
    %245 = vector.broadcast %cst_64 : f32 to vector<2x32xf32>
    %246 = arith.addf %245, %244 : vector<2x32xf32>
    %247 = arith.divf %245, %246 : vector<2x32xf32>
    %248 = vector.extract_strided_slice %228 {offsets = [0, 64], sizes = [2, 32], strides = [1, 1]} : vector<2x128xf32> to vector<2x32xf32>
    %249 = math.tanh %248 : vector<2x32xf32>
    %250 = vector.extract_strided_slice %228 {offsets = [0, 96], sizes = [2, 32], strides = [1, 1]} : vector<2x128xf32> to vector<2x32xf32>
    %251 = arith.negf %250 : vector<2x32xf32>
    %252 = math.exp %251 : vector<2x32xf32>
    %cst_65 = arith.constant 1.000000e+00 : f32
    %253 = vector.broadcast %cst_65 : f32 to vector<2x32xf32>
    %254 = arith.addf %253, %252 : vector<2x32xf32>
    %255 = arith.divf %253, %254 : vector<2x32xf32>
    %256 = arith.mulf %247, %194 : vector<2x32xf32>
    %257 = arith.mulf %241, %249 : vector<2x32xf32>
    %258 = arith.addf %256, %257 : vector<2x32xf32>
    %259 = math.tanh %258 : vector<2x32xf32>
    %260 = arith.mulf %255, %259 : vector<2x32xf32>
    %261 = vector.extract_strided_slice %235 {offsets = [0, 0], sizes = [2, 32], strides = [1, 1]} : vector<2x128xf32> to vector<2x32xf32>
    %262 = arith.negf %261 : vector<2x32xf32>
    %263 = math.exp %262 : vector<2x32xf32>
    %cst_66 = arith.constant 1.000000e+00 : f32
    %264 = vector.broadcast %cst_66 : f32 to vector<2x32xf32>
    %265 = arith.addf %264, %263 : vector<2x32xf32>
    %266 = arith.divf %264, %265 : vector<2x32xf32>
    %267 = vector.extract_strided_slice %235 {offsets = [0, 32], sizes = [2, 32], strides = [1, 1]} : vector<2x128xf32> to vector<2x32xf32>
    %268 = arith.negf %267 : vector<2x32xf32>
    %269 = math.exp %268 : vector<2x32xf32>
    %cst_67 = arith.constant 1.000000e+00 : f32
    %270 = vector.broadcast %cst_67 : f32 to vector<2x32xf32>
    %271 = arith.addf %270, %269 : vector<2x32xf32>
    %272 = arith.divf %270, %271 : vector<2x32xf32>
    %273 = vector.extract_strided_slice %235 {offsets = [0, 64], sizes = [2, 32], strides = [1, 1]} : vector<2x128xf32> to vector<2x32xf32>
    %274 = math.tanh %273 : vector<2x32xf32>
    %275 = vector.extract_strided_slice %235 {offsets = [0, 96], sizes = [2, 32], strides = [1, 1]} : vector<2x128xf32> to vector<2x32xf32>
    %276 = arith.negf %275 : vector<2x32xf32>
    %277 = math.exp %276 : vector<2x32xf32>
    %cst_68 = arith.constant 1.000000e+00 : f32
    %278 = vector.broadcast %cst_68 : f32 to vector<2x32xf32>
    %279 = arith.addf %278, %277 : vector<2x32xf32>
    %280 = arith.divf %278, %279 : vector<2x32xf32>
    %281 = arith.mulf %272, %200 : vector<2x32xf32>
    %282 = arith.mulf %266, %274 : vector<2x32xf32>
    %283 = arith.addf %281, %282 : vector<2x32xf32>
    %284 = math.tanh %283 : vector<2x32xf32>
    %285 = arith.mulf %280, %284 : vector<2x32xf32>
    %286 = arith.index_cast %221 : i32 to index
    %287 = memref.load %arg1[%286] : memref<8xi32, #tpu.memory_space<smem>>
    %288 = vector.broadcast %287 : i32 to vector<2x1xi32>
    %289 = arith.cmpi slt, %3, %288 : vector<2x1xi32>
    %290 = arith.index_cast %222 : i32 to index
    %291 = memref.load %arg1[%290] : memref<8xi32, #tpu.memory_space<smem>>
    %292 = vector.broadcast %291 : i32 to vector<2x1xi32>
    %293 = arith.cmpi slt, %3, %292 : vector<2x1xi32>
    %294 = vector.shape_cast %289 : vector<2x1xi1> to vector<2x1xi1>
    %295 = vector.broadcast %294 : vector<2x1xi1> to vector<2x32xi1>
    %296 = arith.select %295, %260, %191 : vector<2x32xi1>, vector<2x32xf32>
    %297 = vector.shape_cast %289 : vector<2x1xi1> to vector<2x1xi1>
    %298 = vector.broadcast %297 : vector<2x1xi1> to vector<2x32xi1>
    %299 = arith.select %298, %258, %194 : vector<2x32xi1>, vector<2x32xf32>
    %300 = vector.shape_cast %293 : vector<2x1xi1> to vector<2x1xi1>
    %301 = vector.broadcast %300 : vector<2x1xi1> to vector<2x32xi1>
    %302 = arith.select %301, %285, %197 : vector<2x32xi1>, vector<2x32xf32>
    %303 = vector.shape_cast %293 : vector<2x1xi1> to vector<2x1xi1>
    %304 = vector.broadcast %303 : vector<2x1xi1> to vector<2x32xi1>
    %305 = arith.select %304, %283, %200 : vector<2x32xi1>, vector<2x32xf32>
    %cst_69 = arith.constant 0.000000e+00 : f32
    %306 = vector.shape_cast %289 : vector<2x1xi1> to vector<2x1xi1>
    %307 = vector.broadcast %306 : vector<2x1xi1> to vector<2x32xi1>
    %308 = vector.broadcast %cst_69 : f32 to vector<2x32xf32>
    %309 = arith.select %307, %260, %308 : vector<2x32xi1>, vector<2x32xf32>
    %cst_70 = arith.constant 0.000000e+00 : f32
    %310 = vector.shape_cast %293 : vector<2x1xi1> to vector<2x1xi1>
    %311 = vector.broadcast %310 : vector<2x1xi1> to vector<2x32xi1>
    %312 = vector.broadcast %cst_70 : f32 to vector<2x32xf32>
    %313 = arith.select %311, %285, %312 : vector<2x32xi1>, vector<2x32xf32>
    %314 = arith.truncf %309 : vector<2x32xf32> to vector<2x32xbf16>
    %315 = arith.index_cast %c2_i32 : i32 to index
    %c0_71 = arith.constant 0 : index
    %c0_72 = arith.constant 0 : index
    %316 = vector.load %arg6[%315, %c0_71, %c0_72] : memref<8x2x32xbf16, #tpu.memory_space<vmem>>, vector<1x2x32xbf16>
    %317 = vector.shape_cast %316 : vector<1x2x32xbf16> to vector<2x32xbf16>
    %318 = vector.shape_cast %314 : vector<2x32xbf16> to vector<1x2x32xbf16>
    tpu.vector_store %arg6[%315, %c0_71, %c0_72], %318 {strides = array<i32>} : memref<8x2x32xbf16, #tpu.memory_space<vmem>>, vector<1x2x32xbf16>,
    %319 = arith.truncf %313 : vector<2x32xf32> to vector<2x32xbf16>
    %c7_i32_73 = arith.constant 7 : i32
    %320 = arith.subi %c7_i32_73, %c2_i32 : i32
    %321 = arith.index_cast %320 : i32 to index
    %c0_74 = arith.constant 0 : index
    %c0_75 = arith.constant 0 : index
    %322 = vector.load %arg7[%321, %c0_74, %c0_75] : memref<8x2x32xbf16, #tpu.memory_space<vmem>>, vector<1x2x32xbf16>
    %323 = vector.shape_cast %322 : vector<1x2x32xbf16> to vector<2x32xbf16>
    %324 = vector.shape_cast %319 : vector<2x32xbf16> to vector<1x2x32xbf16>
    tpu.vector_store %arg7[%321, %c0_74, %c0_75], %324 {strides = array<i32>} : memref<8x2x32xbf16, #tpu.memory_space<vmem>>, vector<1x2x32xbf16>,
    %c3_i32 = arith.constant 3 : i32
    %c8_i32_76 = arith.constant 8 : i32
    %325 = arith.muli %arg0, %c8_i32_76 : i32
    %326 = arith.addi %325, %c3_i32 : i32
    %c7_i32_77 = arith.constant 7 : i32
    %327 = arith.subi %c7_i32_77, %326 : i32
    %328 = arith.truncf %296 : vector<2x32xf32> to vector<2x32xbf16>
    %cst_78 = arith.constant dense<0.000000e+00> : vector<2x128xf32>
    %329 = tpu.matmul %328, %4, %cst_78 {dimension_numbers = #tpu.dot_dimension_numbers<[1], [0], [0], [1], [0, 0, 1, 1], [], []>} : vector<2x32xbf16>, vector<32x128xbf16>, vector<2x128xf32> -> vector<2x128xf32>
    %330 = arith.index_cast %c3_i32 : i32 to index
    %c0_79 = arith.constant 0 : index
    %c0_80 = arith.constant 0 : index
    %331 = vector.load %arg2[%330, %c0_79, %c0_80] : memref<8x2x128xf32, #tpu.memory_space<vmem>>, vector<1x2x128xf32>
    %332 = vector.shape_cast %331 : vector<1x2x128xf32> to vector<2x128xf32>
    %333 = arith.addf %329, %332 : vector<2x128xf32>
    %334 = arith.truncf %302 : vector<2x32xf32> to vector<2x32xbf16>
    %cst_81 = arith.constant dense<0.000000e+00> : vector<2x128xf32>
    %335 = tpu.matmul %334, %5, %cst_81 {dimension_numbers = #tpu.dot_dimension_numbers<[1], [0], [0], [1], [0, 0, 1, 1], [], []>} : vector<2x32xbf16>, vector<32x128xbf16>, vector<2x128xf32> -> vector<2x128xf32>
    %c7_i32_82 = arith.constant 7 : i32
    %336 = arith.subi %c7_i32_82, %c3_i32 : i32
    %337 = arith.index_cast %336 : i32 to index
    %c0_83 = arith.constant 0 : index
    %c0_84 = arith.constant 0 : index
    %338 = vector.load %arg3[%337, %c0_83, %c0_84] : memref<8x2x128xf32, #tpu.memory_space<vmem>>, vector<1x2x128xf32>
    %339 = vector.shape_cast %338 : vector<1x2x128xf32> to vector<2x128xf32>
    %340 = arith.addf %335, %339 : vector<2x128xf32>
    %341 = vector.extract_strided_slice %333 {offsets = [0, 0], sizes = [2, 32], strides = [1, 1]} : vector<2x128xf32> to vector<2x32xf32>
    %342 = arith.negf %341 : vector<2x32xf32>
    %343 = math.exp %342 : vector<2x32xf32>
    %cst_85 = arith.constant 1.000000e+00 : f32
    %344 = vector.broadcast %cst_85 : f32 to vector<2x32xf32>
    %345 = arith.addf %344, %343 : vector<2x32xf32>
    %346 = arith.divf %344, %345 : vector<2x32xf32>
    %347 = vector.extract_strided_slice %333 {offsets = [0, 32], sizes = [2, 32], strides = [1, 1]} : vector<2x128xf32> to vector<2x32xf32>
    %348 = arith.negf %347 : vector<2x32xf32>
    %349 = math.exp %348 : vector<2x32xf32>
    %cst_86 = arith.constant 1.000000e+00 : f32
    %350 = vector.broadcast %cst_86 : f32 to vector<2x32xf32>
    %351 = arith.addf %350, %349 : vector<2x32xf32>
    %352 = arith.divf %350, %351 : vector<2x32xf32>
    %353 = vector.extract_strided_slice %333 {offsets = [0, 64], sizes = [2, 32], strides = [1, 1]} : vector<2x128xf32> to vector<2x32xf32>
    %354 = math.tanh %353 : vector<2x32xf32>
    %355 = vector.extract_strided_slice %333 {offsets = [0, 96], sizes = [2, 32], strides = [1, 1]} : vector<2x128xf32> to vector<2x32xf32>
    %356 = arith.negf %355 : vector<2x32xf32>
    %357 = math.exp %356 : vector<2x32xf32>
    %cst_87 = arith.constant 1.000000e+00 : f32
    %358 = vector.broadcast %cst_87 : f32 to vector<2x32xf32>
    %359 = arith.addf %358, %357 : vector<2x32xf32>
    %360 = arith.divf %358, %359 : vector<2x32xf32>
    %361 = arith.mulf %352, %299 : vector<2x32xf32>
    %362 = arith.mulf %346, %354 : vector<2x32xf32>
    %363 = arith.addf %361, %362 : vector<2x32xf32>
    %364 = math.tanh %363 : vector<2x32xf32>
    %365 = arith.mulf %360, %364 : vector<2x32xf32>
    %366 = vector.extract_strided_slice %340 {offsets = [0, 0], sizes = [2, 32], strides = [1, 1]} : vector<2x128xf32> to vector<2x32xf32>
    %367 = arith.negf %366 : vector<2x32xf32>
    %368 = math.exp %367 : vector<2x32xf32>
    %cst_88 = arith.constant 1.000000e+00 : f32
    %369 = vector.broadcast %cst_88 : f32 to vector<2x32xf32>
    %370 = arith.addf %369, %368 : vector<2x32xf32>
    %371 = arith.divf %369, %370 : vector<2x32xf32>
    %372 = vector.extract_strided_slice %340 {offsets = [0, 32], sizes = [2, 32], strides = [1, 1]} : vector<2x128xf32> to vector<2x32xf32>
    %373 = arith.negf %372 : vector<2x32xf32>
    %374 = math.exp %373 : vector<2x32xf32>
    %cst_89 = arith.constant 1.000000e+00 : f32
    %375 = vector.broadcast %cst_89 : f32 to vector<2x32xf32>
    %376 = arith.addf %375, %374 : vector<2x32xf32>
    %377 = arith.divf %375, %376 : vector<2x32xf32>
    %378 = vector.extract_strided_slice %340 {offsets = [0, 64], sizes = [2, 32], strides = [1, 1]} : vector<2x128xf32> to vector<2x32xf32>
    %379 = math.tanh %378 : vector<2x32xf32>
    %380 = vector.extract_strided_slice %340 {offsets = [0, 96], sizes = [2, 32], strides = [1, 1]} : vector<2x128xf32> to vector<2x32xf32>
    %381 = arith.negf %380 : vector<2x32xf32>
    %382 = math.exp %381 : vector<2x32xf32>
    %cst_90 = arith.constant 1.000000e+00 : f32
    %383 = vector.broadcast %cst_90 : f32 to vector<2x32xf32>
    %384 = arith.addf %383, %382 : vector<2x32xf32>
    %385 = arith.divf %383, %384 : vector<2x32xf32>
    %386 = arith.mulf %377, %305 : vector<2x32xf32>
    %387 = arith.mulf %371, %379 : vector<2x32xf32>
    %388 = arith.addf %386, %387 : vector<2x32xf32>
    %389 = math.tanh %388 : vector<2x32xf32>
    %390 = arith.mulf %385, %389 : vector<2x32xf32>
    %391 = arith.index_cast %326 : i32 to index
    %392 = memref.load %arg1[%391] : memref<8xi32, #tpu.memory_space<smem>>
    %393 = vector.broadcast %392 : i32 to vector<2x1xi32>
    %394 = arith.cmpi slt, %3, %393 : vector<2x1xi32>
    %395 = arith.index_cast %327 : i32 to index
    %396 = memref.load %arg1[%395] : memref<8xi32, #tpu.memory_space<smem>>
    %397 = vector.broadcast %396 : i32 to vector<2x1xi32>
    %398 = arith.cmpi slt, %3, %397 : vector<2x1xi32>
    %399 = vector.shape_cast %394 : vector<2x1xi1> to vector<2x1xi1>
    %400 = vector.broadcast %399 : vector<2x1xi1> to vector<2x32xi1>
    %401 = arith.select %400, %365, %296 : vector<2x32xi1>, vector<2x32xf32>
    %402 = vector.shape_cast %394 : vector<2x1xi1> to vector<2x1xi1>
    %403 = vector.broadcast %402 : vector<2x1xi1> to vector<2x32xi1>
    %404 = arith.select %403, %363, %299 : vector<2x32xi1>, vector<2x32xf32>
    %405 = vector.shape_cast %398 : vector<2x1xi1> to vector<2x1xi1>
    %406 = vector.broadcast %405 : vector<2x1xi1> to vector<2x32xi1>
    %407 = arith.select %406, %390, %302 : vector<2x32xi1>, vector<2x32xf32>
    %408 = vector.shape_cast %398 : vector<2x1xi1> to vector<2x1xi1>
    %409 = vector.broadcast %408 : vector<2x1xi1> to vector<2x32xi1>
    %410 = arith.select %409, %388, %305 : vector<2x32xi1>, vector<2x32xf32>
    %cst_91 = arith.constant 0.000000e+00 : f32
    %411 = vector.shape_cast %394 : vector<2x1xi1> to vector<2x1xi1>
    %412 = vector.broadcast %411 : vector<2x1xi1> to vector<2x32xi1>
    %413 = vector.broadcast %cst_91 : f32 to vector<2x32xf32>
    %414 = arith.select %412, %365, %413 : vector<2x32xi1>, vector<2x32xf32>
    %cst_92 = arith.constant 0.000000e+00 : f32
    %415 = vector.shape_cast %398 : vector<2x1xi1> to vector<2x1xi1>
    %416 = vector.broadcast %415 : vector<2x1xi1> to vector<2x32xi1>
    %417 = vector.broadcast %cst_92 : f32 to vector<2x32xf32>
    %418 = arith.select %416, %390, %417 : vector<2x32xi1>, vector<2x32xf32>
    %419 = arith.truncf %414 : vector<2x32xf32> to vector<2x32xbf16>
    %420 = arith.index_cast %c3_i32 : i32 to index
    %c0_93 = arith.constant 0 : index
    %c0_94 = arith.constant 0 : index
    %421 = vector.load %arg6[%420, %c0_93, %c0_94] : memref<8x2x32xbf16, #tpu.memory_space<vmem>>, vector<1x2x32xbf16>
    %422 = vector.shape_cast %421 : vector<1x2x32xbf16> to vector<2x32xbf16>
    %423 = vector.shape_cast %419 : vector<2x32xbf16> to vector<1x2x32xbf16>
    tpu.vector_store %arg6[%420, %c0_93, %c0_94], %423 {strides = array<i32>} : memref<8x2x32xbf16, #tpu.memory_space<vmem>>, vector<1x2x32xbf16>,
    %424 = arith.truncf %418 : vector<2x32xf32> to vector<2x32xbf16>
    %c7_i32_95 = arith.constant 7 : i32
    %425 = arith.subi %c7_i32_95, %c3_i32 : i32
    %426 = arith.index_cast %425 : i32 to index
    %c0_96 = arith.constant 0 : index
    %c0_97 = arith.constant 0 : index
    %427 = vector.load %arg7[%426, %c0_96, %c0_97] : memref<8x2x32xbf16, #tpu.memory_space<vmem>>, vector<1x2x32xbf16>
    %428 = vector.shape_cast %427 : vector<1x2x32xbf16> to vector<2x32xbf16>
    %429 = vector.shape_cast %424 : vector<2x32xbf16> to vector<1x2x32xbf16>
    tpu.vector_store %arg7[%426, %c0_96, %c0_97], %429 {strides = array<i32>} : memref<8x2x32xbf16, #tpu.memory_space<vmem>>, vector<1x2x32xbf16>,
    %c4_i32 = arith.constant 4 : i32
    %c8_i32_98 = arith.constant 8 : i32
    %430 = arith.muli %arg0, %c8_i32_98 : i32
    %431 = arith.addi %430, %c4_i32 : i32
    %c7_i32_99 = arith.constant 7 : i32
    %432 = arith.subi %c7_i32_99, %431 : i32
    %433 = arith.truncf %401 : vector<2x32xf32> to vector<2x32xbf16>
    %cst_100 = arith.constant dense<0.000000e+00> : vector<2x128xf32>
    %434 = tpu.matmul %433, %4, %cst_100 {dimension_numbers = #tpu.dot_dimension_numbers<[1], [0], [0], [1], [0, 0, 1, 1], [], []>} : vector<2x32xbf16>, vector<32x128xbf16>, vector<2x128xf32> -> vector<2x128xf32>
    %435 = arith.index_cast %c4_i32 : i32 to index
    %c0_101 = arith.constant 0 : index
    %c0_102 = arith.constant 0 : index
    %436 = vector.load %arg2[%435, %c0_101, %c0_102] : memref<8x2x128xf32, #tpu.memory_space<vmem>>, vector<1x2x128xf32>
    %437 = vector.shape_cast %436 : vector<1x2x128xf32> to vector<2x128xf32>
    %438 = arith.addf %434, %437 : vector<2x128xf32>
    %439 = arith.truncf %407 : vector<2x32xf32> to vector<2x32xbf16>
    %cst_103 = arith.constant dense<0.000000e+00> : vector<2x128xf32>
    %440 = tpu.matmul %439, %5, %cst_103 {dimension_numbers = #tpu.dot_dimension_numbers<[1], [0], [0], [1], [0, 0, 1, 1], [], []>} : vector<2x32xbf16>, vector<32x128xbf16>, vector<2x128xf32> -> vector<2x128xf32>
    %c7_i32_104 = arith.constant 7 : i32
    %441 = arith.subi %c7_i32_104, %c4_i32 : i32
    %442 = arith.index_cast %441 : i32 to index
    %c0_105 = arith.constant 0 : index
    %c0_106 = arith.constant 0 : index
    %443 = vector.load %arg3[%442, %c0_105, %c0_106] : memref<8x2x128xf32, #tpu.memory_space<vmem>>, vector<1x2x128xf32>
    %444 = vector.shape_cast %443 : vector<1x2x128xf32> to vector<2x128xf32>
    %445 = arith.addf %440, %444 : vector<2x128xf32>
    %446 = vector.extract_strided_slice %438 {offsets = [0, 0], sizes = [2, 32], strides = [1, 1]} : vector<2x128xf32> to vector<2x32xf32>
    %447 = arith.negf %446 : vector<2x32xf32>
    %448 = math.exp %447 : vector<2x32xf32>
    %cst_107 = arith.constant 1.000000e+00 : f32
    %449 = vector.broadcast %cst_107 : f32 to vector<2x32xf32>
    %450 = arith.addf %449, %448 : vector<2x32xf32>
    %451 = arith.divf %449, %450 : vector<2x32xf32>
    %452 = vector.extract_strided_slice %438 {offsets = [0, 32], sizes = [2, 32], strides = [1, 1]} : vector<2x128xf32> to vector<2x32xf32>
    %453 = arith.negf %452 : vector<2x32xf32>
    %454 = math.exp %453 : vector<2x32xf32>
    %cst_108 = arith.constant 1.000000e+00 : f32
    %455 = vector.broadcast %cst_108 : f32 to vector<2x32xf32>
    %456 = arith.addf %455, %454 : vector<2x32xf32>
    %457 = arith.divf %455, %456 : vector<2x32xf32>
    %458 = vector.extract_strided_slice %438 {offsets = [0, 64], sizes = [2, 32], strides = [1, 1]} : vector<2x128xf32> to vector<2x32xf32>
    %459 = math.tanh %458 : vector<2x32xf32>
    %460 = vector.extract_strided_slice %438 {offsets = [0, 96], sizes = [2, 32], strides = [1, 1]} : vector<2x128xf32> to vector<2x32xf32>
    %461 = arith.negf %460 : vector<2x32xf32>
    %462 = math.exp %461 : vector<2x32xf32>
    %cst_109 = arith.constant 1.000000e+00 : f32
    %463 = vector.broadcast %cst_109 : f32 to vector<2x32xf32>
    %464 = arith.addf %463, %462 : vector<2x32xf32>
    %465 = arith.divf %463, %464 : vector<2x32xf32>
    %466 = arith.mulf %457, %404 : vector<2x32xf32>
    %467 = arith.mulf %451, %459 : vector<2x32xf32>
    %468 = arith.addf %466, %467 : vector<2x32xf32>
    %469 = math.tanh %468 : vector<2x32xf32>
    %470 = arith.mulf %465, %469 : vector<2x32xf32>
    %471 = vector.extract_strided_slice %445 {offsets = [0, 0], sizes = [2, 32], strides = [1, 1]} : vector<2x128xf32> to vector<2x32xf32>
    %472 = arith.negf %471 : vector<2x32xf32>
    %473 = math.exp %472 : vector<2x32xf32>
    %cst_110 = arith.constant 1.000000e+00 : f32
    %474 = vector.broadcast %cst_110 : f32 to vector<2x32xf32>
    %475 = arith.addf %474, %473 : vector<2x32xf32>
    %476 = arith.divf %474, %475 : vector<2x32xf32>
    %477 = vector.extract_strided_slice %445 {offsets = [0, 32], sizes = [2, 32], strides = [1, 1]} : vector<2x128xf32> to vector<2x32xf32>
    %478 = arith.negf %477 : vector<2x32xf32>
    %479 = math.exp %478 : vector<2x32xf32>
    %cst_111 = arith.constant 1.000000e+00 : f32
    %480 = vector.broadcast %cst_111 : f32 to vector<2x32xf32>
    %481 = arith.addf %480, %479 : vector<2x32xf32>
    %482 = arith.divf %480, %481 : vector<2x32xf32>
    %483 = vector.extract_strided_slice %445 {offsets = [0, 64], sizes = [2, 32], strides = [1, 1]} : vector<2x128xf32> to vector<2x32xf32>
    %484 = math.tanh %483 : vector<2x32xf32>
    %485 = vector.extract_strided_slice %445 {offsets = [0, 96], sizes = [2, 32], strides = [1, 1]} : vector<2x128xf32> to vector<2x32xf32>
    %486 = arith.negf %485 : vector<2x32xf32>
    %487 = math.exp %486 : vector<2x32xf32>
    %cst_112 = arith.constant 1.000000e+00 : f32
    %488 = vector.broadcast %cst_112 : f32 to vector<2x32xf32>
    %489 = arith.addf %488, %487 : vector<2x32xf32>
    %490 = arith.divf %488, %489 : vector<2x32xf32>
    %491 = arith.mulf %482, %410 : vector<2x32xf32>
    %492 = arith.mulf %476, %484 : vector<2x32xf32>
    %493 = arith.addf %491, %492 : vector<2x32xf32>
    %494 = math.tanh %493 : vector<2x32xf32>
    %495 = arith.mulf %490, %494 : vector<2x32xf32>
    %496 = arith.index_cast %431 : i32 to index
    %497 = memref.load %arg1[%496] : memref<8xi32, #tpu.memory_space<smem>>
    %498 = vector.broadcast %497 : i32 to vector<2x1xi32>
    %499 = arith.cmpi slt, %3, %498 : vector<2x1xi32>
    %500 = arith.index_cast %432 : i32 to index
    %501 = memref.load %arg1[%500] : memref<8xi32, #tpu.memory_space<smem>>
    %502 = vector.broadcast %501 : i32 to vector<2x1xi32>
    %503 = arith.cmpi slt, %3, %502 : vector<2x1xi32>
    %504 = vector.shape_cast %499 : vector<2x1xi1> to vector<2x1xi1>
    %505 = vector.broadcast %504 : vector<2x1xi1> to vector<2x32xi1>
    %506 = arith.select %505, %470, %401 : vector<2x32xi1>, vector<2x32xf32>
    %507 = vector.shape_cast %499 : vector<2x1xi1> to vector<2x1xi1>
    %508 = vector.broadcast %507 : vector<2x1xi1> to vector<2x32xi1>
    %509 = arith.select %508, %468, %404 : vector<2x32xi1>, vector<2x32xf32>
    %510 = vector.shape_cast %503 : vector<2x1xi1> to vector<2x1xi1>
    %511 = vector.broadcast %510 : vector<2x1xi1> to vector<2x32xi1>
    %512 = arith.select %511, %495, %407 : vector<2x32xi1>, vector<2x32xf32>
    %513 = vector.shape_cast %503 : vector<2x1xi1> to vector<2x1xi1>
    %514 = vector.broadcast %513 : vector<2x1xi1> to vector<2x32xi1>
    %515 = arith.select %514, %493, %410 : vector<2x32xi1>, vector<2x32xf32>
    %cst_113 = arith.constant 0.000000e+00 : f32
    %516 = vector.shape_cast %499 : vector<2x1xi1> to vector<2x1xi1>
    %517 = vector.broadcast %516 : vector<2x1xi1> to vector<2x32xi1>
    %518 = vector.broadcast %cst_113 : f32 to vector<2x32xf32>
    %519 = arith.select %517, %470, %518 : vector<2x32xi1>, vector<2x32xf32>
    %cst_114 = arith.constant 0.000000e+00 : f32
    %520 = vector.shape_cast %503 : vector<2x1xi1> to vector<2x1xi1>
    %521 = vector.broadcast %520 : vector<2x1xi1> to vector<2x32xi1>
    %522 = vector.broadcast %cst_114 : f32 to vector<2x32xf32>
    %523 = arith.select %521, %495, %522 : vector<2x32xi1>, vector<2x32xf32>
    %524 = arith.truncf %519 : vector<2x32xf32> to vector<2x32xbf16>
    %525 = arith.index_cast %c4_i32 : i32 to index
    %c0_115 = arith.constant 0 : index
    %c0_116 = arith.constant 0 : index
    %526 = vector.load %arg6[%525, %c0_115, %c0_116] : memref<8x2x32xbf16, #tpu.memory_space<vmem>>, vector<1x2x32xbf16>
    %527 = vector.shape_cast %526 : vector<1x2x32xbf16> to vector<2x32xbf16>
    %528 = vector.shape_cast %524 : vector<2x32xbf16> to vector<1x2x32xbf16>
    tpu.vector_store %arg6[%525, %c0_115, %c0_116], %528 {strides = array<i32>} : memref<8x2x32xbf16, #tpu.memory_space<vmem>>, vector<1x2x32xbf16>,
    %529 = arith.truncf %523 : vector<2x32xf32> to vector<2x32xbf16>
    %c7_i32_117 = arith.constant 7 : i32
    %530 = arith.subi %c7_i32_117, %c4_i32 : i32
    %531 = arith.index_cast %530 : i32 to index
    %c0_118 = arith.constant 0 : index
    %c0_119 = arith.constant 0 : index
    %532 = vector.load %arg7[%531, %c0_118, %c0_119] : memref<8x2x32xbf16, #tpu.memory_space<vmem>>, vector<1x2x32xbf16>
    %533 = vector.shape_cast %532 : vector<1x2x32xbf16> to vector<2x32xbf16>
    %534 = vector.shape_cast %529 : vector<2x32xbf16> to vector<1x2x32xbf16>
    tpu.vector_store %arg7[%531, %c0_118, %c0_119], %534 {strides = array<i32>} : memref<8x2x32xbf16, #tpu.memory_space<vmem>>, vector<1x2x32xbf16>,
    %c5_i32 = arith.constant 5 : i32
    %c8_i32_120 = arith.constant 8 : i32
    %535 = arith.muli %arg0, %c8_i32_120 : i32
    %536 = arith.addi %535, %c5_i32 : i32
    %c7_i32_121 = arith.constant 7 : i32
    %537 = arith.subi %c7_i32_121, %536 : i32
    %538 = arith.truncf %506 : vector<2x32xf32> to vector<2x32xbf16>
    %cst_122 = arith.constant dense<0.000000e+00> : vector<2x128xf32>
    %539 = tpu.matmul %538, %4, %cst_122 {dimension_numbers = #tpu.dot_dimension_numbers<[1], [0], [0], [1], [0, 0, 1, 1], [], []>} : vector<2x32xbf16>, vector<32x128xbf16>, vector<2x128xf32> -> vector<2x128xf32>
    %540 = arith.index_cast %c5_i32 : i32 to index
    %c0_123 = arith.constant 0 : index
    %c0_124 = arith.constant 0 : index
    %541 = vector.load %arg2[%540, %c0_123, %c0_124] : memref<8x2x128xf32, #tpu.memory_space<vmem>>, vector<1x2x128xf32>
    %542 = vector.shape_cast %541 : vector<1x2x128xf32> to vector<2x128xf32>
    %543 = arith.addf %539, %542 : vector<2x128xf32>
    %544 = arith.truncf %512 : vector<2x32xf32> to vector<2x32xbf16>
    %cst_125 = arith.constant dense<0.000000e+00> : vector<2x128xf32>
    %545 = tpu.matmul %544, %5, %cst_125 {dimension_numbers = #tpu.dot_dimension_numbers<[1], [0], [0], [1], [0, 0, 1, 1], [], []>} : vector<2x32xbf16>, vector<32x128xbf16>, vector<2x128xf32> -> vector<2x128xf32>
    %c7_i32_126 = arith.constant 7 : i32
    %546 = arith.subi %c7_i32_126, %c5_i32 : i32
    %547 = arith.index_cast %546 : i32 to index
    %c0_127 = arith.constant 0 : index
    %c0_128 = arith.constant 0 : index
    %548 = vector.load %arg3[%547, %c0_127, %c0_128] : memref<8x2x128xf32, #tpu.memory_space<vmem>>, vector<1x2x128xf32>
    %549 = vector.shape_cast %548 : vector<1x2x128xf32> to vector<2x128xf32>
    %550 = arith.addf %545, %549 : vector<2x128xf32>
    %551 = vector.extract_strided_slice %543 {offsets = [0, 0], sizes = [2, 32], strides = [1, 1]} : vector<2x128xf32> to vector<2x32xf32>
    %552 = arith.negf %551 : vector<2x32xf32>
    %553 = math.exp %552 : vector<2x32xf32>
    %cst_129 = arith.constant 1.000000e+00 : f32
    %554 = vector.broadcast %cst_129 : f32 to vector<2x32xf32>
    %555 = arith.addf %554, %553 : vector<2x32xf32>
    %556 = arith.divf %554, %555 : vector<2x32xf32>
    %557 = vector.extract_strided_slice %543 {offsets = [0, 32], sizes = [2, 32], strides = [1, 1]} : vector<2x128xf32> to vector<2x32xf32>
    %558 = arith.negf %557 : vector<2x32xf32>
    %559 = math.exp %558 : vector<2x32xf32>
    %cst_130 = arith.constant 1.000000e+00 : f32
    %560 = vector.broadcast %cst_130 : f32 to vector<2x32xf32>
    %561 = arith.addf %560, %559 : vector<2x32xf32>
    %562 = arith.divf %560, %561 : vector<2x32xf32>
    %563 = vector.extract_strided_slice %543 {offsets = [0, 64], sizes = [2, 32], strides = [1, 1]} : vector<2x128xf32> to vector<2x32xf32>
    %564 = math.tanh %563 : vector<2x32xf32>
    %565 = vector.extract_strided_slice %543 {offsets = [0, 96], sizes = [2, 32], strides = [1, 1]} : vector<2x128xf32> to vector<2x32xf32>
    %566 = arith.negf %565 : vector<2x32xf32>
    %567 = math.exp %566 : vector<2x32xf32>
    %cst_131 = arith.constant 1.000000e+00 : f32
    %568 = vector.broadcast %cst_131 : f32 to vector<2x32xf32>
    %569 = arith.addf %568, %567 : vector<2x32xf32>
    %570 = arith.divf %568, %569 : vector<2x32xf32>
    %571 = arith.mulf %562, %509 : vector<2x32xf32>
    %572 = arith.mulf %556, %564 : vector<2x32xf32>
    %573 = arith.addf %571, %572 : vector<2x32xf32>
    %574 = math.tanh %573 : vector<2x32xf32>
    %575 = arith.mulf %570, %574 : vector<2x32xf32>
    %576 = vector.extract_strided_slice %550 {offsets = [0, 0], sizes = [2, 32], strides = [1, 1]} : vector<2x128xf32> to vector<2x32xf32>
    %577 = arith.negf %576 : vector<2x32xf32>
    %578 = math.exp %577 : vector<2x32xf32>
    %cst_132 = arith.constant 1.000000e+00 : f32
    %579 = vector.broadcast %cst_132 : f32 to vector<2x32xf32>
    %580 = arith.addf %579, %578 : vector<2x32xf32>
    %581 = arith.divf %579, %580 : vector<2x32xf32>
    %582 = vector.extract_strided_slice %550 {offsets = [0, 32], sizes = [2, 32], strides = [1, 1]} : vector<2x128xf32> to vector<2x32xf32>
    %583 = arith.negf %582 : vector<2x32xf32>
    %584 = math.exp %583 : vector<2x32xf32>
    %cst_133 = arith.constant 1.000000e+00 : f32
    %585 = vector.broadcast %cst_133 : f32 to vector<2x32xf32>
    %586 = arith.addf %585, %584 : vector<2x32xf32>
    %587 = arith.divf %585, %586 : vector<2x32xf32>
    %588 = vector.extract_strided_slice %550 {offsets = [0, 64], sizes = [2, 32], strides = [1, 1]} : vector<2x128xf32> to vector<2x32xf32>
    %589 = math.tanh %588 : vector<2x32xf32>
    %590 = vector.extract_strided_slice %550 {offsets = [0, 96], sizes = [2, 32], strides = [1, 1]} : vector<2x128xf32> to vector<2x32xf32>
    %591 = arith.negf %590 : vector<2x32xf32>
    %592 = math.exp %591 : vector<2x32xf32>
    %cst_134 = arith.constant 1.000000e+00 : f32
    %593 = vector.broadcast %cst_134 : f32 to vector<2x32xf32>
    %594 = arith.addf %593, %592 : vector<2x32xf32>
    %595 = arith.divf %593, %594 : vector<2x32xf32>
    %596 = arith.mulf %587, %515 : vector<2x32xf32>
    %597 = arith.mulf %581, %589 : vector<2x32xf32>
    %598 = arith.addf %596, %597 : vector<2x32xf32>
    %599 = math.tanh %598 : vector<2x32xf32>
    %600 = arith.mulf %595, %599 : vector<2x32xf32>
    %601 = arith.index_cast %536 : i32 to index
    %602 = memref.load %arg1[%601] : memref<8xi32, #tpu.memory_space<smem>>
    %603 = vector.broadcast %602 : i32 to vector<2x1xi32>
    %604 = arith.cmpi slt, %3, %603 : vector<2x1xi32>
    %605 = arith.index_cast %537 : i32 to index
    %606 = memref.load %arg1[%605] : memref<8xi32, #tpu.memory_space<smem>>
    %607 = vector.broadcast %606 : i32 to vector<2x1xi32>
    %608 = arith.cmpi slt, %3, %607 : vector<2x1xi32>
    %609 = vector.shape_cast %604 : vector<2x1xi1> to vector<2x1xi1>
    %610 = vector.broadcast %609 : vector<2x1xi1> to vector<2x32xi1>
    %611 = arith.select %610, %575, %506 : vector<2x32xi1>, vector<2x32xf32>
    %612 = vector.shape_cast %604 : vector<2x1xi1> to vector<2x1xi1>
    %613 = vector.broadcast %612 : vector<2x1xi1> to vector<2x32xi1>
    %614 = arith.select %613, %573, %509 : vector<2x32xi1>, vector<2x32xf32>
    %615 = vector.shape_cast %608 : vector<2x1xi1> to vector<2x1xi1>
    %616 = vector.broadcast %615 : vector<2x1xi1> to vector<2x32xi1>
    %617 = arith.select %616, %600, %512 : vector<2x32xi1>, vector<2x32xf32>
    %618 = vector.shape_cast %608 : vector<2x1xi1> to vector<2x1xi1>
    %619 = vector.broadcast %618 : vector<2x1xi1> to vector<2x32xi1>
    %620 = arith.select %619, %598, %515 : vector<2x32xi1>, vector<2x32xf32>
    %cst_135 = arith.constant 0.000000e+00 : f32
    %621 = vector.shape_cast %604 : vector<2x1xi1> to vector<2x1xi1>
    %622 = vector.broadcast %621 : vector<2x1xi1> to vector<2x32xi1>
    %623 = vector.broadcast %cst_135 : f32 to vector<2x32xf32>
    %624 = arith.select %622, %575, %623 : vector<2x32xi1>, vector<2x32xf32>
    %cst_136 = arith.constant 0.000000e+00 : f32
    %625 = vector.shape_cast %608 : vector<2x1xi1> to vector<2x1xi1>
    %626 = vector.broadcast %625 : vector<2x1xi1> to vector<2x32xi1>
    %627 = vector.broadcast %cst_136 : f32 to vector<2x32xf32>
    %628 = arith.select %626, %600, %627 : vector<2x32xi1>, vector<2x32xf32>
    %629 = arith.truncf %624 : vector<2x32xf32> to vector<2x32xbf16>
    %630 = arith.index_cast %c5_i32 : i32 to index
    %c0_137 = arith.constant 0 : index
    %c0_138 = arith.constant 0 : index
    %631 = vector.load %arg6[%630, %c0_137, %c0_138] : memref<8x2x32xbf16, #tpu.memory_space<vmem>>, vector<1x2x32xbf16>
    %632 = vector.shape_cast %631 : vector<1x2x32xbf16> to vector<2x32xbf16>
    %633 = vector.shape_cast %629 : vector<2x32xbf16> to vector<1x2x32xbf16>
    tpu.vector_store %arg6[%630, %c0_137, %c0_138], %633 {strides = array<i32>} : memref<8x2x32xbf16, #tpu.memory_space<vmem>>, vector<1x2x32xbf16>,
    %634 = arith.truncf %628 : vector<2x32xf32> to vector<2x32xbf16>
    %c7_i32_139 = arith.constant 7 : i32
    %635 = arith.subi %c7_i32_139, %c5_i32 : i32
    %636 = arith.index_cast %635 : i32 to index
    %c0_140 = arith.constant 0 : index
    %c0_141 = arith.constant 0 : index
    %637 = vector.load %arg7[%636, %c0_140, %c0_141] : memref<8x2x32xbf16, #tpu.memory_space<vmem>>, vector<1x2x32xbf16>
    %638 = vector.shape_cast %637 : vector<1x2x32xbf16> to vector<2x32xbf16>
    %639 = vector.shape_cast %634 : vector<2x32xbf16> to vector<1x2x32xbf16>
    tpu.vector_store %arg7[%636, %c0_140, %c0_141], %639 {strides = array<i32>} : memref<8x2x32xbf16, #tpu.memory_space<vmem>>, vector<1x2x32xbf16>,
    %c6_i32 = arith.constant 6 : i32
    %c8_i32_142 = arith.constant 8 : i32
    %640 = arith.muli %arg0, %c8_i32_142 : i32
    %641 = arith.addi %640, %c6_i32 : i32
    %c7_i32_143 = arith.constant 7 : i32
    %642 = arith.subi %c7_i32_143, %641 : i32
    %643 = arith.truncf %611 : vector<2x32xf32> to vector<2x32xbf16>
    %cst_144 = arith.constant dense<0.000000e+00> : vector<2x128xf32>
    %644 = tpu.matmul %643, %4, %cst_144 {dimension_numbers = #tpu.dot_dimension_numbers<[1], [0], [0], [1], [0, 0, 1, 1], [], []>} : vector<2x32xbf16>, vector<32x128xbf16>, vector<2x128xf32> -> vector<2x128xf32>
    %645 = arith.index_cast %c6_i32 : i32 to index
    %c0_145 = arith.constant 0 : index
    %c0_146 = arith.constant 0 : index
    %646 = vector.load %arg2[%645, %c0_145, %c0_146] : memref<8x2x128xf32, #tpu.memory_space<vmem>>, vector<1x2x128xf32>
    %647 = vector.shape_cast %646 : vector<1x2x128xf32> to vector<2x128xf32>
    %648 = arith.addf %644, %647 : vector<2x128xf32>
    %649 = arith.truncf %617 : vector<2x32xf32> to vector<2x32xbf16>
    %cst_147 = arith.constant dense<0.000000e+00> : vector<2x128xf32>
    %650 = tpu.matmul %649, %5, %cst_147 {dimension_numbers = #tpu.dot_dimension_numbers<[1], [0], [0], [1], [0, 0, 1, 1], [], []>} : vector<2x32xbf16>, vector<32x128xbf16>, vector<2x128xf32> -> vector<2x128xf32>
    %c7_i32_148 = arith.constant 7 : i32
    %651 = arith.subi %c7_i32_148, %c6_i32 : i32
    %652 = arith.index_cast %651 : i32 to index
    %c0_149 = arith.constant 0 : index
    %c0_150 = arith.constant 0 : index
    %653 = vector.load %arg3[%652, %c0_149, %c0_150] : memref<8x2x128xf32, #tpu.memory_space<vmem>>, vector<1x2x128xf32>
    %654 = vector.shape_cast %653 : vector<1x2x128xf32> to vector<2x128xf32>
    %655 = arith.addf %650, %654 : vector<2x128xf32>
    %656 = vector.extract_strided_slice %648 {offsets = [0, 0], sizes = [2, 32], strides = [1, 1]} : vector<2x128xf32> to vector<2x32xf32>
    %657 = arith.negf %656 : vector<2x32xf32>
    %658 = math.exp %657 : vector<2x32xf32>
    %cst_151 = arith.constant 1.000000e+00 : f32
    %659 = vector.broadcast %cst_151 : f32 to vector<2x32xf32>
    %660 = arith.addf %659, %658 : vector<2x32xf32>
    %661 = arith.divf %659, %660 : vector<2x32xf32>
    %662 = vector.extract_strided_slice %648 {offsets = [0, 32], sizes = [2, 32], strides = [1, 1]} : vector<2x128xf32> to vector<2x32xf32>
    %663 = arith.negf %662 : vector<2x32xf32>
    %664 = math.exp %663 : vector<2x32xf32>
    %cst_152 = arith.constant 1.000000e+00 : f32
    %665 = vector.broadcast %cst_152 : f32 to vector<2x32xf32>
    %666 = arith.addf %665, %664 : vector<2x32xf32>
    %667 = arith.divf %665, %666 : vector<2x32xf32>
    %668 = vector.extract_strided_slice %648 {offsets = [0, 64], sizes = [2, 32], strides = [1, 1]} : vector<2x128xf32> to vector<2x32xf32>
    %669 = math.tanh %668 : vector<2x32xf32>
    %670 = vector.extract_strided_slice %648 {offsets = [0, 96], sizes = [2, 32], strides = [1, 1]} : vector<2x128xf32> to vector<2x32xf32>
    %671 = arith.negf %670 : vector<2x32xf32>
    %672 = math.exp %671 : vector<2x32xf32>
    %cst_153 = arith.constant 1.000000e+00 : f32
    %673 = vector.broadcast %cst_153 : f32 to vector<2x32xf32>
    %674 = arith.addf %673, %672 : vector<2x32xf32>
    %675 = arith.divf %673, %674 : vector<2x32xf32>
    %676 = arith.mulf %667, %614 : vector<2x32xf32>
    %677 = arith.mulf %661, %669 : vector<2x32xf32>
    %678 = arith.addf %676, %677 : vector<2x32xf32>
    %679 = math.tanh %678 : vector<2x32xf32>
    %680 = arith.mulf %675, %679 : vector<2x32xf32>
    %681 = vector.extract_strided_slice %655 {offsets = [0, 0], sizes = [2, 32], strides = [1, 1]} : vector<2x128xf32> to vector<2x32xf32>
    %682 = arith.negf %681 : vector<2x32xf32>
    %683 = math.exp %682 : vector<2x32xf32>
    %cst_154 = arith.constant 1.000000e+00 : f32
    %684 = vector.broadcast %cst_154 : f32 to vector<2x32xf32>
    %685 = arith.addf %684, %683 : vector<2x32xf32>
    %686 = arith.divf %684, %685 : vector<2x32xf32>
    %687 = vector.extract_strided_slice %655 {offsets = [0, 32], sizes = [2, 32], strides = [1, 1]} : vector<2x128xf32> to vector<2x32xf32>
    %688 = arith.negf %687 : vector<2x32xf32>
    %689 = math.exp %688 : vector<2x32xf32>
    %cst_155 = arith.constant 1.000000e+00 : f32
    %690 = vector.broadcast %cst_155 : f32 to vector<2x32xf32>
    %691 = arith.addf %690, %689 : vector<2x32xf32>
    %692 = arith.divf %690, %691 : vector<2x32xf32>
    %693 = vector.extract_strided_slice %655 {offsets = [0, 64], sizes = [2, 32], strides = [1, 1]} : vector<2x128xf32> to vector<2x32xf32>
    %694 = math.tanh %693 : vector<2x32xf32>
    %695 = vector.extract_strided_slice %655 {offsets = [0, 96], sizes = [2, 32], strides = [1, 1]} : vector<2x128xf32> to vector<2x32xf32>
    %696 = arith.negf %695 : vector<2x32xf32>
    %697 = math.exp %696 : vector<2x32xf32>
    %cst_156 = arith.constant 1.000000e+00 : f32
    %698 = vector.broadcast %cst_156 : f32 to vector<2x32xf32>
    %699 = arith.addf %698, %697 : vector<2x32xf32>
    %700 = arith.divf %698, %699 : vector<2x32xf32>
    %701 = arith.mulf %692, %620 : vector<2x32xf32>
    %702 = arith.mulf %686, %694 : vector<2x32xf32>
    %703 = arith.addf %701, %702 : vector<2x32xf32>
    %704 = math.tanh %703 : vector<2x32xf32>
    %705 = arith.mulf %700, %704 : vector<2x32xf32>
    %706 = arith.index_cast %641 : i32 to index
    %707 = memref.load %arg1[%706] : memref<8xi32, #tpu.memory_space<smem>>
    %708 = vector.broadcast %707 : i32 to vector<2x1xi32>
    %709 = arith.cmpi slt, %3, %708 : vector<2x1xi32>
    %710 = arith.index_cast %642 : i32 to index
    %711 = memref.load %arg1[%710] : memref<8xi32, #tpu.memory_space<smem>>
    %712 = vector.broadcast %711 : i32 to vector<2x1xi32>
    %713 = arith.cmpi slt, %3, %712 : vector<2x1xi32>
    %714 = vector.shape_cast %709 : vector<2x1xi1> to vector<2x1xi1>
    %715 = vector.broadcast %714 : vector<2x1xi1> to vector<2x32xi1>
    %716 = arith.select %715, %680, %611 : vector<2x32xi1>, vector<2x32xf32>
    %717 = vector.shape_cast %709 : vector<2x1xi1> to vector<2x1xi1>
    %718 = vector.broadcast %717 : vector<2x1xi1> to vector<2x32xi1>
    %719 = arith.select %718, %678, %614 : vector<2x32xi1>, vector<2x32xf32>
    %720 = vector.shape_cast %713 : vector<2x1xi1> to vector<2x1xi1>
    %721 = vector.broadcast %720 : vector<2x1xi1> to vector<2x32xi1>
    %722 = arith.select %721, %705, %617 : vector<2x32xi1>, vector<2x32xf32>
    %723 = vector.shape_cast %713 : vector<2x1xi1> to vector<2x1xi1>
    %724 = vector.broadcast %723 : vector<2x1xi1> to vector<2x32xi1>
    %725 = arith.select %724, %703, %620 : vector<2x32xi1>, vector<2x32xf32>
    %cst_157 = arith.constant 0.000000e+00 : f32
    %726 = vector.shape_cast %709 : vector<2x1xi1> to vector<2x1xi1>
    %727 = vector.broadcast %726 : vector<2x1xi1> to vector<2x32xi1>
    %728 = vector.broadcast %cst_157 : f32 to vector<2x32xf32>
    %729 = arith.select %727, %680, %728 : vector<2x32xi1>, vector<2x32xf32>
    %cst_158 = arith.constant 0.000000e+00 : f32
    %730 = vector.shape_cast %713 : vector<2x1xi1> to vector<2x1xi1>
    %731 = vector.broadcast %730 : vector<2x1xi1> to vector<2x32xi1>
    %732 = vector.broadcast %cst_158 : f32 to vector<2x32xf32>
    %733 = arith.select %731, %705, %732 : vector<2x32xi1>, vector<2x32xf32>
    %734 = arith.truncf %729 : vector<2x32xf32> to vector<2x32xbf16>
    %735 = arith.index_cast %c6_i32 : i32 to index
    %c0_159 = arith.constant 0 : index
    %c0_160 = arith.constant 0 : index
    %736 = vector.load %arg6[%735, %c0_159, %c0_160] : memref<8x2x32xbf16, #tpu.memory_space<vmem>>, vector<1x2x32xbf16>
    %737 = vector.shape_cast %736 : vector<1x2x32xbf16> to vector<2x32xbf16>
    %738 = vector.shape_cast %734 : vector<2x32xbf16> to vector<1x2x32xbf16>
    tpu.vector_store %arg6[%735, %c0_159, %c0_160], %738 {strides = array<i32>} : memref<8x2x32xbf16, #tpu.memory_space<vmem>>, vector<1x2x32xbf16>,
    %739 = arith.truncf %733 : vector<2x32xf32> to vector<2x32xbf16>
    %c7_i32_161 = arith.constant 7 : i32
    %740 = arith.subi %c7_i32_161, %c6_i32 : i32
    %741 = arith.index_cast %740 : i32 to index
    %c0_162 = arith.constant 0 : index
    %c0_163 = arith.constant 0 : index
    %742 = vector.load %arg7[%741, %c0_162, %c0_163] : memref<8x2x32xbf16, #tpu.memory_space<vmem>>, vector<1x2x32xbf16>
    %743 = vector.shape_cast %742 : vector<1x2x32xbf16> to vector<2x32xbf16>
    %744 = vector.shape_cast %739 : vector<2x32xbf16> to vector<1x2x32xbf16>
    tpu.vector_store %arg7[%741, %c0_162, %c0_163], %744 {strides = array<i32>} : memref<8x2x32xbf16, #tpu.memory_space<vmem>>, vector<1x2x32xbf16>,
    %c7_i32_164 = arith.constant 7 : i32
    %c8_i32_165 = arith.constant 8 : i32
    %745 = arith.muli %arg0, %c8_i32_165 : i32
    %746 = arith.addi %745, %c7_i32_164 : i32
    %c7_i32_166 = arith.constant 7 : i32
    %747 = arith.subi %c7_i32_166, %746 : i32
    %748 = arith.truncf %716 : vector<2x32xf32> to vector<2x32xbf16>
    %cst_167 = arith.constant dense<0.000000e+00> : vector<2x128xf32>
    %749 = tpu.matmul %748, %4, %cst_167 {dimension_numbers = #tpu.dot_dimension_numbers<[1], [0], [0], [1], [0, 0, 1, 1], [], []>} : vector<2x32xbf16>, vector<32x128xbf16>, vector<2x128xf32> -> vector<2x128xf32>
    %750 = arith.index_cast %c7_i32_164 : i32 to index
    %c0_168 = arith.constant 0 : index
    %c0_169 = arith.constant 0 : index
    %751 = vector.load %arg2[%750, %c0_168, %c0_169] : memref<8x2x128xf32, #tpu.memory_space<vmem>>, vector<1x2x128xf32>
    %752 = vector.shape_cast %751 : vector<1x2x128xf32> to vector<2x128xf32>
    %753 = arith.addf %749, %752 : vector<2x128xf32>
    %754 = arith.truncf %722 : vector<2x32xf32> to vector<2x32xbf16>
    %cst_170 = arith.constant dense<0.000000e+00> : vector<2x128xf32>
    %755 = tpu.matmul %754, %5, %cst_170 {dimension_numbers = #tpu.dot_dimension_numbers<[1], [0], [0], [1], [0, 0, 1, 1], [], []>} : vector<2x32xbf16>, vector<32x128xbf16>, vector<2x128xf32> -> vector<2x128xf32>
    %c7_i32_171 = arith.constant 7 : i32
    %756 = arith.subi %c7_i32_171, %c7_i32_164 : i32
    %757 = arith.index_cast %756 : i32 to index
    %c0_172 = arith.constant 0 : index
    %c0_173 = arith.constant 0 : index
    %758 = vector.load %arg3[%757, %c0_172, %c0_173] : memref<8x2x128xf32, #tpu.memory_space<vmem>>, vector<1x2x128xf32>
    %759 = vector.shape_cast %758 : vector<1x2x128xf32> to vector<2x128xf32>
    %760 = arith.addf %755, %759 : vector<2x128xf32>
    %761 = vector.extract_strided_slice %753 {offsets = [0, 0], sizes = [2, 32], strides = [1, 1]} : vector<2x128xf32> to vector<2x32xf32>
    %762 = arith.negf %761 : vector<2x32xf32>
    %763 = math.exp %762 : vector<2x32xf32>
    %cst_174 = arith.constant 1.000000e+00 : f32
    %764 = vector.broadcast %cst_174 : f32 to vector<2x32xf32>
    %765 = arith.addf %764, %763 : vector<2x32xf32>
    %766 = arith.divf %764, %765 : vector<2x32xf32>
    %767 = vector.extract_strided_slice %753 {offsets = [0, 32], sizes = [2, 32], strides = [1, 1]} : vector<2x128xf32> to vector<2x32xf32>
    %768 = arith.negf %767 : vector<2x32xf32>
    %769 = math.exp %768 : vector<2x32xf32>
    %cst_175 = arith.constant 1.000000e+00 : f32
    %770 = vector.broadcast %cst_175 : f32 to vector<2x32xf32>
    %771 = arith.addf %770, %769 : vector<2x32xf32>
    %772 = arith.divf %770, %771 : vector<2x32xf32>
    %773 = vector.extract_strided_slice %753 {offsets = [0, 64], sizes = [2, 32], strides = [1, 1]} : vector<2x128xf32> to vector<2x32xf32>
    %774 = math.tanh %773 : vector<2x32xf32>
    %775 = vector.extract_strided_slice %753 {offsets = [0, 96], sizes = [2, 32], strides = [1, 1]} : vector<2x128xf32> to vector<2x32xf32>
    %776 = arith.negf %775 : vector<2x32xf32>
    %777 = math.exp %776 : vector<2x32xf32>
    %cst_176 = arith.constant 1.000000e+00 : f32
    %778 = vector.broadcast %cst_176 : f32 to vector<2x32xf32>
    %779 = arith.addf %778, %777 : vector<2x32xf32>
    %780 = arith.divf %778, %779 : vector<2x32xf32>
    %781 = arith.mulf %772, %719 : vector<2x32xf32>
    %782 = arith.mulf %766, %774 : vector<2x32xf32>
    %783 = arith.addf %781, %782 : vector<2x32xf32>
    %784 = math.tanh %783 : vector<2x32xf32>
    %785 = arith.mulf %780, %784 : vector<2x32xf32>
    %786 = vector.extract_strided_slice %760 {offsets = [0, 0], sizes = [2, 32], strides = [1, 1]} : vector<2x128xf32> to vector<2x32xf32>
    %787 = arith.negf %786 : vector<2x32xf32>
    %788 = math.exp %787 : vector<2x32xf32>
    %cst_177 = arith.constant 1.000000e+00 : f32
    %789 = vector.broadcast %cst_177 : f32 to vector<2x32xf32>
    %790 = arith.addf %789, %788 : vector<2x32xf32>
    %791 = arith.divf %789, %790 : vector<2x32xf32>
    %792 = vector.extract_strided_slice %760 {offsets = [0, 32], sizes = [2, 32], strides = [1, 1]} : vector<2x128xf32> to vector<2x32xf32>
    %793 = arith.negf %792 : vector<2x32xf32>
    %794 = math.exp %793 : vector<2x32xf32>
    %cst_178 = arith.constant 1.000000e+00 : f32
    %795 = vector.broadcast %cst_178 : f32 to vector<2x32xf32>
    %796 = arith.addf %795, %794 : vector<2x32xf32>
    %797 = arith.divf %795, %796 : vector<2x32xf32>
    %798 = vector.extract_strided_slice %760 {offsets = [0, 64], sizes = [2, 32], strides = [1, 1]} : vector<2x128xf32> to vector<2x32xf32>
    %799 = math.tanh %798 : vector<2x32xf32>
    %800 = vector.extract_strided_slice %760 {offsets = [0, 96], sizes = [2, 32], strides = [1, 1]} : vector<2x128xf32> to vector<2x32xf32>
    %801 = arith.negf %800 : vector<2x32xf32>
    %802 = math.exp %801 : vector<2x32xf32>
    %cst_179 = arith.constant 1.000000e+00 : f32
    %803 = vector.broadcast %cst_179 : f32 to vector<2x32xf32>
    %804 = arith.addf %803, %802 : vector<2x32xf32>
    %805 = arith.divf %803, %804 : vector<2x32xf32>
    %806 = arith.mulf %797, %725 : vector<2x32xf32>
    %807 = arith.mulf %791, %799 : vector<2x32xf32>
    %808 = arith.addf %806, %807 : vector<2x32xf32>
    %809 = math.tanh %808 : vector<2x32xf32>
    %810 = arith.mulf %805, %809 : vector<2x32xf32>
    %811 = arith.index_cast %746 : i32 to index
    %812 = memref.load %arg1[%811] : memref<8xi32, #tpu.memory_space<smem>>
    %813 = vector.broadcast %812 : i32 to vector<2x1xi32>
    %814 = arith.cmpi slt, %3, %813 : vector<2x1xi32>
    %815 = arith.index_cast %747 : i32 to index
    %816 = memref.load %arg1[%815] : memref<8xi32, #tpu.memory_space<smem>>
    %817 = vector.broadcast %816 : i32 to vector<2x1xi32>
    %818 = arith.cmpi slt, %3, %817 : vector<2x1xi32>
    %819 = vector.shape_cast %814 : vector<2x1xi1> to vector<2x1xi1>
    %820 = vector.broadcast %819 : vector<2x1xi1> to vector<2x32xi1>
    %821 = arith.select %820, %785, %716 : vector<2x32xi1>, vector<2x32xf32>
    %822 = vector.shape_cast %814 : vector<2x1xi1> to vector<2x1xi1>
    %823 = vector.broadcast %822 : vector<2x1xi1> to vector<2x32xi1>
    %824 = arith.select %823, %783, %719 : vector<2x32xi1>, vector<2x32xf32>
    %825 = vector.shape_cast %818 : vector<2x1xi1> to vector<2x1xi1>
    %826 = vector.broadcast %825 : vector<2x1xi1> to vector<2x32xi1>
    %827 = arith.select %826, %810, %722 : vector<2x32xi1>, vector<2x32xf32>
    %828 = vector.shape_cast %818 : vector<2x1xi1> to vector<2x1xi1>
    %829 = vector.broadcast %828 : vector<2x1xi1> to vector<2x32xi1>
    %830 = arith.select %829, %808, %725 : vector<2x32xi1>, vector<2x32xf32>
    %cst_180 = arith.constant 0.000000e+00 : f32
    %831 = vector.shape_cast %814 : vector<2x1xi1> to vector<2x1xi1>
    %832 = vector.broadcast %831 : vector<2x1xi1> to vector<2x32xi1>
    %833 = vector.broadcast %cst_180 : f32 to vector<2x32xf32>
    %834 = arith.select %832, %785, %833 : vector<2x32xi1>, vector<2x32xf32>
    %cst_181 = arith.constant 0.000000e+00 : f32
    %835 = vector.shape_cast %818 : vector<2x1xi1> to vector<2x1xi1>
    %836 = vector.broadcast %835 : vector<2x1xi1> to vector<2x32xi1>
    %837 = vector.broadcast %cst_181 : f32 to vector<2x32xf32>
    %838 = arith.select %836, %810, %837 : vector<2x32xi1>, vector<2x32xf32>
    %839 = arith.truncf %834 : vector<2x32xf32> to vector<2x32xbf16>
    %840 = arith.index_cast %c7_i32_164 : i32 to index
    %c0_182 = arith.constant 0 : index
    %c0_183 = arith.constant 0 : index
    %841 = vector.load %arg6[%840, %c0_182, %c0_183] : memref<8x2x32xbf16, #tpu.memory_space<vmem>>, vector<1x2x32xbf16>
    %842 = vector.shape_cast %841 : vector<1x2x32xbf16> to vector<2x32xbf16>
    %843 = vector.shape_cast %839 : vector<2x32xbf16> to vector<1x2x32xbf16>
    tpu.vector_store %arg6[%840, %c0_182, %c0_183], %843 {strides = array<i32>} : memref<8x2x32xbf16, #tpu.memory_space<vmem>>, vector<1x2x32xbf16>,
    %844 = arith.truncf %838 : vector<2x32xf32> to vector<2x32xbf16>
    %c7_i32_184 = arith.constant 7 : i32
    %845 = arith.subi %c7_i32_184, %c7_i32_164 : i32
    %846 = arith.index_cast %845 : i32 to index
    %c0_185 = arith.constant 0 : index
    %c0_186 = arith.constant 0 : index
    %847 = vector.load %arg7[%846, %c0_185, %c0_186] : memref<8x2x32xbf16, #tpu.memory_space<vmem>>, vector<1x2x32xbf16>
    %848 = vector.shape_cast %847 : vector<1x2x32xbf16> to vector<2x32xbf16>
    %849 = vector.shape_cast %844 : vector<2x32xbf16> to vector<1x2x32xbf16>
    tpu.vector_store %arg7[%846, %c0_185, %c0_186], %849 {strides = array<i32>} : memref<8x2x32xbf16, #tpu.memory_space<vmem>>, vector<1x2x32xbf16>,
    %c8_i32_187 = arith.constant 8 : i32
    %c0_188 = arith.constant 0 : index
    %c0_189 = arith.constant 0 : index
    %850 = vector.load %arg8[%c0_188, %c0_189] : memref<2x32xf32, #tpu.memory_space<vmem>>, vector<2x32xf32>
    tpu.vector_store %arg8[%c0_188, %c0_189], %821 {strides = array<i32>} : memref<2x32xf32, #tpu.memory_space<vmem>>, vector<2x32xf32>,
    %c0_190 = arith.constant 0 : index
    %c0_191 = arith.constant 0 : index
    %851 = vector.load %arg9[%c0_190, %c0_191] : memref<2x32xf32, #tpu.memory_space<vmem>>, vector<2x32xf32>
    tpu.vector_store %arg9[%c0_190, %c0_191], %824 {strides = array<i32>} : memref<2x32xf32, #tpu.memory_space<vmem>>, vector<2x32xf32>,
    %c0_192 = arith.constant 0 : index
    %c0_193 = arith.constant 0 : index
    %852 = vector.load %arg10[%c0_192, %c0_193] : memref<2x32xf32, #tpu.memory_space<vmem>>, vector<2x32xf32>
    tpu.vector_store %arg10[%c0_192, %c0_193], %827 {strides = array<i32>} : memref<2x32xf32, #tpu.memory_space<vmem>>, vector<2x32xf32>,
    %c0_194 = arith.constant 0 : index
    %c0_195 = arith.constant 0 : index
    %853 = vector.load %arg11[%c0_194, %c0_195] : memref<2x32xf32, #tpu.memory_space<vmem>>, vector<2x32xf32>
    tpu.vector_store %arg11[%c0_194, %c0_195], %830 {strides = array<i32>} : memref<2x32xf32, #tpu.memory_space<vmem>>, vector<2x32xf32>,
    return
  }
  func.func @transform_0(%arg0: i32, %arg1: memref<8xi32, #tpu.memory_space<smem>>) -> (i32, i32, i32) {
    %c0_i32 = arith.constant 0 : i32
    %c0_i32_0 = arith.constant 0 : i32
    %c0_i32_1 = arith.constant 0 : i32
    return %arg0, %c0_i32, %c0_i32_0 : i32, i32, i32
  }
  func.func @transform_1(%arg0: i32, %arg1: memref<8xi32, #tpu.memory_space<smem>>) -> (i32, i32, i32) {
    %c0_i32 = arith.constant 0 : i32
    %0 = arith.subi %c0_i32, %arg0 : i32
    %c0_i32_0 = arith.constant 0 : i32
    %c0_i32_1 = arith.constant 0 : i32
    %c0_i32_2 = arith.constant 0 : i32
    return %0, %c0_i32_0, %c0_i32_1 : i32, i32, i32
  }
  func.func @transform_2(%arg0: i32, %arg1: memref<8xi32, #tpu.memory_space<smem>>) -> (i32, i32) {
    %c0_i32 = arith.constant 0 : i32
    %c0_i32_0 = arith.constant 0 : i32
    %c0_i32_1 = arith.constant 0 : i32
    return %c0_i32, %c0_i32_0 : i32, i32
  }
  func.func @transform_3(%arg0: i32, %arg1: memref<8xi32, #tpu.memory_space<smem>>) -> (i32, i32) {
    %c0_i32 = arith.constant 0 : i32
    %c0_i32_0 = arith.constant 0 : i32
    %c0_i32_1 = arith.constant 0 : i32
    return %c0_i32, %c0_i32_0 : i32, i32
  }
  func.func @transform_4(%arg0: i32, %arg1: memref<8xi32, #tpu.memory_space<smem>>) -> (i32, i32, i32) {
    %c0_i32 = arith.constant 0 : i32
    %c0_i32_0 = arith.constant 0 : i32
    %c0_i32_1 = arith.constant 0 : i32
    return %arg0, %c0_i32, %c0_i32_0 : i32, i32, i32
  }
  func.func @transform_5(%arg0: i32, %arg1: memref<8xi32, #tpu.memory_space<smem>>) -> (i32, i32, i32) {
    %c0_i32 = arith.constant 0 : i32
    %0 = arith.subi %c0_i32, %arg0 : i32
    %c0_i32_0 = arith.constant 0 : i32
    %c0_i32_1 = arith.constant 0 : i32
    %c0_i32_2 = arith.constant 0 : i32
    return %0, %c0_i32_0, %c0_i32_1 : i32, i32, i32
  }
}

module attributes {stable_mosaic.version = 11 : i64} {
  func.func @_bilstm_rec_kernel(%arg0: i32, %arg1: memref<8xi32, #tpu.memory_space<smem>>, %arg2: memref<8x2x128xf32, #tpu.memory_space<vmem>>, %arg3: memref<8x2x128xf32, #tpu.memory_space<vmem>>, %arg4: memref<32x128xbf16, #tpu.memory_space<vmem>>, %arg5: memref<32x128xbf16, #tpu.memory_space<vmem>>, %arg6: memref<1x64xf32, #tpu.memory_space<vmem>>, %arg7: memref<8x2x1xf32, #tpu.memory_space<vmem>>, %arg8: memref<8x2x1xf32, #tpu.memory_space<vmem>>, %arg9: memref<2x32xf32, #tpu.memory_space<vmem>>, %arg10: memref<2x32xf32, #tpu.memory_space<vmem>>, %arg11: memref<2x32xf32, #tpu.memory_space<vmem>>, %arg12: memref<2x32xf32, #tpu.memory_space<vmem>>) attributes {dimension_semantics = [#tpu.dimension_semantics<arbitrary>], iteration_bounds = array<i64: 1>, scalar_prefetch = 1 : i64, scratch_operands = 4 : i64, tpu.core_type = #tpu.core_type<tc>, window_params = [{transform_indices = @transform_0, window_bounds = array<i64: 8, 2, 128>}, {transform_indices = @transform_1, window_bounds = array<i64: 8, 2, 128>}, {pipeline_mode = #tpu.pipeline_mode<synchronous>, transform_indices = @transform_2, window_bounds = array<i64: 32, 128>}, {pipeline_mode = #tpu.pipeline_mode<synchronous>, transform_indices = @transform_3, window_bounds = array<i64: 32, 128>}, {pipeline_mode = #tpu.pipeline_mode<synchronous>, transform_indices = @transform_4, window_bounds = array<i64: 1, 64>}, {transform_indices = @transform_5, window_bounds = array<i64: 8, 2, 1>}, {transform_indices = @transform_6, window_bounds = array<i64: 8, 2, 1>}]} {
    %c0_i32 = arith.constant 0 : i32
    %0 = arith.cmpi eq, %arg0, %c0_i32 : i32
    %1 = arith.extui %0 : i1 to i32
    %c0_i32_0 = arith.constant 0 : i32
    %2 = arith.cmpi ne, %1, %c0_i32_0 : i32
    scf.if %2 {
      %cst_215 = arith.constant 0.000000e+00 : f32
      %904 = vector.broadcast %cst_215 : f32 to vector<2x32xf32>
      %c0_216 = arith.constant 0 : index
      %c0_217 = arith.constant 0 : index
      %905 = vector.load %arg9[%c0_216, %c0_217] : memref<2x32xf32, #tpu.memory_space<vmem>>, vector<2x32xf32>
      tpu.vector_store %arg9[%c0_216, %c0_217], %904 {strides = array<i32>} : memref<2x32xf32, #tpu.memory_space<vmem>>, vector<2x32xf32>,
      %cst_218 = arith.constant 0.000000e+00 : f32
      %906 = vector.broadcast %cst_218 : f32 to vector<2x32xf32>
      %c0_219 = arith.constant 0 : index
      %c0_220 = arith.constant 0 : index
      %907 = vector.load %arg10[%c0_219, %c0_220] : memref<2x32xf32, #tpu.memory_space<vmem>>, vector<2x32xf32>
      tpu.vector_store %arg10[%c0_219, %c0_220], %906 {strides = array<i32>} : memref<2x32xf32, #tpu.memory_space<vmem>>, vector<2x32xf32>,
      %cst_221 = arith.constant 0.000000e+00 : f32
      %908 = vector.broadcast %cst_221 : f32 to vector<2x32xf32>
      %c0_222 = arith.constant 0 : index
      %c0_223 = arith.constant 0 : index
      %909 = vector.load %arg11[%c0_222, %c0_223] : memref<2x32xf32, #tpu.memory_space<vmem>>, vector<2x32xf32>
      tpu.vector_store %arg11[%c0_222, %c0_223], %908 {strides = array<i32>} : memref<2x32xf32, #tpu.memory_space<vmem>>, vector<2x32xf32>,
      %cst_224 = arith.constant 0.000000e+00 : f32
      %910 = vector.broadcast %cst_224 : f32 to vector<2x32xf32>
      %c0_225 = arith.constant 0 : index
      %c0_226 = arith.constant 0 : index
      %911 = vector.load %arg12[%c0_225, %c0_226] : memref<2x32xf32, #tpu.memory_space<vmem>>, vector<2x32xf32>
      tpu.vector_store %arg12[%c0_225, %c0_226], %910 {strides = array<i32>} : memref<2x32xf32, #tpu.memory_space<vmem>>, vector<2x32xf32>,
    } else {
    }
    %3 = tpu.iota {dimensions = array<i32: 0>} : vector<2x1xi32>
    %c0 = arith.constant 0 : index
    %c0_1 = arith.constant 0 : index
    %4 = vector.load %arg4[%c0, %c0_1] : memref<32x128xbf16, #tpu.memory_space<vmem>>, vector<32x128xbf16>
    %c0_2 = arith.constant 0 : index
    %c0_3 = arith.constant 0 : index
    %5 = vector.load %arg5[%c0_2, %c0_3] : memref<32x128xbf16, #tpu.memory_space<vmem>>, vector<32x128xbf16>
    %c0_4 = arith.constant 0 : index
    %c0_5 = arith.constant 0 : index
    %6 = vector.load %arg6[%c0_4, %c0_5] : memref<1x64xf32, #tpu.memory_space<vmem>>, vector<1x32xf32>
    %c0_6 = arith.constant 0 : index
    %c32 = arith.constant 32 : index
    %7 = vector.load %arg6[%c0_6, %c32] : memref<1x64xf32, #tpu.memory_space<vmem>>, vector<1x32xf32>
    %c0_7 = arith.constant 0 : index
    %c0_8 = arith.constant 0 : index
    %8 = vector.load %arg9[%c0_7, %c0_8] : memref<2x32xf32, #tpu.memory_space<vmem>>, vector<2x32xf32>
    %c0_9 = arith.constant 0 : index
    %c0_10 = arith.constant 0 : index
    %9 = vector.load %arg10[%c0_9, %c0_10] : memref<2x32xf32, #tpu.memory_space<vmem>>, vector<2x32xf32>
    %c0_11 = arith.constant 0 : index
    %c0_12 = arith.constant 0 : index
    %10 = vector.load %arg11[%c0_11, %c0_12] : memref<2x32xf32, #tpu.memory_space<vmem>>, vector<2x32xf32>
    %c0_13 = arith.constant 0 : index
    %c0_14 = arith.constant 0 : index
    %11 = vector.load %arg12[%c0_13, %c0_14] : memref<2x32xf32, #tpu.memory_space<vmem>>, vector<2x32xf32>
    %c0_i32_15 = arith.constant 0 : i32
    %c8_i32 = arith.constant 8 : i32
    %12 = arith.muli %arg0, %c8_i32 : i32
    %13 = arith.addi %12, %c0_i32_15 : i32
    %c7_i32 = arith.constant 7 : i32
    %14 = arith.subi %c7_i32, %13 : i32
    %15 = arith.truncf %8 : vector<2x32xf32> to vector<2x32xbf16>
    %cst = arith.constant dense<0.000000e+00> : vector<2x128xf32>
    %16 = tpu.matmul %15, %4, %cst {dimension_numbers = #tpu.dot_dimension_numbers<[1], [0], [0], [1], [0, 0, 1, 1], [], []>} : vector<2x32xbf16>, vector<32x128xbf16>, vector<2x128xf32> -> vector<2x128xf32>
    %17 = arith.index_cast %c0_i32_15 : i32 to index
    %c0_16 = arith.constant 0 : index
    %c0_17 = arith.constant 0 : index
    %18 = vector.load %arg2[%17, %c0_16, %c0_17] : memref<8x2x128xf32, #tpu.memory_space<vmem>>, vector<1x2x128xf32>
    %19 = vector.shape_cast %18 : vector<1x2x128xf32> to vector<2x128xf32>
    %20 = arith.addf %16, %19 : vector<2x128xf32>
    %21 = arith.truncf %10 : vector<2x32xf32> to vector<2x32xbf16>
    %cst_18 = arith.constant dense<0.000000e+00> : vector<2x128xf32>
    %22 = tpu.matmul %21, %5, %cst_18 {dimension_numbers = #tpu.dot_dimension_numbers<[1], [0], [0], [1], [0, 0, 1, 1], [], []>} : vector<2x32xbf16>, vector<32x128xbf16>, vector<2x128xf32> -> vector<2x128xf32>
    %c7_i32_19 = arith.constant 7 : i32
    %23 = arith.subi %c7_i32_19, %c0_i32_15 : i32
    %24 = arith.index_cast %23 : i32 to index
    %c0_20 = arith.constant 0 : index
    %c0_21 = arith.constant 0 : index
    %25 = vector.load %arg3[%24, %c0_20, %c0_21] : memref<8x2x128xf32, #tpu.memory_space<vmem>>, vector<1x2x128xf32>
    %26 = vector.shape_cast %25 : vector<1x2x128xf32> to vector<2x128xf32>
    %27 = arith.addf %22, %26 : vector<2x128xf32>
    %28 = vector.extract_strided_slice %20 {offsets = [0, 0], sizes = [2, 32], strides = [1, 1]} : vector<2x128xf32> to vector<2x32xf32>
    %29 = arith.negf %28 : vector<2x32xf32>
    %30 = math.exp %29 : vector<2x32xf32>
    %cst_22 = arith.constant 1.000000e+00 : f32
    %31 = vector.broadcast %cst_22 : f32 to vector<2x32xf32>
    %32 = arith.addf %31, %30 : vector<2x32xf32>
    %33 = arith.divf %31, %32 : vector<2x32xf32>
    %34 = vector.extract_strided_slice %20 {offsets = [0, 32], sizes = [2, 32], strides = [1, 1]} : vector<2x128xf32> to vector<2x32xf32>
    %35 = arith.negf %34 : vector<2x32xf32>
    %36 = math.exp %35 : vector<2x32xf32>
    %cst_23 = arith.constant 1.000000e+00 : f32
    %37 = vector.broadcast %cst_23 : f32 to vector<2x32xf32>
    %38 = arith.addf %37, %36 : vector<2x32xf32>
    %39 = arith.divf %37, %38 : vector<2x32xf32>
    %40 = vector.extract_strided_slice %20 {offsets = [0, 64], sizes = [2, 32], strides = [1, 1]} : vector<2x128xf32> to vector<2x32xf32>
    %41 = math.tanh %40 : vector<2x32xf32>
    %42 = vector.extract_strided_slice %20 {offsets = [0, 96], sizes = [2, 32], strides = [1, 1]} : vector<2x128xf32> to vector<2x32xf32>
    %43 = arith.negf %42 : vector<2x32xf32>
    %44 = math.exp %43 : vector<2x32xf32>
    %cst_24 = arith.constant 1.000000e+00 : f32
    %45 = vector.broadcast %cst_24 : f32 to vector<2x32xf32>
    %46 = arith.addf %45, %44 : vector<2x32xf32>
    %47 = arith.divf %45, %46 : vector<2x32xf32>
    %48 = arith.mulf %39, %9 : vector<2x32xf32>
    %49 = arith.mulf %33, %41 : vector<2x32xf32>
    %50 = arith.addf %48, %49 : vector<2x32xf32>
    %51 = math.tanh %50 : vector<2x32xf32>
    %52 = arith.mulf %47, %51 : vector<2x32xf32>
    %53 = vector.extract_strided_slice %27 {offsets = [0, 0], sizes = [2, 32], strides = [1, 1]} : vector<2x128xf32> to vector<2x32xf32>
    %54 = arith.negf %53 : vector<2x32xf32>
    %55 = math.exp %54 : vector<2x32xf32>
    %cst_25 = arith.constant 1.000000e+00 : f32
    %56 = vector.broadcast %cst_25 : f32 to vector<2x32xf32>
    %57 = arith.addf %56, %55 : vector<2x32xf32>
    %58 = arith.divf %56, %57 : vector<2x32xf32>
    %59 = vector.extract_strided_slice %27 {offsets = [0, 32], sizes = [2, 32], strides = [1, 1]} : vector<2x128xf32> to vector<2x32xf32>
    %60 = arith.negf %59 : vector<2x32xf32>
    %61 = math.exp %60 : vector<2x32xf32>
    %cst_26 = arith.constant 1.000000e+00 : f32
    %62 = vector.broadcast %cst_26 : f32 to vector<2x32xf32>
    %63 = arith.addf %62, %61 : vector<2x32xf32>
    %64 = arith.divf %62, %63 : vector<2x32xf32>
    %65 = vector.extract_strided_slice %27 {offsets = [0, 64], sizes = [2, 32], strides = [1, 1]} : vector<2x128xf32> to vector<2x32xf32>
    %66 = math.tanh %65 : vector<2x32xf32>
    %67 = vector.extract_strided_slice %27 {offsets = [0, 96], sizes = [2, 32], strides = [1, 1]} : vector<2x128xf32> to vector<2x32xf32>
    %68 = arith.negf %67 : vector<2x32xf32>
    %69 = math.exp %68 : vector<2x32xf32>
    %cst_27 = arith.constant 1.000000e+00 : f32
    %70 = vector.broadcast %cst_27 : f32 to vector<2x32xf32>
    %71 = arith.addf %70, %69 : vector<2x32xf32>
    %72 = arith.divf %70, %71 : vector<2x32xf32>
    %73 = arith.mulf %64, %11 : vector<2x32xf32>
    %74 = arith.mulf %58, %66 : vector<2x32xf32>
    %75 = arith.addf %73, %74 : vector<2x32xf32>
    %76 = math.tanh %75 : vector<2x32xf32>
    %77 = arith.mulf %72, %76 : vector<2x32xf32>
    %78 = arith.index_cast %13 : i32 to index
    %79 = memref.load %arg1[%78] : memref<8xi32, #tpu.memory_space<smem>>
    %80 = vector.broadcast %79 : i32 to vector<2x1xi32>
    %81 = arith.cmpi slt, %3, %80 : vector<2x1xi32>
    %82 = arith.index_cast %14 : i32 to index
    %83 = memref.load %arg1[%82] : memref<8xi32, #tpu.memory_space<smem>>
    %84 = vector.broadcast %83 : i32 to vector<2x1xi32>
    %85 = arith.cmpi slt, %3, %84 : vector<2x1xi32>
    %86 = vector.shape_cast %81 : vector<2x1xi1> to vector<2x1xi1>
    %87 = vector.broadcast %86 : vector<2x1xi1> to vector<2x32xi1>
    %88 = arith.select %87, %52, %8 : vector<2x32xi1>, vector<2x32xf32>
    %89 = vector.shape_cast %81 : vector<2x1xi1> to vector<2x1xi1>
    %90 = vector.broadcast %89 : vector<2x1xi1> to vector<2x32xi1>
    %91 = arith.select %90, %50, %9 : vector<2x32xi1>, vector<2x32xf32>
    %92 = vector.shape_cast %85 : vector<2x1xi1> to vector<2x1xi1>
    %93 = vector.broadcast %92 : vector<2x1xi1> to vector<2x32xi1>
    %94 = arith.select %93, %77, %10 : vector<2x32xi1>, vector<2x32xf32>
    %95 = vector.shape_cast %85 : vector<2x1xi1> to vector<2x1xi1>
    %96 = vector.broadcast %95 : vector<2x1xi1> to vector<2x32xi1>
    %97 = arith.select %96, %75, %11 : vector<2x32xi1>, vector<2x32xf32>
    %cst_28 = arith.constant 0.000000e+00 : f32
    %98 = vector.shape_cast %81 : vector<2x1xi1> to vector<2x1xi1>
    %99 = vector.broadcast %98 : vector<2x1xi1> to vector<2x32xi1>
    %100 = vector.broadcast %cst_28 : f32 to vector<2x32xf32>
    %101 = arith.select %99, %52, %100 : vector<2x32xi1>, vector<2x32xf32>
    %cst_29 = arith.constant 0.000000e+00 : f32
    %102 = vector.shape_cast %85 : vector<2x1xi1> to vector<2x1xi1>
    %103 = vector.broadcast %102 : vector<2x1xi1> to vector<2x32xi1>
    %104 = vector.broadcast %cst_29 : f32 to vector<2x32xf32>
    %105 = arith.select %103, %77, %104 : vector<2x32xi1>, vector<2x32xf32>
    %106 = vector.broadcast %6 : vector<1x32xf32> to vector<2x32xf32>
    %107 = arith.mulf %101, %106 : vector<2x32xf32>
    %cst_30 = arith.constant dense<0.000000e+00> : vector<2xf32>
    %108 = vector.multi_reduction <add>, %107, %cst_30 [1] : vector<2x32xf32> to vector<2xf32>
    %109 = vector.shape_cast %108 : vector<2xf32> to vector<2x1xf32>
    %110 = arith.index_cast %c0_i32_15 : i32 to index
    %c0_31 = arith.constant 0 : index
    %c0_32 = arith.constant 0 : index
    %111 = vector.load %arg7[%110, %c0_31, %c0_32] : memref<8x2x1xf32, #tpu.memory_space<vmem>>, vector<1x2x1xf32>
    %112 = vector.shape_cast %111 : vector<1x2x1xf32> to vector<2x1xf32>
    %113 = vector.shape_cast %109 : vector<2x1xf32> to vector<1x2x1xf32>
    tpu.vector_store %arg7[%110, %c0_31, %c0_32], %113 {strides = array<i32>} : memref<8x2x1xf32, #tpu.memory_space<vmem>>, vector<1x2x1xf32>,
    %114 = vector.broadcast %7 : vector<1x32xf32> to vector<2x32xf32>
    %115 = arith.mulf %105, %114 : vector<2x32xf32>
    %cst_33 = arith.constant dense<0.000000e+00> : vector<2xf32>
    %116 = vector.multi_reduction <add>, %115, %cst_33 [1] : vector<2x32xf32> to vector<2xf32>
    %117 = vector.shape_cast %116 : vector<2xf32> to vector<2x1xf32>
    %c7_i32_34 = arith.constant 7 : i32
    %118 = arith.subi %c7_i32_34, %c0_i32_15 : i32
    %119 = arith.index_cast %118 : i32 to index
    %c0_35 = arith.constant 0 : index
    %c0_36 = arith.constant 0 : index
    %120 = vector.load %arg8[%119, %c0_35, %c0_36] : memref<8x2x1xf32, #tpu.memory_space<vmem>>, vector<1x2x1xf32>
    %121 = vector.shape_cast %120 : vector<1x2x1xf32> to vector<2x1xf32>
    %122 = vector.shape_cast %117 : vector<2x1xf32> to vector<1x2x1xf32>
    tpu.vector_store %arg8[%119, %c0_35, %c0_36], %122 {strides = array<i32>} : memref<8x2x1xf32, #tpu.memory_space<vmem>>, vector<1x2x1xf32>,
    %c1_i32 = arith.constant 1 : i32
    %c8_i32_37 = arith.constant 8 : i32
    %123 = arith.muli %arg0, %c8_i32_37 : i32
    %124 = arith.addi %123, %c1_i32 : i32
    %c7_i32_38 = arith.constant 7 : i32
    %125 = arith.subi %c7_i32_38, %124 : i32
    %126 = arith.truncf %88 : vector<2x32xf32> to vector<2x32xbf16>
    %cst_39 = arith.constant dense<0.000000e+00> : vector<2x128xf32>
    %127 = tpu.matmul %126, %4, %cst_39 {dimension_numbers = #tpu.dot_dimension_numbers<[1], [0], [0], [1], [0, 0, 1, 1], [], []>} : vector<2x32xbf16>, vector<32x128xbf16>, vector<2x128xf32> -> vector<2x128xf32>
    %128 = arith.index_cast %c1_i32 : i32 to index
    %c0_40 = arith.constant 0 : index
    %c0_41 = arith.constant 0 : index
    %129 = vector.load %arg2[%128, %c0_40, %c0_41] : memref<8x2x128xf32, #tpu.memory_space<vmem>>, vector<1x2x128xf32>
    %130 = vector.shape_cast %129 : vector<1x2x128xf32> to vector<2x128xf32>
    %131 = arith.addf %127, %130 : vector<2x128xf32>
    %132 = arith.truncf %94 : vector<2x32xf32> to vector<2x32xbf16>
    %cst_42 = arith.constant dense<0.000000e+00> : vector<2x128xf32>
    %133 = tpu.matmul %132, %5, %cst_42 {dimension_numbers = #tpu.dot_dimension_numbers<[1], [0], [0], [1], [0, 0, 1, 1], [], []>} : vector<2x32xbf16>, vector<32x128xbf16>, vector<2x128xf32> -> vector<2x128xf32>
    %c7_i32_43 = arith.constant 7 : i32
    %134 = arith.subi %c7_i32_43, %c1_i32 : i32
    %135 = arith.index_cast %134 : i32 to index
    %c0_44 = arith.constant 0 : index
    %c0_45 = arith.constant 0 : index
    %136 = vector.load %arg3[%135, %c0_44, %c0_45] : memref<8x2x128xf32, #tpu.memory_space<vmem>>, vector<1x2x128xf32>
    %137 = vector.shape_cast %136 : vector<1x2x128xf32> to vector<2x128xf32>
    %138 = arith.addf %133, %137 : vector<2x128xf32>
    %139 = vector.extract_strided_slice %131 {offsets = [0, 0], sizes = [2, 32], strides = [1, 1]} : vector<2x128xf32> to vector<2x32xf32>
    %140 = arith.negf %139 : vector<2x32xf32>
    %141 = math.exp %140 : vector<2x32xf32>
    %cst_46 = arith.constant 1.000000e+00 : f32
    %142 = vector.broadcast %cst_46 : f32 to vector<2x32xf32>
    %143 = arith.addf %142, %141 : vector<2x32xf32>
    %144 = arith.divf %142, %143 : vector<2x32xf32>
    %145 = vector.extract_strided_slice %131 {offsets = [0, 32], sizes = [2, 32], strides = [1, 1]} : vector<2x128xf32> to vector<2x32xf32>
    %146 = arith.negf %145 : vector<2x32xf32>
    %147 = math.exp %146 : vector<2x32xf32>
    %cst_47 = arith.constant 1.000000e+00 : f32
    %148 = vector.broadcast %cst_47 : f32 to vector<2x32xf32>
    %149 = arith.addf %148, %147 : vector<2x32xf32>
    %150 = arith.divf %148, %149 : vector<2x32xf32>
    %151 = vector.extract_strided_slice %131 {offsets = [0, 64], sizes = [2, 32], strides = [1, 1]} : vector<2x128xf32> to vector<2x32xf32>
    %152 = math.tanh %151 : vector<2x32xf32>
    %153 = vector.extract_strided_slice %131 {offsets = [0, 96], sizes = [2, 32], strides = [1, 1]} : vector<2x128xf32> to vector<2x32xf32>
    %154 = arith.negf %153 : vector<2x32xf32>
    %155 = math.exp %154 : vector<2x32xf32>
    %cst_48 = arith.constant 1.000000e+00 : f32
    %156 = vector.broadcast %cst_48 : f32 to vector<2x32xf32>
    %157 = arith.addf %156, %155 : vector<2x32xf32>
    %158 = arith.divf %156, %157 : vector<2x32xf32>
    %159 = arith.mulf %150, %91 : vector<2x32xf32>
    %160 = arith.mulf %144, %152 : vector<2x32xf32>
    %161 = arith.addf %159, %160 : vector<2x32xf32>
    %162 = math.tanh %161 : vector<2x32xf32>
    %163 = arith.mulf %158, %162 : vector<2x32xf32>
    %164 = vector.extract_strided_slice %138 {offsets = [0, 0], sizes = [2, 32], strides = [1, 1]} : vector<2x128xf32> to vector<2x32xf32>
    %165 = arith.negf %164 : vector<2x32xf32>
    %166 = math.exp %165 : vector<2x32xf32>
    %cst_49 = arith.constant 1.000000e+00 : f32
    %167 = vector.broadcast %cst_49 : f32 to vector<2x32xf32>
    %168 = arith.addf %167, %166 : vector<2x32xf32>
    %169 = arith.divf %167, %168 : vector<2x32xf32>
    %170 = vector.extract_strided_slice %138 {offsets = [0, 32], sizes = [2, 32], strides = [1, 1]} : vector<2x128xf32> to vector<2x32xf32>
    %171 = arith.negf %170 : vector<2x32xf32>
    %172 = math.exp %171 : vector<2x32xf32>
    %cst_50 = arith.constant 1.000000e+00 : f32
    %173 = vector.broadcast %cst_50 : f32 to vector<2x32xf32>
    %174 = arith.addf %173, %172 : vector<2x32xf32>
    %175 = arith.divf %173, %174 : vector<2x32xf32>
    %176 = vector.extract_strided_slice %138 {offsets = [0, 64], sizes = [2, 32], strides = [1, 1]} : vector<2x128xf32> to vector<2x32xf32>
    %177 = math.tanh %176 : vector<2x32xf32>
    %178 = vector.extract_strided_slice %138 {offsets = [0, 96], sizes = [2, 32], strides = [1, 1]} : vector<2x128xf32> to vector<2x32xf32>
    %179 = arith.negf %178 : vector<2x32xf32>
    %180 = math.exp %179 : vector<2x32xf32>
    %cst_51 = arith.constant 1.000000e+00 : f32
    %181 = vector.broadcast %cst_51 : f32 to vector<2x32xf32>
    %182 = arith.addf %181, %180 : vector<2x32xf32>
    %183 = arith.divf %181, %182 : vector<2x32xf32>
    %184 = arith.mulf %175, %97 : vector<2x32xf32>
    %185 = arith.mulf %169, %177 : vector<2x32xf32>
    %186 = arith.addf %184, %185 : vector<2x32xf32>
    %187 = math.tanh %186 : vector<2x32xf32>
    %188 = arith.mulf %183, %187 : vector<2x32xf32>
    %189 = arith.index_cast %124 : i32 to index
    %190 = memref.load %arg1[%189] : memref<8xi32, #tpu.memory_space<smem>>
    %191 = vector.broadcast %190 : i32 to vector<2x1xi32>
    %192 = arith.cmpi slt, %3, %191 : vector<2x1xi32>
    %193 = arith.index_cast %125 : i32 to index
    %194 = memref.load %arg1[%193] : memref<8xi32, #tpu.memory_space<smem>>
    %195 = vector.broadcast %194 : i32 to vector<2x1xi32>
    %196 = arith.cmpi slt, %3, %195 : vector<2x1xi32>
    %197 = vector.shape_cast %192 : vector<2x1xi1> to vector<2x1xi1>
    %198 = vector.broadcast %197 : vector<2x1xi1> to vector<2x32xi1>
    %199 = arith.select %198, %163, %88 : vector<2x32xi1>, vector<2x32xf32>
    %200 = vector.shape_cast %192 : vector<2x1xi1> to vector<2x1xi1>
    %201 = vector.broadcast %200 : vector<2x1xi1> to vector<2x32xi1>
    %202 = arith.select %201, %161, %91 : vector<2x32xi1>, vector<2x32xf32>
    %203 = vector.shape_cast %196 : vector<2x1xi1> to vector<2x1xi1>
    %204 = vector.broadcast %203 : vector<2x1xi1> to vector<2x32xi1>
    %205 = arith.select %204, %188, %94 : vector<2x32xi1>, vector<2x32xf32>
    %206 = vector.shape_cast %196 : vector<2x1xi1> to vector<2x1xi1>
    %207 = vector.broadcast %206 : vector<2x1xi1> to vector<2x32xi1>
    %208 = arith.select %207, %186, %97 : vector<2x32xi1>, vector<2x32xf32>
    %cst_52 = arith.constant 0.000000e+00 : f32
    %209 = vector.shape_cast %192 : vector<2x1xi1> to vector<2x1xi1>
    %210 = vector.broadcast %209 : vector<2x1xi1> to vector<2x32xi1>
    %211 = vector.broadcast %cst_52 : f32 to vector<2x32xf32>
    %212 = arith.select %210, %163, %211 : vector<2x32xi1>, vector<2x32xf32>
    %cst_53 = arith.constant 0.000000e+00 : f32
    %213 = vector.shape_cast %196 : vector<2x1xi1> to vector<2x1xi1>
    %214 = vector.broadcast %213 : vector<2x1xi1> to vector<2x32xi1>
    %215 = vector.broadcast %cst_53 : f32 to vector<2x32xf32>
    %216 = arith.select %214, %188, %215 : vector<2x32xi1>, vector<2x32xf32>
    %217 = vector.broadcast %6 : vector<1x32xf32> to vector<2x32xf32>
    %218 = arith.mulf %212, %217 : vector<2x32xf32>
    %cst_54 = arith.constant dense<0.000000e+00> : vector<2xf32>
    %219 = vector.multi_reduction <add>, %218, %cst_54 [1] : vector<2x32xf32> to vector<2xf32>
    %220 = vector.shape_cast %219 : vector<2xf32> to vector<2x1xf32>
    %221 = arith.index_cast %c1_i32 : i32 to index
    %c0_55 = arith.constant 0 : index
    %c0_56 = arith.constant 0 : index
    %222 = vector.load %arg7[%221, %c0_55, %c0_56] : memref<8x2x1xf32, #tpu.memory_space<vmem>>, vector<1x2x1xf32>
    %223 = vector.shape_cast %222 : vector<1x2x1xf32> to vector<2x1xf32>
    %224 = vector.shape_cast %220 : vector<2x1xf32> to vector<1x2x1xf32>
    tpu.vector_store %arg7[%221, %c0_55, %c0_56], %224 {strides = array<i32>} : memref<8x2x1xf32, #tpu.memory_space<vmem>>, vector<1x2x1xf32>,
    %225 = vector.broadcast %7 : vector<1x32xf32> to vector<2x32xf32>
    %226 = arith.mulf %216, %225 : vector<2x32xf32>
    %cst_57 = arith.constant dense<0.000000e+00> : vector<2xf32>
    %227 = vector.multi_reduction <add>, %226, %cst_57 [1] : vector<2x32xf32> to vector<2xf32>
    %228 = vector.shape_cast %227 : vector<2xf32> to vector<2x1xf32>
    %c7_i32_58 = arith.constant 7 : i32
    %229 = arith.subi %c7_i32_58, %c1_i32 : i32
    %230 = arith.index_cast %229 : i32 to index
    %c0_59 = arith.constant 0 : index
    %c0_60 = arith.constant 0 : index
    %231 = vector.load %arg8[%230, %c0_59, %c0_60] : memref<8x2x1xf32, #tpu.memory_space<vmem>>, vector<1x2x1xf32>
    %232 = vector.shape_cast %231 : vector<1x2x1xf32> to vector<2x1xf32>
    %233 = vector.shape_cast %228 : vector<2x1xf32> to vector<1x2x1xf32>
    tpu.vector_store %arg8[%230, %c0_59, %c0_60], %233 {strides = array<i32>} : memref<8x2x1xf32, #tpu.memory_space<vmem>>, vector<1x2x1xf32>,
    %c2_i32 = arith.constant 2 : i32
    %c8_i32_61 = arith.constant 8 : i32
    %234 = arith.muli %arg0, %c8_i32_61 : i32
    %235 = arith.addi %234, %c2_i32 : i32
    %c7_i32_62 = arith.constant 7 : i32
    %236 = arith.subi %c7_i32_62, %235 : i32
    %237 = arith.truncf %199 : vector<2x32xf32> to vector<2x32xbf16>
    %cst_63 = arith.constant dense<0.000000e+00> : vector<2x128xf32>
    %238 = tpu.matmul %237, %4, %cst_63 {dimension_numbers = #tpu.dot_dimension_numbers<[1], [0], [0], [1], [0, 0, 1, 1], [], []>} : vector<2x32xbf16>, vector<32x128xbf16>, vector<2x128xf32> -> vector<2x128xf32>
    %239 = arith.index_cast %c2_i32 : i32 to index
    %c0_64 = arith.constant 0 : index
    %c0_65 = arith.constant 0 : index
    %240 = vector.load %arg2[%239, %c0_64, %c0_65] : memref<8x2x128xf32, #tpu.memory_space<vmem>>, vector<1x2x128xf32>
    %241 = vector.shape_cast %240 : vector<1x2x128xf32> to vector<2x128xf32>
    %242 = arith.addf %238, %241 : vector<2x128xf32>
    %243 = arith.truncf %205 : vector<2x32xf32> to vector<2x32xbf16>
    %cst_66 = arith.constant dense<0.000000e+00> : vector<2x128xf32>
    %244 = tpu.matmul %243, %5, %cst_66 {dimension_numbers = #tpu.dot_dimension_numbers<[1], [0], [0], [1], [0, 0, 1, 1], [], []>} : vector<2x32xbf16>, vector<32x128xbf16>, vector<2x128xf32> -> vector<2x128xf32>
    %c7_i32_67 = arith.constant 7 : i32
    %245 = arith.subi %c7_i32_67, %c2_i32 : i32
    %246 = arith.index_cast %245 : i32 to index
    %c0_68 = arith.constant 0 : index
    %c0_69 = arith.constant 0 : index
    %247 = vector.load %arg3[%246, %c0_68, %c0_69] : memref<8x2x128xf32, #tpu.memory_space<vmem>>, vector<1x2x128xf32>
    %248 = vector.shape_cast %247 : vector<1x2x128xf32> to vector<2x128xf32>
    %249 = arith.addf %244, %248 : vector<2x128xf32>
    %250 = vector.extract_strided_slice %242 {offsets = [0, 0], sizes = [2, 32], strides = [1, 1]} : vector<2x128xf32> to vector<2x32xf32>
    %251 = arith.negf %250 : vector<2x32xf32>
    %252 = math.exp %251 : vector<2x32xf32>
    %cst_70 = arith.constant 1.000000e+00 : f32
    %253 = vector.broadcast %cst_70 : f32 to vector<2x32xf32>
    %254 = arith.addf %253, %252 : vector<2x32xf32>
    %255 = arith.divf %253, %254 : vector<2x32xf32>
    %256 = vector.extract_strided_slice %242 {offsets = [0, 32], sizes = [2, 32], strides = [1, 1]} : vector<2x128xf32> to vector<2x32xf32>
    %257 = arith.negf %256 : vector<2x32xf32>
    %258 = math.exp %257 : vector<2x32xf32>
    %cst_71 = arith.constant 1.000000e+00 : f32
    %259 = vector.broadcast %cst_71 : f32 to vector<2x32xf32>
    %260 = arith.addf %259, %258 : vector<2x32xf32>
    %261 = arith.divf %259, %260 : vector<2x32xf32>
    %262 = vector.extract_strided_slice %242 {offsets = [0, 64], sizes = [2, 32], strides = [1, 1]} : vector<2x128xf32> to vector<2x32xf32>
    %263 = math.tanh %262 : vector<2x32xf32>
    %264 = vector.extract_strided_slice %242 {offsets = [0, 96], sizes = [2, 32], strides = [1, 1]} : vector<2x128xf32> to vector<2x32xf32>
    %265 = arith.negf %264 : vector<2x32xf32>
    %266 = math.exp %265 : vector<2x32xf32>
    %cst_72 = arith.constant 1.000000e+00 : f32
    %267 = vector.broadcast %cst_72 : f32 to vector<2x32xf32>
    %268 = arith.addf %267, %266 : vector<2x32xf32>
    %269 = arith.divf %267, %268 : vector<2x32xf32>
    %270 = arith.mulf %261, %202 : vector<2x32xf32>
    %271 = arith.mulf %255, %263 : vector<2x32xf32>
    %272 = arith.addf %270, %271 : vector<2x32xf32>
    %273 = math.tanh %272 : vector<2x32xf32>
    %274 = arith.mulf %269, %273 : vector<2x32xf32>
    %275 = vector.extract_strided_slice %249 {offsets = [0, 0], sizes = [2, 32], strides = [1, 1]} : vector<2x128xf32> to vector<2x32xf32>
    %276 = arith.negf %275 : vector<2x32xf32>
    %277 = math.exp %276 : vector<2x32xf32>
    %cst_73 = arith.constant 1.000000e+00 : f32
    %278 = vector.broadcast %cst_73 : f32 to vector<2x32xf32>
    %279 = arith.addf %278, %277 : vector<2x32xf32>
    %280 = arith.divf %278, %279 : vector<2x32xf32>
    %281 = vector.extract_strided_slice %249 {offsets = [0, 32], sizes = [2, 32], strides = [1, 1]} : vector<2x128xf32> to vector<2x32xf32>
    %282 = arith.negf %281 : vector<2x32xf32>
    %283 = math.exp %282 : vector<2x32xf32>
    %cst_74 = arith.constant 1.000000e+00 : f32
    %284 = vector.broadcast %cst_74 : f32 to vector<2x32xf32>
    %285 = arith.addf %284, %283 : vector<2x32xf32>
    %286 = arith.divf %284, %285 : vector<2x32xf32>
    %287 = vector.extract_strided_slice %249 {offsets = [0, 64], sizes = [2, 32], strides = [1, 1]} : vector<2x128xf32> to vector<2x32xf32>
    %288 = math.tanh %287 : vector<2x32xf32>
    %289 = vector.extract_strided_slice %249 {offsets = [0, 96], sizes = [2, 32], strides = [1, 1]} : vector<2x128xf32> to vector<2x32xf32>
    %290 = arith.negf %289 : vector<2x32xf32>
    %291 = math.exp %290 : vector<2x32xf32>
    %cst_75 = arith.constant 1.000000e+00 : f32
    %292 = vector.broadcast %cst_75 : f32 to vector<2x32xf32>
    %293 = arith.addf %292, %291 : vector<2x32xf32>
    %294 = arith.divf %292, %293 : vector<2x32xf32>
    %295 = arith.mulf %286, %208 : vector<2x32xf32>
    %296 = arith.mulf %280, %288 : vector<2x32xf32>
    %297 = arith.addf %295, %296 : vector<2x32xf32>
    %298 = math.tanh %297 : vector<2x32xf32>
    %299 = arith.mulf %294, %298 : vector<2x32xf32>
    %300 = arith.index_cast %235 : i32 to index
    %301 = memref.load %arg1[%300] : memref<8xi32, #tpu.memory_space<smem>>
    %302 = vector.broadcast %301 : i32 to vector<2x1xi32>
    %303 = arith.cmpi slt, %3, %302 : vector<2x1xi32>
    %304 = arith.index_cast %236 : i32 to index
    %305 = memref.load %arg1[%304] : memref<8xi32, #tpu.memory_space<smem>>
    %306 = vector.broadcast %305 : i32 to vector<2x1xi32>
    %307 = arith.cmpi slt, %3, %306 : vector<2x1xi32>
    %308 = vector.shape_cast %303 : vector<2x1xi1> to vector<2x1xi1>
    %309 = vector.broadcast %308 : vector<2x1xi1> to vector<2x32xi1>
    %310 = arith.select %309, %274, %199 : vector<2x32xi1>, vector<2x32xf32>
    %311 = vector.shape_cast %303 : vector<2x1xi1> to vector<2x1xi1>
    %312 = vector.broadcast %311 : vector<2x1xi1> to vector<2x32xi1>
    %313 = arith.select %312, %272, %202 : vector<2x32xi1>, vector<2x32xf32>
    %314 = vector.shape_cast %307 : vector<2x1xi1> to vector<2x1xi1>
    %315 = vector.broadcast %314 : vector<2x1xi1> to vector<2x32xi1>
    %316 = arith.select %315, %299, %205 : vector<2x32xi1>, vector<2x32xf32>
    %317 = vector.shape_cast %307 : vector<2x1xi1> to vector<2x1xi1>
    %318 = vector.broadcast %317 : vector<2x1xi1> to vector<2x32xi1>
    %319 = arith.select %318, %297, %208 : vector<2x32xi1>, vector<2x32xf32>
    %cst_76 = arith.constant 0.000000e+00 : f32
    %320 = vector.shape_cast %303 : vector<2x1xi1> to vector<2x1xi1>
    %321 = vector.broadcast %320 : vector<2x1xi1> to vector<2x32xi1>
    %322 = vector.broadcast %cst_76 : f32 to vector<2x32xf32>
    %323 = arith.select %321, %274, %322 : vector<2x32xi1>, vector<2x32xf32>
    %cst_77 = arith.constant 0.000000e+00 : f32
    %324 = vector.shape_cast %307 : vector<2x1xi1> to vector<2x1xi1>
    %325 = vector.broadcast %324 : vector<2x1xi1> to vector<2x32xi1>
    %326 = vector.broadcast %cst_77 : f32 to vector<2x32xf32>
    %327 = arith.select %325, %299, %326 : vector<2x32xi1>, vector<2x32xf32>
    %328 = vector.broadcast %6 : vector<1x32xf32> to vector<2x32xf32>
    %329 = arith.mulf %323, %328 : vector<2x32xf32>
    %cst_78 = arith.constant dense<0.000000e+00> : vector<2xf32>
    %330 = vector.multi_reduction <add>, %329, %cst_78 [1] : vector<2x32xf32> to vector<2xf32>
    %331 = vector.shape_cast %330 : vector<2xf32> to vector<2x1xf32>
    %332 = arith.index_cast %c2_i32 : i32 to index
    %c0_79 = arith.constant 0 : index
    %c0_80 = arith.constant 0 : index
    %333 = vector.load %arg7[%332, %c0_79, %c0_80] : memref<8x2x1xf32, #tpu.memory_space<vmem>>, vector<1x2x1xf32>
    %334 = vector.shape_cast %333 : vector<1x2x1xf32> to vector<2x1xf32>
    %335 = vector.shape_cast %331 : vector<2x1xf32> to vector<1x2x1xf32>
    tpu.vector_store %arg7[%332, %c0_79, %c0_80], %335 {strides = array<i32>} : memref<8x2x1xf32, #tpu.memory_space<vmem>>, vector<1x2x1xf32>,
    %336 = vector.broadcast %7 : vector<1x32xf32> to vector<2x32xf32>
    %337 = arith.mulf %327, %336 : vector<2x32xf32>
    %cst_81 = arith.constant dense<0.000000e+00> : vector<2xf32>
    %338 = vector.multi_reduction <add>, %337, %cst_81 [1] : vector<2x32xf32> to vector<2xf32>
    %339 = vector.shape_cast %338 : vector<2xf32> to vector<2x1xf32>
    %c7_i32_82 = arith.constant 7 : i32
    %340 = arith.subi %c7_i32_82, %c2_i32 : i32
    %341 = arith.index_cast %340 : i32 to index
    %c0_83 = arith.constant 0 : index
    %c0_84 = arith.constant 0 : index
    %342 = vector.load %arg8[%341, %c0_83, %c0_84] : memref<8x2x1xf32, #tpu.memory_space<vmem>>, vector<1x2x1xf32>
    %343 = vector.shape_cast %342 : vector<1x2x1xf32> to vector<2x1xf32>
    %344 = vector.shape_cast %339 : vector<2x1xf32> to vector<1x2x1xf32>
    tpu.vector_store %arg8[%341, %c0_83, %c0_84], %344 {strides = array<i32>} : memref<8x2x1xf32, #tpu.memory_space<vmem>>, vector<1x2x1xf32>,
    %c3_i32 = arith.constant 3 : i32
    %c8_i32_85 = arith.constant 8 : i32
    %345 = arith.muli %arg0, %c8_i32_85 : i32
    %346 = arith.addi %345, %c3_i32 : i32
    %c7_i32_86 = arith.constant 7 : i32
    %347 = arith.subi %c7_i32_86, %346 : i32
    %348 = arith.truncf %310 : vector<2x32xf32> to vector<2x32xbf16>
    %cst_87 = arith.constant dense<0.000000e+00> : vector<2x128xf32>
    %349 = tpu.matmul %348, %4, %cst_87 {dimension_numbers = #tpu.dot_dimension_numbers<[1], [0], [0], [1], [0, 0, 1, 1], [], []>} : vector<2x32xbf16>, vector<32x128xbf16>, vector<2x128xf32> -> vector<2x128xf32>
    %350 = arith.index_cast %c3_i32 : i32 to index
    %c0_88 = arith.constant 0 : index
    %c0_89 = arith.constant 0 : index
    %351 = vector.load %arg2[%350, %c0_88, %c0_89] : memref<8x2x128xf32, #tpu.memory_space<vmem>>, vector<1x2x128xf32>
    %352 = vector.shape_cast %351 : vector<1x2x128xf32> to vector<2x128xf32>
    %353 = arith.addf %349, %352 : vector<2x128xf32>
    %354 = arith.truncf %316 : vector<2x32xf32> to vector<2x32xbf16>
    %cst_90 = arith.constant dense<0.000000e+00> : vector<2x128xf32>
    %355 = tpu.matmul %354, %5, %cst_90 {dimension_numbers = #tpu.dot_dimension_numbers<[1], [0], [0], [1], [0, 0, 1, 1], [], []>} : vector<2x32xbf16>, vector<32x128xbf16>, vector<2x128xf32> -> vector<2x128xf32>
    %c7_i32_91 = arith.constant 7 : i32
    %356 = arith.subi %c7_i32_91, %c3_i32 : i32
    %357 = arith.index_cast %356 : i32 to index
    %c0_92 = arith.constant 0 : index
    %c0_93 = arith.constant 0 : index
    %358 = vector.load %arg3[%357, %c0_92, %c0_93] : memref<8x2x128xf32, #tpu.memory_space<vmem>>, vector<1x2x128xf32>
    %359 = vector.shape_cast %358 : vector<1x2x128xf32> to vector<2x128xf32>
    %360 = arith.addf %355, %359 : vector<2x128xf32>
    %361 = vector.extract_strided_slice %353 {offsets = [0, 0], sizes = [2, 32], strides = [1, 1]} : vector<2x128xf32> to vector<2x32xf32>
    %362 = arith.negf %361 : vector<2x32xf32>
    %363 = math.exp %362 : vector<2x32xf32>
    %cst_94 = arith.constant 1.000000e+00 : f32
    %364 = vector.broadcast %cst_94 : f32 to vector<2x32xf32>
    %365 = arith.addf %364, %363 : vector<2x32xf32>
    %366 = arith.divf %364, %365 : vector<2x32xf32>
    %367 = vector.extract_strided_slice %353 {offsets = [0, 32], sizes = [2, 32], strides = [1, 1]} : vector<2x128xf32> to vector<2x32xf32>
    %368 = arith.negf %367 : vector<2x32xf32>
    %369 = math.exp %368 : vector<2x32xf32>
    %cst_95 = arith.constant 1.000000e+00 : f32
    %370 = vector.broadcast %cst_95 : f32 to vector<2x32xf32>
    %371 = arith.addf %370, %369 : vector<2x32xf32>
    %372 = arith.divf %370, %371 : vector<2x32xf32>
    %373 = vector.extract_strided_slice %353 {offsets = [0, 64], sizes = [2, 32], strides = [1, 1]} : vector<2x128xf32> to vector<2x32xf32>
    %374 = math.tanh %373 : vector<2x32xf32>
    %375 = vector.extract_strided_slice %353 {offsets = [0, 96], sizes = [2, 32], strides = [1, 1]} : vector<2x128xf32> to vector<2x32xf32>
    %376 = arith.negf %375 : vector<2x32xf32>
    %377 = math.exp %376 : vector<2x32xf32>
    %cst_96 = arith.constant 1.000000e+00 : f32
    %378 = vector.broadcast %cst_96 : f32 to vector<2x32xf32>
    %379 = arith.addf %378, %377 : vector<2x32xf32>
    %380 = arith.divf %378, %379 : vector<2x32xf32>
    %381 = arith.mulf %372, %313 : vector<2x32xf32>
    %382 = arith.mulf %366, %374 : vector<2x32xf32>
    %383 = arith.addf %381, %382 : vector<2x32xf32>
    %384 = math.tanh %383 : vector<2x32xf32>
    %385 = arith.mulf %380, %384 : vector<2x32xf32>
    %386 = vector.extract_strided_slice %360 {offsets = [0, 0], sizes = [2, 32], strides = [1, 1]} : vector<2x128xf32> to vector<2x32xf32>
    %387 = arith.negf %386 : vector<2x32xf32>
    %388 = math.exp %387 : vector<2x32xf32>
    %cst_97 = arith.constant 1.000000e+00 : f32
    %389 = vector.broadcast %cst_97 : f32 to vector<2x32xf32>
    %390 = arith.addf %389, %388 : vector<2x32xf32>
    %391 = arith.divf %389, %390 : vector<2x32xf32>
    %392 = vector.extract_strided_slice %360 {offsets = [0, 32], sizes = [2, 32], strides = [1, 1]} : vector<2x128xf32> to vector<2x32xf32>
    %393 = arith.negf %392 : vector<2x32xf32>
    %394 = math.exp %393 : vector<2x32xf32>
    %cst_98 = arith.constant 1.000000e+00 : f32
    %395 = vector.broadcast %cst_98 : f32 to vector<2x32xf32>
    %396 = arith.addf %395, %394 : vector<2x32xf32>
    %397 = arith.divf %395, %396 : vector<2x32xf32>
    %398 = vector.extract_strided_slice %360 {offsets = [0, 64], sizes = [2, 32], strides = [1, 1]} : vector<2x128xf32> to vector<2x32xf32>
    %399 = math.tanh %398 : vector<2x32xf32>
    %400 = vector.extract_strided_slice %360 {offsets = [0, 96], sizes = [2, 32], strides = [1, 1]} : vector<2x128xf32> to vector<2x32xf32>
    %401 = arith.negf %400 : vector<2x32xf32>
    %402 = math.exp %401 : vector<2x32xf32>
    %cst_99 = arith.constant 1.000000e+00 : f32
    %403 = vector.broadcast %cst_99 : f32 to vector<2x32xf32>
    %404 = arith.addf %403, %402 : vector<2x32xf32>
    %405 = arith.divf %403, %404 : vector<2x32xf32>
    %406 = arith.mulf %397, %319 : vector<2x32xf32>
    %407 = arith.mulf %391, %399 : vector<2x32xf32>
    %408 = arith.addf %406, %407 : vector<2x32xf32>
    %409 = math.tanh %408 : vector<2x32xf32>
    %410 = arith.mulf %405, %409 : vector<2x32xf32>
    %411 = arith.index_cast %346 : i32 to index
    %412 = memref.load %arg1[%411] : memref<8xi32, #tpu.memory_space<smem>>
    %413 = vector.broadcast %412 : i32 to vector<2x1xi32>
    %414 = arith.cmpi slt, %3, %413 : vector<2x1xi32>
    %415 = arith.index_cast %347 : i32 to index
    %416 = memref.load %arg1[%415] : memref<8xi32, #tpu.memory_space<smem>>
    %417 = vector.broadcast %416 : i32 to vector<2x1xi32>
    %418 = arith.cmpi slt, %3, %417 : vector<2x1xi32>
    %419 = vector.shape_cast %414 : vector<2x1xi1> to vector<2x1xi1>
    %420 = vector.broadcast %419 : vector<2x1xi1> to vector<2x32xi1>
    %421 = arith.select %420, %385, %310 : vector<2x32xi1>, vector<2x32xf32>
    %422 = vector.shape_cast %414 : vector<2x1xi1> to vector<2x1xi1>
    %423 = vector.broadcast %422 : vector<2x1xi1> to vector<2x32xi1>
    %424 = arith.select %423, %383, %313 : vector<2x32xi1>, vector<2x32xf32>
    %425 = vector.shape_cast %418 : vector<2x1xi1> to vector<2x1xi1>
    %426 = vector.broadcast %425 : vector<2x1xi1> to vector<2x32xi1>
    %427 = arith.select %426, %410, %316 : vector<2x32xi1>, vector<2x32xf32>
    %428 = vector.shape_cast %418 : vector<2x1xi1> to vector<2x1xi1>
    %429 = vector.broadcast %428 : vector<2x1xi1> to vector<2x32xi1>
    %430 = arith.select %429, %408, %319 : vector<2x32xi1>, vector<2x32xf32>
    %cst_100 = arith.constant 0.000000e+00 : f32
    %431 = vector.shape_cast %414 : vector<2x1xi1> to vector<2x1xi1>
    %432 = vector.broadcast %431 : vector<2x1xi1> to vector<2x32xi1>
    %433 = vector.broadcast %cst_100 : f32 to vector<2x32xf32>
    %434 = arith.select %432, %385, %433 : vector<2x32xi1>, vector<2x32xf32>
    %cst_101 = arith.constant 0.000000e+00 : f32
    %435 = vector.shape_cast %418 : vector<2x1xi1> to vector<2x1xi1>
    %436 = vector.broadcast %435 : vector<2x1xi1> to vector<2x32xi1>
    %437 = vector.broadcast %cst_101 : f32 to vector<2x32xf32>
    %438 = arith.select %436, %410, %437 : vector<2x32xi1>, vector<2x32xf32>
    %439 = vector.broadcast %6 : vector<1x32xf32> to vector<2x32xf32>
    %440 = arith.mulf %434, %439 : vector<2x32xf32>
    %cst_102 = arith.constant dense<0.000000e+00> : vector<2xf32>
    %441 = vector.multi_reduction <add>, %440, %cst_102 [1] : vector<2x32xf32> to vector<2xf32>
    %442 = vector.shape_cast %441 : vector<2xf32> to vector<2x1xf32>
    %443 = arith.index_cast %c3_i32 : i32 to index
    %c0_103 = arith.constant 0 : index
    %c0_104 = arith.constant 0 : index
    %444 = vector.load %arg7[%443, %c0_103, %c0_104] : memref<8x2x1xf32, #tpu.memory_space<vmem>>, vector<1x2x1xf32>
    %445 = vector.shape_cast %444 : vector<1x2x1xf32> to vector<2x1xf32>
    %446 = vector.shape_cast %442 : vector<2x1xf32> to vector<1x2x1xf32>
    tpu.vector_store %arg7[%443, %c0_103, %c0_104], %446 {strides = array<i32>} : memref<8x2x1xf32, #tpu.memory_space<vmem>>, vector<1x2x1xf32>,
    %447 = vector.broadcast %7 : vector<1x32xf32> to vector<2x32xf32>
    %448 = arith.mulf %438, %447 : vector<2x32xf32>
    %cst_105 = arith.constant dense<0.000000e+00> : vector<2xf32>
    %449 = vector.multi_reduction <add>, %448, %cst_105 [1] : vector<2x32xf32> to vector<2xf32>
    %450 = vector.shape_cast %449 : vector<2xf32> to vector<2x1xf32>
    %c7_i32_106 = arith.constant 7 : i32
    %451 = arith.subi %c7_i32_106, %c3_i32 : i32
    %452 = arith.index_cast %451 : i32 to index
    %c0_107 = arith.constant 0 : index
    %c0_108 = arith.constant 0 : index
    %453 = vector.load %arg8[%452, %c0_107, %c0_108] : memref<8x2x1xf32, #tpu.memory_space<vmem>>, vector<1x2x1xf32>
    %454 = vector.shape_cast %453 : vector<1x2x1xf32> to vector<2x1xf32>
    %455 = vector.shape_cast %450 : vector<2x1xf32> to vector<1x2x1xf32>
    tpu.vector_store %arg8[%452, %c0_107, %c0_108], %455 {strides = array<i32>} : memref<8x2x1xf32, #tpu.memory_space<vmem>>, vector<1x2x1xf32>,
    %c4_i32 = arith.constant 4 : i32
    %c8_i32_109 = arith.constant 8 : i32
    %456 = arith.muli %arg0, %c8_i32_109 : i32
    %457 = arith.addi %456, %c4_i32 : i32
    %c7_i32_110 = arith.constant 7 : i32
    %458 = arith.subi %c7_i32_110, %457 : i32
    %459 = arith.truncf %421 : vector<2x32xf32> to vector<2x32xbf16>
    %cst_111 = arith.constant dense<0.000000e+00> : vector<2x128xf32>
    %460 = tpu.matmul %459, %4, %cst_111 {dimension_numbers = #tpu.dot_dimension_numbers<[1], [0], [0], [1], [0, 0, 1, 1], [], []>} : vector<2x32xbf16>, vector<32x128xbf16>, vector<2x128xf32> -> vector<2x128xf32>
    %461 = arith.index_cast %c4_i32 : i32 to index
    %c0_112 = arith.constant 0 : index
    %c0_113 = arith.constant 0 : index
    %462 = vector.load %arg2[%461, %c0_112, %c0_113] : memref<8x2x128xf32, #tpu.memory_space<vmem>>, vector<1x2x128xf32>
    %463 = vector.shape_cast %462 : vector<1x2x128xf32> to vector<2x128xf32>
    %464 = arith.addf %460, %463 : vector<2x128xf32>
    %465 = arith.truncf %427 : vector<2x32xf32> to vector<2x32xbf16>
    %cst_114 = arith.constant dense<0.000000e+00> : vector<2x128xf32>
    %466 = tpu.matmul %465, %5, %cst_114 {dimension_numbers = #tpu.dot_dimension_numbers<[1], [0], [0], [1], [0, 0, 1, 1], [], []>} : vector<2x32xbf16>, vector<32x128xbf16>, vector<2x128xf32> -> vector<2x128xf32>
    %c7_i32_115 = arith.constant 7 : i32
    %467 = arith.subi %c7_i32_115, %c4_i32 : i32
    %468 = arith.index_cast %467 : i32 to index
    %c0_116 = arith.constant 0 : index
    %c0_117 = arith.constant 0 : index
    %469 = vector.load %arg3[%468, %c0_116, %c0_117] : memref<8x2x128xf32, #tpu.memory_space<vmem>>, vector<1x2x128xf32>
    %470 = vector.shape_cast %469 : vector<1x2x128xf32> to vector<2x128xf32>
    %471 = arith.addf %466, %470 : vector<2x128xf32>
    %472 = vector.extract_strided_slice %464 {offsets = [0, 0], sizes = [2, 32], strides = [1, 1]} : vector<2x128xf32> to vector<2x32xf32>
    %473 = arith.negf %472 : vector<2x32xf32>
    %474 = math.exp %473 : vector<2x32xf32>
    %cst_118 = arith.constant 1.000000e+00 : f32
    %475 = vector.broadcast %cst_118 : f32 to vector<2x32xf32>
    %476 = arith.addf %475, %474 : vector<2x32xf32>
    %477 = arith.divf %475, %476 : vector<2x32xf32>
    %478 = vector.extract_strided_slice %464 {offsets = [0, 32], sizes = [2, 32], strides = [1, 1]} : vector<2x128xf32> to vector<2x32xf32>
    %479 = arith.negf %478 : vector<2x32xf32>
    %480 = math.exp %479 : vector<2x32xf32>
    %cst_119 = arith.constant 1.000000e+00 : f32
    %481 = vector.broadcast %cst_119 : f32 to vector<2x32xf32>
    %482 = arith.addf %481, %480 : vector<2x32xf32>
    %483 = arith.divf %481, %482 : vector<2x32xf32>
    %484 = vector.extract_strided_slice %464 {offsets = [0, 64], sizes = [2, 32], strides = [1, 1]} : vector<2x128xf32> to vector<2x32xf32>
    %485 = math.tanh %484 : vector<2x32xf32>
    %486 = vector.extract_strided_slice %464 {offsets = [0, 96], sizes = [2, 32], strides = [1, 1]} : vector<2x128xf32> to vector<2x32xf32>
    %487 = arith.negf %486 : vector<2x32xf32>
    %488 = math.exp %487 : vector<2x32xf32>
    %cst_120 = arith.constant 1.000000e+00 : f32
    %489 = vector.broadcast %cst_120 : f32 to vector<2x32xf32>
    %490 = arith.addf %489, %488 : vector<2x32xf32>
    %491 = arith.divf %489, %490 : vector<2x32xf32>
    %492 = arith.mulf %483, %424 : vector<2x32xf32>
    %493 = arith.mulf %477, %485 : vector<2x32xf32>
    %494 = arith.addf %492, %493 : vector<2x32xf32>
    %495 = math.tanh %494 : vector<2x32xf32>
    %496 = arith.mulf %491, %495 : vector<2x32xf32>
    %497 = vector.extract_strided_slice %471 {offsets = [0, 0], sizes = [2, 32], strides = [1, 1]} : vector<2x128xf32> to vector<2x32xf32>
    %498 = arith.negf %497 : vector<2x32xf32>
    %499 = math.exp %498 : vector<2x32xf32>
    %cst_121 = arith.constant 1.000000e+00 : f32
    %500 = vector.broadcast %cst_121 : f32 to vector<2x32xf32>
    %501 = arith.addf %500, %499 : vector<2x32xf32>
    %502 = arith.divf %500, %501 : vector<2x32xf32>
    %503 = vector.extract_strided_slice %471 {offsets = [0, 32], sizes = [2, 32], strides = [1, 1]} : vector<2x128xf32> to vector<2x32xf32>
    %504 = arith.negf %503 : vector<2x32xf32>
    %505 = math.exp %504 : vector<2x32xf32>
    %cst_122 = arith.constant 1.000000e+00 : f32
    %506 = vector.broadcast %cst_122 : f32 to vector<2x32xf32>
    %507 = arith.addf %506, %505 : vector<2x32xf32>
    %508 = arith.divf %506, %507 : vector<2x32xf32>
    %509 = vector.extract_strided_slice %471 {offsets = [0, 64], sizes = [2, 32], strides = [1, 1]} : vector<2x128xf32> to vector<2x32xf32>
    %510 = math.tanh %509 : vector<2x32xf32>
    %511 = vector.extract_strided_slice %471 {offsets = [0, 96], sizes = [2, 32], strides = [1, 1]} : vector<2x128xf32> to vector<2x32xf32>
    %512 = arith.negf %511 : vector<2x32xf32>
    %513 = math.exp %512 : vector<2x32xf32>
    %cst_123 = arith.constant 1.000000e+00 : f32
    %514 = vector.broadcast %cst_123 : f32 to vector<2x32xf32>
    %515 = arith.addf %514, %513 : vector<2x32xf32>
    %516 = arith.divf %514, %515 : vector<2x32xf32>
    %517 = arith.mulf %508, %430 : vector<2x32xf32>
    %518 = arith.mulf %502, %510 : vector<2x32xf32>
    %519 = arith.addf %517, %518 : vector<2x32xf32>
    %520 = math.tanh %519 : vector<2x32xf32>
    %521 = arith.mulf %516, %520 : vector<2x32xf32>
    %522 = arith.index_cast %457 : i32 to index
    %523 = memref.load %arg1[%522] : memref<8xi32, #tpu.memory_space<smem>>
    %524 = vector.broadcast %523 : i32 to vector<2x1xi32>
    %525 = arith.cmpi slt, %3, %524 : vector<2x1xi32>
    %526 = arith.index_cast %458 : i32 to index
    %527 = memref.load %arg1[%526] : memref<8xi32, #tpu.memory_space<smem>>
    %528 = vector.broadcast %527 : i32 to vector<2x1xi32>
    %529 = arith.cmpi slt, %3, %528 : vector<2x1xi32>
    %530 = vector.shape_cast %525 : vector<2x1xi1> to vector<2x1xi1>
    %531 = vector.broadcast %530 : vector<2x1xi1> to vector<2x32xi1>
    %532 = arith.select %531, %496, %421 : vector<2x32xi1>, vector<2x32xf32>
    %533 = vector.shape_cast %525 : vector<2x1xi1> to vector<2x1xi1>
    %534 = vector.broadcast %533 : vector<2x1xi1> to vector<2x32xi1>
    %535 = arith.select %534, %494, %424 : vector<2x32xi1>, vector<2x32xf32>
    %536 = vector.shape_cast %529 : vector<2x1xi1> to vector<2x1xi1>
    %537 = vector.broadcast %536 : vector<2x1xi1> to vector<2x32xi1>
    %538 = arith.select %537, %521, %427 : vector<2x32xi1>, vector<2x32xf32>
    %539 = vector.shape_cast %529 : vector<2x1xi1> to vector<2x1xi1>
    %540 = vector.broadcast %539 : vector<2x1xi1> to vector<2x32xi1>
    %541 = arith.select %540, %519, %430 : vector<2x32xi1>, vector<2x32xf32>
    %cst_124 = arith.constant 0.000000e+00 : f32
    %542 = vector.shape_cast %525 : vector<2x1xi1> to vector<2x1xi1>
    %543 = vector.broadcast %542 : vector<2x1xi1> to vector<2x32xi1>
    %544 = vector.broadcast %cst_124 : f32 to vector<2x32xf32>
    %545 = arith.select %543, %496, %544 : vector<2x32xi1>, vector<2x32xf32>
    %cst_125 = arith.constant 0.000000e+00 : f32
    %546 = vector.shape_cast %529 : vector<2x1xi1> to vector<2x1xi1>
    %547 = vector.broadcast %546 : vector<2x1xi1> to vector<2x32xi1>
    %548 = vector.broadcast %cst_125 : f32 to vector<2x32xf32>
    %549 = arith.select %547, %521, %548 : vector<2x32xi1>, vector<2x32xf32>
    %550 = vector.broadcast %6 : vector<1x32xf32> to vector<2x32xf32>
    %551 = arith.mulf %545, %550 : vector<2x32xf32>
    %cst_126 = arith.constant dense<0.000000e+00> : vector<2xf32>
    %552 = vector.multi_reduction <add>, %551, %cst_126 [1] : vector<2x32xf32> to vector<2xf32>
    %553 = vector.shape_cast %552 : vector<2xf32> to vector<2x1xf32>
    %554 = arith.index_cast %c4_i32 : i32 to index
    %c0_127 = arith.constant 0 : index
    %c0_128 = arith.constant 0 : index
    %555 = vector.load %arg7[%554, %c0_127, %c0_128] : memref<8x2x1xf32, #tpu.memory_space<vmem>>, vector<1x2x1xf32>
    %556 = vector.shape_cast %555 : vector<1x2x1xf32> to vector<2x1xf32>
    %557 = vector.shape_cast %553 : vector<2x1xf32> to vector<1x2x1xf32>
    tpu.vector_store %arg7[%554, %c0_127, %c0_128], %557 {strides = array<i32>} : memref<8x2x1xf32, #tpu.memory_space<vmem>>, vector<1x2x1xf32>,
    %558 = vector.broadcast %7 : vector<1x32xf32> to vector<2x32xf32>
    %559 = arith.mulf %549, %558 : vector<2x32xf32>
    %cst_129 = arith.constant dense<0.000000e+00> : vector<2xf32>
    %560 = vector.multi_reduction <add>, %559, %cst_129 [1] : vector<2x32xf32> to vector<2xf32>
    %561 = vector.shape_cast %560 : vector<2xf32> to vector<2x1xf32>
    %c7_i32_130 = arith.constant 7 : i32
    %562 = arith.subi %c7_i32_130, %c4_i32 : i32
    %563 = arith.index_cast %562 : i32 to index
    %c0_131 = arith.constant 0 : index
    %c0_132 = arith.constant 0 : index
    %564 = vector.load %arg8[%563, %c0_131, %c0_132] : memref<8x2x1xf32, #tpu.memory_space<vmem>>, vector<1x2x1xf32>
    %565 = vector.shape_cast %564 : vector<1x2x1xf32> to vector<2x1xf32>
    %566 = vector.shape_cast %561 : vector<2x1xf32> to vector<1x2x1xf32>
    tpu.vector_store %arg8[%563, %c0_131, %c0_132], %566 {strides = array<i32>} : memref<8x2x1xf32, #tpu.memory_space<vmem>>, vector<1x2x1xf32>,
    %c5_i32 = arith.constant 5 : i32
    %c8_i32_133 = arith.constant 8 : i32
    %567 = arith.muli %arg0, %c8_i32_133 : i32
    %568 = arith.addi %567, %c5_i32 : i32
    %c7_i32_134 = arith.constant 7 : i32
    %569 = arith.subi %c7_i32_134, %568 : i32
    %570 = arith.truncf %532 : vector<2x32xf32> to vector<2x32xbf16>
    %cst_135 = arith.constant dense<0.000000e+00> : vector<2x128xf32>
    %571 = tpu.matmul %570, %4, %cst_135 {dimension_numbers = #tpu.dot_dimension_numbers<[1], [0], [0], [1], [0, 0, 1, 1], [], []>} : vector<2x32xbf16>, vector<32x128xbf16>, vector<2x128xf32> -> vector<2x128xf32>
    %572 = arith.index_cast %c5_i32 : i32 to index
    %c0_136 = arith.constant 0 : index
    %c0_137 = arith.constant 0 : index
    %573 = vector.load %arg2[%572, %c0_136, %c0_137] : memref<8x2x128xf32, #tpu.memory_space<vmem>>, vector<1x2x128xf32>
    %574 = vector.shape_cast %573 : vector<1x2x128xf32> to vector<2x128xf32>
    %575 = arith.addf %571, %574 : vector<2x128xf32>
    %576 = arith.truncf %538 : vector<2x32xf32> to vector<2x32xbf16>
    %cst_138 = arith.constant dense<0.000000e+00> : vector<2x128xf32>
    %577 = tpu.matmul %576, %5, %cst_138 {dimension_numbers = #tpu.dot_dimension_numbers<[1], [0], [0], [1], [0, 0, 1, 1], [], []>} : vector<2x32xbf16>, vector<32x128xbf16>, vector<2x128xf32> -> vector<2x128xf32>
    %c7_i32_139 = arith.constant 7 : i32
    %578 = arith.subi %c7_i32_139, %c5_i32 : i32
    %579 = arith.index_cast %578 : i32 to index
    %c0_140 = arith.constant 0 : index
    %c0_141 = arith.constant 0 : index
    %580 = vector.load %arg3[%579, %c0_140, %c0_141] : memref<8x2x128xf32, #tpu.memory_space<vmem>>, vector<1x2x128xf32>
    %581 = vector.shape_cast %580 : vector<1x2x128xf32> to vector<2x128xf32>
    %582 = arith.addf %577, %581 : vector<2x128xf32>
    %583 = vector.extract_strided_slice %575 {offsets = [0, 0], sizes = [2, 32], strides = [1, 1]} : vector<2x128xf32> to vector<2x32xf32>
    %584 = arith.negf %583 : vector<2x32xf32>
    %585 = math.exp %584 : vector<2x32xf32>
    %cst_142 = arith.constant 1.000000e+00 : f32
    %586 = vector.broadcast %cst_142 : f32 to vector<2x32xf32>
    %587 = arith.addf %586, %585 : vector<2x32xf32>
    %588 = arith.divf %586, %587 : vector<2x32xf32>
    %589 = vector.extract_strided_slice %575 {offsets = [0, 32], sizes = [2, 32], strides = [1, 1]} : vector<2x128xf32> to vector<2x32xf32>
    %590 = arith.negf %589 : vector<2x32xf32>
    %591 = math.exp %590 : vector<2x32xf32>
    %cst_143 = arith.constant 1.000000e+00 : f32
    %592 = vector.broadcast %cst_143 : f32 to vector<2x32xf32>
    %593 = arith.addf %592, %591 : vector<2x32xf32>
    %594 = arith.divf %592, %593 : vector<2x32xf32>
    %595 = vector.extract_strided_slice %575 {offsets = [0, 64], sizes = [2, 32], strides = [1, 1]} : vector<2x128xf32> to vector<2x32xf32>
    %596 = math.tanh %595 : vector<2x32xf32>
    %597 = vector.extract_strided_slice %575 {offsets = [0, 96], sizes = [2, 32], strides = [1, 1]} : vector<2x128xf32> to vector<2x32xf32>
    %598 = arith.negf %597 : vector<2x32xf32>
    %599 = math.exp %598 : vector<2x32xf32>
    %cst_144 = arith.constant 1.000000e+00 : f32
    %600 = vector.broadcast %cst_144 : f32 to vector<2x32xf32>
    %601 = arith.addf %600, %599 : vector<2x32xf32>
    %602 = arith.divf %600, %601 : vector<2x32xf32>
    %603 = arith.mulf %594, %535 : vector<2x32xf32>
    %604 = arith.mulf %588, %596 : vector<2x32xf32>
    %605 = arith.addf %603, %604 : vector<2x32xf32>
    %606 = math.tanh %605 : vector<2x32xf32>
    %607 = arith.mulf %602, %606 : vector<2x32xf32>
    %608 = vector.extract_strided_slice %582 {offsets = [0, 0], sizes = [2, 32], strides = [1, 1]} : vector<2x128xf32> to vector<2x32xf32>
    %609 = arith.negf %608 : vector<2x32xf32>
    %610 = math.exp %609 : vector<2x32xf32>
    %cst_145 = arith.constant 1.000000e+00 : f32
    %611 = vector.broadcast %cst_145 : f32 to vector<2x32xf32>
    %612 = arith.addf %611, %610 : vector<2x32xf32>
    %613 = arith.divf %611, %612 : vector<2x32xf32>
    %614 = vector.extract_strided_slice %582 {offsets = [0, 32], sizes = [2, 32], strides = [1, 1]} : vector<2x128xf32> to vector<2x32xf32>
    %615 = arith.negf %614 : vector<2x32xf32>
    %616 = math.exp %615 : vector<2x32xf32>
    %cst_146 = arith.constant 1.000000e+00 : f32
    %617 = vector.broadcast %cst_146 : f32 to vector<2x32xf32>
    %618 = arith.addf %617, %616 : vector<2x32xf32>
    %619 = arith.divf %617, %618 : vector<2x32xf32>
    %620 = vector.extract_strided_slice %582 {offsets = [0, 64], sizes = [2, 32], strides = [1, 1]} : vector<2x128xf32> to vector<2x32xf32>
    %621 = math.tanh %620 : vector<2x32xf32>
    %622 = vector.extract_strided_slice %582 {offsets = [0, 96], sizes = [2, 32], strides = [1, 1]} : vector<2x128xf32> to vector<2x32xf32>
    %623 = arith.negf %622 : vector<2x32xf32>
    %624 = math.exp %623 : vector<2x32xf32>
    %cst_147 = arith.constant 1.000000e+00 : f32
    %625 = vector.broadcast %cst_147 : f32 to vector<2x32xf32>
    %626 = arith.addf %625, %624 : vector<2x32xf32>
    %627 = arith.divf %625, %626 : vector<2x32xf32>
    %628 = arith.mulf %619, %541 : vector<2x32xf32>
    %629 = arith.mulf %613, %621 : vector<2x32xf32>
    %630 = arith.addf %628, %629 : vector<2x32xf32>
    %631 = math.tanh %630 : vector<2x32xf32>
    %632 = arith.mulf %627, %631 : vector<2x32xf32>
    %633 = arith.index_cast %568 : i32 to index
    %634 = memref.load %arg1[%633] : memref<8xi32, #tpu.memory_space<smem>>
    %635 = vector.broadcast %634 : i32 to vector<2x1xi32>
    %636 = arith.cmpi slt, %3, %635 : vector<2x1xi32>
    %637 = arith.index_cast %569 : i32 to index
    %638 = memref.load %arg1[%637] : memref<8xi32, #tpu.memory_space<smem>>
    %639 = vector.broadcast %638 : i32 to vector<2x1xi32>
    %640 = arith.cmpi slt, %3, %639 : vector<2x1xi32>
    %641 = vector.shape_cast %636 : vector<2x1xi1> to vector<2x1xi1>
    %642 = vector.broadcast %641 : vector<2x1xi1> to vector<2x32xi1>
    %643 = arith.select %642, %607, %532 : vector<2x32xi1>, vector<2x32xf32>
    %644 = vector.shape_cast %636 : vector<2x1xi1> to vector<2x1xi1>
    %645 = vector.broadcast %644 : vector<2x1xi1> to vector<2x32xi1>
    %646 = arith.select %645, %605, %535 : vector<2x32xi1>, vector<2x32xf32>
    %647 = vector.shape_cast %640 : vector<2x1xi1> to vector<2x1xi1>
    %648 = vector.broadcast %647 : vector<2x1xi1> to vector<2x32xi1>
    %649 = arith.select %648, %632, %538 : vector<2x32xi1>, vector<2x32xf32>
    %650 = vector.shape_cast %640 : vector<2x1xi1> to vector<2x1xi1>
    %651 = vector.broadcast %650 : vector<2x1xi1> to vector<2x32xi1>
    %652 = arith.select %651, %630, %541 : vector<2x32xi1>, vector<2x32xf32>
    %cst_148 = arith.constant 0.000000e+00 : f32
    %653 = vector.shape_cast %636 : vector<2x1xi1> to vector<2x1xi1>
    %654 = vector.broadcast %653 : vector<2x1xi1> to vector<2x32xi1>
    %655 = vector.broadcast %cst_148 : f32 to vector<2x32xf32>
    %656 = arith.select %654, %607, %655 : vector<2x32xi1>, vector<2x32xf32>
    %cst_149 = arith.constant 0.000000e+00 : f32
    %657 = vector.shape_cast %640 : vector<2x1xi1> to vector<2x1xi1>
    %658 = vector.broadcast %657 : vector<2x1xi1> to vector<2x32xi1>
    %659 = vector.broadcast %cst_149 : f32 to vector<2x32xf32>
    %660 = arith.select %658, %632, %659 : vector<2x32xi1>, vector<2x32xf32>
    %661 = vector.broadcast %6 : vector<1x32xf32> to vector<2x32xf32>
    %662 = arith.mulf %656, %661 : vector<2x32xf32>
    %cst_150 = arith.constant dense<0.000000e+00> : vector<2xf32>
    %663 = vector.multi_reduction <add>, %662, %cst_150 [1] : vector<2x32xf32> to vector<2xf32>
    %664 = vector.shape_cast %663 : vector<2xf32> to vector<2x1xf32>
    %665 = arith.index_cast %c5_i32 : i32 to index
    %c0_151 = arith.constant 0 : index
    %c0_152 = arith.constant 0 : index
    %666 = vector.load %arg7[%665, %c0_151, %c0_152] : memref<8x2x1xf32, #tpu.memory_space<vmem>>, vector<1x2x1xf32>
    %667 = vector.shape_cast %666 : vector<1x2x1xf32> to vector<2x1xf32>
    %668 = vector.shape_cast %664 : vector<2x1xf32> to vector<1x2x1xf32>
    tpu.vector_store %arg7[%665, %c0_151, %c0_152], %668 {strides = array<i32>} : memref<8x2x1xf32, #tpu.memory_space<vmem>>, vector<1x2x1xf32>,
    %669 = vector.broadcast %7 : vector<1x32xf32> to vector<2x32xf32>
    %670 = arith.mulf %660, %669 : vector<2x32xf32>
    %cst_153 = arith.constant dense<0.000000e+00> : vector<2xf32>
    %671 = vector.multi_reduction <add>, %670, %cst_153 [1] : vector<2x32xf32> to vector<2xf32>
    %672 = vector.shape_cast %671 : vector<2xf32> to vector<2x1xf32>
    %c7_i32_154 = arith.constant 7 : i32
    %673 = arith.subi %c7_i32_154, %c5_i32 : i32
    %674 = arith.index_cast %673 : i32 to index
    %c0_155 = arith.constant 0 : index
    %c0_156 = arith.constant 0 : index
    %675 = vector.load %arg8[%674, %c0_155, %c0_156] : memref<8x2x1xf32, #tpu.memory_space<vmem>>, vector<1x2x1xf32>
    %676 = vector.shape_cast %675 : vector<1x2x1xf32> to vector<2x1xf32>
    %677 = vector.shape_cast %672 : vector<2x1xf32> to vector<1x2x1xf32>
    tpu.vector_store %arg8[%674, %c0_155, %c0_156], %677 {strides = array<i32>} : memref<8x2x1xf32, #tpu.memory_space<vmem>>, vector<1x2x1xf32>,
    %c6_i32 = arith.constant 6 : i32
    %c8_i32_157 = arith.constant 8 : i32
    %678 = arith.muli %arg0, %c8_i32_157 : i32
    %679 = arith.addi %678, %c6_i32 : i32
    %c7_i32_158 = arith.constant 7 : i32
    %680 = arith.subi %c7_i32_158, %679 : i32
    %681 = arith.truncf %643 : vector<2x32xf32> to vector<2x32xbf16>
    %cst_159 = arith.constant dense<0.000000e+00> : vector<2x128xf32>
    %682 = tpu.matmul %681, %4, %cst_159 {dimension_numbers = #tpu.dot_dimension_numbers<[1], [0], [0], [1], [0, 0, 1, 1], [], []>} : vector<2x32xbf16>, vector<32x128xbf16>, vector<2x128xf32> -> vector<2x128xf32>
    %683 = arith.index_cast %c6_i32 : i32 to index
    %c0_160 = arith.constant 0 : index
    %c0_161 = arith.constant 0 : index
    %684 = vector.load %arg2[%683, %c0_160, %c0_161] : memref<8x2x128xf32, #tpu.memory_space<vmem>>, vector<1x2x128xf32>
    %685 = vector.shape_cast %684 : vector<1x2x128xf32> to vector<2x128xf32>
    %686 = arith.addf %682, %685 : vector<2x128xf32>
    %687 = arith.truncf %649 : vector<2x32xf32> to vector<2x32xbf16>
    %cst_162 = arith.constant dense<0.000000e+00> : vector<2x128xf32>
    %688 = tpu.matmul %687, %5, %cst_162 {dimension_numbers = #tpu.dot_dimension_numbers<[1], [0], [0], [1], [0, 0, 1, 1], [], []>} : vector<2x32xbf16>, vector<32x128xbf16>, vector<2x128xf32> -> vector<2x128xf32>
    %c7_i32_163 = arith.constant 7 : i32
    %689 = arith.subi %c7_i32_163, %c6_i32 : i32
    %690 = arith.index_cast %689 : i32 to index
    %c0_164 = arith.constant 0 : index
    %c0_165 = arith.constant 0 : index
    %691 = vector.load %arg3[%690, %c0_164, %c0_165] : memref<8x2x128xf32, #tpu.memory_space<vmem>>, vector<1x2x128xf32>
    %692 = vector.shape_cast %691 : vector<1x2x128xf32> to vector<2x128xf32>
    %693 = arith.addf %688, %692 : vector<2x128xf32>
    %694 = vector.extract_strided_slice %686 {offsets = [0, 0], sizes = [2, 32], strides = [1, 1]} : vector<2x128xf32> to vector<2x32xf32>
    %695 = arith.negf %694 : vector<2x32xf32>
    %696 = math.exp %695 : vector<2x32xf32>
    %cst_166 = arith.constant 1.000000e+00 : f32
    %697 = vector.broadcast %cst_166 : f32 to vector<2x32xf32>
    %698 = arith.addf %697, %696 : vector<2x32xf32>
    %699 = arith.divf %697, %698 : vector<2x32xf32>
    %700 = vector.extract_strided_slice %686 {offsets = [0, 32], sizes = [2, 32], strides = [1, 1]} : vector<2x128xf32> to vector<2x32xf32>
    %701 = arith.negf %700 : vector<2x32xf32>
    %702 = math.exp %701 : vector<2x32xf32>
    %cst_167 = arith.constant 1.000000e+00 : f32
    %703 = vector.broadcast %cst_167 : f32 to vector<2x32xf32>
    %704 = arith.addf %703, %702 : vector<2x32xf32>
    %705 = arith.divf %703, %704 : vector<2x32xf32>
    %706 = vector.extract_strided_slice %686 {offsets = [0, 64], sizes = [2, 32], strides = [1, 1]} : vector<2x128xf32> to vector<2x32xf32>
    %707 = math.tanh %706 : vector<2x32xf32>
    %708 = vector.extract_strided_slice %686 {offsets = [0, 96], sizes = [2, 32], strides = [1, 1]} : vector<2x128xf32> to vector<2x32xf32>
    %709 = arith.negf %708 : vector<2x32xf32>
    %710 = math.exp %709 : vector<2x32xf32>
    %cst_168 = arith.constant 1.000000e+00 : f32
    %711 = vector.broadcast %cst_168 : f32 to vector<2x32xf32>
    %712 = arith.addf %711, %710 : vector<2x32xf32>
    %713 = arith.divf %711, %712 : vector<2x32xf32>
    %714 = arith.mulf %705, %646 : vector<2x32xf32>
    %715 = arith.mulf %699, %707 : vector<2x32xf32>
    %716 = arith.addf %714, %715 : vector<2x32xf32>
    %717 = math.tanh %716 : vector<2x32xf32>
    %718 = arith.mulf %713, %717 : vector<2x32xf32>
    %719 = vector.extract_strided_slice %693 {offsets = [0, 0], sizes = [2, 32], strides = [1, 1]} : vector<2x128xf32> to vector<2x32xf32>
    %720 = arith.negf %719 : vector<2x32xf32>
    %721 = math.exp %720 : vector<2x32xf32>
    %cst_169 = arith.constant 1.000000e+00 : f32
    %722 = vector.broadcast %cst_169 : f32 to vector<2x32xf32>
    %723 = arith.addf %722, %721 : vector<2x32xf32>
    %724 = arith.divf %722, %723 : vector<2x32xf32>
    %725 = vector.extract_strided_slice %693 {offsets = [0, 32], sizes = [2, 32], strides = [1, 1]} : vector<2x128xf32> to vector<2x32xf32>
    %726 = arith.negf %725 : vector<2x32xf32>
    %727 = math.exp %726 : vector<2x32xf32>
    %cst_170 = arith.constant 1.000000e+00 : f32
    %728 = vector.broadcast %cst_170 : f32 to vector<2x32xf32>
    %729 = arith.addf %728, %727 : vector<2x32xf32>
    %730 = arith.divf %728, %729 : vector<2x32xf32>
    %731 = vector.extract_strided_slice %693 {offsets = [0, 64], sizes = [2, 32], strides = [1, 1]} : vector<2x128xf32> to vector<2x32xf32>
    %732 = math.tanh %731 : vector<2x32xf32>
    %733 = vector.extract_strided_slice %693 {offsets = [0, 96], sizes = [2, 32], strides = [1, 1]} : vector<2x128xf32> to vector<2x32xf32>
    %734 = arith.negf %733 : vector<2x32xf32>
    %735 = math.exp %734 : vector<2x32xf32>
    %cst_171 = arith.constant 1.000000e+00 : f32
    %736 = vector.broadcast %cst_171 : f32 to vector<2x32xf32>
    %737 = arith.addf %736, %735 : vector<2x32xf32>
    %738 = arith.divf %736, %737 : vector<2x32xf32>
    %739 = arith.mulf %730, %652 : vector<2x32xf32>
    %740 = arith.mulf %724, %732 : vector<2x32xf32>
    %741 = arith.addf %739, %740 : vector<2x32xf32>
    %742 = math.tanh %741 : vector<2x32xf32>
    %743 = arith.mulf %738, %742 : vector<2x32xf32>
    %744 = arith.index_cast %679 : i32 to index
    %745 = memref.load %arg1[%744] : memref<8xi32, #tpu.memory_space<smem>>
    %746 = vector.broadcast %745 : i32 to vector<2x1xi32>
    %747 = arith.cmpi slt, %3, %746 : vector<2x1xi32>
    %748 = arith.index_cast %680 : i32 to index
    %749 = memref.load %arg1[%748] : memref<8xi32, #tpu.memory_space<smem>>
    %750 = vector.broadcast %749 : i32 to vector<2x1xi32>
    %751 = arith.cmpi slt, %3, %750 : vector<2x1xi32>
    %752 = vector.shape_cast %747 : vector<2x1xi1> to vector<2x1xi1>
    %753 = vector.broadcast %752 : vector<2x1xi1> to vector<2x32xi1>
    %754 = arith.select %753, %718, %643 : vector<2x32xi1>, vector<2x32xf32>
    %755 = vector.shape_cast %747 : vector<2x1xi1> to vector<2x1xi1>
    %756 = vector.broadcast %755 : vector<2x1xi1> to vector<2x32xi1>
    %757 = arith.select %756, %716, %646 : vector<2x32xi1>, vector<2x32xf32>
    %758 = vector.shape_cast %751 : vector<2x1xi1> to vector<2x1xi1>
    %759 = vector.broadcast %758 : vector<2x1xi1> to vector<2x32xi1>
    %760 = arith.select %759, %743, %649 : vector<2x32xi1>, vector<2x32xf32>
    %761 = vector.shape_cast %751 : vector<2x1xi1> to vector<2x1xi1>
    %762 = vector.broadcast %761 : vector<2x1xi1> to vector<2x32xi1>
    %763 = arith.select %762, %741, %652 : vector<2x32xi1>, vector<2x32xf32>
    %cst_172 = arith.constant 0.000000e+00 : f32
    %764 = vector.shape_cast %747 : vector<2x1xi1> to vector<2x1xi1>
    %765 = vector.broadcast %764 : vector<2x1xi1> to vector<2x32xi1>
    %766 = vector.broadcast %cst_172 : f32 to vector<2x32xf32>
    %767 = arith.select %765, %718, %766 : vector<2x32xi1>, vector<2x32xf32>
    %cst_173 = arith.constant 0.000000e+00 : f32
    %768 = vector.shape_cast %751 : vector<2x1xi1> to vector<2x1xi1>
    %769 = vector.broadcast %768 : vector<2x1xi1> to vector<2x32xi1>
    %770 = vector.broadcast %cst_173 : f32 to vector<2x32xf32>
    %771 = arith.select %769, %743, %770 : vector<2x32xi1>, vector<2x32xf32>
    %772 = vector.broadcast %6 : vector<1x32xf32> to vector<2x32xf32>
    %773 = arith.mulf %767, %772 : vector<2x32xf32>
    %cst_174 = arith.constant dense<0.000000e+00> : vector<2xf32>
    %774 = vector.multi_reduction <add>, %773, %cst_174 [1] : vector<2x32xf32> to vector<2xf32>
    %775 = vector.shape_cast %774 : vector<2xf32> to vector<2x1xf32>
    %776 = arith.index_cast %c6_i32 : i32 to index
    %c0_175 = arith.constant 0 : index
    %c0_176 = arith.constant 0 : index
    %777 = vector.load %arg7[%776, %c0_175, %c0_176] : memref<8x2x1xf32, #tpu.memory_space<vmem>>, vector<1x2x1xf32>
    %778 = vector.shape_cast %777 : vector<1x2x1xf32> to vector<2x1xf32>
    %779 = vector.shape_cast %775 : vector<2x1xf32> to vector<1x2x1xf32>
    tpu.vector_store %arg7[%776, %c0_175, %c0_176], %779 {strides = array<i32>} : memref<8x2x1xf32, #tpu.memory_space<vmem>>, vector<1x2x1xf32>,
    %780 = vector.broadcast %7 : vector<1x32xf32> to vector<2x32xf32>
    %781 = arith.mulf %771, %780 : vector<2x32xf32>
    %cst_177 = arith.constant dense<0.000000e+00> : vector<2xf32>
    %782 = vector.multi_reduction <add>, %781, %cst_177 [1] : vector<2x32xf32> to vector<2xf32>
    %783 = vector.shape_cast %782 : vector<2xf32> to vector<2x1xf32>
    %c7_i32_178 = arith.constant 7 : i32
    %784 = arith.subi %c7_i32_178, %c6_i32 : i32
    %785 = arith.index_cast %784 : i32 to index
    %c0_179 = arith.constant 0 : index
    %c0_180 = arith.constant 0 : index
    %786 = vector.load %arg8[%785, %c0_179, %c0_180] : memref<8x2x1xf32, #tpu.memory_space<vmem>>, vector<1x2x1xf32>
    %787 = vector.shape_cast %786 : vector<1x2x1xf32> to vector<2x1xf32>
    %788 = vector.shape_cast %783 : vector<2x1xf32> to vector<1x2x1xf32>
    tpu.vector_store %arg8[%785, %c0_179, %c0_180], %788 {strides = array<i32>} : memref<8x2x1xf32, #tpu.memory_space<vmem>>, vector<1x2x1xf32>,
    %c7_i32_181 = arith.constant 7 : i32
    %c8_i32_182 = arith.constant 8 : i32
    %789 = arith.muli %arg0, %c8_i32_182 : i32
    %790 = arith.addi %789, %c7_i32_181 : i32
    %c7_i32_183 = arith.constant 7 : i32
    %791 = arith.subi %c7_i32_183, %790 : i32
    %792 = arith.truncf %754 : vector<2x32xf32> to vector<2x32xbf16>
    %cst_184 = arith.constant dense<0.000000e+00> : vector<2x128xf32>
    %793 = tpu.matmul %792, %4, %cst_184 {dimension_numbers = #tpu.dot_dimension_numbers<[1], [0], [0], [1], [0, 0, 1, 1], [], []>} : vector<2x32xbf16>, vector<32x128xbf16>, vector<2x128xf32> -> vector<2x128xf32>
    %794 = arith.index_cast %c7_i32_181 : i32 to index
    %c0_185 = arith.constant 0 : index
    %c0_186 = arith.constant 0 : index
    %795 = vector.load %arg2[%794, %c0_185, %c0_186] : memref<8x2x128xf32, #tpu.memory_space<vmem>>, vector<1x2x128xf32>
    %796 = vector.shape_cast %795 : vector<1x2x128xf32> to vector<2x128xf32>
    %797 = arith.addf %793, %796 : vector<2x128xf32>
    %798 = arith.truncf %760 : vector<2x32xf32> to vector<2x32xbf16>
    %cst_187 = arith.constant dense<0.000000e+00> : vector<2x128xf32>
    %799 = tpu.matmul %798, %5, %cst_187 {dimension_numbers = #tpu.dot_dimension_numbers<[1], [0], [0], [1], [0, 0, 1, 1], [], []>} : vector<2x32xbf16>, vector<32x128xbf16>, vector<2x128xf32> -> vector<2x128xf32>
    %c7_i32_188 = arith.constant 7 : i32
    %800 = arith.subi %c7_i32_188, %c7_i32_181 : i32
    %801 = arith.index_cast %800 : i32 to index
    %c0_189 = arith.constant 0 : index
    %c0_190 = arith.constant 0 : index
    %802 = vector.load %arg3[%801, %c0_189, %c0_190] : memref<8x2x128xf32, #tpu.memory_space<vmem>>, vector<1x2x128xf32>
    %803 = vector.shape_cast %802 : vector<1x2x128xf32> to vector<2x128xf32>
    %804 = arith.addf %799, %803 : vector<2x128xf32>
    %805 = vector.extract_strided_slice %797 {offsets = [0, 0], sizes = [2, 32], strides = [1, 1]} : vector<2x128xf32> to vector<2x32xf32>
    %806 = arith.negf %805 : vector<2x32xf32>
    %807 = math.exp %806 : vector<2x32xf32>
    %cst_191 = arith.constant 1.000000e+00 : f32
    %808 = vector.broadcast %cst_191 : f32 to vector<2x32xf32>
    %809 = arith.addf %808, %807 : vector<2x32xf32>
    %810 = arith.divf %808, %809 : vector<2x32xf32>
    %811 = vector.extract_strided_slice %797 {offsets = [0, 32], sizes = [2, 32], strides = [1, 1]} : vector<2x128xf32> to vector<2x32xf32>
    %812 = arith.negf %811 : vector<2x32xf32>
    %813 = math.exp %812 : vector<2x32xf32>
    %cst_192 = arith.constant 1.000000e+00 : f32
    %814 = vector.broadcast %cst_192 : f32 to vector<2x32xf32>
    %815 = arith.addf %814, %813 : vector<2x32xf32>
    %816 = arith.divf %814, %815 : vector<2x32xf32>
    %817 = vector.extract_strided_slice %797 {offsets = [0, 64], sizes = [2, 32], strides = [1, 1]} : vector<2x128xf32> to vector<2x32xf32>
    %818 = math.tanh %817 : vector<2x32xf32>
    %819 = vector.extract_strided_slice %797 {offsets = [0, 96], sizes = [2, 32], strides = [1, 1]} : vector<2x128xf32> to vector<2x32xf32>
    %820 = arith.negf %819 : vector<2x32xf32>
    %821 = math.exp %820 : vector<2x32xf32>
    %cst_193 = arith.constant 1.000000e+00 : f32
    %822 = vector.broadcast %cst_193 : f32 to vector<2x32xf32>
    %823 = arith.addf %822, %821 : vector<2x32xf32>
    %824 = arith.divf %822, %823 : vector<2x32xf32>
    %825 = arith.mulf %816, %757 : vector<2x32xf32>
    %826 = arith.mulf %810, %818 : vector<2x32xf32>
    %827 = arith.addf %825, %826 : vector<2x32xf32>
    %828 = math.tanh %827 : vector<2x32xf32>
    %829 = arith.mulf %824, %828 : vector<2x32xf32>
    %830 = vector.extract_strided_slice %804 {offsets = [0, 0], sizes = [2, 32], strides = [1, 1]} : vector<2x128xf32> to vector<2x32xf32>
    %831 = arith.negf %830 : vector<2x32xf32>
    %832 = math.exp %831 : vector<2x32xf32>
    %cst_194 = arith.constant 1.000000e+00 : f32
    %833 = vector.broadcast %cst_194 : f32 to vector<2x32xf32>
    %834 = arith.addf %833, %832 : vector<2x32xf32>
    %835 = arith.divf %833, %834 : vector<2x32xf32>
    %836 = vector.extract_strided_slice %804 {offsets = [0, 32], sizes = [2, 32], strides = [1, 1]} : vector<2x128xf32> to vector<2x32xf32>
    %837 = arith.negf %836 : vector<2x32xf32>
    %838 = math.exp %837 : vector<2x32xf32>
    %cst_195 = arith.constant 1.000000e+00 : f32
    %839 = vector.broadcast %cst_195 : f32 to vector<2x32xf32>
    %840 = arith.addf %839, %838 : vector<2x32xf32>
    %841 = arith.divf %839, %840 : vector<2x32xf32>
    %842 = vector.extract_strided_slice %804 {offsets = [0, 64], sizes = [2, 32], strides = [1, 1]} : vector<2x128xf32> to vector<2x32xf32>
    %843 = math.tanh %842 : vector<2x32xf32>
    %844 = vector.extract_strided_slice %804 {offsets = [0, 96], sizes = [2, 32], strides = [1, 1]} : vector<2x128xf32> to vector<2x32xf32>
    %845 = arith.negf %844 : vector<2x32xf32>
    %846 = math.exp %845 : vector<2x32xf32>
    %cst_196 = arith.constant 1.000000e+00 : f32
    %847 = vector.broadcast %cst_196 : f32 to vector<2x32xf32>
    %848 = arith.addf %847, %846 : vector<2x32xf32>
    %849 = arith.divf %847, %848 : vector<2x32xf32>
    %850 = arith.mulf %841, %763 : vector<2x32xf32>
    %851 = arith.mulf %835, %843 : vector<2x32xf32>
    %852 = arith.addf %850, %851 : vector<2x32xf32>
    %853 = math.tanh %852 : vector<2x32xf32>
    %854 = arith.mulf %849, %853 : vector<2x32xf32>
    %855 = arith.index_cast %790 : i32 to index
    %856 = memref.load %arg1[%855] : memref<8xi32, #tpu.memory_space<smem>>
    %857 = vector.broadcast %856 : i32 to vector<2x1xi32>
    %858 = arith.cmpi slt, %3, %857 : vector<2x1xi32>
    %859 = arith.index_cast %791 : i32 to index
    %860 = memref.load %arg1[%859] : memref<8xi32, #tpu.memory_space<smem>>
    %861 = vector.broadcast %860 : i32 to vector<2x1xi32>
    %862 = arith.cmpi slt, %3, %861 : vector<2x1xi32>
    %863 = vector.shape_cast %858 : vector<2x1xi1> to vector<2x1xi1>
    %864 = vector.broadcast %863 : vector<2x1xi1> to vector<2x32xi1>
    %865 = arith.select %864, %829, %754 : vector<2x32xi1>, vector<2x32xf32>
    %866 = vector.shape_cast %858 : vector<2x1xi1> to vector<2x1xi1>
    %867 = vector.broadcast %866 : vector<2x1xi1> to vector<2x32xi1>
    %868 = arith.select %867, %827, %757 : vector<2x32xi1>, vector<2x32xf32>
    %869 = vector.shape_cast %862 : vector<2x1xi1> to vector<2x1xi1>
    %870 = vector.broadcast %869 : vector<2x1xi1> to vector<2x32xi1>
    %871 = arith.select %870, %854, %760 : vector<2x32xi1>, vector<2x32xf32>
    %872 = vector.shape_cast %862 : vector<2x1xi1> to vector<2x1xi1>
    %873 = vector.broadcast %872 : vector<2x1xi1> to vector<2x32xi1>
    %874 = arith.select %873, %852, %763 : vector<2x32xi1>, vector<2x32xf32>
    %cst_197 = arith.constant 0.000000e+00 : f32
    %875 = vector.shape_cast %858 : vector<2x1xi1> to vector<2x1xi1>
    %876 = vector.broadcast %875 : vector<2x1xi1> to vector<2x32xi1>
    %877 = vector.broadcast %cst_197 : f32 to vector<2x32xf32>
    %878 = arith.select %876, %829, %877 : vector<2x32xi1>, vector<2x32xf32>
    %cst_198 = arith.constant 0.000000e+00 : f32
    %879 = vector.shape_cast %862 : vector<2x1xi1> to vector<2x1xi1>
    %880 = vector.broadcast %879 : vector<2x1xi1> to vector<2x32xi1>
    %881 = vector.broadcast %cst_198 : f32 to vector<2x32xf32>
    %882 = arith.select %880, %854, %881 : vector<2x32xi1>, vector<2x32xf32>
    %883 = vector.broadcast %6 : vector<1x32xf32> to vector<2x32xf32>
    %884 = arith.mulf %878, %883 : vector<2x32xf32>
    %cst_199 = arith.constant dense<0.000000e+00> : vector<2xf32>
    %885 = vector.multi_reduction <add>, %884, %cst_199 [1] : vector<2x32xf32> to vector<2xf32>
    %886 = vector.shape_cast %885 : vector<2xf32> to vector<2x1xf32>
    %887 = arith.index_cast %c7_i32_181 : i32 to index
    %c0_200 = arith.constant 0 : index
    %c0_201 = arith.constant 0 : index
    %888 = vector.load %arg7[%887, %c0_200, %c0_201] : memref<8x2x1xf32, #tpu.memory_space<vmem>>, vector<1x2x1xf32>
    %889 = vector.shape_cast %888 : vector<1x2x1xf32> to vector<2x1xf32>
    %890 = vector.shape_cast %886 : vector<2x1xf32> to vector<1x2x1xf32>
    tpu.vector_store %arg7[%887, %c0_200, %c0_201], %890 {strides = array<i32>} : memref<8x2x1xf32, #tpu.memory_space<vmem>>, vector<1x2x1xf32>,
    %891 = vector.broadcast %7 : vector<1x32xf32> to vector<2x32xf32>
    %892 = arith.mulf %882, %891 : vector<2x32xf32>
    %cst_202 = arith.constant dense<0.000000e+00> : vector<2xf32>
    %893 = vector.multi_reduction <add>, %892, %cst_202 [1] : vector<2x32xf32> to vector<2xf32>
    %894 = vector.shape_cast %893 : vector<2xf32> to vector<2x1xf32>
    %c7_i32_203 = arith.constant 7 : i32
    %895 = arith.subi %c7_i32_203, %c7_i32_181 : i32
    %896 = arith.index_cast %895 : i32 to index
    %c0_204 = arith.constant 0 : index
    %c0_205 = arith.constant 0 : index
    %897 = vector.load %arg8[%896, %c0_204, %c0_205] : memref<8x2x1xf32, #tpu.memory_space<vmem>>, vector<1x2x1xf32>
    %898 = vector.shape_cast %897 : vector<1x2x1xf32> to vector<2x1xf32>
    %899 = vector.shape_cast %894 : vector<2x1xf32> to vector<1x2x1xf32>
    tpu.vector_store %arg8[%896, %c0_204, %c0_205], %899 {strides = array<i32>} : memref<8x2x1xf32, #tpu.memory_space<vmem>>, vector<1x2x1xf32>,
    %c8_i32_206 = arith.constant 8 : i32
    %c0_207 = arith.constant 0 : index
    %c0_208 = arith.constant 0 : index
    %900 = vector.load %arg9[%c0_207, %c0_208] : memref<2x32xf32, #tpu.memory_space<vmem>>, vector<2x32xf32>
    tpu.vector_store %arg9[%c0_207, %c0_208], %865 {strides = array<i32>} : memref<2x32xf32, #tpu.memory_space<vmem>>, vector<2x32xf32>,
    %c0_209 = arith.constant 0 : index
    %c0_210 = arith.constant 0 : index
    %901 = vector.load %arg10[%c0_209, %c0_210] : memref<2x32xf32, #tpu.memory_space<vmem>>, vector<2x32xf32>
    tpu.vector_store %arg10[%c0_209, %c0_210], %868 {strides = array<i32>} : memref<2x32xf32, #tpu.memory_space<vmem>>, vector<2x32xf32>,
    %c0_211 = arith.constant 0 : index
    %c0_212 = arith.constant 0 : index
    %902 = vector.load %arg11[%c0_211, %c0_212] : memref<2x32xf32, #tpu.memory_space<vmem>>, vector<2x32xf32>
    tpu.vector_store %arg11[%c0_211, %c0_212], %871 {strides = array<i32>} : memref<2x32xf32, #tpu.memory_space<vmem>>, vector<2x32xf32>,
    %c0_213 = arith.constant 0 : index
    %c0_214 = arith.constant 0 : index
    %903 = vector.load %arg12[%c0_213, %c0_214] : memref<2x32xf32, #tpu.memory_space<vmem>>, vector<2x32xf32>
    tpu.vector_store %arg12[%c0_213, %c0_214], %874 {strides = array<i32>} : memref<2x32xf32, #tpu.memory_space<vmem>>, vector<2x32xf32>,
    return
  }
  func.func @transform_0(%arg0: i32, %arg1: memref<8xi32, #tpu.memory_space<smem>>) -> (i32, i32, i32) {
    %c0_i32 = arith.constant 0 : i32
    %c0_i32_0 = arith.constant 0 : i32
    %c0_i32_1 = arith.constant 0 : i32
    return %arg0, %c0_i32, %c0_i32_0 : i32, i32, i32
  }
  func.func @transform_1(%arg0: i32, %arg1: memref<8xi32, #tpu.memory_space<smem>>) -> (i32, i32, i32) {
    %c0_i32 = arith.constant 0 : i32
    %0 = arith.subi %c0_i32, %arg0 : i32
    %c0_i32_0 = arith.constant 0 : i32
    %c0_i32_1 = arith.constant 0 : i32
    %c0_i32_2 = arith.constant 0 : i32
    return %0, %c0_i32_0, %c0_i32_1 : i32, i32, i32
  }
  func.func @transform_2(%arg0: i32, %arg1: memref<8xi32, #tpu.memory_space<smem>>) -> (i32, i32) {
    %c0_i32 = arith.constant 0 : i32
    %c0_i32_0 = arith.constant 0 : i32
    %c0_i32_1 = arith.constant 0 : i32
    return %c0_i32, %c0_i32_0 : i32, i32
  }
  func.func @transform_3(%arg0: i32, %arg1: memref<8xi32, #tpu.memory_space<smem>>) -> (i32, i32) {
    %c0_i32 = arith.constant 0 : i32
    %c0_i32_0 = arith.constant 0 : i32
    %c0_i32_1 = arith.constant 0 : i32
    return %c0_i32, %c0_i32_0 : i32, i32
  }
  func.func @transform_4(%arg0: i32, %arg1: memref<8xi32, #tpu.memory_space<smem>>) -> (i32, i32) {
    %c0_i32 = arith.constant 0 : i32
    %c0_i32_0 = arith.constant 0 : i32
    %c0_i32_1 = arith.constant 0 : i32
    return %c0_i32, %c0_i32_0 : i32, i32
  }
  func.func @transform_5(%arg0: i32, %arg1: memref<8xi32, #tpu.memory_space<smem>>) -> (i32, i32, i32) {
    %c0_i32 = arith.constant 0 : i32
    %c0_i32_0 = arith.constant 0 : i32
    %c0_i32_1 = arith.constant 0 : i32
    return %arg0, %c0_i32, %c0_i32_0 : i32, i32, i32
  }
  func.func @transform_6(%arg0: i32, %arg1: memref<8xi32, #tpu.memory_space<smem>>) -> (i32, i32, i32) {
    %c0_i32 = arith.constant 0 : i32
    %0 = arith.subi %c0_i32, %arg0 : i32
    %c0_i32_0 = arith.constant 0 : i32
    %c0_i32_1 = arith.constant 0 : i32
    %c0_i32_2 = arith.constant 0 : i32
    return %0, %c0_i32_0, %c0_i32_1 : i32, i32, i32
  }
}

</mosaic_0001>

<bundles_post_ra>
// kernel: _lambda_.4
= control target key start
LH: loop header
LB: loop body
LE: loop exit
PB: predicated region body
PF: predicated region fallthrough
CT: control target
= control target key end

     0   :  { %12 = vsyncpa [#allocation3], 0  ;;  %s362_s0 = inlined_call_operand.vmem [shape: bf16[16,64], index: 0, kind: input, shape index: {}]   ;;  %s363_s1 = inlined_call_operand.hbm [shape: bf16[64,128], index: 1, kind: input, shape index: {}]   ;;  %s364_s2 = inlined_call_operand.vmem [shape: bf16[64,128], index: 2, kind: input, shape index: {}]   ;;  %s365_s3 = inlined_call_operand.hbm [shape: f32[1,128], index: 3, kind: input, shape index: {}]   ;;  %s366_s4 = inlined_call_operand.vmem [shape: f32[1,128], index: 4, kind: input, shape index: {}]   ;;  %s367_s5 = inlined_call_operand.vmem [shape: f32[16,128], index: 5, kind: output, shape index: {0}]   ;;  %s368_s6 = inlined_call_operand.vmem [shape: f32[16,128], index: 6, kind: output, shape index: {1}]  }
   0x1   :  { %s20_s23 = sshll.u32 %s363_s1, 4  ;;  %s21_s23 = int_to_ptr.hbm [resolvable:$true] %s20_s23 }
   0x2   :  { %13 = vsyncpa [#allocation5], 0  ;;  %s287_s24 = smov [#allocation2]   ;;  %s36_s28 = sshll.u32 %s365_s3, 4  ;;  %s37_s28 = int_to_ptr.hbm [resolvable:$true] %s36_s28 }
   0x3   :  { %s22_s25 = sshll.u32 %s287_s24, 4  ;;  %s288_s29 = smov 64   ;;  %s23_s25 = int_to_ptr.vmem [resolvable:$true] %s22_s25 }
   0x4   :  { %s289_s30 = smov 4   ;;  %s290_s7 = smov [#allocation4]  }
   0x5   :  { %28 = dma.hbm_to_vmem [thread:$0]  %s21_s23, 512, %s23_s25, [#allocation3], %s288_s29, %s288_s29, %s289_s30  }
   0x6   :  { %s38_s8 = sshll.u32 %s290_s7, 4  ;;  %s39_s8 = int_to_ptr.vmem [resolvable:$true] %s38_s8 }
   0x7   :  { %41 = dma.hbm_to_vmem [thread:$0]  %s37_s28, 16, %s39_s8, [#allocation5]  }
   0x8   :  { %283 = dma.done.wait [#allocation3], 512  }
   0x9   :  { %284 = vsyncadd [#allocation3], 4294966784 }
   0xa   :  { %285 = dma.done.wait [#allocation5], 16  }
   0xb   :  { %286 = vsyncadd [#allocation5], 4294967280  ;;  %v224_v0 = vld [vmem:[#allocation2 + $0x18] sm:$0xff]  ;;  %v223_v2 = vld [vmem:[#allocation2 + $0x10] sm:$0xff]  ;;  %vm94_vm0 = vcmask 523264  }
   0xc   :  { %v228_v1 = vld [vmem:[%s364_s2 + $0x18] sm:$0xff]  ;;  %102 = vmatpush.bf16.msra.mxu0 %v224_v0  ;;  %v227_v3 = vld [vmem:[%s364_s2 + $0x10] sm:$0xff]  ;;  %v222_v4 = vld [vmem:[#allocation2 + $0x8] sm:$0xff] }
   0xd   :  { %153 = vmatpush.bf16.msra.mxu1 %v228_v1  ;;  %v226_v5 = vld [vmem:[%s364_s2 + $0x8] sm:$0xff]  ;;  %v221_v6 = vld [vmem:[#allocation2] sm:$0xff] }
   0xe   :  { %v225_v7 = vld [vmem:[%s364_s2] sm:$0xff] }
   0xf   :  { %v220_v8 = vld [vmem:[%s362_s0] sm:$0xff] }
  0x10   :  { %103 = vmatpush.bf16.msra.mxu0 %v223_v2  ;;  %v233_v9 = vld [vmem:[#allocation4] ss:$0 sm:$0xff] }
  0x11   :  { %154 = vmatpush.bf16.msra.mxu1 %v227_v3  ;;  %v234_v10 = vld [vmem:[%s366_s4] ss:$0 sm:$0xff] }
  0x14   :  { %104 = vmatpush.bf16.msra.mxu0 %v222_v4 }
  0x15   :  { %155 = vmatpush.bf16.msra.mxu1 %v226_v5 }
  0x18   :  { %105 = vmatpush.bf16.msra.mxu0 %v221_v6 }
  0x19   :  { %156 = vmatpush.bf16.msra.mxu1 %v225_v7 }
  0x1b   :  { %202 = vmatmul.msk.bf16.vlgmr.msra.gmra.mxu0 %vm94_vm0, %v220_v8 }
  0x1c   :  { %219 = vmatmul.msk.bf16.vlgmr.msra.gmra.mxu1 %vm94_vm0, %v220_v8 }
  0x98   :  { %v107_v11 = vpop.f32.mrf.mxu0 }
  0x99   :  { %v158_v12 = vpop.f32.mrf.mxu1  ;;  %v115_v13 = vadd.f32 %v233_v9, %v107_v11 }
  0x9a   :  { %v166_v14 = vadd.f32 %v234_v10, %v158_v12 }
  0x9b   :  { %168 = vst [vmem:[%s367_s5] sm:$0xff] %v115_v13 }
  0x9c   :  { %170 = vst [vmem:[%s368_s6] sm:$0xff] %v166_v14 }
  0xa0   :  { %v109_v15 = vpop.f32.mrf.mxu0 }
  0xa1   :  { %v160_v16 = vpop.f32.mrf.mxu1  ;;  %v116_v17 = vadd.f32 %v233_v9, %v109_v15 }
  0xa2   :  { %v167_v18 = vadd.f32 %v234_v10, %v160_v16 }
  0xa3   :  { %169 = vst [vmem:[%s367_s5 + $0x8] sm:$0xff] %v116_v17 }
  0xa4   :  { %171 = vst [vmem:[%s368_s6 + $0x8] sm:$0xff] %v167_v18 }
  0xa5   :  { %180 = vsyncpa [#allocation3], 1 }
  0xa6   :  { %181 = vsyncpa [#allocation5], 1 }

// kernel: _lambda_.6
= control target key start
LH: loop header
LB: loop body
LE: loop exit
PB: predicated region body
PF: predicated region fallthrough
CT: control target
= control target key end

     0   :  { %15 = vsyncpa [#allocation3], 0  ;;  %s523_s0 = inlined_call_operand.vmem [shape: bf16[16,32], index: 0, kind: input, shape index: {}]   ;;  %s524_s1 = inlined_call_operand.vmem [shape: bf16[16,32], index: 1, kind: input, shape index: {}]   ;;  %s525_s2 = inlined_call_operand.hbm [shape: bf16[32,128], index: 2, kind: input, shape index: {}]   ;;  %s526_s3 = inlined_call_operand.hbm [shape: bf16[32,128], index: 3, kind: input, shape index: {}]   ;;  %s527_s4 = inlined_call_operand.hbm [shape: bf16[32,128], index: 4, kind: input, shape index: {}]   ;;  %s528_s5 = inlined_call_operand.hbm [shape: bf16[32,128], index: 5, kind: input, shape index: {}]   ;;  %s529_s6 = inlined_call_operand.vmem [shape: f32[1,128], index: 6, kind: input, shape index: {}]   ;;  %s530_s7 = inlined_call_operand.vmem [shape: f32[1,128], index: 7, kind: input, shape index: {}]   ;;  %s531_s8 = inlined_call_operand.vmem [shape: f32[16,128], index: 8, kind: output, shape index: {0}]   ;;  %s532_s9 = inlined_call_operand.vmem [shape: f32[16,128], index: 9, kind: output, shape index: {1}]  }
   0x1   :  { %16 = vsyncpa [#allocation5], 0 }
   0x2   :  { %17 = vsyncpa [#allocation8], 0  ;;  %s39_s11 = sshll.u32 %s526_s3, 4  ;;  %s431_s12 = smov [#allocation4]   ;;  %s40_s11 = int_to_ptr.hbm [resolvable:$true] %s39_s11 }
   0x3   :  { %s41_s13 = sshll.u32 %s431_s12, 4  ;;  %s26_s16 = sshll.u32 %s525_s2, 4  ;;  %s42_s13 = int_to_ptr.vmem [resolvable:$true] %s41_s13  ;;  %s27_s16 = int_to_ptr.hbm [resolvable:$true] %s26_s16 }
   0x4   :  { %s432_s17 = smov 64   ;;  %s433_s18 = smov 4  }
   0x5   :  { %47 = dma.hbm_to_vmem [thread:$0]  %s40_s11, 256, %s42_s13, [#allocation5], %s432_s17, %s432_s17, %s433_s18  }
   0x6   :  { %s434_s19 = smov [#allocation2]   ;;  %s52_s23 = sshll.u32 %s527_s4, 4  ;;  %s53_s23 = int_to_ptr.hbm [resolvable:$true] %s52_s23 }
   0x7   :  { %s28_s20 = sshll.u32 %s434_s19, 4  ;;  %s65_s25 = sshll.u32 %s528_s5, 4  ;;  %s29_s20 = int_to_ptr.vmem [resolvable:$true] %s28_s20  ;;  %s66_s25 = int_to_ptr.hbm [resolvable:$true] %s65_s25 }
   0x8   :  { %34 = dma.hbm_to_vmem [thread:$0]  %s27_s16, 256, %s29_s20, [#allocation3], %s432_s17, %s432_s17, %s433_s18  }
   0x9   :  { %s435_s26 = smov [#allocation6]   ;;  %s436_s2 = smov [#allocation7]  }
   0xa   :  { %s54_s27 = sshll.u32 %s435_s26, 4  ;;  %s67_s28 = sshll.u32 %s436_s2, 4  ;;  %s55_s27 = int_to_ptr.vmem [resolvable:$true] %s54_s27  ;;  %s68_s28 = int_to_ptr.vmem [resolvable:$true] %s67_s28 }
   0xb   :  { %60 = dma.hbm_to_vmem [thread:$0]  %s53_s23, 256, %s55_s27, [#allocation5], %s432_s17, %s432_s17, %s433_s18  }
   0xc   :  { %73 = dma.hbm_to_vmem [thread:$0]  %s66_s25, 256, %s68_s28, [#allocation8], %s432_s17, %s432_s17, %s433_s18  }
   0xd   :  { %425 = dma.done.wait [#allocation3], 256  }
   0xe   :  { %426 = vsyncadd [#allocation3], 4294967040 }
   0xf   :  { %427 = dma.done.wait [#allocation5], 512  }
  0x10   :  { %428 = vsyncadd [#allocation5], 4294966784 }
  0x11   :  { %429 = dma.done.wait [#allocation8], 256  }
  0x12   :  { %430 = vsyncadd [#allocation8], 4294967040  ;;  %v313_v0 = vld [vmem:[#allocation2 + $0x8] sm:$0xff]  ;;  %v318_v2 = vld [vmem:[#allocation4 + $0x8] sm:$0xff]  ;;  %vm120_vm0 = vcmask 261120  }
  0x13   :  { %v315_v1 = vld [vmem:[#allocation6 + $0x8] sm:$0xff]  ;;  %v320_v3 = vld [vmem:[#allocation7 + $0x8] sm:$0xff]  ;;  %130 = vmatpush.bf16.msra.mxu0 %v313_v0  ;;  %v312_v4 = vld [vmem:[#allocation2] sm:$0xff]  ;;  %210 = vmatpush.bf16.msra.mxu2 %v318_v2 }
  0x14   :  { %165 = vmatpush.bf16.msra.mxu1 %v315_v1  ;;  %v314_v5 = vld [vmem:[#allocation6] sm:$0xff]  ;;  %v317_v6 = vld [vmem:[#allocation4] sm:$0xff]  ;;  %242 = vmatpush.bf16.msra.mxu3 %v320_v3 }
  0x15   :  { %v319_v7 = vld [vmem:[#allocation7] sm:$0xff]  ;;  %v311_v8 = vld [vmem:[%s523_s0] sm:$0xff] }
  0x16   :  { %v316_v9 = vld [vmem:[%s524_s1] sm:$0xff] }
  0x17   :  { %131 = vmatpush.bf16.msra.mxu0 %v312_v4  ;;  %211 = vmatpush.bf16.msra.mxu2 %v317_v6  ;;  %v327_v10 = vld [vmem:[%s529_s6] ss:$0 sm:$0xff] }
  0x18   :  { %166 = vmatpush.bf16.msra.mxu1 %v314_v5  ;;  %243 = vmatpush.bf16.msra.mxu3 %v319_v7  ;;  %v328_v11 = vld [vmem:[%s530_s7] ss:$0 sm:$0xff] }
  0x1a   :  { %279 = vmatmul.msk.bf16.vlgmr.msra.gmra.mxu0 %vm120_vm0, %v311_v8  ;;  %301 = vmatmul.msk.bf16.vlgmr.msra.gmra.mxu2 %vm120_vm0, %v316_v9 }
  0x1b   :  { %288 = vmatmul.msk.bf16.vlgmr.msra.gmra.mxu1 %vm120_vm0, %v311_v8  ;;  %310 = vmatmul.msk.bf16.vlgmr.msra.gmra.mxu3 %vm120_vm0, %v316_v9 }
  0x97   :  { %v133_v12 = vpop.f32.mrf.mxu0 }
  0x98   :  { %v168_v13 = vpop.f32.mrf.mxu1  ;;  %v141_v14 = vadd.f32 %v327_v10, %v133_v12 }
  0x99   :  { %v176_v15 = vadd.f32 %v328_v11, %v168_v13 }
  0x9d   :  { %v213_v16 = vpop.f32.mrf.mxu2 }
  0x9e   :  { %v245_v17 = vpop.f32.mrf.mxu3  ;;  %v218_v18 = vadd.f32 %v213_v16, %v141_v14 }
  0x9f   :  { %v250_v19 = vadd.f32 %v245_v17, %v176_v15  ;;  %v135_v20 = vpop.f32.mrf.mxu0 }
  0xa0   :  { %252 = vst [vmem:[%s531_s8] sm:$0xff] %v218_v18  ;;  %v170_v21 = vpop.f32.mrf.mxu1  ;;  %v142_v22 = vadd.f32 %v327_v10, %v135_v20 }
  0xa1   :  { %254 = vst [vmem:[%s532_s9] sm:$0xff] %v250_v19  ;;  %v177_v23 = vadd.f32 %v328_v11, %v170_v21 }
  0xa5   :  { %v215_v24 = vpop.f32.mrf.mxu2 }
  0xa6   :  { %v247_v25 = vpop.f32.mrf.mxu3  ;;  %v219_v26 = vadd.f32 %v215_v24, %v142_v22 }
  0xa7   :  { %v251_v27 = vadd.f32 %v247_v25, %v177_v23 }
  0xa8   :  { %253 = vst [vmem:[%s531_s8 + $0x8] sm:$0xff] %v219_v26 }
  0xa9   :  { %255 = vst [vmem:[%s532_s9 + $0x8] sm:$0xff] %v251_v27 }
  0xaa   :  { %264 = vsyncpa [#allocation3], 1 }
  0xab   :  { %265 = vsyncpa [#allocation5], 1 }
  0xac   :  { %266 = vsyncpa [#allocation8], 1 }

// kernel: _lambda_.5
= control target key start
LH: loop header
LB: loop body
LE: loop exit
PB: predicated region body
PF: predicated region fallthrough
CT: control target
= control target key end

     0   :  { %s1780_s24 = smov [#allocation7]   ;;  %s2536_s0 = inlined_call_operand.vmem [shape: s32[8], index: 0, kind: input, shape index: {}]   ;;  %s2537_s1 = inlined_call_operand.vmem [shape: f32[8,2,128], index: 1, kind: input, shape index: {}]   ;;  %s2538_s2 = inlined_call_operand.vmem [shape: f32[8,2,128], index: 2, kind: input, shape index: {}]   ;;  %s2539_s3 = inlined_call_operand.hbm [shape: bf16[32,128], index: 3, kind: input, shape index: {}]   ;;  %s2540_s4 = inlined_call_operand.hbm [shape: bf16[32,128], index: 4, kind: input, shape index: {}]   ;;  %s2541_s5 = inlined_call_operand.vmem [shape: bf16[8,2,32], index: 5, kind: output, shape index: {0}]   ;;  %s2542_s6 = inlined_call_operand.vmem [shape: bf16[8,2,32], index: 6, kind: output, shape index: {1}]  }
   0x1   :  { %s13_s23 = sshll.u32 %s2536_s0, 4  ;;  %s14_s23 = int_to_ptr.vmem [resolvable:$true] %s13_s23 }
   0x2   :  { %16 = dma.vmem_to_smem %s14_s23, 16, %s1780_s24, [#allocation6] }
   0x3   :  { %1774 = dma.done.wait [#allocation6], 16 }
   0x4   :  { %1775 = vsyncadd [#allocation6], 4294967280 }
   0x5   :  { %19 = sfence }
   0x6   :  { %20 = vsyncpa [#allocation9], 0  ;;  %s38_s27 = sshll.u32 %s2539_s3, 4  ;;  %s39_s27 = int_to_ptr.hbm [resolvable:$true] %s38_s27 }
   0x7   :  { %21 = vsyncpa [#allocation11], 0  ;;  %s1781_s28 = smov [#allocation8]   ;;  %s51_s0 = sshll.u32 %s2540_s4, 4  ;;  %s52_s0 = int_to_ptr.hbm [resolvable:$true] %s51_s0 }
   0x8   :  { %s40_s29 = sshll.u32 %s1781_s28, 4  ;;  %s1782_s8 = smov 64   ;;  %s41_s29 = int_to_ptr.vmem [resolvable:$true] %s40_s29 }
   0x9   :  { %s1783_s9 = smov 4   ;;  %s1784_s10 = smov [#allocation10]  }
   0xa   :  { %46 = dma.hbm_to_vmem [thread:$0]  %s39_s27, 256, %s41_s29, [#allocation9], %s1782_s8, %s1782_s8, %s1783_s9  }
   0xb   :  { %s53_s11 = sshll.u32 %s1784_s10, 4  ;;  %s54_s11 = int_to_ptr.vmem [resolvable:$true] %s53_s11 }
   0xc   :  { %59 = dma.hbm_to_vmem [thread:$0]  %s52_s0, 256, %s54_s11, [#allocation11], %s1782_s8, %s1782_s8, %s1783_s9  }
   0xd   :  { %1776 = dma.done.wait [#allocation9], 256  }
   0xe   :  { %1777 = vsyncadd [#allocation9], 4294967040 }
   0xf   :  { %1778 = dma.done.wait [#allocation11], 256  }
  0x10   :  { %1779 = vsyncadd [#allocation11], 4294967040  ;;  %vm2543_vm0 = vcmask 254976   ;;  %v1785_v0 = vmov 0.0   ;;  %v1840_v1 = vld [vmem:[#allocation8 + $0x8] sm:$0xff]  ;;  %v1842_v2 = vld [vmem:[#allocation10 + $0x8] sm:$0xff]  ;;  %v104_v61 = vlaneseq }
  0x11   :  { %100 = vst.msk [vmem:[#allocation2] sm:$0x3] %vm2543_vm0, %v1785_v0  ;;  %v1844_v3 = vld [vmem:[#allocation8] sm:$0xff]  ;;  %144 = vmatpush.bf16.msra.mxu0 %v1840_v1  ;;  %175 = vmatpush.bf16.msra.mxu1 %v1842_v2  ;;  %v1850_v5 = vld [vmem:[#allocation10] sm:$0xff]  ;;  %s1786_s3 = smov 32   ;;  %vm2544_vm1 = vcmask 261120  }
  0x12   :  { %101 = vst.msk [vmem:[#allocation3] sm:$0x3] %vm2543_vm0, %v1785_v0  ;;  %352 = vmatpush.bf16.msra.mxu3 %v1842_v2  ;;  %330 = vmatpush.bf16.msra.mxu2 %v1840_v1  ;;  %v121_v11 = vld [vmem:[%s2537_s1] sm:$0x3]  ;;  %v1493_v15 = vld [vmem:[%s2538_s2 + $0xe] sm:$0x3] }
  0x13   :  { %102 = vst.msk [vmem:[#allocation4] sm:$0x3] %vm2543_vm0, %v1785_v0  ;;  %s1787_s15 = smov 96   ;;  %s264_s16 = sld [smem:[#allocation7]]  ;;  %v1908_v62 = vshrl.u32 %v104_v61, 7 }
  0x14   :  { %103 = vst.msk [vmem:[#allocation5] sm:$0x3] %vm2543_vm0, %v1785_v0  ;;  %s1505_s17 = sld [smem:[#allocation7 + $0x7]] }
  0x15   :  { %145 = vmatpush.bf16.msra.mxu0 %v1844_v3  ;;  %176 = vmatpush.bf16.msra.mxu1 %v1850_v5  ;;  %s1514_s22 = sld [smem:[#allocation7 + $0x6]] }
  0x16   :  { %353 = vmatpush.bf16.msra.mxu3 %v1850_v5  ;;  %331 = vmatpush.bf16.msra.mxu2 %v1844_v3  ;;  %s1513_s23 = sld [smem:[#allocation7 + $0x1]] }
  0x17   :  { %s1524_s28 = sld [smem:[#allocation7 + $0x5]] }
  0x18   :  { %v1848_v4 = vld [vmem:[#allocation2] sm:$0x3]  ;;  %s1523_s29 = sld [smem:[#allocation7 + $0x2]] }
  0x19   :  { %v115_v6 = vld [vmem:[#allocation3] sm:$0x3]  ;;  %v120_v8 = vpack.c.bf16 %v1848_v4, %v1848_v4  ;;  %512 = vmatpush.bf16.msrb.mxu1 %v1842_v2  ;;  %490 = vmatpush.bf16.msrb.mxu0 %v1840_v1  ;;  %v265_v63 = vstv %s264_s16  ;;  %s1533_s10 = sld [smem:[#allocation7 + $0x3]] }
  0x1a   :  { %v1852_v7 = vld [vmem:[#allocation4] sm:$0x3]  ;;  %203 = vrot.lane.b32.xlu1 %v115_v6, %s1786_s3  ;;  %650 = vmatpush.bf16.msrb.mxu2 %v1840_v1  ;;  %vm1913_vm10 = vcmp.lt.s32.totalorder %v1908_v62, %v265_v63  ;;  %s1534_s11 = sld [smem:[#allocation7 + $0x4]] }
  0x1b   :  { %v151_v9 = vpack.c.bf16 %v1852_v7, %v1852_v7  ;;  %v117_v10 = vld [vmem:[#allocation5] sm:$0x3]  ;;  %1492 = vmatmul.msk.bf16.vlgmr.msra.gmra.mxu0 %vm2544_vm1, %v120_v8  ;;  %672 = vmatpush.bf16.msrb.mxu3 %v1842_v2  ;;  %s1395_s12 = sld [smem:[#allocation7]] }
  0x1c   :  { %s1572_s13 = sld [smem:[#allocation7 + $0x7]] }
  0x1d   :  { %1502 = vmatmul.msk.bf16.vlgmr.msra.gmra.mxu1 %vm2544_vm1, %v151_v9  ;;  %491 = vmatpush.bf16.msrb.mxu0 %v1844_v3 }
  0x1e   :  { %513 = vmatpush.bf16.msrb.mxu1 %v1850_v5  ;;  %651 = vmatpush.bf16.msrb.mxu2 %v1844_v3 }
  0x1f   :  { %673 = vmatpush.bf16.msrb.mxu3 %v1850_v5 }
  0x21   :  { %810 = vmatpush.bf16.msra.mxu0 %v1840_v1 }
  0x22   :  { %244 = vrot.lane.b32.xlu1 %v117_v10, %s1786_s3  ;;  %832 = vmatpush.bf16.msra.mxu1 %v1842_v2  ;;  %v268_v10 = vstv %s1505_s17 }
  0x23   :  { %vm1928_vm11 = vcmp.lt.s32.totalorder %v1908_v62, %v268_v10 }
  0x25   :  { %811 = vmatpush.bf16.msra.mxu0 %v1844_v3 }
  0x26   :  { %833 = vmatpush.bf16.msra.mxu1 %v1850_v5 }
  0x8c   :  { %v1892_v51 = vpop.permute.xlu1 %203 }
  0x94   :  { %v1898_v55 = vpop.permute.xlu1 %244 }
  0x98   :  { %v147_v12 = vpop.f32.mrf.mxu0 }
  0x99   :  { %v148_v14 = vadd.f32 %v147_v12, %v121_v11 }
  0x9a   :  { %v178_v13 = vpop.f32.mrf.mxu1 }
  0x9b   :  { %1586 = vtanh.f32 %v148_v14  ;;  %v179_v16 = vadd.f32 %v1493_v15, %v178_v13  ;;  %v1503_v21 = vmul.f32 -1.442695, %v148_v14 }
  0x9d   :  { %1588 = vtanh.f32 %v179_v16  ;;  %v1504_v22 = vmul.f32 -1.442695, %v179_v16 }
  0x9e   :  { %1590 = vpow2.f32 %v1503_v21 }
  0x9f   :  { %1592 = vpow2.f32 %v1504_v22 }
  0xa0   :  { %v149_v17 = vpop.f32.mrf.mxu0 }
  0xa1   :  { %v1587_v19 = vpop.eup %1586 }
  0xa2   :  { %v180_v18 = vpop.f32.mrf.mxu1  ;;  %208 = vrot.lane.b32.xlu0 %v1587_v19, %s1782_s8  ;;  %v1509_v19 = vld [vmem:[%s2538_s2 + $0xc] sm:$0x3] }
  0xa3   :  { %v1589_v20 = vpop.eup %1588 }
  0xa4   :  { %v1591_v23 = vpop.eup %1590 }
  0xa5   :  { %v185_v24 = vadd.f32 1.0, %v1591_v23  ;;  %v1593_v25 = vpop.eup %1592 }
  0xa6   :  { %v226_v26 = vadd.f32 1.0, %v1593_v25 }
  0xa7   :  { %1594 = vrcp.f32 %v185_v24  ;;  %v197_v35 = vand.u32 2147483648, %v185_v24  ;;  %vm191_vm3 = vweird.f32 %v185_v24  ;;  %v195_v36 = vand.u32 2147483647, %v185_v24 }
  0xa8   :  { %1596 = vrcp.f32 %v226_v26  ;;  %vm232_vm6 = vweird.f32 %v226_v26  ;;  %v238_v41 = vand.u32 2147483648, %v226_v26  ;;  %v236_v44 = vand.u32 2147483647, %v226_v26 }
  0xa9   :  { %v198_v39 = vor.u32 1.1754944e-38, %v197_v35  ;;  %vm196_vm5 = vcmp.eq.f32.partialorder %v195_v36, 8.507059e+37 }
  0xaa   :  { %249 = vrot.lane.b32.xlu0 %v1589_v20, %s1782_s8  ;;  %v239_v46 = vor.u32 1.1754944e-38, %v238_v41  ;;  %vm237_vm9 = vcmp.eq.f32.partialorder %v236_v44, 8.507059e+37 }
  0xad   :  { %v1595_v27 = vpop.eup %1594 }
  0xae   :  { %v187_v28 = vmul.f32 %v1595_v27, %v185_v24  ;;  %v1597_v30 = vpop.eup %1596  ;;  %vm192_vm2 = vweird.f32 %v1595_v27  ;;  %v1507_v24 = vld [vmem:[%s2537_s1 + $0x2] sm:$0x3] }
  0xaf   :  { %v228_v32 = vmul.f32 %v1597_v30, %v226_v26  ;;  %vm193_vm4 = vmor %vm191_vm3, %vm192_vm2  ;;  %vm233_vm7 = vweird.f32 %v1597_v30 }
  0xb0   :  { %v188_v29 = vsub.f32 1.0, %v187_v28  ;;  %vm234_vm8 = vmor %vm232_vm6, %vm233_vm7 }
  0xb1   :  { %v229_v34 = vsub.f32 1.0, %v228_v32 }
  0xb2   :  { %v189_v31 = vmul.f32 %v1595_v27, %v188_v29 }
  0xb3   :  { %v230_v38 = vmul.f32 %v1597_v30, %v229_v34 }
  0xb4   :  { %v190_v33 = vadd.f32 %v1595_v27, %v189_v31 }
  0xb5   :  { %v231_v43 = vadd.f32 %v1597_v30, %v230_v38 }
  0xb6   :  { %v194_v37 = vsel %vm193_vm4, %v1595_v27, %v190_v33 }
  0xb7   :  { %v199_v40 = vsel %vm196_vm5, %v198_v39, %v194_v37  ;;  %v235_v47 = vsel %vm234_vm8, %v1597_v30, %v231_v43 }
  0xb8   :  { %v240_v48 = vsel %vm237_vm9, %v239_v46, %v235_v47  ;;  %v206_v52 = vmul.f32 %v1892_v51, %v199_v40 }
  0xb9   :  { %v247_v56 = vmul.f32 %v1898_v55, %v240_v48 }
 0x114   :  { %v209_v42 = vpop.permute.xlu0 %208 }
 0x115   :  { %v211_v45 = vmul.f32 %v209_v42, %v199_v40 }
 0x117   :  { %213 = vrot.lane.b32.xlu2 %v211_v45, %s1786_s3 }
 0x11c   :  { %v250_v49 = vpop.permute.xlu0 %249 }
 0x11d   :  { %v252_v50 = vmul.f32 %v250_v49, %v240_v48 }
 0x11f   :  { %254 = vrot.lane.b32.xlu2 %v252_v50, %s1786_s3 }
 0x127   :  { %273 = vrot.lane.b32.xlu2 %v1848_v4, %s1787_s15 }
 0x171   :  { %v214_v53 = vpop.permute.xlu2 %213 }
 0x172   :  { %v1895_v54 = vadd.f32 %v214_v53, %v206_v52 }
 0x174   :  { %1598 = vtanh.f32 %v1895_v54 }
 0x179   :  { %v255_v57 = vpop.permute.xlu2 %254 }
 0x17a   :  { %v1599_v58 = vpop.eup %1598  ;;  %v1901_v59 = vadd.f32 %v255_v57, %v247_v56 }
 0x17b   :  { %219 = vrot.lane.b32.xlu0 %v1599_v58, %s1782_s8 }
 0x17c   :  { %1600 = vtanh.f32 %v1901_v59 }
 0x181   :  { %v274_v4 = vpop.permute.xlu2 %273 }
 0x182   :  { %v1601_v60 = vpop.eup %1600 }
 0x183   :  { %260 = vrot.lane.b32.xlu1 %v1601_v60, %s1782_s8  ;;  %281 = vrot.lane.b32.xlu0 %v1852_v7, %s1787_s15 }
 0x1ed   :  { %v220_v0 = vpop.permute.xlu0 %219 }
 0x1ee   :  { %v1910_v6 = vmul.f32 %v220_v0, %v199_v40  ;;  %v1960_v0 = vsel %vm1913_vm10, %v1895_v54, %v1892_v51  ;;  %v437_v54 = vstv %s1514_s22 }
 0x1ef   :  { %vm1981_vm6 = vcmp.lt.s32.totalorder %v1908_v62, %v437_v54 }
 0x1f0   :  { %v1920_v9 = vsel %vm1913_vm10, %v1910_v6, %v274_v4 }
 0x1f1   :  { %v315_v7 = vpack.c.bf16 %v1920_v9, %v1920_v9 }
 0x1f3   :  { %319 = vrot.lane.b32.xlu1 %v315_v7, %s1786_s3 }
 0x1f5   :  { %v261_v11 = vpop.permute.xlu1 %260  ;;  %v282_v12 = vpop.permute.xlu0 %281 }
 0x1f6   :  { %v1925_v13 = vmul.f32 %v261_v11, %v240_v48  ;;  %v1970_v11 = vsel %vm1928_vm11, %v1901_v59, %v1898_v55 }
 0x1f8   :  { %v1935_v15 = vsel %vm1928_vm11, %v1925_v13, %v282_v12 }
 0x1f9   :  { %v337_v16 = vpack.c.bf16 %v1935_v15, %v1935_v15 }
 0x1fb   :  { %341 = vrot.lane.b32.xlu2 %v337_v16, %s1786_s3 }
 0x255   :  { %v342_v17 = vpop.permute.xlu2 %341 }
 0x256   :  { %1510 = vmatmul.msk.bf16.vlgmr.msra.gmra.mxu3 %vm2544_vm1, %v342_v17 }
 0x257   :  { %992 = vmatpush.bf16.msra.mxu3 %v1842_v2 }
 0x25b   :  { %993 = vmatpush.bf16.msra.mxu3 %v1850_v5 }
 0x265   :  { %v320_v18 = vpop.permute.xlu1 %319 }
 0x266   :  { %1508 = vmatmul.msk.bf16.vlgmr.msra.gmra.mxu2 %vm2544_vm1, %v320_v18 }
 0x267   :  { %970 = vmatpush.bf16.msra.mxu2 %v1840_v1 }
 0x26b   :  { %971 = vmatpush.bf16.msra.mxu2 %v1844_v3 }
 0x2d9   :  { %v355_v20 = vpop.f32.mrf.mxu3 }
 0x2da   :  { %v356_v21 = vadd.f32 %v1509_v19, %v355_v20 }
 0x2dc   :  { %1602 = vtanh.f32 %v356_v21  ;;  %v1512_v29 = vmul.f32 -1.442695, %v356_v21 }
 0x2e1   :  { %v357_v22 = vpop.f32.mrf.mxu3 }
 0x2e2   :  { %v1603_v23 = vpop.eup %1602  ;;  %v434_v22 = vstv %s1513_s23 }
 0x2e3   :  { %418 = vrot.lane.b32.xlu1 %v1603_v23, %s1782_s8  ;;  %vm1997_vm7 = vcmp.lt.s32.totalorder %v1908_v62, %v434_v22 }
 0x2e9   :  { %v333_v25 = vpop.f32.mrf.mxu2 }
 0x2ea   :  { %v334_v26 = vadd.f32 %v1507_v24, %v333_v25 }
 0x2ec   :  { %1604 = vtanh.f32 %v334_v26  ;;  %v1511_v32 = vmul.f32 -1.442695, %v334_v26 }
 0x2ed   :  { %1606 = vpow2.f32 %v1512_v29 }
 0x2f1   :  { %v335_v27 = vpop.f32.mrf.mxu2 }
 0x2f2   :  { %v1605_v28 = vpop.eup %1604 }
 0x2f3   :  { %381 = vrot.lane.b32.xlu0 %v1605_v28, %s1782_s8  ;;  %v1607_v30 = vpop.eup %1606 }
 0x2f4   :  { %v399_v31 = vadd.f32 1.0, %v1607_v30 }
 0x2f6   :  { %1608 = vrcp.f32 %v399_v31  ;;  %v411_v41 = vand.u32 2147483648, %v399_v31  ;;  %vm405_vm13 = vweird.f32 %v399_v31  ;;  %v409_v42 = vand.u32 2147483647, %v399_v31 }
 0x2f7   :  { %1610 = vpow2.f32 %v1511_v32 }
 0x2f8   :  { %v412_v45 = vor.u32 1.1754944e-38, %v411_v41  ;;  %vm410_vm15 = vcmp.eq.f32.partialorder %v409_v42, 8.507059e+37 }
 0x2fc   :  { %v1609_v33 = vpop.eup %1608 }
 0x2fd   :  { %v1611_v34 = vpop.eup %1610  ;;  %v401_v35 = vmul.f32 %v1609_v33, %v399_v31  ;;  %vm406_vm12 = vweird.f32 %v1609_v33 }
 0x2fe   :  { %v362_v36 = vadd.f32 1.0, %v1611_v34  ;;  %vm407_vm14 = vmor %vm405_vm13, %vm406_vm12 }
 0x2ff   :  { %v402_v37 = vsub.f32 1.0, %v401_v35 }
 0x300   :  { %1612 = vrcp.f32 %v362_v36  ;;  %v374_v53 = vand.u32 2147483648, %v362_v36  ;;  %vm368_vm3 = vweird.f32 %v362_v36  ;;  %v372_v56 = vand.u32 2147483647, %v362_v36 }
 0x301   :  { %v403_v38 = vmul.f32 %v1609_v33, %v402_v37 }
 0x302   :  { %v375_v58 = vor.u32 1.1754944e-38, %v374_v53  ;;  %vm373_vm5 = vcmp.eq.f32.partialorder %v372_v56, 8.507059e+37 }
 0x303   :  { %v404_v39 = vadd.f32 %v1609_v33, %v403_v38 }
 0x305   :  { %v408_v43 = vsel %vm407_vm14, %v1609_v33, %v404_v39  ;;  %v1517_v33 = vld [vmem:[%s2537_s1 + $0x4] sm:$0x3] }
 0x306   :  { %v1613_v40 = vpop.eup %1612  ;;  %v413_v47 = vsel %vm410_vm15, %v412_v45, %v408_v43 }
 0x307   :  { %v364_v44 = vmul.f32 %v1613_v40, %v362_v36  ;;  %vm369_vm2 = vweird.f32 %v1613_v40  ;;  %v416_v12 = vmul.f32 %v413_v47, %v1970_v11 }
 0x308   :  { %vm370_vm4 = vmor %vm368_vm3, %vm369_vm2 }
 0x309   :  { %v365_v49 = vsub.f32 1.0, %v364_v44 }
 0x30b   :  { %v366_v50 = vmul.f32 %v1613_v40, %v365_v49 }
 0x30d   :  { %v367_v52 = vadd.f32 %v1613_v40, %v366_v50 }
 0x30f   :  { %v371_v57 = vsel %vm370_vm4, %v1613_v40, %v367_v52 }
 0x310   :  { %v376_v60 = vsel %vm373_vm5, %v375_v58, %v371_v57 }
 0x311   :  { %v379_v4 = vmul.f32 %v376_v60, %v1960_v0 }
 0x355   :  { %v419_v46 = vpop.permute.xlu1 %418 }
 0x356   :  { %v421_v48 = vmul.f32 %v419_v46, %v413_v47 }
 0x358   :  { %423 = vrot.lane.b32.xlu0 %v421_v48, %s1786_s3 }
 0x365   :  { %v382_v61 = vpop.permute.xlu0 %381 }
 0x366   :  { %v384_v63 = vmul.f32 %v382_v61, %v376_v60 }
 0x368   :  { %386 = vrot.lane.b32.xlu2 %v384_v63, %s1786_s3 }
 0x3c2   :  { %v387_v7 = vpop.permute.xlu2 %386 }
 0x3c3   :  { %v1963_v10 = vadd.f32 %v387_v7, %v379_v4 }
 0x3c5   :  { %1614 = vtanh.f32 %v1963_v10 }
 0x3ca   :  { %v424_v16 = vpop.permute.xlu0 %423 }
 0x3cb   :  { %v1615_v17 = vpop.eup %1614  ;;  %v1973_v18 = vadd.f32 %v424_v16, %v416_v12 }
 0x3cc   :  { %392 = vrot.lane.b32.xlu1 %v1615_v17, %s1782_s8 }
 0x3cd   :  { %1616 = vtanh.f32 %v1973_v18  ;;  %v2030_v22 = vsel %vm1981_vm6, %v1973_v18, %v1970_v11 }
 0x3d3   :  { %v1617_v51 = vpop.eup %1616 }
 0x3d4   :  { %429 = vrot.lane.b32.xlu2 %v1617_v51, %s1782_s8 }
 0x42e   :  { %v430_v19 = vpop.permute.xlu2 %429 }
 0x42f   :  { %v1978_v20 = vmul.f32 %v430_v19, %v413_v47 }
 0x431   :  { %v1989_v59 = vsel %vm1981_vm6, %v1978_v20, %v1935_v15 }
 0x432   :  { %v497_v21 = vpack.c.bf16 %v1989_v59, %v1989_v59 }
 0x434   :  { %501 = vrot.lane.b32.xlu1 %v497_v21, %s1786_s3 }
 0x43e   :  { %v393_v23 = vpop.permute.xlu1 %392 }
 0x43f   :  { %v1994_v24 = vmul.f32 %v393_v23, %v376_v60 }
 0x441   :  { %v2005_v15 = vsel %vm1997_vm7, %v1994_v24, %v1920_v9  ;;  %v1519_v9 = vld [vmem:[%s2538_s2 + $0xa] sm:$0x3] }
 0x442   :  { %v475_v26 = vpack.c.bf16 %v2005_v15, %v2005_v15 }
 0x444   :  { %479 = vrot.lane.b32.xlu0 %v475_v26, %s1786_s3 }
 0x4a6   :  { %v502_v27 = vpop.permute.xlu1 %501 }
 0x4a7   :  { %1520 = vmatmul.msk.bf16.vlgmr.msrb.gmra.mxu1 %vm2544_vm1, %v502_v27 }
 0x4a8   :  { %1152 = vmatpush.bf16.msrb.mxu1 %v1842_v2 }
 0x4ac   :  { %1153 = vmatpush.bf16.msrb.mxu1 %v1850_v5 }
 0x4b6   :  { %v480_v28 = vpop.permute.xlu0 %479 }
 0x4b7   :  { %1518 = vmatmul.msk.bf16.vlgmr.msrb.gmra.mxu0 %vm2544_vm1, %v480_v28 }
 0x4b8   :  { %1130 = vmatpush.bf16.msrb.mxu0 %v1840_v1 }
 0x4bc   :  { %1131 = vmatpush.bf16.msrb.mxu0 %v1844_v3 }
 0x524   :  { %v515_v29 = vpop.f32.mrf.mxu1 }
 0x525   :  { %v516_v30 = vadd.f32 %v1519_v9, %v515_v29  ;;  %v2041_v9 = vsel %vm1997_vm7, %v1963_v10, %v1960_v0 }
 0x527   :  { %1618 = vtanh.f32 %v516_v30  ;;  %v1522_v39 = vmul.f32 -1.442695, %v516_v30 }
 0x52c   :  { %v517_v31 = vpop.f32.mrf.mxu1 }
 0x52d   :  { %v1619_v32 = vpop.eup %1618  ;;  %v597_v31 = vstv %s1524_s28 }
 0x52e   :  { %578 = vrot.lane.b32.xlu0 %v1619_v32, %s1782_s8  ;;  %vm2051_vm4 = vcmp.lt.s32.totalorder %v1908_v62, %v597_v31 }
 0x534   :  { %v493_v34 = vpop.f32.mrf.mxu0 }
 0x535   :  { %v494_v35 = vadd.f32 %v1517_v33, %v493_v34 }
 0x537   :  { %1620 = vtanh.f32 %v494_v35  ;;  %v1521_v38 = vmul.f32 -1.442695, %v494_v35  ;;  %v594_v35 = vstv %s1523_s29 }
 0x538   :  { %vm2067_vm5 = vcmp.lt.s32.totalorder %v1908_v62, %v594_v35 }
 0x539   :  { %1622 = vpow2.f32 %v1521_v38 }
 0x53a   :  { %1624 = vpow2.f32 %v1522_v39 }
 0x53c   :  { %v495_v36 = vpop.f32.mrf.mxu0 }
 0x53d   :  { %v1621_v37 = vpop.eup %1620 }
 0x53e   :  { %541 = vrot.lane.b32.xlu2 %v1621_v37, %s1782_s8 }
 0x53f   :  { %v1623_v40 = vpop.eup %1622 }
 0x540   :  { %v522_v41 = vadd.f32 1.0, %v1623_v40  ;;  %v1625_v42 = vpop.eup %1624 }
 0x541   :  { %v559_v43 = vadd.f32 1.0, %v1625_v42 }
 0x542   :  { %1626 = vrcp.f32 %v522_v41  ;;  %v534_v53 = vand.u32 2147483648, %v522_v41  ;;  %vm528_vm9 = vweird.f32 %v522_v41  ;;  %v532_v56 = vand.u32 2147483647, %v522_v41 }
 0x543   :  { %1628 = vrcp.f32 %v559_v43  ;;  %v571_v12 = vand.u32 2147483648, %v559_v43  ;;  %vm565_vm15 = vweird.f32 %v559_v43  ;;  %v569_v16 = vand.u32 2147483647, %v559_v43 }
 0x544   :  { %v535_v60 = vor.u32 1.1754944e-38, %v534_v53  ;;  %vm533_vm13 = vcmp.eq.f32.partialorder %v532_v56, 8.507059e+37 }
 0x545   :  { %v572_v51 = vor.u32 1.1754944e-38, %v571_v12  ;;  %vm570_vm3 = vcmp.eq.f32.partialorder %v569_v16, 8.507059e+37 }
 0x548   :  { %v1627_v44 = vpop.eup %1626 }
 0x549   :  { %v524_v45 = vmul.f32 %v1627_v44, %v522_v41  ;;  %v1629_v47 = vpop.eup %1628  ;;  %vm529_vm8 = vweird.f32 %v1627_v44 }
 0x54a   :  { %v561_v49 = vmul.f32 %v1629_v47, %v559_v43  ;;  %vm530_vm12 = vmor %vm528_vm9, %vm529_vm8  ;;  %vm566_vm14 = vweird.f32 %v1629_v47 }
 0x54b   :  { %v525_v46 = vsub.f32 1.0, %v524_v45  ;;  %vm567_vm2 = vmor %vm565_vm15, %vm566_vm14 }
 0x54c   :  { %v562_v52 = vsub.f32 1.0, %v561_v49 }
 0x54d   :  { %v526_v48 = vmul.f32 %v1627_v44, %v525_v46 }
 0x54e   :  { %v563_v58 = vmul.f32 %v1629_v47, %v562_v52 }
 0x54f   :  { %v527_v50 = vadd.f32 %v1627_v44, %v526_v48 }
 0x550   :  { %v564_v7 = vadd.f32 %v1629_v47, %v563_v58 }
 0x551   :  { %v531_v57 = vsel %vm530_vm12, %v1627_v44, %v527_v50 }
 0x552   :  { %v536_v63 = vsel %vm533_vm13, %v535_v60, %v531_v57  ;;  %v568_v17 = vsel %vm567_vm2, %v1629_v47, %v564_v7 }
 0x553   :  { %v573_v54 = vsel %vm570_vm3, %v572_v51, %v568_v17  ;;  %v539_v29 = vmul.f32 %v536_v63, %v2041_v9 }
 0x554   :  { %v576_v23 = vmul.f32 %v573_v54, %v2030_v22 }
 0x598   :  { %v542_v61 = vpop.permute.xlu2 %541 }
 0x599   :  { %v544_v4 = vmul.f32 %v542_v61, %v536_v63 }
 0x59b   :  { %546 = vrot.lane.b32.xlu1 %v544_v4, %s1786_s3 }
 0x5a0   :  { %v579_v19 = vpop.permute.xlu0 %578 }
 0x5a1   :  { %v581_v21 = vmul.f32 %v579_v19, %v573_v54 }
 0x5a3   :  { %583 = vrot.lane.b32.xlu2 %v581_v21, %s1786_s3 }
 0x5fd   :  { %v584_v26 = vpop.permute.xlu2 %583 }
 0x5fe   :  { %v2033_v27 = vadd.f32 %v584_v26, %v576_v23 }
 0x600   :  { %1630 = vtanh.f32 %v2033_v27  ;;  %v2100_v35 = vsel %vm2051_vm4, %v2033_v27, %v2030_v22 }
 0x606   :  { %v1631_v28 = vpop.eup %1630 }
 0x607   :  { %589 = vrot.lane.b32.xlu1 %v1631_v28, %s1782_s8 }
 0x60d   :  { %v547_v11 = vpop.permute.xlu1 %546 }
 0x60e   :  { %v2044_v18 = vadd.f32 %v547_v11, %v539_v29 }
 0x610   :  { %1632 = vtanh.f32 %v2044_v18 }
 0x616   :  { %v1633_v30 = vpop.eup %1632 }
 0x617   :  { %552 = vrot.lane.b32.xlu0 %v1633_v30, %s1782_s8 }
 0x679   :  { %v590_v32 = vpop.permute.xlu1 %589 }
 0x67a   :  { %v2048_v33 = vmul.f32 %v590_v32, %v573_v54 }
 0x67c   :  { %v2059_v0 = vsel %vm2051_vm4, %v2048_v33, %v1989_v59 }
 0x67d   :  { %v657_v10 = vpack.c.bf16 %v2059_v0, %v2059_v0 }
 0x67f   :  { %661 = vrot.lane.b32.xlu0 %v657_v10, %s1786_s3 }
 0x689   :  { %v553_v36 = vpop.permute.xlu0 %552 }
 0x68a   :  { %v2064_v37 = vmul.f32 %v553_v36, %v536_v63 }
 0x68c   :  { %v2075_v59 = vsel %vm2067_vm5, %v2064_v37, %v2005_v15  ;;  %v1527_v15 = vld [vmem:[%s2537_s1 + $0x6] sm:$0x3] }
 0x68d   :  { %v635_v39 = vpack.c.bf16 %v2075_v59, %v2075_v59 }
 0x68f   :  { %639 = vrot.lane.b32.xlu2 %v635_v39, %s1786_s3 }
 0x6e9   :  { %v640_v40 = vpop.permute.xlu2 %639 }
 0x6ea   :  { %1528 = vmatmul.msk.bf16.vlgmr.msrb.gmra.mxu2 %vm2544_vm1, %v640_v40 }
 0x6eb   :  { %1290 = vmatpush.bf16.msrb.mxu2 %v1840_v1  ;;  %v1529_v1 = vld [vmem:[%s2538_s2 + $0x8] sm:$0x3] }
 0x6ef   :  { %1291 = vmatpush.bf16.msrb.mxu2 %v1844_v3 }
 0x6f1   :  { %v662_v41 = vpop.permute.xlu0 %661 }
 0x6f2   :  { %1530 = vmatmul.msk.bf16.vlgmr.msrb.gmra.mxu3 %vm2544_vm1, %v662_v41 }
 0x6f3   :  { %1311 = vmatpush.bf16.msrb.mxu3 %v1842_v2 }
 0x6f7   :  { %1312 = vmatpush.bf16.msrb.mxu3 %v1850_v5 }
 0x76d   :  { %v653_v42 = vpop.f32.mrf.mxu2 }
 0x76e   :  { %v654_v43 = vadd.f32 %v1527_v15, %v653_v42  ;;  %v2111_v15 = vsel %vm2067_vm5, %v2044_v18, %v2041_v9 }
 0x770   :  { %1634 = vtanh.f32 %v654_v43  ;;  %v1531_v50 = vmul.f32 -1.442695, %v654_v43 }
 0x775   :  { %v655_v44 = vpop.f32.mrf.mxu2  ;;  %v675_v3 = vpop.f32.mrf.mxu3 }
 0x776   :  { %v1635_v45 = vpop.eup %1634  ;;  %v676_v46 = vadd.f32 %v1529_v1, %v675_v3  ;;  %v754_v1 = vstv %s1533_s10 }
 0x777   :  { %701 = vrot.lane.b32.xlu1 %v1635_v45, %s1782_s8 }
 0x778   :  { %1636 = vtanh.f32 %v676_v46  ;;  %v1532_v47 = vmul.f32 -1.442695, %v676_v46  ;;  %v757_v46 = vstv %s1534_s11 }
 0x77a   :  { %1638 = vpow2.f32 %v1532_v47 }
 0x77d   :  { %v677_v2 = vpop.f32.mrf.mxu3 }
 0x77e   :  { %v1637_v5 = vpop.eup %1636 }
 0x77f   :  { %738 = vrot.lane.b32.xlu2 %v1637_v5, %s1782_s8 }
 0x780   :  { %v1639_v48 = vpop.eup %1638 }
 0x781   :  { %v719_v49 = vadd.f32 1.0, %v1639_v48 }
 0x783   :  { %1640 = vrcp.f32 %v719_v49  ;;  %v731_v4 = vand.u32 2147483648, %v719_v49  ;;  %vm725_vm9 = vweird.f32 %v719_v49  ;;  %v729_v7 = vand.u32 2147483647, %v719_v49 }
 0x784   :  { %1642 = vpow2.f32 %v1531_v50 }
 0x785   :  { %v732_v17 = vor.u32 1.1754944e-38, %v731_v4  ;;  %vm730_vm13 = vcmp.eq.f32.partialorder %v729_v7, 8.507059e+37 }
 0x789   :  { %v1641_v52 = vpop.eup %1640 }
 0x78a   :  { %v1643_v53 = vpop.eup %1642  ;;  %v721_v56 = vmul.f32 %v1641_v52, %v719_v49  ;;  %vm726_vm8 = vweird.f32 %v1641_v52 }
 0x78b   :  { %v682_v57 = vadd.f32 1.0, %v1643_v53  ;;  %vm727_vm12 = vmor %vm725_vm9, %vm726_vm8  ;;  %vm2121_vm8 = vcmp.lt.s32.totalorder %v1908_v62, %v754_v1  ;;  %vm2137_vm9 = vcmp.lt.s32.totalorder %v1908_v62, %v757_v46 }
 0x78c   :  { %v722_v58 = vsub.f32 1.0, %v721_v56 }
 0x78d   :  { %1644 = vrcp.f32 %v682_v57  ;;  %v694_v28 = vand.u32 2147483648, %v682_v57  ;;  %vm688_vm15 = vweird.f32 %v682_v57  ;;  %v692_v29 = vand.u32 2147483647, %v682_v57 }
 0x78e   :  { %v723_v60 = vmul.f32 %v1641_v52, %v722_v58  ;;  %v1537_v58 = vld [vmem:[%s2537_s1 + $0x8] sm:$0x3] }
 0x78f   :  { %v695_v30 = vor.u32 1.1754944e-38, %v694_v28  ;;  %vm693_vm3 = vcmp.eq.f32.partialorder %v692_v29, 8.507059e+37 }
 0x790   :  { %v724_v61 = vadd.f32 %v1641_v52, %v723_v60 }
 0x792   :  { %v728_v12 = vsel %vm727_vm12, %v1641_v52, %v724_v61  ;;  %v1539_v52 = vld [vmem:[%s2538_s2 + $0x6] sm:$0x3] }
 0x793   :  { %v1645_v63 = vpop.eup %1644  ;;  %v733_v54 = vsel %vm730_vm13, %v732_v17, %v728_v12 }
 0x794   :  { %v684_v16 = vmul.f32 %v1645_v63, %v682_v57  ;;  %vm689_vm14 = vweird.f32 %v1645_v63  ;;  %v736_v36 = vmul.f32 %v733_v54, %v2100_v35 }
 0x795   :  { %vm690_vm2 = vmor %vm688_vm15, %vm689_vm14 }
 0x796   :  { %v685_v21 = vsub.f32 1.0, %v684_v16 }
 0x798   :  { %v686_v23 = vmul.f32 %v1645_v63, %v685_v21 }
 0x79a   :  { %v687_v26 = vadd.f32 %v1645_v63, %v686_v23 }
 0x79c   :  { %v691_v11 = vsel %vm690_vm2, %v1645_v63, %v687_v26 }
 0x79d   :  { %v696_v32 = vsel %vm693_vm3, %v695_v30, %v691_v11 }
 0x79e   :  { %v699_v42 = vmul.f32 %v696_v32, %v2111_v15 }
 0x7d9   :  { %v739_v51 = vpop.permute.xlu2 %738 }
 0x7da   :  { %v741_v19 = vmul.f32 %v739_v51, %v733_v54 }
 0x7dc   :  { %743 = vrot.lane.b32.xlu1 %v741_v19, %s1786_s3 }
 0x7e9   :  { %v702_v31 = vpop.permute.xlu1 %701 }
 0x7ea   :  { %v704_v10 = vmul.f32 %v702_v31, %v696_v32 }
 0x7ec   :  { %706 = vrot.lane.b32.xlu0 %v704_v10, %s1786_s3 }
 0x84e   :  { %v744_v39 = vpop.permute.xlu1 %743 }
 0x84f   :  { %v2103_v40 = vadd.f32 %v744_v39, %v736_v36 }
 0x851   :  { %1646 = vtanh.f32 %v2103_v40 }
 0x857   :  { %v1647_v41 = vpop.eup %1646 }
 0x858   :  { %749 = vrot.lane.b32.xlu0 %v1647_v41, %s1782_s8 }
 0x85e   :  { %v707_v22 = vpop.permute.xlu0 %706 }
 0x85f   :  { %v2114_v27 = vadd.f32 %v707_v22, %v699_v42 }
 0x861   :  { %1648 = vtanh.f32 %v2114_v27 }
 0x867   :  { %v1649_v43 = vpop.eup %1648 }
 0x868   :  { %712 = vrot.lane.b32.xlu2 %v1649_v43, %s1782_s8 }
 0x8c2   :  { %v713_v44 = vpop.permute.xlu2 %712 }
 0x8c3   :  { %v2118_v3 = vmul.f32 %v713_v44, %v696_v32 }
 0x8c5   :  { %v2129_v18 = vsel %vm2121_vm8, %v2118_v3, %v2075_v59 }
 0x8c6   :  { %v795_v45 = vpack.c.bf16 %v2129_v18, %v2129_v18 }
 0x8c8   :  { %799 = vrot.lane.b32.xlu1 %v795_v45, %s1786_s3 }
 0x8ca   :  { %v750_v2 = vpop.permute.xlu0 %749 }
 0x8cb   :  { %v2134_v5 = vmul.f32 %v750_v2, %v733_v54 }
 0x8cd   :  { %v2145_v59 = vsel %vm2137_vm9, %v2134_v5, %v2059_v0 }
 0x8ce   :  { %v817_v48 = vpack.c.bf16 %v2145_v59, %v2145_v59 }
 0x8d0   :  { %821 = vrot.lane.b32.xlu2 %v817_v48, %s1786_s3 }
 0x92a   :  { %v822_v49 = vpop.permute.xlu2 %821 }
 0x92b   :  { %1540 = vmatmul.msk.bf16.vlgmr.msra.gmra.mxu1 %vm2544_vm1, %v822_v49 }
 0x93a   :  { %v800_v50 = vpop.permute.xlu1 %799 }
 0x93b   :  { %1538 = vmatmul.msk.bf16.vlgmr.msra.gmra.mxu0 %vm2544_vm1, %v800_v50  ;;  %v2166_v50 = vsel %vm2121_vm8, %v2114_v27, %v2111_v15 }
 0x9a8   :  { %v835_v53 = vpop.f32.mrf.mxu1 }
 0x9a9   :  { %v836_v56 = vadd.f32 %v1539_v52, %v835_v53 }
 0x9ab   :  { %1650 = vtanh.f32 %v836_v56  ;;  %v1542_v7 = vmul.f32 -1.442695, %v836_v56 }
 0x9b0   :  { %v837_v0 = vpop.f32.mrf.mxu1 }
 0x9b1   :  { %v1651_v57 = vpop.eup %1650  ;;  %v2176_v0 = vsel %vm2137_vm9, %v2103_v40, %v2100_v35 }
 0x9b2   :  { %898 = vrot.lane.b32.xlu1 %v1651_v57, %s1782_s8 }
 0x9b8   :  { %v813_v60 = vpop.f32.mrf.mxu0 }
 0x9b9   :  { %v814_v61 = vadd.f32 %v1537_v58, %v813_v60 }
 0x9bb   :  { %1652 = vtanh.f32 %v814_v61  ;;  %v1541_v17 = vmul.f32 -1.442695, %v814_v61 }
 0x9bc   :  { %1654 = vpow2.f32 %v1542_v7 }
 0x9c0   :  { %v815_v63 = vpop.f32.mrf.mxu0 }
 0x9c1   :  { %v1653_v4 = vpop.eup %1652 }
 0x9c2   :  { %861 = vrot.lane.b32.xlu0 %v1653_v4, %s1782_s8  ;;  %v1655_v12 = vpop.eup %1654 }
 0x9c3   :  { %v879_v16 = vadd.f32 1.0, %v1655_v12 }
 0x9c5   :  { %1656 = vrcp.f32 %v879_v16  ;;  %v891_v11 = vand.u32 2147483648, %v879_v16  ;;  %vm885_vm13 = vweird.f32 %v879_v16  ;;  %v889_v30 = vand.u32 2147483647, %v879_v16 }
 0x9c6   :  { %1658 = vpow2.f32 %v1541_v17 }
 0x9c7   :  { %v892_v10 = vor.u32 1.1754944e-38, %v891_v11  ;;  %vm890_vm15 = vcmp.eq.f32.partialorder %v889_v30, 8.507059e+37 }
 0x9cb   :  { %v1657_v51 = vpop.eup %1656 }
 0x9cc   :  { %v1659_v54 = vpop.eup %1658  ;;  %v881_v19 = vmul.f32 %v1657_v51, %v879_v16  ;;  %vm886_vm12 = vweird.f32 %v1657_v51 }
 0x9cd   :  { %v842_v21 = vadd.f32 1.0, %v1659_v54  ;;  %vm887_vm14 = vmor %vm885_vm13, %vm886_vm12 }
 0x9ce   :  { %v882_v23 = vsub.f32 1.0, %v881_v19 }
 0x9cf   :  { %1660 = vrcp.f32 %v842_v21  ;;  %v854_v1 = vand.u32 2147483648, %v842_v21  ;;  %vm848_vm3 = vweird.f32 %v842_v21  ;;  %v852_v44 = vand.u32 2147483647, %v842_v21 }
 0x9d0   :  { %v883_v26 = vmul.f32 %v1657_v51, %v882_v23  ;;  %v1547_v23 = vld [vmem:[%s2537_s1 + $0xa] sm:$0x3] }
 0x9d1   :  { %v855_v46 = vor.u32 1.1754944e-38, %v854_v1  ;;  %vm853_vm12 = vcmp.eq.f32.partialorder %v852_v44, 8.507059e+37 }
 0x9d2   :  { %v884_v28 = vadd.f32 %v1657_v51, %v883_v26 }
 0x9d4   :  { %v888_v31 = vsel %vm887_vm14, %v1657_v51, %v884_v28  ;;  %v1549_v51 = vld [vmem:[%s2538_s2 + $0x4] sm:$0x3] }
 0x9d5   :  { %v1661_v29 = vpop.eup %1660  ;;  %v893_v39 = vsel %vm890_vm15, %v892_v10, %v888_v31 }
 0x9d6   :  { %v844_v32 = vmul.f32 %v1661_v29, %v842_v21  ;;  %vm849_vm2 = vweird.f32 %v1661_v29  ;;  %v896_v57 = vmul.f32 %v893_v39, %v2176_v0 }
 0x9d7   :  { %vm850_vm0 = vmor %vm848_vm3, %vm849_vm2 }
 0x9d8   :  { %v845_v42 = vsub.f32 1.0, %v844_v32 }
 0x9da   :  { %v846_v22 = vmul.f32 %v1661_v29, %v845_v42 }
 0x9dc   :  { %v847_v43 = vadd.f32 %v1661_v29, %v846_v22 }
 0x9de   :  { %v851_v45 = vsel %vm850_vm0, %v1661_v29, %v847_v43 }
 0x9df   :  { %v856_v2 = vsel %vm853_vm12, %v855_v46, %v851_v45 }
 0x9e0   :  { %v859_v52 = vmul.f32 %v856_v2, %v2166_v50 }
 0xa24   :  { %v899_v36 = vpop.permute.xlu1 %898 }
 0xa25   :  { %v901_v41 = vmul.f32 %v899_v36, %v893_v39 }
 0xa27   :  { %903 = vrot.lane.b32.xlu0 %v901_v41, %s1786_s3 }
 0xa34   :  { %v862_v48 = vpop.permute.xlu0 %861 }
 0xa35   :  { %v864_v49 = vmul.f32 %v862_v48, %v856_v2 }
 0xa37   :  { %866 = vrot.lane.b32.xlu2 %v864_v49, %s1786_s3 }
 0xa91   :  { %v867_v53 = vpop.permute.xlu2 %866 }
 0xa92   :  { %v2169_v56 = vadd.f32 %v867_v53, %v859_v52 }
 0xa94   :  { %1662 = vtanh.f32 %v2169_v56 }
 0xa99   :  { %v904_v58 = vpop.permute.xlu0 %903 }
 0xa9a   :  { %v1663_v60 = vpop.eup %1662  ;;  %v2179_v61 = vadd.f32 %v904_v58, %v896_v57 }
 0xa9b   :  { %872 = vrot.lane.b32.xlu1 %v1663_v60, %s1782_s8 }
 0xa9c   :  { %1664 = vtanh.f32 %v2179_v61 }
 0xaa2   :  { %v1665_v15 = vpop.eup %1664 }
 0xaa3   :  { %909 = vrot.lane.b32.xlu2 %v1665_v15, %s1782_s8 }
 0xafd   :  { %v910_v27 = vpop.permute.xlu2 %909 }
 0xafe   :  { %v2184_v63 = vmul.f32 %v910_v27, %v893_v39 }
 0xb00   :  { %v2190_v35 = vsel %vm2121_vm8, %v2184_v63, %v2145_v59 }
 0xb01   :  { %v977_v40 = vpack.c.bf16 %v2190_v35, %v2190_v35 }
 0xb03   :  { %981 = vrot.lane.b32.xlu1 %v977_v40, %s1786_s3 }
 0xb0d   :  { %v873_v4 = vpop.permute.xlu1 %872 }
 0xb0e   :  { %v2195_v7 = vmul.f32 %v873_v4, %v856_v2 }
 0xb10   :  { %v2201_v12 = vsel %vm2137_vm9, %v2195_v7, %v2129_v18  ;;  %v927_v34 = vsel %vm2137_vm9, %v2195_v7, 0.0 }
 0xb11   :  { %v955_v16 = vpack.c.bf16 %v2201_v12, %v2201_v12 }
 0xb13   :  { %959 = vrot.lane.b32.xlu0 %v955_v16, %s1786_s3 }
 0xb75   :  { %v982_v59 = vpop.permute.xlu1 %981 }
 0xb76   :  { %1550 = vmatmul.msk.bf16.vlgmr.msra.gmra.mxu3 %vm2544_vm1, %v982_v59 }
 0xb85   :  { %v960_v17 = vpop.permute.xlu0 %959 }
 0xb86   :  { %1548 = vmatmul.msk.bf16.vlgmr.msra.gmra.mxu2 %vm2544_vm1, %v960_v17 }
 0xbf9   :  { %v995_v54 = vpop.f32.mrf.mxu3 }
 0xbfa   :  { %v996_v19 = vadd.f32 %v1549_v51, %v995_v54  ;;  %v2222_v54 = vsel %vm2121_vm8, %v2179_v61, %v2176_v0 }
 0xbfc   :  { %1666 = vtanh.f32 %v996_v19  ;;  %v1552_v31 = vmul.f32 -1.442695, %v996_v19 }
 0xc01   :  { %v997_v18 = vpop.f32.mrf.mxu3 }
 0xc02   :  { %v1667_v21 = vpop.eup %1666 }
 0xc03   :  { %1058 = vrot.lane.b32.xlu0 %v1667_v21, %s1782_s8 }
 0xc09   :  { %v973_v26 = vpop.f32.mrf.mxu2 }
 0xc0a   :  { %v974_v28 = vadd.f32 %v1547_v23, %v973_v26  ;;  %v2233_v26 = vsel %vm2137_vm9, %v2169_v56, %v2166_v50 }
 0xc0c   :  { %1668 = vtanh.f32 %v974_v28  ;;  %v1551_v30 = vmul.f32 -1.442695, %v974_v28 }
 0xc0e   :  { %1670 = vpow2.f32 %v1551_v30 }
 0xc0f   :  { %1672 = vpow2.f32 %v1552_v31 }
 0xc11   :  { %v975_v29 = vpop.f32.mrf.mxu2 }
 0xc12   :  { %v1669_v11 = vpop.eup %1668 }
 0xc13   :  { %1021 = vrot.lane.b32.xlu2 %v1669_v11, %s1782_s8 }
 0xc14   :  { %v1671_v32 = vpop.eup %1670 }
 0xc15   :  { %v1002_v10 = vadd.f32 1.0, %v1671_v32  ;;  %v1673_v36 = vpop.eup %1672 }
 0xc16   :  { %v1039_v39 = vadd.f32 1.0, %v1673_v36 }
 0xc17   :  { %1674 = vrcp.f32 %v1002_v10  ;;  %v1014_v2 = vand.u32 2147483648, %v1002_v10  ;;  %vm1008_vm13 = vweird.f32 %v1002_v10  ;;  %v1012_v48 = vand.u32 2147483647, %v1002_v10 }
 0xc18   :  { %1676 = vrcp.f32 %v1039_v39  ;;  %v1051_v27 = vand.u32 2147483648, %v1039_v39  ;;  %vm1045_vm3 = vweird.f32 %v1039_v39  ;;  %v1049_v40 = vand.u32 2147483647, %v1039_v39 }
 0xc19   :  { %v1015_v53 = vor.u32 1.1754944e-38, %v1014_v2  ;;  %vm1013_vm15 = vcmp.eq.f32.partialorder %v1012_v48, 8.507059e+37 }
 0xc1a   :  { %v1052_v16 = vor.u32 1.1754944e-38, %v1051_v27  ;;  %vm1050_vm1 = vcmp.eq.f32.partialorder %v1049_v40, 8.507059e+37 }
 0xc1d   :  { %v1675_v41 = vpop.eup %1674 }
 0xc1e   :  { %v1004_v42 = vmul.f32 %v1675_v41, %v1002_v10  ;;  %v1677_v43 = vpop.eup %1676  ;;  %vm1009_vm0 = vweird.f32 %v1675_v41 }
 0xc1f   :  { %v1041_v44 = vmul.f32 %v1677_v43, %v1039_v39  ;;  %vm1010_vm14 = vmor %vm1008_vm13, %vm1009_vm0  ;;  %vm1046_vm2 = vweird.f32 %v1677_v43 }
 0xc20   :  { %v1005_v22 = vsub.f32 1.0, %v1004_v42  ;;  %vm1047_vm12 = vmor %vm1045_vm3, %vm1046_vm2 }
 0xc21   :  { %v1042_v46 = vsub.f32 1.0, %v1041_v44 }
 0xc22   :  { %v1006_v1 = vmul.f32 %v1675_v41, %v1005_v22 }
 0xc23   :  { %v1043_v52 = vmul.f32 %v1677_v43, %v1042_v46 }
 0xc24   :  { %v1007_v45 = vadd.f32 %v1675_v41, %v1006_v1 }
 0xc25   :  { %v1044_v15 = vadd.f32 %v1677_v43, %v1043_v52 }
 0xc26   :  { %v1011_v49 = vsel %vm1010_vm14, %v1675_v41, %v1007_v45  ;;  %v1557_v41 = vld [vmem:[%s2537_s1 + $0xc] sm:$0x3] }
 0xc27   :  { %v1016_v58 = vsel %vm1013_vm15, %v1015_v53, %v1011_v49  ;;  %v1048_v4 = vsel %vm1047_vm12, %v1677_v43, %v1044_v15 }
 0xc28   :  { %v1053_v59 = vsel %vm1050_vm1, %v1052_v16, %v1048_v4  ;;  %v1019_v28 = vmul.f32 %v1016_v58, %v2233_v26  ;;  %vm2561_vm1 = vcmask 261120  }
 0xc29   :  { %v1056_v19 = vmul.f32 %v1053_v59, %v2222_v54  ;;  %vm2562_vm0 = vmmov %vm2561_vm1 }
 0xc6d   :  { %v1022_v57 = vpop.permute.xlu2 %1021 }
 0xc6e   :  { %v1024_v60 = vmul.f32 %v1022_v57, %v1016_v58 }
 0xc70   :  { %1026 = vrot.lane.b32.xlu1 %v1024_v60, %s1786_s3 }
 0xc75   :  { %v1059_v17 = vpop.permute.xlu0 %1058 }
 0xc76   :  { %v1061_v51 = vmul.f32 %v1059_v17, %v1053_v59 }
 0xc78   :  { %1063 = vrot.lane.b32.xlu2 %v1061_v51, %s1786_s3 }
 0xcd2   :  { %v1064_v18 = vpop.permute.xlu2 %1063 }
 0xcd3   :  { %v2225_v21 = vadd.f32 %v1064_v18, %v1056_v19 }
 0xcd5   :  { %1678 = vtanh.f32 %v2225_v21 }
 0xcdb   :  { %v1679_v23 = vpop.eup %1678 }
 0xcdc   :  { %1069 = vrot.lane.b32.xlu1 %v1679_v23, %s1782_s8 }
 0xce2   :  { %v1027_v0 = vpop.permute.xlu1 %1026 }
 0xce3   :  { %v2236_v61 = vadd.f32 %v1027_v0, %v1019_v28 }
 0xce5   :  { %1680 = vtanh.f32 %v2236_v61 }
 0xceb   :  { %v1681_v29 = vpop.eup %1680 }
 0xcec   :  { %1032 = vrot.lane.b32.xlu0 %v1681_v29, %s1782_s8 }
 0xd4e   :  { %v1070_v11 = vpop.permute.xlu1 %1069 }
 0xd4f   :  { %v2240_v30 = vmul.f32 %v1070_v11, %v1053_v59 }
 0xd51   :  { %v2246_v31 = vsel %vm2067_vm5, %v2240_v30, %v2190_v35  ;;  %v1088_v25 = vsel %vm2067_vm5, %v2240_v30, 0.0  ;;  %v1396_v30 = vstv %s1395_s12 }
 0xd52   :  { %v1137_v50 = vpack.c.bf16 %v2246_v31, %v2246_v31 }
 0xd54   :  { %1141 = vrot.lane.b32.xlu0 %v1137_v50, %s1786_s3 }
 0xd5e   :  { %v1033_v56 = vpop.permute.xlu0 %1032 }
 0xd5f   :  { %v2251_v32 = vmul.f32 %v1033_v56, %v1016_v58 }
 0xd61   :  { %v2257_v10 = vsel %vm2051_vm4, %v2251_v32, %v2201_v12  ;;  %v1559_v12 = vld [vmem:[%s2538_s2 + $0x2] sm:$0x3] }
 0xd62   :  { %v1115_v36 = vpack.c.bf16 %v2257_v10, %v2257_v10 }
 0xd64   :  { %1119 = vrot.lane.b32.xlu2 %v1115_v36, %s1786_s3 }
 0xdbe   :  { %v1120_v35 = vpop.permute.xlu2 %1119 }
 0xdbf   :  { %1558 = vmatmul.msk.bf16.vlgmr.msrb.gmra.mxu0 %vm2561_vm1, %v1120_v35 }
 0xdc6   :  { %v1142_v39 = vpop.permute.xlu0 %1141 }
 0xdc7   :  { %1560 = vmatmul.msk.bf16.vlgmr.msrb.gmra.mxu1 %vm2562_vm0, %v1142_v39 }
 0xe3c   :  { %v1133_v42 = vpop.f32.mrf.mxu0 }
 0xe3d   :  { %v1134_v22 = vadd.f32 %v1557_v41, %v1133_v42 }
 0xe3f   :  { %1682 = vtanh.f32 %v1134_v22  ;;  %v1561_v53 = vmul.f32 -1.442695, %v1134_v22 }
 0xe44   :  { %v1135_v43 = vpop.f32.mrf.mxu0  ;;  %v1155_v1 = vpop.f32.mrf.mxu1 }
 0xe45   :  { %v1683_v44 = vpop.eup %1682  ;;  %v1156_v45 = vadd.f32 %v1559_v12, %v1155_v1  ;;  %v2278_v12 = vsel %vm2067_vm5, %v2225_v21, %v2222_v54 }
 0xe46   :  { %1181 = vrot.lane.b32.xlu1 %v1683_v44, %s1782_s8 }
 0xe47   :  { %1684 = vtanh.f32 %v1156_v45  ;;  %v1562_v48 = vmul.f32 -1.442695, %v1156_v45 }
 0xe49   :  { %1686 = vpow2.f32 %v1562_v48 }
 0xe4c   :  { %v1157_v46 = vpop.f32.mrf.mxu1 }
 0xe4d   :  { %v1685_v2 = vpop.eup %1684  ;;  %v2289_v46 = vsel %vm2051_vm4, %v2236_v61, %v2233_v26 }
 0xe4e   :  { %1218 = vrot.lane.b32.xlu2 %v1685_v2, %s1782_s8 }
 0xe4f   :  { %v1687_v49 = vpop.eup %1686 }
 0xe50   :  { %v1199_v52 = vadd.f32 1.0, %v1687_v49 }
 0xe52   :  { %1688 = vrcp.f32 %v1199_v52  ;;  %v1211_v59 = vand.u32 2147483648, %v1199_v52  ;;  %vm1205_vm14 = vweird.f32 %v1199_v52  ;;  %v1209_v17 = vand.u32 2147483647, %v1199_v52 }
 0xe53   :  { %1690 = vpow2.f32 %v1561_v53 }
 0xe54   :  { %v1212_v18 = vor.u32 1.1754944e-38, %v1211_v59  ;;  %vm1210_vm2 = vcmp.eq.f32.partialorder %v1209_v17, 8.507059e+37 }
 0xe58   :  { %v1689_v57 = vpop.eup %1688 }
 0xe59   :  { %v1691_v58 = vpop.eup %1690  ;;  %v1201_v60 = vmul.f32 %v1689_v57, %v1199_v52  ;;  %vm1206_vm13 = vweird.f32 %v1689_v57 }
 0xe5a   :  { %v1162_v15 = vadd.f32 1.0, %v1691_v58  ;;  %vm1207_vm15 = vmor %vm1205_vm14, %vm1206_vm13  ;;  %vm2563_vm13 = vcmask 261120  }
 0xe5b   :  { %v1202_v27 = vsub.f32 1.0, %v1201_v60  ;;  %vm2564_vm14 = vmmov %vm2563_vm13 }
 0xe5c   :  { %1692 = vrcp.f32 %v1162_v15  ;;  %v1174_v56 = vand.u32 2147483648, %v1162_v15  ;;  %vm1168_vm12 = vweird.f32 %v1162_v15  ;;  %v1172_v36 = vand.u32 2147483647, %v1162_v15 }
 0xe5d   :  { %v1203_v40 = vmul.f32 %v1689_v57, %v1202_v27  ;;  %v1298_v27 = vld [vmem:[%s2538_s2] sm:$0x3] }
 0xe5e   :  { %v1175_v39 = vor.u32 1.1754944e-38, %v1174_v56  ;;  %vm1173_vm0 = vcmp.eq.f32.partialorder %v1172_v36, 8.507059e+37 }
 0xe5f   :  { %v1204_v4 = vadd.f32 %v1689_v57, %v1203_v40 }
 0xe61   :  { %v1208_v51 = vsel %vm1207_vm15, %v1689_v57, %v1204_v4  ;;  %vm291_vm15 = vcmask 1040384  }
 0xe62   :  { %v1693_v16 = vpop.eup %1692  ;;  %v1213_v28 = vsel %vm1210_vm2, %v1212_v18, %v1208_v51 }
 0xe63   :  { %v1164_v19 = vmul.f32 %v1693_v16, %v1162_v15  ;;  %vm1169_vm3 = vweird.f32 %v1693_v16  ;;  %v1216_v43 = vmul.f32 %v1213_v28, %v2278_v12 }
 0xe64   :  { %vm1170_vm1 = vmor %vm1168_vm12, %vm1169_vm3 }
 0xe65   :  { %v1165_v29 = vsub.f32 1.0, %v1164_v19  ;;  %v1567_v19 = vld [vmem:[%s2537_s1 + $0xe] sm:$0x3] }
 0xe67   :  { %v1166_v11 = vmul.f32 %v1693_v16, %v1165_v29 }
 0xe69   :  { %v1167_v50 = vadd.f32 %v1693_v16, %v1166_v11 }
 0xe6b   :  { %v1171_v35 = vsel %vm1170_vm1, %v1693_v16, %v1167_v50  ;;  %vm299_vm1 = vcmask 253952  }
 0xe6c   :  { %v1176_v42 = vsel %vm1173_vm0, %v1175_v39, %v1171_v35 }
 0xe6d   :  { %v1179_v2 = vmul.f32 %v1176_v42, %v2289_v46 }
 0xea8   :  { %v1219_v23 = vpop.permute.xlu2 %1218 }
 0xea9   :  { %v1221_v0 = vmul.f32 %v1219_v23, %v1213_v28 }
 0xeab   :  { %1223 = vrot.lane.b32.xlu1 %v1221_v0, %s1786_s3 }
 0xeb8   :  { %v1182_v41 = vpop.permute.xlu1 %1181 }
 0xeb9   :  { %v1184_v22 = vmul.f32 %v1182_v41, %v1176_v42 }
 0xebb   :  { %1186 = vrot.lane.b32.xlu0 %v1184_v22, %s1786_s3 }
 0xf1d   :  { %v1224_v1 = vpop.permute.xlu1 %1223 }
 0xf1e   :  { %v2281_v44 = vadd.f32 %v1224_v1, %v1216_v43 }
 0xf20   :  { %1694 = vtanh.f32 %v2281_v44 }
 0xf26   :  { %v1695_v45 = vpop.eup %1694 }
 0xf27   :  { %1229 = vrot.lane.b32.xlu0 %v1695_v45, %s1782_s8 }
 0xf2d   :  { %v1187_v54 = vpop.permute.xlu0 %1186 }
 0xf2e   :  { %v2292_v21 = vadd.f32 %v1187_v54, %v1179_v2 }
 0xf30   :  { %1696 = vtanh.f32 %v2292_v21  ;;  %v2374_v9 = vsel %vm1981_vm6, %v2292_v21, %v2289_v46 }
 0xf36   :  { %v1697_v48 = vpop.eup %1696 }
 0xf37   :  { %1192 = vrot.lane.b32.xlu2 %v1697_v48, %s1782_s8 }
 0xf91   :  { %v1193_v49 = vpop.permute.xlu2 %1192 }
 0xf92   :  { %v2296_v52 = vmul.f32 %v1193_v49, %v1176_v42  ;;  %v286_v49 = vsel %vm1913_vm10, %v1910_v6, 0.0 }
 0xf94   :  { %v2302_v53 = vsel %vm1981_vm6, %v2296_v52, %v2257_v10 }
 0xf95   :  { %v1275_v26 = vpack.c.bf16 %v2302_v53, %v2302_v53 }
 0xf97   :  { %1279 = vrot.lane.b32.xlu1 %v1275_v26, %s1786_s3 }
 0xf99   :  { %v1230_v61 = vpop.permute.xlu0 %1229 }
 0xf9a   :  { %v2307_v57 = vmul.f32 %v1230_v61, %v1213_v28 }
 0xf9c   :  { %v2313_v58 = vsel %vm1997_vm7, %v2307_v57, %v2246_v31  ;;  %v287_v31 = vsel %vm1928_vm11, %v1925_v13, 0.0 }
 0xf9d   :  { %v1297_v60 = vpack.c.bf16 %v2313_v58, %v2313_v58  ;;  %v301_v17 = vpack.c.bf16 %v287_v31, %v287_v31 }
 0xf9f   :  { %1300 = vrot.lane.b32.xlu2 %v1297_v60, %s1786_s3  ;;  %v303_v51 = vrot.slane %v301_v17, 3 }
 0xfa1   :  { %v306_v28 = vsel %vm291_vm15, %v301_v17, %v303_v51 }
 0xff9   :  { %v1301_v10 = vpop.permute.xlu2 %1300 }
 0xffa   :  { %1569 = vmatmul.msk.bf16.vlgmr.msrb.gmra.mxu3 %vm2563_vm13, %v1301_v10 }
0x1009   :  { %v1280_v15 = vpop.permute.xlu1 %1279 }
0x100a   :  { %1568 = vmatmul.msk.bf16.vlgmr.msrb.gmra.mxu2 %vm2564_vm14, %v1280_v15  ;;  %v288_v15 = vpack.c.bf16 %v286_v49, %v286_v49 }
0x107d   :  { %v1314_v40 = vpop.f32.mrf.mxu3 }
0x107e   :  { %v1315_v4 = vadd.f32 %v1314_v40, %v1298_v27  ;;  %v290_v40 = vrot.slane %v288_v15, 3 }
0x1080   :  { %1698 = vtanh.f32 %v1315_v4  ;;  %v1571_v0 = vmul.f32 -1.442695, %v1315_v4  ;;  %v448_v4 = vsel %vm1981_vm6, %v1978_v20, 0.0 }
0x1081   :  { %v461_v8 = vpack.c.bf16 %v448_v4, %v448_v4 }
0x1085   :  { %v1316_v16 = vpop.f32.mrf.mxu3 }
0x1086   :  { %v1699_v59 = vpop.eup %1698  ;;  %v294_v16 = vsel %vm291_vm15, %v288_v15, %v290_v40  ;;  %v1087_v15 = vsel %vm2051_vm4, %v2251_v32, 0.0  ;;  %v1248_v32 = vsel %vm1997_vm7, %v2307_v57, 0.0 }
0x1087   :  { %1377 = vrot.lane.b32.xlu1 %v1699_v59, %s1782_s8  ;;  %v1089_v4 = vpack.c.bf16 %v1087_v15, %v1087_v15 }
0x108d   :  { %v1293_v18 = vpop.f32.mrf.mxu2 }
0x108e   :  { %v1294_v23 = vadd.f32 %v1567_v19, %v1293_v18  ;;  %v463_v19 = vrot.slane %v461_v8, 3  ;;  %v767_v18 = vsel %vm2121_vm8, %v2118_v3, 0.0 }
0x108f   :  { %308 = vrot.lane.b32.xlu1 %v306_v28, %s1786_s3 }
0x1090   :  { %1700 = vtanh.f32 %v1294_v23  ;;  %v1570_v50 = vmul.f32 -1.442695, %v1294_v23 }
0x1091   :  { %1702 = vpow2.f32 %v1571_v0  ;;  %v466_v0 = vsel %vm291_vm15, %v461_v8, %v463_v19  ;;  %v1091_v8 = vrot.slane %v1089_v4, 3 }
0x1095   :  { %v1295_v14 = vpop.f32.mrf.mxu2 }
0x1096   :  { %v1701_v13 = vpop.eup %1700 }
0x1097   :  { %1340 = vrot.lane.b32.xlu0 %v1701_v13, %s1782_s8  ;;  %v1703_v29 = vpop.eup %1702  ;;  %v769_v13 = vpack.c.bf16 %v767_v18, %v767_v18 }
0x1098   :  { %v1358_v11 = vadd.f32 1.0, %v1703_v29 }
0x1099   :  { %v771_v29 = vrot.slane %v769_v13, 3 }
0x109a   :  { %1704 = vrcp.f32 %v1358_v11  ;;  %v1370_v1 = vand.u32 2147483648, %v1358_v11  ;;  %vm1364_vm2 = vweird.f32 %v1358_v11  ;;  %v1368_v45 = vand.u32 2147483647, %v1358_v11 }
0x109b   :  { %1706 = vpow2.f32 %v1570_v50  ;;  %v774_v3 = vsel %vm291_vm15, %v769_v13, %v771_v29 }
0x109c   :  { %v1371_v48 = vor.u32 1.1754944e-38, %v1370_v1  ;;  %vm1369_vm12 = vcmp.eq.f32.partialorder %v1368_v45, 8.507059e+37  ;;  %v2388_v1 = vsel %vm1997_vm7, %v2281_v44, %v2278_v12  ;;  %v768_v12 = vsel %vm2137_vm9, %v2134_v5, 0.0 }
0x109d   :  { %v608_v5 = vsel %vm2051_vm4, %v2048_v33, 0.0  ;;  %vm2569_vm4 = vcmask 254976  }
0x109e   :  { %v621_v40 = vpack.c.bf16 %v608_v5, %v608_v5  ;;  %vm2572_vm9 = vmmov %vm2569_vm4 }
0x10a0   :  { %v1705_v56 = vpop.eup %1704  ;;  %v623_v33 = vrot.slane %v621_v40, 3 }
0x10a1   :  { %v1707_v36 = vpop.eup %1706  ;;  %v1360_v35 = vmul.f32 %v1705_v56, %v1358_v11  ;;  %vm1365_vm11 = vweird.f32 %v1705_v56  ;;  %v928_v11 = vsel %vm2121_vm8, %v2184_v63, 0.0  ;;  %vm2571_vm8 = vmmov %vm2569_vm4 }
0x10a2   :  { %v1321_v39 = vadd.f32 1.0, %v1707_v36  ;;  %vm1366_vm3 = vmor %vm1364_vm2, %vm1365_vm11  ;;  %v941_v50 = vpack.c.bf16 %v928_v11, %v928_v11  ;;  %v1247_v36 = vsel %vm1981_vm6, %v2296_v52, 0.0  ;;  %v626_v19 = vsel %vm291_vm15, %v621_v40, %v623_v33 }
0x10a3   :  { %v1361_v41 = vsub.f32 1.0, %v1360_v35  ;;  %v1249_v35 = vpack.c.bf16 %v1247_v36, %v1247_v36  ;;  %vm2456_vm6 = vcmp.lt.s32.totalorder %v1908_v62, %v1396_v30 }
0x10a4   :  { %1708 = vrcp.f32 %v1321_v39  ;;  %v1333_v59 = vand.u32 2147483648, %v1321_v39  ;;  %vm1327_vm0 = vweird.f32 %v1321_v39  ;;  %v1331_v17 = vand.u32 2147483647, %v1321_v39 }
0x10a5   :  { %v1362_v42 = vmul.f32 %v1705_v56, %v1361_v41  ;;  %v1251_v41 = vrot.slane %v1249_v35, 3 }
0x10a6   :  { %v1334_v20 = vor.u32 1.1754944e-38, %v1333_v59  ;;  %vm1332_vm14 = vcmp.eq.f32.partialorder %v1331_v17, 8.507059e+37  ;;  %v929_v59 = vpack.c.bf16 %v927_v34, %v927_v34  ;;  %v1261_v17 = vpack.c.bf16 %v1248_v32, %v1248_v32 }
0x10a7   :  { %v1363_v22 = vadd.f32 %v1705_v56, %v1362_v42  ;;  %v1254_v42 = vsel %vm291_vm15, %v1249_v35, %v1251_v41 }
0x10a8   :  { %v931_v47 = vrot.slane %v929_v59, 3  ;;  %v1263_v7 = vrot.slane %v1261_v17, 3 }
0x10a9   :  { %v1367_v2 = vsel %vm1366_vm3, %v1705_v56, %v1363_v22  ;;  %v943_v56 = vrot.slane %v941_v50, 3 }
0x10aa   :  { %v1709_v43 = vpop.eup %1708  ;;  %v2336_v61 = vsel %vm1369_vm12, %v1371_v48, %v1367_v2  ;;  %v1266_v18 = vsel %vm291_vm15, %v1261_v17, %v1263_v7 }
0x10ab   :  { %v1323_v54 = vmul.f32 %v1709_v43, %v1321_v39  ;;  %vm1328_vm10 = vweird.f32 %v1709_v43  ;;  %v946_v39 = vsel %vm291_vm15, %v941_v50, %v943_v56  ;;  %v1375_v55 = vmul.f32 %v2336_v61, %v2388_v1 }
0x10ac   :  { %vm1329_vm13 = vmor %vm1327_vm0, %vm1328_vm10 }
0x10ad   :  { %v1324_v10 = vsub.f32 1.0, %v1323_v54 }
0x10af   :  { %v1325_v27 = vmul.f32 %v1709_v43, %v1324_v10 }
0x10b1   :  { %v1326_v6 = vadd.f32 %v1709_v43, %v1325_v27 }
0x10b3   :  { %v1330_v51 = vsel %vm1329_vm13, %v1709_v43, %v1326_v6  ;;  %v607_v43 = vsel %vm2067_vm5, %v2064_v37, 0.0  ;;  %v447_v37 = vsel %vm1997_vm7, %v1994_v24, 0.0  ;;  %vm2570_vm5 = vmmov %vm2569_vm4 }
0x10b4   :  { %v2352_v23 = vsel %vm1332_vm14, %v1334_v20, %v1330_v51  ;;  %v609_v45 = vpack.c.bf16 %v607_v43, %v607_v43  ;;  %v449_v49 = vpack.c.bf16 %v447_v37, %v447_v37  ;;  %v1094_v51 = vsel %vm291_vm15, %v1089_v4, %v1091_v8 }
0x10b5   :  { %v1338_v63 = vmul.f32 %v2352_v23, %v2374_v9  ;;  %v1101_v20 = vpack.c.bf16 %v1088_v25, %v1088_v25 }
0x10b6   :  { %v611_v54 = vrot.slane %v609_v45, 3  ;;  %v451_v24 = vrot.slane %v449_v49, 3 }
0x10b8   :  { %v454_v6 = vsel %vm291_vm15, %v449_v49, %v451_v24 }
0x10f9   :  { %v1378_v26 = vpop.permute.xlu1 %1377 }
0x10fa   :  { %v1380_v60 = vmul.f32 %v1378_v26, %v2336_v61  ;;  %v781_v26 = vpack.c.bf16 %v768_v12, %v768_v12 }
0x10fc   :  { %1382 = vrot.lane.b32.xlu0 %v1380_v60, %s1786_s3  ;;  %v614_v60 = vsel %vm291_vm15, %v609_v45, %v611_v54  ;;  %v783_v10 = vrot.slane %v781_v26, 3 }
0x1101   :  { %v309_v31 = vpop.permute.xlu1 %308 }
0x1102   :  { %1506 = vst.msk [vmem:[%s2542_s6 + $0x7] sm:$0x1] %vm299_vm1, %v309_v31  ;;  %v786_v31 = vsel %vm291_vm15, %v781_v26, %v783_v10 }
0x1104   :  { %296 = vrot.lane.b32.xlu0 %v294_v16, %s1786_s3 }
0x1109   :  { %v1341_v28 = vpop.permute.xlu0 %1340 }
0x110a   :  { %v1343_v14 = vmul.f32 %v1341_v28, %v2352_v23  ;;  %v934_v28 = vsel %vm291_vm15, %v929_v59, %v931_v47 }
0x110c   :  { %468 = vrot.lane.b32.xlu0 %v466_v0, %s1786_s3  ;;  %1345 = vrot.lane.b32.xlu2 %v1343_v14, %s1786_s3  ;;  %v1103_v14 = vrot.slane %v1101_v20, 3 }
0x110e   :  { %v1106_v38 = vsel %vm291_vm15, %v1101_v20, %v1103_v14 }
0x1114   :  { %776 = vrot.lane.b32.xlu0 %v774_v3, %s1786_s3 }
0x111c   :  { %948 = vrot.lane.b32.xlu0 %v946_v39, %s1786_s3 }
0x1124   :  { %1256 = vrot.lane.b32.xlu0 %v1254_v42, %s1786_s3 }
0x1166   :  { %v1346_v52 = vpop.permute.xlu2 %1345 }
0x1167   :  { %v2378_v22 = vadd.f32 %v1346_v52, %v1338_v63 }
0x1169   :  { %1710 = vtanh.f32 %v2378_v22 }
0x116e   :  { %v1383_v46 = vpop.permute.xlu0 %1382 }
0x116f   :  { %v1711_v21 = vpop.eup %1710  ;;  %v2392_v2 = vadd.f32 %v1383_v46, %v1375_v55 }
0x1170   :  { %1351 = vrot.lane.b32.xlu1 %v1711_v21, %s1782_s8 }
0x1171   :  { %1712 = vtanh.f32 %v2392_v2 }
0x1176   :  { %v297_v44 = vpop.permute.xlu0 %296 }
0x1177   :  { %v1713_v48 = vpop.eup %1712  ;;  %300 = vst.msk [vmem:[%s2541_s5] sm:$0x1] %vm299_vm1, %v297_v44 }
0x1178   :  { %616 = vrot.lane.b32.xlu1 %v614_v60, %s1786_s3  ;;  %1388 = vrot.lane.b32.xlu2 %v1713_v48, %s1782_s8 }
0x117e   :  { %v469_v27 = vpop.permute.xlu0 %468 }
0x117f   :  { %1516 = vst.msk [vmem:[%s2542_s6 + $0x6] sm:$0x1] %vm299_vm1, %v469_v27 }
0x1180   :  { %788 = vrot.lane.b32.xlu1 %v786_v31, %s1786_s3  ;;  %456 = vrot.lane.b32.xlu2 %v454_v6, %s1786_s3 }
0x1186   :  { %v777_v16 = vpop.permute.xlu0 %776 }
0x1187   :  { %1535 = vst.msk [vmem:[%s2541_s5 + $0x3] sm:$0x1] %vm299_vm1, %v777_v16 }
0x1188   :  { %1096 = vrot.lane.b32.xlu1 %v1094_v51, %s1786_s3  ;;  %628 = vrot.lane.b32.xlu2 %v626_v19, %s1786_s3 }
0x118e   :  { %v949_v57 = vpop.permute.xlu0 %948 }
0x118f   :  { %1546 = vst.msk [vmem:[%s2542_s6 + $0x3] sm:$0x1] %vm299_vm1, %v949_v57 }
0x1190   :  { %1268 = vrot.lane.b32.xlu1 %v1266_v18, %s1786_s3  ;;  %936 = vrot.lane.b32.xlu2 %v934_v28, %s1786_s3 }
0x1196   :  { %v1257_v13 = vpop.permute.xlu0 %1256 }
0x1197   :  { %1565 = vst.msk [vmem:[%s2541_s5 + $0x6] sm:$0x1] %vm299_vm1, %v1257_v13 }
0x1198   :  { %1108 = vrot.lane.b32.xlu2 %v1106_v38, %s1786_s3 }
0x11d2   :  { %v1389_v0 = vpop.permute.xlu2 %1388 }
0x11d3   :  { %v1391_v29 = vmul.f32 %v1389_v0, %v2336_v61  ;;  %v1393_v61 = vstv %s1572_s13 }
0x11d4   :  { %vm2478_vm7 = vcmp.lt.s32.totalorder %v1908_v62, %v1393_v61  ;;  %v1405_v62 = vsel %vm2456_vm6, %v2392_v2, %v2388_v1 }
0x11d5   :  { %v1407_v50 = vsel %vm2456_vm6, %v1391_v29, 0.0  ;;  %v1404_v42 = vsel %vm2456_vm6, %v1391_v29, %v2313_v58  ;;  %v1401_v37 = vsel %vm2478_vm7, %v2378_v22, %v2374_v9 }
0x11d6   :  { %v1420_v3 = vpack.c.bf16 %v1407_v50, %v1407_v50 }
0x11d8   :  { %v1422_v56 = vrot.slane %v1420_v3, 3 }
0x11da   :  { %v457_v36 = vpop.permute.xlu2 %456  ;;  %v1425_v35 = vsel %vm291_vm15, %v1420_v3, %v1422_v56 }
0x11db   :  { %1515 = vst.msk [vmem:[%s2541_s5 + $0x1] sm:$0x1] %vm299_vm1, %v457_v36  ;;  %1427 = vrot.lane.b32.xlu0 %v1425_v35, %s1786_s3 }
0x11e2   :  { %v1352_v39 = vpop.permute.xlu1 %1351  ;;  %v629_v41 = vpop.permute.xlu2 %628 }
0x11e3   :  { %v1354_v63 = vmul.f32 %v1352_v39, %v2352_v23  ;;  %1526 = vst.msk [vmem:[%s2542_s6 + $0x5] sm:$0x1] %vm299_vm1, %v629_v41  ;;  %1443 = vrot.lane.b32.xlu0 %v1404_v42, %s1786_s3 }
0x11e5   :  { %v1406_v43 = vsel %vm2478_vm7, %v1354_v63, 0.0  ;;  %v1400_v58 = vsel %vm2478_vm7, %v1354_v63, %v2302_v53 }
0x11e6   :  { %v1408_v23 = vpack.c.bf16 %v1406_v43, %v1406_v43  ;;  %1432 = vrot.lane.b32.xlu1 %v1400_v58, %s1786_s3 }
0x11e8   :  { %v1410_v55 = vrot.slane %v1408_v23, 3 }
0x11ea   :  { %v617_v46 = vpop.permute.xlu1 %616  ;;  %v937_v21 = vpop.permute.xlu2 %936  ;;  %v1413_v45 = vsel %vm291_vm15, %v1408_v23, %v1410_v55 }
0x11eb   :  { %1525 = vst.msk [vmem:[%s2541_s5 + $0x2] sm:$0x1] %vm299_vm1, %v617_v46  ;;  %1415 = vrot.lane.b32.xlu2 %v1413_v45, %s1786_s3 }
0x11ec   :  { %1545 = vst.msk [vmem:[%s2541_s5 + $0x4] sm:$0x1] %vm299_vm1, %v937_v21 }
0x11ee   :  { %1448 = vrot.lane.b32.xlu1 %v1405_v62, %s1787_s15 }
0x11f2   :  { %v789_v53 = vpop.permute.xlu1 %788  ;;  %v1109_v54 = vpop.permute.xlu2 %1108 }
0x11f3   :  { %1536 = vst.msk [vmem:[%s2542_s6 + $0x4] sm:$0x1] %vm299_vm1, %v789_v53  ;;  %1438 = vrot.lane.b32.xlu2 %v1401_v37, %s1787_s15 }
0x11f4   :  { %1556 = vst.msk [vmem:[%s2542_s6 + $0x2] sm:$0x1] %vm299_vm1, %v1109_v54 }
0x11fa   :  { %v1097_v1 = vpop.permute.xlu1 %1096 }
0x11fb   :  { %1555 = vst.msk [vmem:[%s2541_s5 + $0x5] sm:$0x1] %vm299_vm1, %v1097_v1 }
0x1202   :  { %v1269_v2 = vpop.permute.xlu1 %1268 }
0x1203   :  { %1566 = vst.msk [vmem:[%s2542_s6 + $0x1] sm:$0x1] %vm299_vm1, %v1269_v2 }
0x1245   :  { %v1416_v9 = vpop.permute.xlu2 %1415 }
0x1246   :  { %1573 = vst.msk [vmem:[%s2541_s5 + $0x7] sm:$0x1] %vm299_vm1, %v1416_v9 }
0x124d   :  { %v1439_v22 = vpop.permute.xlu2 %1438  ;;  %v1428_v12 = vpop.permute.xlu0 %1427 }
0x124e   :  { %1441 = vst.msk [vmem:[#allocation3] sm:$0x3] %vm2569_vm4, %v1439_v22 }
0x124f   :  { %1430 = vst.msk [vmem:[%s2542_s6] sm:$0x1] %vm299_vm1, %v1428_v12 }
0x1255   :  { %v1444_v44 = vpop.permute.xlu0 %1443 }
0x1256   :  { %1446 = vst.msk [vmem:[#allocation4] sm:$0x3] %vm2570_vm5, %v1444_v44 }
0x1258   :  { %v1433_v48 = vpop.permute.xlu1 %1432 }
0x1259   :  { %1436 = vst.msk [vmem:[#allocation2] sm:$0x3] %vm2571_vm8, %v1433_v48 }
0x1260   :  { %v1449_v49 = vpop.permute.xlu1 %1448 }
0x1261   :  { %1451 = vst.msk [vmem:[#allocation5] sm:$0x3] %vm2572_vm9, %v1449_v49 }
0x1262   :  { %1472 = vsyncpa [#allocation9], 1 }
0x1263   :  { %1473 = vsyncpa [#allocation11], 1 }

// kernel: _lambda_.7
= control target key start
LH: loop header
LB: loop body
LE: loop exit
PB: predicated region body
PF: predicated region fallthrough
CT: control target
= control target key end

     0   :  { %s1679_s27 = smov [#allocation7]   ;;  %s2443_s0 = inlined_call_operand.vmem [shape: s32[8], index: 0, kind: input, shape index: {}]   ;;  %s2444_s1 = inlined_call_operand.vmem [shape: f32[8,2,128], index: 1, kind: input, shape index: {}]   ;;  %s2445_s2 = inlined_call_operand.vmem [shape: f32[8,2,128], index: 2, kind: input, shape index: {}]   ;;  %s2446_s3 = inlined_call_operand.vmem [shape: bf16[32,128], index: 3, kind: input, shape index: {}]   ;;  %s2447_s4 = inlined_call_operand.vmem [shape: bf16[32,128], index: 4, kind: input, shape index: {}]   ;;  %s2448_s5 = inlined_call_operand.vmem [shape: f32[1,64], index: 5, kind: input, shape index: {}]   ;;  %s2449_s6 = inlined_call_operand.vmem [shape: f32[8,2,1], index: 6, kind: output, shape index: {0}]   ;;  %s2450_s7 = inlined_call_operand.vmem [shape: f32[8,2,1], index: 7, kind: output, shape index: {1}]  }
   0x1   :  { %s14_s26 = sshll.u32 %s2443_s0, 4  ;;  %s15_s26 = int_to_ptr.vmem [resolvable:$true] %s14_s26 }
   0x2   :  { %17 = dma.vmem_to_smem %s15_s26, 16, %s1679_s27, [#allocation6] }
   0x3   :  { %1677 = dma.done.wait [#allocation6], 16 }
   0x4   :  { %1678 = vsyncadd [#allocation6], 4294967280 }
   0x5   :  { %20 = sfence }
   0x6   :  { %v1730_v0 = vld [vmem:[%s2446_s3 + $0x8] sm:$0xff]  ;;  %vm2451_vm0 = vcmask 254976   ;;  %v1680_v2 = vmov 0.0   ;;  %v1743_v3 = vld [vmem:[%s2446_s3] sm:$0xff]  ;;  %vm2452_vm1 = vcmask 261120   ;;  %s1681_s3 = smov 32   ;;  %v77_v61 = vlaneseq }
   0x7   :  { %v1735_v1 = vld [vmem:[%s2447_s4 + $0x8] sm:$0xff]  ;;  %73 = vst.msk [vmem:[#allocation2] sm:$0x3] %vm2451_vm0, %v1680_v2  ;;  %118 = vmatpush.bf16.msra.mxu0 %v1730_v0  ;;  %v1748_v4 = vld [vmem:[%s2447_s4] sm:$0xff]  ;;  %308 = vmatpush.bf16.msra.mxu2 %v1730_v0  ;;  %s1682_s15 = smov 64   ;;  %s1683_s16 = smov 96  }
   0x8   :  { %149 = vmatpush.bf16.msra.mxu1 %v1735_v1  ;;  %74 = vst.msk [vmem:[#allocation3] sm:$0x3] %vm2451_vm0, %v1680_v2  ;;  %330 = vmatpush.bf16.msra.mxu3 %v1735_v1  ;;  %v95_v11 = vld [vmem:[%s2444_s1] sm:$0x3]  ;;  %v1446_v15 = vld [vmem:[%s2445_s2 + $0xe] sm:$0x3] }
   0x9   :  { %75 = vst.msk [vmem:[#allocation4] sm:$0x3] %vm2451_vm0, %v1680_v2  ;;  %s238_s17 = sld [smem:[#allocation7]]  ;;  %v1811_v62 = vshrl.u32 %v77_v61, 7 }
   0xa   :  { %76 = vst.msk [vmem:[#allocation5] sm:$0x3] %vm2451_vm0, %v1680_v2  ;;  %s1458_s18 = sld [smem:[#allocation7 + $0x7]] }
   0xb   :  { %119 = vmatpush.bf16.msra.mxu0 %v1743_v3  ;;  %309 = vmatpush.bf16.msra.mxu2 %v1743_v3  ;;  %s1467_s23 = sld [smem:[#allocation7 + $0x6]] }
   0xc   :  { %150 = vmatpush.bf16.msra.mxu1 %v1748_v4  ;;  %331 = vmatpush.bf16.msra.mxu3 %v1748_v4  ;;  %s1466_s24 = sld [smem:[#allocation7 + $0x1]] }
   0xd   :  { %s1477_s29 = sld [smem:[#allocation7 + $0x5]] }
   0xe   :  { %v1759_v5 = vld [vmem:[#allocation2] sm:$0x3]  ;;  %s1476_s30 = sld [smem:[#allocation7 + $0x2]] }
   0xf   :  { %464 = vmatpush.bf16.msrb.mxu0 %v1730_v0  ;;  %v94_v6 = vpack.c.bf16 %v1759_v5, %v1759_v5  ;;  %v89_v7 = vld [vmem:[#allocation3] sm:$0x3]  ;;  %620 = vmatpush.bf16.msrb.mxu2 %v1730_v0  ;;  %v239_v63 = vstv %s238_s17  ;;  %s1486_s11 = sld [smem:[#allocation7 + $0x3]] }
  0x10   :  { %486 = vmatpush.bf16.msrb.mxu1 %v1735_v1  ;;  %642 = vmatpush.bf16.msrb.mxu3 %v1735_v1  ;;  %v1767_v8 = vld [vmem:[#allocation4] sm:$0x3]  ;;  %vm1816_vm10 = vcmp.lt.s32.totalorder %v1811_v62, %v239_v63  ;;  %s1487_s4 = sld [smem:[#allocation7 + $0x4]] }
  0x11   :  { %177 = vrot.lane.b32.xlu1 %v89_v7, %s1681_s3  ;;  %1445 = vmatmul.msk.bf16.vlgmr.msra.gmra.mxu0 %vm2452_vm1, %v94_v6  ;;  %v125_v9 = vpack.c.bf16 %v1767_v8, %v1767_v8  ;;  %v91_v10 = vld [vmem:[#allocation5] sm:$0x3] }
  0x13   :  { %465 = vmatpush.bf16.msrb.mxu0 %v1743_v3  ;;  %1455 = vmatmul.msk.bf16.vlgmr.msra.gmra.mxu1 %vm2452_vm1, %v125_v9 }
  0x14   :  { %487 = vmatpush.bf16.msrb.mxu1 %v1748_v4  ;;  %621 = vmatpush.bf16.msrb.mxu2 %v1743_v3 }
  0x15   :  { %643 = vmatpush.bf16.msrb.mxu3 %v1748_v4 }
  0x17   :  { %776 = vmatpush.bf16.msra.mxu0 %v1730_v0 }
  0x18   :  { %798 = vmatpush.bf16.msra.mxu1 %v1735_v1 }
  0x19   :  { %218 = vrot.lane.b32.xlu1 %v91_v10, %s1681_s3  ;;  %v242_v10 = vstv %s1458_s18 }
  0x1a   :  { %vm1831_vm11 = vcmp.lt.s32.totalorder %v1811_v62, %v242_v10 }
  0x1b   :  { %777 = vmatpush.bf16.msra.mxu0 %v1743_v3 }
  0x1c   :  { %799 = vmatpush.bf16.msra.mxu1 %v1748_v4 }
  0x83   :  { %v1795_v51 = vpop.permute.xlu1 %177 }
  0x8b   :  { %v1801_v55 = vpop.permute.xlu1 %218 }
  0x8e   :  { %v121_v12 = vpop.f32.mrf.mxu0 }
  0x8f   :  { %v122_v13 = vadd.f32 %v121_v12, %v95_v11 }
  0x90   :  { %v152_v14 = vpop.f32.mrf.mxu1 }
  0x91   :  { %1537 = vtanh.f32 %v122_v13  ;;  %v153_v16 = vadd.f32 %v1446_v15, %v152_v14  ;;  %v1456_v21 = vmul.f32 -1.442695, %v122_v13 }
  0x93   :  { %1539 = vtanh.f32 %v153_v16  ;;  %v1457_v22 = vmul.f32 -1.442695, %v153_v16 }
  0x94   :  { %1541 = vpow2.f32 %v1456_v21 }
  0x95   :  { %1543 = vpow2.f32 %v1457_v22 }
  0x96   :  { %v123_v17 = vpop.f32.mrf.mxu0 }
  0x97   :  { %v1538_v18 = vpop.eup %1537 }
  0x98   :  { %v154_v19 = vpop.f32.mrf.mxu1  ;;  %182 = vrot.lane.b32.xlu0 %v1538_v18, %s1682_s15 }
  0x99   :  { %v1540_v20 = vpop.eup %1539  ;;  %v1462_v19 = vld [vmem:[%s2445_s2 + $0xc] sm:$0x3] }
  0x9a   :  { %v1542_v23 = vpop.eup %1541 }
  0x9b   :  { %v159_v24 = vadd.f32 1.0, %v1542_v23  ;;  %v1544_v25 = vpop.eup %1543 }
  0x9c   :  { %v200_v26 = vadd.f32 1.0, %v1544_v25 }
  0x9d   :  { %1545 = vrcp.f32 %v159_v24  ;;  %v171_v35 = vand.u32 2147483648, %v159_v24  ;;  %vm165_vm3 = vweird.f32 %v159_v24  ;;  %v169_v36 = vand.u32 2147483647, %v159_v24 }
  0x9e   :  { %1547 = vrcp.f32 %v200_v26  ;;  %vm206_vm6 = vweird.f32 %v200_v26  ;;  %v212_v44 = vand.u32 2147483648, %v200_v26  ;;  %v210_v45 = vand.u32 2147483647, %v200_v26 }
  0x9f   :  { %v172_v39 = vor.u32 1.1754944e-38, %v171_v35  ;;  %vm170_vm5 = vcmp.eq.f32.partialorder %v169_v36, 8.507059e+37 }
  0xa0   :  { %223 = vrot.lane.b32.xlu0 %v1540_v20, %s1682_s15  ;;  %v213_v47 = vor.u32 1.1754944e-38, %v212_v44  ;;  %vm211_vm9 = vcmp.eq.f32.partialorder %v210_v45, 8.507059e+37 }
  0xa3   :  { %v1546_v27 = vpop.eup %1545 }
  0xa4   :  { %v161_v28 = vmul.f32 %v1546_v27, %v159_v24  ;;  %v1548_v30 = vpop.eup %1547  ;;  %vm166_vm2 = vweird.f32 %v1546_v27  ;;  %v1460_v24 = vld [vmem:[%s2444_s1 + $0x2] sm:$0x3] }
  0xa5   :  { %v202_v32 = vmul.f32 %v1548_v30, %v200_v26  ;;  %vm167_vm4 = vmor %vm165_vm3, %vm166_vm2  ;;  %vm207_vm7 = vweird.f32 %v1548_v30 }
  0xa6   :  { %v162_v29 = vsub.f32 1.0, %v161_v28  ;;  %vm208_vm8 = vmor %vm206_vm6, %vm207_vm7 }
  0xa7   :  { %v203_v34 = vsub.f32 1.0, %v202_v32 }
  0xa8   :  { %v163_v31 = vmul.f32 %v1546_v27, %v162_v29 }
  0xa9   :  { %v204_v38 = vmul.f32 %v1548_v30, %v203_v34 }
  0xaa   :  { %v164_v33 = vadd.f32 %v1546_v27, %v163_v31 }
  0xab   :  { %v205_v42 = vadd.f32 %v1548_v30, %v204_v38 }
  0xac   :  { %v168_v37 = vsel %vm167_vm4, %v1546_v27, %v164_v33 }
  0xad   :  { %v173_v40 = vsel %vm170_vm5, %v172_v39, %v168_v37  ;;  %v209_v46 = vsel %vm208_vm8, %v1548_v30, %v205_v42 }
  0xae   :  { %v214_v48 = vsel %vm211_vm9, %v213_v47, %v209_v46  ;;  %v180_v52 = vmul.f32 %v1795_v51, %v173_v40 }
  0xaf   :  { %v221_v56 = vmul.f32 %v1801_v55, %v214_v48 }
 0x10a   :  { %v183_v41 = vpop.permute.xlu0 %182 }
 0x10b   :  { %v185_v43 = vmul.f32 %v183_v41, %v173_v40 }
 0x10d   :  { %187 = vrot.lane.b32.xlu2 %v185_v43, %s1681_s3 }
 0x112   :  { %v224_v49 = vpop.permute.xlu0 %223 }
 0x113   :  { %v226_v50 = vmul.f32 %v224_v49, %v214_v48 }
 0x115   :  { %228 = vrot.lane.b32.xlu2 %v226_v50, %s1681_s3 }
 0x11d   :  { %247 = vrot.lane.b32.xlu2 %v1759_v5, %s1683_s16 }
 0x167   :  { %v188_v53 = vpop.permute.xlu2 %187 }
 0x168   :  { %v1798_v54 = vadd.f32 %v188_v53, %v180_v52 }
 0x16a   :  { %1549 = vtanh.f32 %v1798_v54 }
 0x16f   :  { %v229_v57 = vpop.permute.xlu2 %228 }
 0x170   :  { %v1550_v58 = vpop.eup %1549  ;;  %v1804_v59 = vadd.f32 %v229_v57, %v221_v56 }
 0x171   :  { %193 = vrot.lane.b32.xlu0 %v1550_v58, %s1682_s15 }
 0x172   :  { %1551 = vtanh.f32 %v1804_v59 }
 0x177   :  { %v248_v5 = vpop.permute.xlu2 %247 }
 0x178   :  { %v1552_v60 = vpop.eup %1551 }
 0x179   :  { %234 = vrot.lane.b32.xlu1 %v1552_v60, %s1682_s15  ;;  %255 = vrot.lane.b32.xlu0 %v1767_v8, %s1683_s16 }
 0x1e3   :  { %v194_v2 = vpop.permute.xlu0 %193 }
 0x1e4   :  { %v1813_v6 = vmul.f32 %v194_v2, %v173_v40  ;;  %v1863_v2 = vsel %vm1816_vm10, %v1798_v54, %v1795_v51  ;;  %v415_v54 = vstv %s1467_s23 }
 0x1e5   :  { %vm1884_vm6 = vcmp.lt.s32.totalorder %v1811_v62, %v415_v54 }
 0x1e6   :  { %v1823_v9 = vsel %vm1816_vm10, %v1813_v6, %v248_v5 }
 0x1e7   :  { %v293_v8 = vpack.c.bf16 %v1823_v9, %v1823_v9 }
 0x1e9   :  { %297 = vrot.lane.b32.xlu1 %v293_v8, %s1681_s3 }
 0x1eb   :  { %v235_v11 = vpop.permute.xlu1 %234  ;;  %v256_v12 = vpop.permute.xlu0 %255 }
 0x1ec   :  { %v1828_v13 = vmul.f32 %v235_v11, %v214_v48  ;;  %v1873_v11 = vsel %vm1831_vm11, %v1804_v59, %v1801_v55 }
 0x1ee   :  { %v1838_v15 = vsel %vm1831_vm11, %v1828_v13, %v256_v12 }
 0x1ef   :  { %v315_v16 = vpack.c.bf16 %v1838_v15, %v1838_v15 }
 0x1f1   :  { %319 = vrot.lane.b32.xlu2 %v315_v16, %s1681_s3 }
 0x24b   :  { %v320_v17 = vpop.permute.xlu2 %319 }
 0x24c   :  { %1463 = vmatmul.msk.bf16.vlgmr.msra.gmra.mxu3 %vm2452_vm1, %v320_v17 }
 0x24d   :  { %954 = vmatpush.bf16.msra.mxu3 %v1735_v1 }
 0x251   :  { %955 = vmatpush.bf16.msra.mxu3 %v1748_v4 }
 0x25b   :  { %v298_v18 = vpop.permute.xlu1 %297 }
 0x25c   :  { %1461 = vmatmul.msk.bf16.vlgmr.msra.gmra.mxu2 %vm2452_vm1, %v298_v18 }
 0x25d   :  { %932 = vmatpush.bf16.msra.mxu2 %v1730_v0 }
 0x261   :  { %933 = vmatpush.bf16.msra.mxu2 %v1743_v3 }
 0x2cf   :  { %v333_v20 = vpop.f32.mrf.mxu3 }
 0x2d0   :  { %v334_v21 = vadd.f32 %v1462_v19, %v333_v20 }
 0x2d2   :  { %1553 = vtanh.f32 %v334_v21  ;;  %v1465_v29 = vmul.f32 -1.442695, %v334_v21 }
 0x2d7   :  { %v335_v22 = vpop.f32.mrf.mxu3 }
 0x2d8   :  { %v1554_v23 = vpop.eup %1553  ;;  %v412_v22 = vstv %s1466_s24 }
 0x2d9   :  { %396 = vrot.lane.b32.xlu1 %v1554_v23, %s1682_s15  ;;  %vm1900_vm7 = vcmp.lt.s32.totalorder %v1811_v62, %v412_v22 }
 0x2df   :  { %v311_v25 = vpop.f32.mrf.mxu2 }
 0x2e0   :  { %v312_v26 = vadd.f32 %v1460_v24, %v311_v25 }
 0x2e2   :  { %1555 = vtanh.f32 %v312_v26  ;;  %v1464_v32 = vmul.f32 -1.442695, %v312_v26 }
 0x2e3   :  { %1557 = vpow2.f32 %v1465_v29 }
 0x2e7   :  { %v313_v27 = vpop.f32.mrf.mxu2 }
 0x2e8   :  { %v1556_v28 = vpop.eup %1555 }
 0x2e9   :  { %359 = vrot.lane.b32.xlu0 %v1556_v28, %s1682_s15  ;;  %v1558_v30 = vpop.eup %1557 }
 0x2ea   :  { %v377_v31 = vadd.f32 1.0, %v1558_v30 }
 0x2ec   :  { %1559 = vrcp.f32 %v377_v31  ;;  %v389_v41 = vand.u32 2147483648, %v377_v31  ;;  %vm383_vm13 = vweird.f32 %v377_v31  ;;  %v387_v42 = vand.u32 2147483647, %v377_v31 }
 0x2ed   :  { %1561 = vpow2.f32 %v1464_v32 }
 0x2ee   :  { %v390_v45 = vor.u32 1.1754944e-38, %v389_v41  ;;  %vm388_vm15 = vcmp.eq.f32.partialorder %v387_v42, 8.507059e+37 }
 0x2f2   :  { %v1560_v33 = vpop.eup %1559 }
 0x2f3   :  { %v1562_v34 = vpop.eup %1561  ;;  %v379_v35 = vmul.f32 %v1560_v33, %v377_v31  ;;  %vm384_vm12 = vweird.f32 %v1560_v33 }
 0x2f4   :  { %v340_v36 = vadd.f32 1.0, %v1562_v34  ;;  %vm385_vm14 = vmor %vm383_vm13, %vm384_vm12 }
 0x2f5   :  { %v380_v37 = vsub.f32 1.0, %v379_v35 }
 0x2f6   :  { %1563 = vrcp.f32 %v340_v36  ;;  %v352_v53 = vand.u32 2147483648, %v340_v36  ;;  %vm346_vm3 = vweird.f32 %v340_v36  ;;  %v350_v56 = vand.u32 2147483647, %v340_v36 }
 0x2f7   :  { %v381_v38 = vmul.f32 %v1560_v33, %v380_v37 }
 0x2f8   :  { %v353_v58 = vor.u32 1.1754944e-38, %v352_v53  ;;  %vm351_vm5 = vcmp.eq.f32.partialorder %v350_v56, 8.507059e+37 }
 0x2f9   :  { %v382_v39 = vadd.f32 %v1560_v33, %v381_v38 }
 0x2fb   :  { %v386_v43 = vsel %vm385_vm14, %v1560_v33, %v382_v39  ;;  %v1470_v33 = vld [vmem:[%s2444_s1 + $0x4] sm:$0x3] }
 0x2fc   :  { %v1564_v40 = vpop.eup %1563  ;;  %v391_v47 = vsel %vm388_vm15, %v390_v45, %v386_v43 }
 0x2fd   :  { %v342_v44 = vmul.f32 %v1564_v40, %v340_v36  ;;  %vm347_vm2 = vweird.f32 %v1564_v40  ;;  %v394_v12 = vmul.f32 %v391_v47, %v1873_v11 }
 0x2fe   :  { %vm348_vm4 = vmor %vm346_vm3, %vm347_vm2 }
 0x2ff   :  { %v343_v49 = vsub.f32 1.0, %v342_v44 }
 0x301   :  { %v344_v50 = vmul.f32 %v1564_v40, %v343_v49 }
 0x303   :  { %v345_v52 = vadd.f32 %v1564_v40, %v344_v50 }
 0x305   :  { %v349_v57 = vsel %vm348_vm4, %v1564_v40, %v345_v52 }
 0x306   :  { %v354_v60 = vsel %vm351_vm5, %v353_v58, %v349_v57 }
 0x307   :  { %v357_v5 = vmul.f32 %v354_v60, %v1863_v2 }
 0x34b   :  { %v397_v46 = vpop.permute.xlu1 %396 }
 0x34c   :  { %v399_v48 = vmul.f32 %v397_v46, %v391_v47 }
 0x34e   :  { %401 = vrot.lane.b32.xlu0 %v399_v48, %s1681_s3 }
 0x35b   :  { %v360_v61 = vpop.permute.xlu0 %359 }
 0x35c   :  { %v362_v63 = vmul.f32 %v360_v61, %v354_v60 }
 0x35e   :  { %364 = vrot.lane.b32.xlu2 %v362_v63, %s1681_s3 }
 0x3b8   :  { %v365_v8 = vpop.permute.xlu2 %364 }
 0x3b9   :  { %v1866_v10 = vadd.f32 %v365_v8, %v357_v5 }
 0x3bb   :  { %1565 = vtanh.f32 %v1866_v10 }
 0x3c0   :  { %v402_v16 = vpop.permute.xlu0 %401 }
 0x3c1   :  { %v1566_v17 = vpop.eup %1565  ;;  %v1876_v18 = vadd.f32 %v402_v16, %v394_v12 }
 0x3c2   :  { %370 = vrot.lane.b32.xlu1 %v1566_v17, %s1682_s15 }
 0x3c3   :  { %1567 = vtanh.f32 %v1876_v18  ;;  %v1933_v22 = vsel %vm1884_vm6, %v1876_v18, %v1873_v11 }
 0x3c9   :  { %v1568_v51 = vpop.eup %1567 }
 0x3ca   :  { %407 = vrot.lane.b32.xlu2 %v1568_v51, %s1682_s15 }
 0x424   :  { %v408_v19 = vpop.permute.xlu2 %407 }
 0x425   :  { %v1881_v20 = vmul.f32 %v408_v19, %v391_v47 }
 0x427   :  { %v1892_v59 = vsel %vm1884_vm6, %v1881_v20, %v1838_v15 }
 0x428   :  { %v471_v21 = vpack.c.bf16 %v1892_v59, %v1892_v59 }
 0x42a   :  { %475 = vrot.lane.b32.xlu1 %v471_v21, %s1681_s3 }
 0x434   :  { %v371_v23 = vpop.permute.xlu1 %370 }
 0x435   :  { %v1897_v24 = vmul.f32 %v371_v23, %v354_v60 }
 0x437   :  { %v1908_v15 = vsel %vm1900_vm7, %v1897_v24, %v1823_v9  ;;  %v1472_v9 = vld [vmem:[%s2445_s2 + $0xa] sm:$0x3] }
 0x438   :  { %v449_v26 = vpack.c.bf16 %v1908_v15, %v1908_v15 }
 0x43a   :  { %453 = vrot.lane.b32.xlu0 %v449_v26, %s1681_s3 }
 0x49c   :  { %v476_v27 = vpop.permute.xlu1 %475 }
 0x49d   :  { %1473 = vmatmul.msk.bf16.vlgmr.msrb.gmra.mxu1 %vm2452_vm1, %v476_v27 }
 0x49e   :  { %1110 = vmatpush.bf16.msrb.mxu1 %v1735_v1 }
 0x4a2   :  { %1111 = vmatpush.bf16.msrb.mxu1 %v1748_v4 }
 0x4ac   :  { %v454_v28 = vpop.permute.xlu0 %453 }
 0x4ad   :  { %1471 = vmatmul.msk.bf16.vlgmr.msrb.gmra.mxu0 %vm2452_vm1, %v454_v28 }
 0x4ae   :  { %1088 = vmatpush.bf16.msrb.mxu0 %v1730_v0 }
 0x4b2   :  { %1089 = vmatpush.bf16.msrb.mxu0 %v1743_v3 }
 0x51a   :  { %v489_v29 = vpop.f32.mrf.mxu1 }
 0x51b   :  { %v490_v30 = vadd.f32 %v1472_v9, %v489_v29  ;;  %v1944_v9 = vsel %vm1900_vm7, %v1866_v10, %v1863_v2 }
 0x51d   :  { %1569 = vtanh.f32 %v490_v30  ;;  %v1475_v39 = vmul.f32 -1.442695, %v490_v30 }
 0x522   :  { %v491_v31 = vpop.f32.mrf.mxu1 }
 0x523   :  { %v1570_v32 = vpop.eup %1569  ;;  %v571_v31 = vstv %s1477_s29 }
 0x524   :  { %552 = vrot.lane.b32.xlu0 %v1570_v32, %s1682_s15  ;;  %vm1954_vm4 = vcmp.lt.s32.totalorder %v1811_v62, %v571_v31 }
 0x52a   :  { %v467_v34 = vpop.f32.mrf.mxu0 }
 0x52b   :  { %v468_v35 = vadd.f32 %v1470_v33, %v467_v34 }
 0x52d   :  { %1571 = vtanh.f32 %v468_v35  ;;  %v1474_v38 = vmul.f32 -1.442695, %v468_v35  ;;  %v568_v35 = vstv %s1476_s30 }
 0x52e   :  { %vm1970_vm5 = vcmp.lt.s32.totalorder %v1811_v62, %v568_v35 }
 0x52f   :  { %1573 = vpow2.f32 %v1474_v38 }
 0x530   :  { %1575 = vpow2.f32 %v1475_v39 }
 0x532   :  { %v469_v36 = vpop.f32.mrf.mxu0 }
 0x533   :  { %v1572_v37 = vpop.eup %1571 }
 0x534   :  { %515 = vrot.lane.b32.xlu2 %v1572_v37, %s1682_s15 }
 0x535   :  { %v1574_v40 = vpop.eup %1573 }
 0x536   :  { %v496_v41 = vadd.f32 1.0, %v1574_v40  ;;  %v1576_v42 = vpop.eup %1575 }
 0x537   :  { %v533_v43 = vadd.f32 1.0, %v1576_v42 }
 0x538   :  { %1577 = vrcp.f32 %v496_v41  ;;  %v508_v53 = vand.u32 2147483648, %v496_v41  ;;  %vm502_vm9 = vweird.f32 %v496_v41  ;;  %v506_v56 = vand.u32 2147483647, %v496_v41 }
 0x539   :  { %1579 = vrcp.f32 %v533_v43  ;;  %v545_v12 = vand.u32 2147483648, %v533_v43  ;;  %vm539_vm15 = vweird.f32 %v533_v43  ;;  %v543_v16 = vand.u32 2147483647, %v533_v43 }
 0x53a   :  { %v509_v60 = vor.u32 1.1754944e-38, %v508_v53  ;;  %vm507_vm13 = vcmp.eq.f32.partialorder %v506_v56, 8.507059e+37 }
 0x53b   :  { %v546_v51 = vor.u32 1.1754944e-38, %v545_v12  ;;  %vm544_vm3 = vcmp.eq.f32.partialorder %v543_v16, 8.507059e+37 }
 0x53e   :  { %v1578_v44 = vpop.eup %1577 }
 0x53f   :  { %v498_v45 = vmul.f32 %v1578_v44, %v496_v41  ;;  %v1580_v47 = vpop.eup %1579  ;;  %vm503_vm8 = vweird.f32 %v1578_v44 }
 0x540   :  { %v535_v49 = vmul.f32 %v1580_v47, %v533_v43  ;;  %vm504_vm12 = vmor %vm502_vm9, %vm503_vm8  ;;  %vm540_vm14 = vweird.f32 %v1580_v47 }
 0x541   :  { %v499_v46 = vsub.f32 1.0, %v498_v45  ;;  %vm541_vm2 = vmor %vm539_vm15, %vm540_vm14 }
 0x542   :  { %v536_v52 = vsub.f32 1.0, %v535_v49 }
 0x543   :  { %v500_v48 = vmul.f32 %v1578_v44, %v499_v46 }
 0x544   :  { %v537_v58 = vmul.f32 %v1580_v47, %v536_v52 }
 0x545   :  { %v501_v50 = vadd.f32 %v1578_v44, %v500_v48 }
 0x546   :  { %v538_v8 = vadd.f32 %v1580_v47, %v537_v58 }
 0x547   :  { %v505_v57 = vsel %vm504_vm12, %v1578_v44, %v501_v50 }
 0x548   :  { %v510_v63 = vsel %vm507_vm13, %v509_v60, %v505_v57  ;;  %v542_v17 = vsel %vm541_vm2, %v1580_v47, %v538_v8 }
 0x549   :  { %v547_v54 = vsel %vm544_vm3, %v546_v51, %v542_v17  ;;  %v513_v29 = vmul.f32 %v510_v63, %v1944_v9 }
 0x54a   :  { %v550_v23 = vmul.f32 %v547_v54, %v1933_v22 }
 0x58e   :  { %v516_v61 = vpop.permute.xlu2 %515 }
 0x58f   :  { %v518_v5 = vmul.f32 %v516_v61, %v510_v63 }
 0x591   :  { %520 = vrot.lane.b32.xlu1 %v518_v5, %s1681_s3 }
 0x596   :  { %v553_v19 = vpop.permute.xlu0 %552 }
 0x597   :  { %v555_v21 = vmul.f32 %v553_v19, %v547_v54 }
 0x599   :  { %557 = vrot.lane.b32.xlu2 %v555_v21, %s1681_s3 }
 0x5f3   :  { %v558_v26 = vpop.permute.xlu2 %557 }
 0x5f4   :  { %v1936_v27 = vadd.f32 %v558_v26, %v550_v23 }
 0x5f6   :  { %1581 = vtanh.f32 %v1936_v27  ;;  %v2003_v35 = vsel %vm1954_vm4, %v1936_v27, %v1933_v22 }
 0x5fc   :  { %v1582_v28 = vpop.eup %1581 }
 0x5fd   :  { %563 = vrot.lane.b32.xlu1 %v1582_v28, %s1682_s15 }
 0x603   :  { %v521_v11 = vpop.permute.xlu1 %520 }
 0x604   :  { %v1947_v18 = vadd.f32 %v521_v11, %v513_v29 }
 0x606   :  { %1583 = vtanh.f32 %v1947_v18 }
 0x60c   :  { %v1584_v30 = vpop.eup %1583 }
 0x60d   :  { %526 = vrot.lane.b32.xlu0 %v1584_v30, %s1682_s15 }
 0x66f   :  { %v564_v32 = vpop.permute.xlu1 %563 }
 0x670   :  { %v1951_v33 = vmul.f32 %v564_v32, %v547_v54 }
 0x672   :  { %v1962_v2 = vsel %vm1954_vm4, %v1951_v33, %v1892_v59 }
 0x673   :  { %v627_v10 = vpack.c.bf16 %v1962_v2, %v1962_v2 }
 0x675   :  { %631 = vrot.lane.b32.xlu0 %v627_v10, %s1681_s3 }
 0x67f   :  { %v527_v36 = vpop.permute.xlu0 %526 }
 0x680   :  { %v1967_v37 = vmul.f32 %v527_v36, %v510_v63 }
 0x682   :  { %v1978_v59 = vsel %vm1970_vm5, %v1967_v37, %v1908_v15  ;;  %v1480_v15 = vld [vmem:[%s2444_s1 + $0x6] sm:$0x3] }
 0x683   :  { %v605_v39 = vpack.c.bf16 %v1978_v59, %v1978_v59 }
 0x685   :  { %609 = vrot.lane.b32.xlu2 %v605_v39, %s1681_s3 }
 0x6df   :  { %v610_v40 = vpop.permute.xlu2 %609 }
 0x6e0   :  { %1481 = vmatmul.msk.bf16.vlgmr.msrb.gmra.mxu2 %vm2452_vm1, %v610_v40 }
 0x6e1   :  { %1244 = vmatpush.bf16.msrb.mxu2 %v1730_v0  ;;  %v1482_v0 = vld [vmem:[%s2445_s2 + $0x8] sm:$0x3] }
 0x6e5   :  { %1245 = vmatpush.bf16.msrb.mxu2 %v1743_v3 }
 0x6e7   :  { %v632_v41 = vpop.permute.xlu0 %631 }
 0x6e8   :  { %1483 = vmatmul.msk.bf16.vlgmr.msrb.gmra.mxu3 %vm2452_vm1, %v632_v41 }
 0x6e9   :  { %1265 = vmatpush.bf16.msrb.mxu3 %v1735_v1 }
 0x6ed   :  { %1266 = vmatpush.bf16.msrb.mxu3 %v1748_v4 }
 0x763   :  { %v623_v42 = vpop.f32.mrf.mxu2 }
 0x764   :  { %v624_v43 = vadd.f32 %v1480_v15, %v623_v42  ;;  %v2014_v15 = vsel %vm1970_vm5, %v1947_v18, %v1944_v9 }
 0x766   :  { %1585 = vtanh.f32 %v624_v43  ;;  %v1484_v50 = vmul.f32 -1.442695, %v624_v43 }
 0x76b   :  { %v625_v44 = vpop.f32.mrf.mxu2  ;;  %v645_v3 = vpop.f32.mrf.mxu3 }
 0x76c   :  { %v1586_v45 = vpop.eup %1585  ;;  %v646_v46 = vadd.f32 %v1482_v0, %v645_v3  ;;  %v724_v0 = vstv %s1486_s11 }
 0x76d   :  { %671 = vrot.lane.b32.xlu1 %v1586_v45, %s1682_s15 }
 0x76e   :  { %1587 = vtanh.f32 %v646_v46  ;;  %v1485_v47 = vmul.f32 -1.442695, %v646_v46  ;;  %v727_v46 = vstv %s1487_s4 }
 0x770   :  { %1589 = vpow2.f32 %v1485_v47 }
 0x773   :  { %v647_v1 = vpop.f32.mrf.mxu3 }
 0x774   :  { %v1588_v4 = vpop.eup %1587 }
 0x775   :  { %708 = vrot.lane.b32.xlu2 %v1588_v4, %s1682_s15 }
 0x776   :  { %v1590_v48 = vpop.eup %1589 }
 0x777   :  { %v689_v49 = vadd.f32 1.0, %v1590_v48 }
 0x779   :  { %1591 = vrcp.f32 %v689_v49  ;;  %v701_v5 = vand.u32 2147483648, %v689_v49  ;;  %vm695_vm9 = vweird.f32 %v689_v49  ;;  %v699_v8 = vand.u32 2147483647, %v689_v49 }
 0x77a   :  { %1593 = vpow2.f32 %v1484_v50 }
 0x77b   :  { %v702_v17 = vor.u32 1.1754944e-38, %v701_v5  ;;  %vm700_vm13 = vcmp.eq.f32.partialorder %v699_v8, 8.507059e+37 }
 0x77f   :  { %v1592_v52 = vpop.eup %1591 }
 0x780   :  { %v1594_v53 = vpop.eup %1593  ;;  %v691_v56 = vmul.f32 %v1592_v52, %v689_v49  ;;  %vm696_vm8 = vweird.f32 %v1592_v52 }
 0x781   :  { %v652_v57 = vadd.f32 1.0, %v1594_v53  ;;  %vm697_vm12 = vmor %vm695_vm9, %vm696_vm8  ;;  %vm2024_vm8 = vcmp.lt.s32.totalorder %v1811_v62, %v724_v0  ;;  %vm2040_vm9 = vcmp.lt.s32.totalorder %v1811_v62, %v727_v46 }
 0x782   :  { %v692_v58 = vsub.f32 1.0, %v691_v56 }
 0x783   :  { %1595 = vrcp.f32 %v652_v57  ;;  %v664_v28 = vand.u32 2147483648, %v652_v57  ;;  %vm658_vm15 = vweird.f32 %v652_v57  ;;  %v662_v29 = vand.u32 2147483647, %v652_v57 }
 0x784   :  { %v693_v60 = vmul.f32 %v1592_v52, %v692_v58  ;;  %v1490_v58 = vld [vmem:[%s2444_s1 + $0x8] sm:$0x3] }
 0x785   :  { %v665_v30 = vor.u32 1.1754944e-38, %v664_v28  ;;  %vm663_vm3 = vcmp.eq.f32.partialorder %v662_v29, 8.507059e+37 }
 0x786   :  { %v694_v61 = vadd.f32 %v1592_v52, %v693_v60 }
 0x788   :  { %v698_v12 = vsel %vm697_vm12, %v1592_v52, %v694_v61  ;;  %v1492_v52 = vld [vmem:[%s2445_s2 + $0x6] sm:$0x3] }
 0x789   :  { %v1596_v63 = vpop.eup %1595  ;;  %v703_v54 = vsel %vm700_vm13, %v702_v17, %v698_v12 }
 0x78a   :  { %v654_v16 = vmul.f32 %v1596_v63, %v652_v57  ;;  %vm659_vm14 = vweird.f32 %v1596_v63  ;;  %v706_v36 = vmul.f32 %v703_v54, %v2003_v35 }
 0x78b   :  { %vm660_vm2 = vmor %vm658_vm15, %vm659_vm14 }
 0x78c   :  { %v655_v21 = vsub.f32 1.0, %v654_v16 }
 0x78e   :  { %v656_v23 = vmul.f32 %v1596_v63, %v655_v21 }
 0x790   :  { %v657_v26 = vadd.f32 %v1596_v63, %v656_v23 }
 0x792   :  { %v661_v11 = vsel %vm660_vm2, %v1596_v63, %v657_v26 }
 0x793   :  { %v666_v32 = vsel %vm663_vm3, %v665_v30, %v661_v11 }
 0x794   :  { %v669_v42 = vmul.f32 %v666_v32, %v2014_v15 }
 0x7cf   :  { %v709_v51 = vpop.permute.xlu2 %708 }
 0x7d0   :  { %v711_v19 = vmul.f32 %v709_v51, %v703_v54 }
 0x7d2   :  { %713 = vrot.lane.b32.xlu1 %v711_v19, %s1681_s3 }
 0x7df   :  { %v672_v31 = vpop.permute.xlu1 %671 }
 0x7e0   :  { %v674_v10 = vmul.f32 %v672_v31, %v666_v32 }
 0x7e2   :  { %676 = vrot.lane.b32.xlu0 %v674_v10, %s1681_s3 }
 0x844   :  { %v714_v39 = vpop.permute.xlu1 %713 }
 0x845   :  { %v2006_v40 = vadd.f32 %v714_v39, %v706_v36 }
 0x847   :  { %1597 = vtanh.f32 %v2006_v40 }
 0x84d   :  { %v1598_v41 = vpop.eup %1597 }
 0x84e   :  { %719 = vrot.lane.b32.xlu0 %v1598_v41, %s1682_s15 }
 0x854   :  { %v677_v22 = vpop.permute.xlu0 %676 }
 0x855   :  { %v2017_v27 = vadd.f32 %v677_v22, %v669_v42 }
 0x857   :  { %1599 = vtanh.f32 %v2017_v27 }
 0x85d   :  { %v1600_v43 = vpop.eup %1599 }
 0x85e   :  { %682 = vrot.lane.b32.xlu2 %v1600_v43, %s1682_s15 }
 0x8b8   :  { %v683_v44 = vpop.permute.xlu2 %682 }
 0x8b9   :  { %v2021_v3 = vmul.f32 %v683_v44, %v666_v32 }
 0x8bb   :  { %v2032_v18 = vsel %vm2024_vm8, %v2021_v3, %v1978_v59 }
 0x8bc   :  { %v761_v45 = vpack.c.bf16 %v2032_v18, %v2032_v18 }
 0x8be   :  { %765 = vrot.lane.b32.xlu1 %v761_v45, %s1681_s3 }
 0x8c0   :  { %v720_v1 = vpop.permute.xlu0 %719 }
 0x8c1   :  { %v2037_v4 = vmul.f32 %v720_v1, %v703_v54 }
 0x8c3   :  { %v2048_v59 = vsel %vm2040_vm9, %v2037_v4, %v1962_v2 }
 0x8c4   :  { %v783_v48 = vpack.c.bf16 %v2048_v59, %v2048_v59 }
 0x8c6   :  { %787 = vrot.lane.b32.xlu2 %v783_v48, %s1681_s3 }
 0x920   :  { %v788_v49 = vpop.permute.xlu2 %787 }
 0x921   :  { %1493 = vmatmul.msk.bf16.vlgmr.msra.gmra.mxu1 %vm2452_vm1, %v788_v49 }
 0x930   :  { %v766_v50 = vpop.permute.xlu1 %765 }
 0x931   :  { %1491 = vmatmul.msk.bf16.vlgmr.msra.gmra.mxu0 %vm2452_vm1, %v766_v50  ;;  %v2069_v50 = vsel %vm2024_vm8, %v2017_v27, %v2014_v15 }
 0x99e   :  { %v801_v53 = vpop.f32.mrf.mxu1 }
 0x99f   :  { %v802_v56 = vadd.f32 %v1492_v52, %v801_v53 }
 0x9a1   :  { %1601 = vtanh.f32 %v802_v56  ;;  %v1495_v8 = vmul.f32 -1.442695, %v802_v56 }
 0x9a6   :  { %v803_v2 = vpop.f32.mrf.mxu1 }
 0x9a7   :  { %v1602_v57 = vpop.eup %1601  ;;  %v2079_v2 = vsel %vm2040_vm9, %v2006_v40, %v2003_v35 }
 0x9a8   :  { %864 = vrot.lane.b32.xlu1 %v1602_v57, %s1682_s15 }
 0x9ae   :  { %v779_v60 = vpop.f32.mrf.mxu0 }
 0x9af   :  { %v780_v61 = vadd.f32 %v1490_v58, %v779_v60 }
 0x9b1   :  { %1603 = vtanh.f32 %v780_v61  ;;  %v1494_v17 = vmul.f32 -1.442695, %v780_v61 }
 0x9b2   :  { %1605 = vpow2.f32 %v1495_v8 }
 0x9b6   :  { %v781_v63 = vpop.f32.mrf.mxu0 }
 0x9b7   :  { %v1604_v5 = vpop.eup %1603 }
 0x9b8   :  { %827 = vrot.lane.b32.xlu0 %v1604_v5, %s1682_s15  ;;  %v1606_v12 = vpop.eup %1605 }
 0x9b9   :  { %v845_v16 = vadd.f32 1.0, %v1606_v12 }
 0x9bb   :  { %1607 = vrcp.f32 %v845_v16  ;;  %v857_v11 = vand.u32 2147483648, %v845_v16  ;;  %vm851_vm13 = vweird.f32 %v845_v16  ;;  %v855_v30 = vand.u32 2147483647, %v845_v16 }
 0x9bc   :  { %1609 = vpow2.f32 %v1494_v17 }
 0x9bd   :  { %v858_v10 = vor.u32 1.1754944e-38, %v857_v11  ;;  %vm856_vm15 = vcmp.eq.f32.partialorder %v855_v30, 8.507059e+37 }
 0x9c1   :  { %v1608_v51 = vpop.eup %1607 }
 0x9c2   :  { %v1610_v54 = vpop.eup %1609  ;;  %v847_v19 = vmul.f32 %v1608_v51, %v845_v16  ;;  %vm852_vm12 = vweird.f32 %v1608_v51 }
 0x9c3   :  { %v808_v21 = vadd.f32 1.0, %v1610_v54  ;;  %vm853_vm14 = vmor %vm851_vm13, %vm852_vm12 }
 0x9c4   :  { %v848_v23 = vsub.f32 1.0, %v847_v19 }
 0x9c5   :  { %1611 = vrcp.f32 %v808_v21  ;;  %v820_v0 = vand.u32 2147483648, %v808_v21  ;;  %vm814_vm3 = vweird.f32 %v808_v21  ;;  %v818_v44 = vand.u32 2147483647, %v808_v21 }
 0x9c6   :  { %v849_v26 = vmul.f32 %v1608_v51, %v848_v23  ;;  %v1500_v23 = vld [vmem:[%s2444_s1 + $0xa] sm:$0x3] }
 0x9c7   :  { %v821_v46 = vor.u32 1.1754944e-38, %v820_v0  ;;  %vm819_vm12 = vcmp.eq.f32.partialorder %v818_v44, 8.507059e+37 }
 0x9c8   :  { %v850_v28 = vadd.f32 %v1608_v51, %v849_v26 }
 0x9ca   :  { %v854_v31 = vsel %vm853_vm14, %v1608_v51, %v850_v28  ;;  %v1502_v51 = vld [vmem:[%s2445_s2 + $0x4] sm:$0x3] }
 0x9cb   :  { %v1612_v29 = vpop.eup %1611  ;;  %v859_v39 = vsel %vm856_vm15, %v858_v10, %v854_v31 }
 0x9cc   :  { %v810_v32 = vmul.f32 %v1612_v29, %v808_v21  ;;  %vm815_vm2 = vweird.f32 %v1612_v29  ;;  %v862_v57 = vmul.f32 %v859_v39, %v2079_v2 }
 0x9cd   :  { %vm816_vm0 = vmor %vm814_vm3, %vm815_vm2 }
 0x9ce   :  { %v811_v42 = vsub.f32 1.0, %v810_v32 }
 0x9d0   :  { %v812_v22 = vmul.f32 %v1612_v29, %v811_v42 }
 0x9d2   :  { %v813_v43 = vadd.f32 %v1612_v29, %v812_v22 }
 0x9d4   :  { %v817_v45 = vsel %vm816_vm0, %v1612_v29, %v813_v43 }
 0x9d5   :  { %v822_v1 = vsel %vm819_vm12, %v821_v46, %v817_v45 }
 0x9d6   :  { %v825_v52 = vmul.f32 %v822_v1, %v2069_v50 }
 0xa1a   :  { %v865_v36 = vpop.permute.xlu1 %864 }
 0xa1b   :  { %v867_v41 = vmul.f32 %v865_v36, %v859_v39 }
 0xa1d   :  { %869 = vrot.lane.b32.xlu0 %v867_v41, %s1681_s3 }
 0xa2a   :  { %v828_v48 = vpop.permute.xlu0 %827 }
 0xa2b   :  { %v830_v49 = vmul.f32 %v828_v48, %v822_v1 }
 0xa2d   :  { %832 = vrot.lane.b32.xlu2 %v830_v49, %s1681_s3 }
 0xa87   :  { %v833_v53 = vpop.permute.xlu2 %832 }
 0xa88   :  { %v2072_v56 = vadd.f32 %v833_v53, %v825_v52 }
 0xa8a   :  { %1613 = vtanh.f32 %v2072_v56 }
 0xa8f   :  { %v870_v58 = vpop.permute.xlu0 %869 }
 0xa90   :  { %v1614_v60 = vpop.eup %1613  ;;  %v2082_v61 = vadd.f32 %v870_v58, %v862_v57 }
 0xa91   :  { %838 = vrot.lane.b32.xlu1 %v1614_v60, %s1682_s15 }
 0xa92   :  { %1615 = vtanh.f32 %v2082_v61 }
 0xa98   :  { %v1616_v15 = vpop.eup %1615 }
 0xa99   :  { %875 = vrot.lane.b32.xlu2 %v1616_v15, %s1682_s15 }
 0xaf3   :  { %v876_v27 = vpop.permute.xlu2 %875 }
 0xaf4   :  { %v2087_v63 = vmul.f32 %v876_v27, %v859_v39 }
 0xaf6   :  { %v2093_v35 = vsel %vm2024_vm8, %v2087_v63, %v2048_v59 }
 0xaf7   :  { %v939_v40 = vpack.c.bf16 %v2093_v35, %v2093_v35 }
 0xaf9   :  { %943 = vrot.lane.b32.xlu1 %v939_v40, %s1681_s3 }
 0xb03   :  { %v839_v5 = vpop.permute.xlu1 %838 }
 0xb04   :  { %v2098_v8 = vmul.f32 %v839_v5, %v822_v1 }
 0xb06   :  { %v2104_v12 = vsel %vm2040_vm9, %v2098_v8, %v2032_v18 }
 0xb07   :  { %v917_v16 = vpack.c.bf16 %v2104_v12, %v2104_v12 }
 0xb09   :  { %921 = vrot.lane.b32.xlu0 %v917_v16, %s1681_s3 }
 0xb6b   :  { %v944_v59 = vpop.permute.xlu1 %943 }
 0xb6c   :  { %1503 = vmatmul.msk.bf16.vlgmr.msra.gmra.mxu3 %vm2452_vm1, %v944_v59 }
 0xb7b   :  { %v922_v17 = vpop.permute.xlu0 %921 }
 0xb7c   :  { %1501 = vmatmul.msk.bf16.vlgmr.msra.gmra.mxu2 %vm2452_vm1, %v922_v17 }
 0xbef   :  { %v957_v54 = vpop.f32.mrf.mxu3 }
 0xbf0   :  { %v958_v19 = vadd.f32 %v1502_v51, %v957_v54  ;;  %v2125_v54 = vsel %vm2024_vm8, %v2082_v61, %v2079_v2 }
 0xbf2   :  { %1617 = vtanh.f32 %v958_v19  ;;  %v1505_v31 = vmul.f32 -1.442695, %v958_v19 }
 0xbf7   :  { %v959_v18 = vpop.f32.mrf.mxu3 }
 0xbf8   :  { %v1618_v21 = vpop.eup %1617 }
 0xbf9   :  { %1020 = vrot.lane.b32.xlu0 %v1618_v21, %s1682_s15 }
 0xbff   :  { %v935_v26 = vpop.f32.mrf.mxu2 }
 0xc00   :  { %v936_v28 = vadd.f32 %v1500_v23, %v935_v26  ;;  %v2136_v26 = vsel %vm2040_vm9, %v2072_v56, %v2069_v50 }
 0xc02   :  { %1619 = vtanh.f32 %v936_v28  ;;  %v1504_v30 = vmul.f32 -1.442695, %v936_v28 }
 0xc04   :  { %1621 = vpow2.f32 %v1504_v30 }
 0xc05   :  { %1623 = vpow2.f32 %v1505_v31 }
 0xc07   :  { %v937_v29 = vpop.f32.mrf.mxu2 }
 0xc08   :  { %v1620_v11 = vpop.eup %1619 }
 0xc09   :  { %983 = vrot.lane.b32.xlu2 %v1620_v11, %s1682_s15 }
 0xc0a   :  { %v1622_v32 = vpop.eup %1621 }
 0xc0b   :  { %v964_v10 = vadd.f32 1.0, %v1622_v32  ;;  %v1624_v36 = vpop.eup %1623 }
 0xc0c   :  { %v1001_v39 = vadd.f32 1.0, %v1624_v36 }
 0xc0d   :  { %1625 = vrcp.f32 %v964_v10  ;;  %v976_v1 = vand.u32 2147483648, %v964_v10  ;;  %vm970_vm13 = vweird.f32 %v964_v10  ;;  %v974_v48 = vand.u32 2147483647, %v964_v10 }
 0xc0e   :  { %1627 = vrcp.f32 %v1001_v39  ;;  %v1013_v27 = vand.u32 2147483648, %v1001_v39  ;;  %vm1007_vm3 = vweird.f32 %v1001_v39  ;;  %v1011_v40 = vand.u32 2147483647, %v1001_v39 }
 0xc0f   :  { %v977_v53 = vor.u32 1.1754944e-38, %v976_v1  ;;  %vm975_vm15 = vcmp.eq.f32.partialorder %v974_v48, 8.507059e+37 }
 0xc10   :  { %v1014_v16 = vor.u32 1.1754944e-38, %v1013_v27  ;;  %vm1012_vm1 = vcmp.eq.f32.partialorder %v1011_v40, 8.507059e+37 }
 0xc13   :  { %v1626_v41 = vpop.eup %1625 }
 0xc14   :  { %v966_v42 = vmul.f32 %v1626_v41, %v964_v10  ;;  %v1628_v43 = vpop.eup %1627  ;;  %vm971_vm0 = vweird.f32 %v1626_v41 }
 0xc15   :  { %v1003_v44 = vmul.f32 %v1628_v43, %v1001_v39  ;;  %vm972_vm14 = vmor %vm970_vm13, %vm971_vm0  ;;  %vm1008_vm2 = vweird.f32 %v1628_v43 }
 0xc16   :  { %v967_v22 = vsub.f32 1.0, %v966_v42  ;;  %vm1009_vm12 = vmor %vm1007_vm3, %vm1008_vm2 }
 0xc17   :  { %v1004_v46 = vsub.f32 1.0, %v1003_v44 }
 0xc18   :  { %v968_v0 = vmul.f32 %v1626_v41, %v967_v22 }
 0xc19   :  { %v1005_v52 = vmul.f32 %v1628_v43, %v1004_v46 }
 0xc1a   :  { %v969_v45 = vadd.f32 %v1626_v41, %v968_v0 }
 0xc1b   :  { %v1006_v15 = vadd.f32 %v1628_v43, %v1005_v52 }
 0xc1c   :  { %v973_v49 = vsel %vm972_vm14, %v1626_v41, %v969_v45  ;;  %v1510_v41 = vld [vmem:[%s2444_s1 + $0xc] sm:$0x3] }
 0xc1d   :  { %v978_v58 = vsel %vm975_vm15, %v977_v53, %v973_v49  ;;  %v1010_v5 = vsel %vm1009_vm12, %v1628_v43, %v1006_v15 }
 0xc1e   :  { %v1015_v59 = vsel %vm1012_vm1, %v1014_v16, %v1010_v5  ;;  %v981_v28 = vmul.f32 %v978_v58, %v2136_v26  ;;  %vm2469_vm1 = vcmask 261120  }
 0xc1f   :  { %v1018_v19 = vmul.f32 %v1015_v59, %v2125_v54  ;;  %vm2470_vm0 = vmmov %vm2469_vm1 }
 0xc63   :  { %v984_v57 = vpop.permute.xlu2 %983 }
 0xc64   :  { %v986_v60 = vmul.f32 %v984_v57, %v978_v58 }
 0xc66   :  { %988 = vrot.lane.b32.xlu1 %v986_v60, %s1681_s3 }
 0xc6b   :  { %v1021_v17 = vpop.permute.xlu0 %1020 }
 0xc6c   :  { %v1023_v51 = vmul.f32 %v1021_v17, %v1015_v59 }
 0xc6e   :  { %1025 = vrot.lane.b32.xlu2 %v1023_v51, %s1681_s3 }
 0xcc8   :  { %v1026_v18 = vpop.permute.xlu2 %1025 }
 0xcc9   :  { %v2128_v21 = vadd.f32 %v1026_v18, %v1018_v19 }
 0xccb   :  { %1629 = vtanh.f32 %v2128_v21 }
 0xcd1   :  { %v1630_v23 = vpop.eup %1629 }
 0xcd2   :  { %1031 = vrot.lane.b32.xlu1 %v1630_v23, %s1682_s15 }
 0xcd8   :  { %v989_v2 = vpop.permute.xlu1 %988 }
 0xcd9   :  { %v2139_v61 = vadd.f32 %v989_v2, %v981_v28 }
 0xcdb   :  { %1631 = vtanh.f32 %v2139_v61 }
 0xce1   :  { %v1632_v29 = vpop.eup %1631 }
 0xce2   :  { %994 = vrot.lane.b32.xlu0 %v1632_v29, %s1682_s15 }
 0xd44   :  { %v1032_v11 = vpop.permute.xlu1 %1031 }
 0xd45   :  { %v2143_v30 = vmul.f32 %v1032_v11, %v1015_v59 }
 0xd47   :  { %v2149_v31 = vsel %vm1970_vm5, %v2143_v30, %v2093_v35 }
 0xd48   :  { %v1095_v50 = vpack.c.bf16 %v2149_v31, %v2149_v31 }
 0xd4a   :  { %1099 = vrot.lane.b32.xlu0 %v1095_v50, %s1681_s3 }
 0xd54   :  { %v995_v56 = vpop.permute.xlu0 %994 }
 0xd55   :  { %v2154_v32 = vmul.f32 %v995_v56, %v978_v58 }
 0xd57   :  { %v2160_v10 = vsel %vm1954_vm4, %v2154_v32, %v2104_v12  ;;  %v1512_v12 = vld [vmem:[%s2445_s2 + $0x2] sm:$0x3] }
 0xd58   :  { %v1073_v36 = vpack.c.bf16 %v2160_v10, %v2160_v10 }
 0xd5a   :  { %1077 = vrot.lane.b32.xlu2 %v1073_v36, %s1681_s3 }
 0xdb4   :  { %v1078_v35 = vpop.permute.xlu2 %1077 }
 0xdb5   :  { %1511 = vmatmul.msk.bf16.vlgmr.msrb.gmra.mxu0 %vm2469_vm1, %v1078_v35 }
 0xdbc   :  { %v1100_v39 = vpop.permute.xlu0 %1099 }
 0xdbd   :  { %1513 = vmatmul.msk.bf16.vlgmr.msrb.gmra.mxu1 %vm2470_vm0, %v1100_v39 }
 0xe32   :  { %v1091_v42 = vpop.f32.mrf.mxu0 }
 0xe33   :  { %v1092_v22 = vadd.f32 %v1510_v41, %v1091_v42 }
 0xe35   :  { %1633 = vtanh.f32 %v1092_v22  ;;  %v1514_v53 = vmul.f32 -1.442695, %v1092_v22 }
 0xe3a   :  { %v1093_v43 = vpop.f32.mrf.mxu0  ;;  %v1113_v0 = vpop.f32.mrf.mxu1 }
 0xe3b   :  { %v1634_v44 = vpop.eup %1633  ;;  %v1114_v45 = vadd.f32 %v1512_v12, %v1113_v0  ;;  %v2181_v12 = vsel %vm1970_vm5, %v2128_v21, %v2125_v54  ;;  %v1536_v54 = vld [vmem:[%s2448_s5] ss:$0 sm:$0xff]  ;;  %s1349_s5 = sld [smem:[#allocation7]] }
 0xe3c   :  { %1139 = vrot.lane.b32.xlu1 %v1634_v44, %s1682_s15 }
 0xe3d   :  { %1635 = vtanh.f32 %v1114_v45  ;;  %v1515_v48 = vmul.f32 -1.442695, %v1114_v45 }
 0xe3f   :  { %1637 = vpow2.f32 %v1515_v48 }
 0xe42   :  { %v1115_v46 = vpop.f32.mrf.mxu1 }
 0xe43   :  { %v1636_v1 = vpop.eup %1635  ;;  %v2192_v46 = vsel %vm1954_vm4, %v2139_v61, %v2136_v26 }
 0xe44   :  { %1176 = vrot.lane.b32.xlu2 %v1636_v1, %s1682_s15 }
 0xe45   :  { %v1638_v49 = vpop.eup %1637 }
 0xe46   :  { %v1157_v52 = vadd.f32 1.0, %v1638_v49 }
 0xe48   :  { %1639 = vrcp.f32 %v1157_v52  ;;  %v1169_v59 = vand.u32 2147483648, %v1157_v52  ;;  %vm1163_vm14 = vweird.f32 %v1157_v52  ;;  %v1167_v17 = vand.u32 2147483647, %v1157_v52 }
 0xe49   :  { %1641 = vpow2.f32 %v1514_v53 }
 0xe4a   :  { %v1170_v18 = vor.u32 1.1754944e-38, %v1169_v59  ;;  %vm1168_vm2 = vcmp.eq.f32.partialorder %v1167_v17, 8.507059e+37 }
 0xe4e   :  { %v1640_v57 = vpop.eup %1639 }
 0xe4f   :  { %v1642_v58 = vpop.eup %1641  ;;  %v1159_v60 = vmul.f32 %v1640_v57, %v1157_v52  ;;  %vm1164_vm13 = vweird.f32 %v1640_v57 }
 0xe50   :  { %v1120_v15 = vadd.f32 1.0, %v1642_v58  ;;  %vm1165_vm15 = vmor %vm1163_vm14, %vm1164_vm13 }
 0xe51   :  { %v1160_v27 = vsub.f32 1.0, %v1159_v60 }
 0xe52   :  { %1643 = vrcp.f32 %v1120_v15  ;;  %v1132_v56 = vand.u32 2147483648, %v1120_v15  ;;  %vm1126_vm12 = vweird.f32 %v1120_v15  ;;  %v1130_v36 = vand.u32 2147483647, %v1120_v15 }
 0xe53   :  { %v1161_v40 = vmul.f32 %v1640_v57, %v1160_v27 }
 0xe54   :  { %v1133_v39 = vor.u32 1.1754944e-38, %v1132_v56  ;;  %vm1131_vm0 = vcmp.eq.f32.partialorder %v1130_v36, 8.507059e+37 }
 0xe55   :  { %v1162_v5 = vadd.f32 %v1640_v57, %v1161_v40 }
 0xe57   :  { %v1166_v51 = vsel %vm1165_vm15, %v1640_v57, %v1162_v5 }
 0xe58   :  { %v1644_v16 = vpop.eup %1643  ;;  %v1171_v28 = vsel %vm1168_vm2, %v1170_v18, %v1166_v51  ;;  %vm276_vm2 = vcmask 1024  }
 0xe59   :  { %v1122_v19 = vmul.f32 %v1644_v16, %v1120_v15  ;;  %vm1127_vm3 = vweird.f32 %v1644_v16  ;;  %v1174_v43 = vmul.f32 %v1171_v28, %v2181_v12 }
 0xe5a   :  { %vm1128_vm1 = vmor %vm1126_vm12, %vm1127_vm3 }
 0xe5b   :  { %v1123_v29 = vsub.f32 1.0, %v1122_v19 }
 0xe5d   :  { %v1124_v11 = vmul.f32 %v1644_v16, %v1123_v29 }
 0xe5f   :  { %v1125_v50 = vadd.f32 %v1644_v16, %v1124_v11  ;;  %v582_v11 = vsel %vm1954_vm4, %v1951_v33, 0.0 }
 0xe61   :  { %v1129_v35 = vsel %vm1128_vm1, %v1644_v16, %v1125_v50 }
 0xe62   :  { %v1134_v42 = vsel %vm1131_vm0, %v1133_v39, %v1129_v35 }
 0xe63   :  { %v1137_v21 = vmul.f32 %v1134_v42, %v2192_v46 }
 0xe9e   :  { %v1177_v23 = vpop.permute.xlu2 %1176 }
 0xe9f   :  { %v1179_v2 = vmul.f32 %v1177_v23, %v1171_v28  ;;  %v426_v23 = vsel %vm1884_vm6, %v1881_v20, 0.0 }
 0xea1   :  { %1181 = vrot.lane.b32.xlu1 %v1179_v2, %s1681_s3  ;;  %v581_v2 = vsel %vm1970_vm5, %v1967_v37, 0.0 }
 0xeae   :  { %v1140_v41 = vpop.permute.xlu1 %1139 }
 0xeaf   :  { %v1142_v22 = vmul.f32 %v1140_v41, %v1134_v42 }
 0xeb1   :  { %1144 = vrot.lane.b32.xlu0 %v1142_v22, %s1681_s3 }
 0xf13   :  { %v1182_v0 = vpop.permute.xlu1 %1181 }
 0xf14   :  { %v2184_v44 = vadd.f32 %v1182_v0, %v1174_v43  ;;  %v737_v0 = vsel %vm2024_vm8, %v2021_v3, 0.0  ;;  %v1520_v3 = vld [vmem:[%s2444_s1 + $0xe] sm:$0x3] }
 0xf16   :  { %1645 = vtanh.f32 %v2184_v44 }
 0xf1c   :  { %v1646_v45 = vpop.eup %1645 }
 0xf1d   :  { %1187 = vrot.lane.b32.xlu0 %v1646_v45, %s1682_s15 }
 0xf23   :  { %v1145_v1 = vpop.permute.xlu0 %1144 }
 0xf24   :  { %v2198_v48 = vadd.f32 %v1145_v1, %v1137_v21  ;;  %v738_v1 = vsel %vm2040_vm9, %v2037_v4, 0.0  ;;  %v894_v4 = vsel %vm2024_vm8, %v2087_v63, 0.0 }
 0xf25   :  { %264 = vrot.lane.b32.xlu0 %v1536_v54, %s1683_s16 }
 0xf26   :  { %1647 = vtanh.f32 %v2198_v48 }
 0xf2c   :  { %v1648_v49 = vpop.eup %1647 }
 0xf2d   :  { %278 = vrot.lane.b32.xlu0 %v1536_v54, %s1682_s15  ;;  %1150 = vrot.lane.b32.xlu2 %v1648_v49, %s1682_s15 }
 0xf87   :  { %v1151_v26 = vpop.permute.xlu2 %1150 }
 0xf88   :  { %v2204_v61 = vmul.f32 %v1151_v26, %v1134_v42 }
 0xf8a   :  { %v2210_v52 = vsel %vm1884_vm6, %v2204_v61, %v2160_v10  ;;  %v260_v10 = vsel %vm1816_vm10, %v1813_v6, 0.0  ;;  %v425_v6 = vsel %vm1900_vm7, %v1897_v24, 0.0  ;;  %vm2471_vm10 = vcmask 261120  }
 0xf8b   :  { %v1229_v53 = vpack.c.bf16 %v2210_v52, %v2210_v52  ;;  %vm2472_vm13 = vmmov %vm2471_vm10 }
 0xf8d   :  { %1233 = vrot.lane.b32.xlu1 %v1229_v53, %s1681_s3 }
 0xf8f   :  { %v1188_v57 = vpop.permute.xlu0 %1187 }
 0xf90   :  { %v2215_v58 = vmul.f32 %v1188_v57, %v1171_v28  ;;  %v893_v57 = vsel %vm2040_vm9, %v2098_v8, 0.0 }
 0xf92   :  { %v2221_v60 = vsel %vm1900_vm7, %v2215_v58, %v2149_v31  ;;  %v261_v31 = vsel %vm1831_vm11, %v1828_v13, 0.0  ;;  %vm2473_vm11 = vcmask 254976  }
 0xf93   :  { %v1251_v15 = vpack.c.bf16 %v2221_v60, %v2221_v60  ;;  %vm2474_vm14 = vmmov %vm2473_vm11 }
 0xf94   :  { %vm2475_vm15 = vmmov %vm2473_vm11 }
 0xf95   :  { %1254 = vrot.lane.b32.xlu2 %v1251_v15, %s1681_s3  ;;  %vm2476_vm3 = vmmov %vm2473_vm11 }
 0xf96   :  { %vm2477_vm12 = vmmov %vm2476_vm3 }
 0xf97   :  { %v2229_v27 = vpop.permute.xlu0 %264  ;;  %vm2478_vm1 = vmmov %vm2476_vm3 }
 0xf98   :  { %v267_v40 = vmul.f32 %v2229_v27, %v260_v10  ;;  %v427_v7 = vmul.f32 %v425_v6, %v2229_v27  ;;  %v583_v29 = vmul.f32 %v581_v2, %v2229_v27  ;;  %v739_v45 = vmul.f32 %v737_v0, %v2229_v27  ;;  %vm2479_vm8 = vmmov %vm2478_vm1 }
 0xf99   :  { %v895_v15 = vmul.f32 %v893_v57, %v2229_v27  ;;  %vm2480_vm9 = vmmov %vm2478_vm1 }
 0xf9a   :  { %269 = vrot.lane.b32.xlu1 %v267_v40, %s1681_s3  ;;  %vm2481_vm0 = vmmov %vm2478_vm1 }
 0xf9f   :  { %v2236_v5 = vpop.permute.xlu0 %278 }
 0xfa0   :  { %v281_v16 = vmul.f32 %v2236_v5, %v261_v31  ;;  %v437_v28 = vmul.f32 %v426_v23, %v2236_v5  ;;  %v593_v50 = vmul.f32 %v582_v11, %v2236_v5  ;;  %v749_v49 = vmul.f32 %v738_v1, %v2236_v5 }
 0xfa1   :  { %v905_v10 = vmul.f32 %v894_v4, %v2236_v5 }
 0xfa2   :  { %283 = vrot.lane.b32.xlu1 %v281_v16, %s1681_s3 }
 0xfaa   :  { %429 = vrot.lane.b32.xlu1 %v427_v7, %s1681_s3 }
 0xfef   :  { %v1255_v59 = vpop.permute.xlu2 %1254 }
 0xff0   :  { %1522 = vmatmul.msk.bf16.vlgmr.msrb.gmra.mxu3 %vm2471_vm10, %v1255_v59 }
 0xfff   :  { %v1234_v17 = vpop.permute.xlu1 %1233 }
0x1000   :  { %1521 = vmatmul.msk.bf16.vlgmr.msrb.gmra.mxu2 %vm2472_vm13, %v1234_v17  ;;  %v1252_v17 = vld [vmem:[%s2445_s2] sm:$0x3] }
0x100c   :  { %v270_v13 = vpop.permute.xlu1 %269 }
0x100d   :  { %v273_v14 = vsel %vm2473_vm11, %v270_v13, 0.0 }
0x100e   :  { %274 = vadd.xlane.f32.xlu2 %v273_v14 }
0x1014   :  { %v284_v51 = vpop.permute.xlu1 %283 }
0x1015   :  { %v286_v19 = vsel %vm2474_vm14, %v284_v51, 0.0 }
0x1016   :  { %287 = vadd.xlane.f32.xlu0 %v286_v19 }
0x101c   :  { %v430_v18 = vpop.permute.xlu1 %429 }
0x101d   :  { %v432_v24 = vsel %vm2475_vm15, %v430_v18, 0.0  ;;  %vm2482_vm15 = vmmov %vm2481_vm0 }
0x101e   :  { %433 = vadd.xlane.f32.xlu1 %v432_v24 }
0x1026   :  { %439 = vrot.lane.b32.xlu2 %v437_v28, %s1681_s3 }
0x102e   :  { %585 = vrot.lane.b32.xlu2 %v583_v29, %s1681_s3 }
0x1037   :  { %595 = vrot.lane.b32.xlu1 %v593_v50, %s1681_s3 }
0x1073   :  { %v1268_v20 = vpop.f32.mrf.mxu3 }
0x1074   :  { %v1269_v14 = vadd.f32 %v1268_v20, %v1252_v17 }
0x107b   :  { %v1270_v56 = vpop.f32.mrf.mxu3 }
0x1081   :  { %v275_v36 = vpop.xlane.xlu2 %274 }
0x1082   :  { %277 = vst.msk [vmem:[%s2449_s6] sm:$0x3] %vm276_vm2, %v275_v36 }
0x1083   :  { %v1247_v37 = vpop.f32.mrf.mxu2 }
0x1084   :  { %v1248_v26 = vadd.f32 %v1520_v3, %v1247_v37 }
0x1086   :  { %1649 = vtanh.f32 %v1248_v26  ;;  %v1523_v8 = vmul.f32 -1.442695, %v1248_v26 }
0x1088   :  { %1651 = vpow2.f32 %v1523_v8 }
0x1089   :  { %v288_v35 = vpop.xlane.xlu0 %287  ;;  %v440_v39 = vpop.permute.xlu2 %439 }
0x108a   :  { %1459 = vst.msk [vmem:[%s2450_s7 + $0xe] sm:$0x3] %vm276_vm2, %v288_v35  ;;  %v442_v33 = vsel %vm2476_vm3, %v440_v39, 0.0  ;;  %v1050_v35 = vsel %vm1970_vm5, %v2143_v30, 0.0 }
0x108b   :  { %v1249_v41 = vpop.f32.mrf.mxu2  ;;  %443 = vadd.xlane.f32.xlu0 %v442_v33  ;;  %v1061_v39 = vmul.f32 %v1050_v35, %v2236_v5 }
0x108c   :  { %v1650_v53 = vpop.eup %1649 }
0x108e   :  { %v1652_v31 = vpop.eup %1651 }
0x108f   :  { %v1275_v6 = vadd.f32 1.0, %v1652_v31 }
0x1091   :  { %v434_v42 = vpop.xlane.xlu1 %433  ;;  %v586_v22 = vpop.permute.xlu2 %585  ;;  %1653 = vrcp.f32 %v1275_v6  ;;  %v1287_v11 = vand.u32 2147483648, %v1275_v6  ;;  %vm1281_vm13 = vweird.f32 %v1275_v6  ;;  %v1285_v50 = vand.u32 2147483647, %v1275_v6 }
0x1092   :  { %1468 = vst.msk [vmem:[%s2449_s6 + $0x2] sm:$0x3] %vm276_vm2, %v434_v42  ;;  %v588_v43 = vsel %vm2477_vm12, %v586_v22, 0.0  ;;  %1655 = vtanh.f32 %v1269_v14  ;;  %v1205_v42 = vsel %vm1884_vm6, %v2204_v61, 0.0 }
0x1093   :  { %589 = vadd.xlane.f32.xlu0 %v588_v43  ;;  %v1288_v20 = vor.u32 1.1754944e-38, %v1287_v11  ;;  %vm1286_vm14 = vcmp.eq.f32.partialorder %v1285_v50, 8.507059e+37  ;;  %v1207_v22 = vmul.f32 %v1205_v42, %v2229_v27  ;;  %v1524_v43 = vmul.f32 -1.442695, %v1269_v14 }
0x1095   :  { %1657 = vpow2.f32 %v1524_v43 }
0x1097   :  { %v1654_v51 = vpop.eup %1653 }
0x1098   :  { %v1277_v19 = vmul.f32 %v1654_v51, %v1275_v6  ;;  %v1656_v28 = vpop.eup %1655  ;;  %vm1282_vm10 = vweird.f32 %v1654_v51 }
0x1099   :  { %vm1283_vm11 = vmor %vm1281_vm13, %vm1282_vm10 }
0x109a   :  { %v1278_v23 = vsub.f32 1.0, %v1277_v19  ;;  %vm2490_vm10 = vmmov %vm2481_vm0 }
0x109b   :  { %v1658_v38 = vpop.eup %1657  ;;  %vm2491_vm13 = vmmov %vm2481_vm0 }
0x109c   :  { %v1279_v2 = vmul.f32 %v1654_v51, %v1278_v23  ;;  %v1312_v30 = vadd.f32 1.0, %v1658_v38 }
0x109e   :  { %v1280_v29 = vadd.f32 %v1654_v51, %v1279_v2  ;;  %1659 = vrcp.f32 %v1312_v30  ;;  %v1324_v3 = vand.u32 2147483648, %v1312_v30  ;;  %vm1318_vm3 = vweird.f32 %v1312_v30 }
0x109f   :  { %v1322_v26 = vand.u32 2147483647, %v1312_v30 }
0x10a0   :  { %v1284_v56 = vsel %vm1283_vm11, %v1654_v51, %v1280_v29  ;;  %v1350_v29 = vstv %s1349_s5  ;;  %vm2492_vm11 = vmmov %vm2481_vm0 }
0x10a1   :  { %v2323_v36 = vsel %vm1286_vm14, %v1288_v20, %v1284_v56  ;;  %vm2493_vm14 = vmmov %vm2481_vm0 }
0x10a7   :  { %741 = vrot.lane.b32.xlu0 %v739_v45, %s1681_s3  ;;  %v1660_v45 = vpop.eup %1659 }
0x10a8   :  { %vm1319_vm5 = vweird.f32 %v1660_v45 }
0x10a9   :  { %v596_v54 = vpop.permute.xlu1 %595  ;;  %vm1320_vm12 = vmor %vm1318_vm3, %vm1319_vm5 }
0x10aa   :  { %v598_v21 = vsel %vm2478_vm1, %v596_v54, 0.0  ;;  %v1314_v54 = vmul.f32 %v1660_v45, %v1312_v30  ;;  %vm1323_vm1 = vcmp.eq.f32.partialorder %v1322_v26, 8.507059e+37  ;;  %vm2495_vm5 = vmmov %vm2481_vm0 }
0x10ab   :  { %599 = vadd.xlane.f32.xlu2 %v598_v21 }
0x10ac   :  { %v1315_v61 = vsub.f32 1.0, %v1314_v54 }
0x10ae   :  { %v1316_v1 = vmul.f32 %v1660_v45, %v1315_v61 }
0x10af   :  { %751 = vrot.lane.b32.xlu0 %v749_v49, %s1681_s3 }
0x10b0   :  { %v1317_v49 = vadd.f32 %v1660_v45, %v1316_v1 }
0x10b2   :  { %v1321_v57 = vsel %vm1320_vm12, %v1660_v45, %v1317_v49 }
0x10c3   :  { %1294 = vrot.lane.b32.xlu2 %v1650_v53, %s1682_s15 }
0x10cb   :  { %897 = vrot.lane.b32.xlu2 %v895_v15, %s1681_s3  ;;  %v1325_v15 = vor.u32 1.1754944e-38, %v1324_v3 }
0x10cd   :  { %v1326_v4 = vsel %vm1323_vm1, %v1325_v15, %v1321_v57 }
0x10d3   :  { %907 = vrot.lane.b32.xlu2 %v905_v10, %s1681_s3 }
0x10fe   :  { %v444_v40 = vpop.xlane.xlu0 %443 }
0x10ff   :  { %1469 = vst.msk [vmem:[%s2450_s7 + $0xc] sm:$0x3] %vm276_vm2, %v444_v40 }
0x1106   :  { %v590_v47 = vpop.xlane.xlu0 %589 }
0x1107   :  { %1478 = vst.msk [vmem:[%s2449_s6 + $0x4] sm:$0x3] %vm276_vm2, %v590_v47  ;;  %v1049_v47 = vsel %vm1954_vm4, %v2154_v32, 0.0  ;;  %vm2485_vm4 = vmmov %vm2481_vm0 }
0x1108   :  { %v1051_v8 = vmul.f32 %v1049_v47, %v2229_v27 }
0x1119   :  { %v742_v9 = vpop.permute.xlu0 %741 }
0x111a   :  { %v744_v63 = vsel %vm2479_vm8, %v742_v9, 0.0  ;;  %vm2483_vm8 = vmmov %vm2481_vm0 }
0x111b   :  { %745 = vadd.xlane.f32.xlu1 %v744_v63 }
0x111e   :  { %v600_v16 = vpop.xlane.xlu2 %599 }
0x111f   :  { %1479 = vst.msk [vmem:[%s2450_s7 + $0xa] sm:$0x3] %vm276_vm2, %v600_v16  ;;  %v1200_v16 = vsel %vm1884_vm6, %v2198_v48, %v2192_v46  ;;  %vm2484_vm6 = vmmov %vm2481_vm0 }
0x1120   :  { %v1292_v6 = vmul.f32 %v2323_v36, %v1200_v16 }
0x1121   :  { %v752_v7 = vpop.permute.xlu0 %751 }
0x1122   :  { %v754_v59 = vsel %vm2480_vm9, %v752_v7, 0.0 }
0x1123   :  { %755 = vadd.xlane.f32.xlu0 %v754_v59  ;;  %v1204_v59 = vsel %vm1900_vm7, %v2184_v44, %v2181_v12 }
0x1124   :  { %v1329_v55 = vmul.f32 %v1326_v4, %v1204_v59 }
0x1126   :  { %v1295_v13 = vpop.permute.xlu2 %1294 }
0x1127   :  { %v1297_v37 = vmul.f32 %v1295_v13, %v2323_v36 }
0x112e   :  { %v898_v18 = vpop.permute.xlu2 %897 }
0x112f   :  { %v900_v24 = vsel %vm2481_vm0, %v898_v18, 0.0  ;;  %v1206_v18 = vsel %vm1900_vm7, %v2215_v58, 0.0  ;;  %vm2394_vm7 = vcmp.lt.s32.totalorder %v1811_v62, %v1350_v29 }
0x1130   :  { %901 = vadd.xlane.f32.xlu0 %v900_v24  ;;  %v1217_v12 = vmul.f32 %v1206_v18, %v2236_v5 }
0x1134   :  { %1331 = vrot.lane.b32.xlu1 %v1656_v28, %s1682_s15 }
0x1136   :  { %v908_v33 = vpop.permute.xlu2 %907 }
0x1137   :  { %v910_v41 = vsel %vm2482_vm15, %v908_v33, 0.0  ;;  %vm2494_vm15 = vmmov %vm2481_vm0 }
0x1144   :  { %1299 = vrot.lane.b32.xlu0 %v1297_v37, %s1681_s3 }
0x114c   :  { %1063 = vrot.lane.b32.xlu0 %v1061_v39, %s1681_s3 }
0x115e   :  { %911 = vadd.xlane.f32.xlu1 %v910_v41 }
0x1177   :  { %1209 = vrot.lane.b32.xlu1 %v1207_v22, %s1681_s3 }
0x118e   :  { %v746_v0 = vpop.xlane.xlu1 %745 }
0x118f   :  { %1488 = vst.msk [vmem:[%s2449_s6 + $0x6] sm:$0x3] %vm276_vm2, %v746_v0 }
0x1196   :  { %v756_v21 = vpop.xlane.xlu0 %755 }
0x1197   :  { %1489 = vst.msk [vmem:[%s2450_s7 + $0x8] sm:$0x3] %vm276_vm2, %v756_v21 }
0x11a3   :  { %v902_v53 = vpop.xlane.xlu0 %901 }
0x11a4   :  { %1498 = vst.msk [vmem:[%s2449_s6 + $0x8] sm:$0x3] %vm276_vm2, %v902_v53 }
0x11a6   :  { %v1332_v10 = vpop.permute.xlu1 %1331 }
0x11a7   :  { %v1334_v40 = vmul.f32 %v1332_v10, %v1326_v4 }
0x11a9   :  { %1336 = vrot.lane.b32.xlu2 %v1334_v40, %s1681_s3 }
0x11b1   :  { %1053 = vrot.lane.b32.xlu2 %v1051_v8, %s1681_s3 }
0x11b6   :  { %v1300_v9 = vpop.permute.xlu0 %1299 }
0x11b7   :  { %v1302_v7 = vadd.f32 %v1300_v9, %v1292_v6 }
0x11b9   :  { %1661 = vtanh.f32 %v1302_v7 }
0x11be   :  { %v1064_v63 = vpop.permute.xlu0 %1063 }
0x11bf   :  { %v1066_v31 = vsel %vm2483_vm8, %v1064_v63, 0.0  ;;  %v1662_v32 = vpop.eup %1661 }
0x11c0   :  { %1067 = vadd.xlane.f32.xlu0 %v1066_v31 }
0x11d1   :  { %v912_v34 = vpop.xlane.xlu1 %911 }
0x11d2   :  { %1499 = vst.msk [vmem:[%s2450_s7 + $0x6] sm:$0x3] %vm276_vm2, %v912_v34 }
0x11d4   :  { %1305 = vrot.lane.b32.xlu0 %v1662_v32, %s1682_s15 }
0x11e9   :  { %v1210_v51 = vpop.permute.xlu1 %1209 }
0x11ea   :  { %v1212_v19 = vsel %vm2485_vm4, %v1210_v51, 0.0 }
0x1203   :  { %v1337_v46 = vpop.permute.xlu2 %1336 }
0x1204   :  { %v1339_v48 = vadd.f32 %v1337_v46, %v1329_v55 }
0x1206   :  { %1663 = vtanh.f32 %v1339_v48  ;;  %v1359_v41 = vsel %vm2394_vm7, %v1339_v48, %v1204_v59 }
0x120b   :  { %v1054_v17 = vpop.permute.xlu2 %1053 }
0x120c   :  { %v1664_v13 = vpop.eup %1663  ;;  %v1056_v14 = vsel %vm2484_vm6, %v1054_v17, 0.0 }
0x120d   :  { %1342 = vrot.lane.b32.xlu0 %v1664_v13, %s1682_s15  ;;  %1057 = vadd.xlane.f32.xlu2 %v1056_v14  ;;  %s1525_s15 = sld [smem:[#allocation7 + $0x7]] }
0x1213   :  { %v1347_v24 = vstv %s1525_s15 }
0x1214   :  { %vm2385_vm9 = vcmp.lt.s32.totalorder %v1811_v62, %v1347_v24 }
0x1215   :  { %1213 = vadd.xlane.f32.xlu2 %v1212_v19 }
0x122d   :  { %1219 = vrot.lane.b32.xlu2 %v1217_v12, %s1681_s3 }
0x1233   :  { %v1068_v44 = vpop.xlane.xlu0 %1067 }
0x1234   :  { %1509 = vst.msk [vmem:[%s2450_s7 + $0x4] sm:$0x3] %vm276_vm2, %v1068_v44 }
0x1246   :  { %v1306_v23 = vpop.permute.xlu0 %1305 }
0x1247   :  { %v1308_v28 = vmul.f32 %v1306_v23, %v2323_v36 }
0x1249   :  { %v1360_v25 = vsel %vm2385_vm9, %v1308_v28, 0.0  ;;  %v1354_v39 = vsel %vm2385_vm9, %v1308_v28, %v2210_v52 }
0x124a   :  { %v1362_v58 = vmul.f32 %v1360_v25, %v2229_v27 }
0x124c   :  { %1364 = vrot.lane.b32.xlu1 %v1362_v58, %s1681_s3 }
0x127f   :  { %v1343_v11 = vpop.permute.xlu0 %1342 }
0x1280   :  { %v1345_v50 = vmul.f32 %v1343_v11, %v1326_v4  ;;  %v1058_v56 = vpop.xlane.xlu2 %1057 }
0x1281   :  { %1508 = vst.msk [vmem:[%s2449_s6 + $0xa] sm:$0x3] %vm276_vm2, %v1058_v56 }
0x1282   :  { %v1361_v27 = vsel %vm2394_vm7, %v1345_v50, 0.0  ;;  %v1358_v33 = vsel %vm2394_vm7, %v1345_v50, %v2221_v60 }
0x1283   :  { %v1372_v36 = vmul.f32 %v1361_v27, %v2236_v5  ;;  %v1355_v5 = vsel %vm2385_vm9, %v1302_v7, %v1200_v16 }
0x1285   :  { %1374 = vrot.lane.b32.xlu1 %v1372_v36, %s1681_s3 }
0x1288   :  { %v1214_v37 = vpop.xlane.xlu2 %1213 }
0x1289   :  { %1518 = vst.msk [vmem:[%s2449_s6 + $0xc] sm:$0x3] %vm276_vm2, %v1214_v37 }
0x1290   :  { %v1220_v62 = vpop.permute.xlu2 %1219 }
0x1291   :  { %v1222_v35 = vsel %vm2481_vm0, %v1220_v62, 0.0 }
0x1292   :  { %1223 = vadd.xlane.f32.xlu0 %v1222_v35 }
0x12a6   :  { %1382 = vrot.lane.b32.xlu0 %v1354_v39, %s1681_s3 }
0x12ae   :  { %1387 = vrot.lane.b32.xlu0 %v1355_v5, %s1683_s16 }
0x12b6   :  { %1392 = vrot.lane.b32.xlu0 %v1358_v33, %s1681_s3 }
0x12be   :  { %v1365_v42 = vpop.permute.xlu1 %1364  ;;  %1397 = vrot.lane.b32.xlu0 %v1359_v41, %s1683_s16 }
0x12bf   :  { %v1367_v52 = vsel %vm2490_vm10, %v1365_v42, 0.0 }
0x12c0   :  { %1368 = vadd.xlane.f32.xlu1 %v1367_v52 }
0x12f7   :  { %v1375_v22 = vpop.permute.xlu1 %1374 }
0x12f8   :  { %v1377_v43 = vsel %vm2491_vm13, %v1375_v22, 0.0 }
0x12f9   :  { %1378 = vadd.xlane.f32.xlu2 %v1377_v43 }
0x1305   :  { %v1224_v38 = vpop.xlane.xlu0 %1223 }
0x1306   :  { %1519 = vst.msk [vmem:[%s2450_s7 + $0x2] sm:$0x3] %vm276_vm2, %v1224_v38 }
0x1318   :  { %v1383_v60 = vpop.permute.xlu0 %1382 }
0x1319   :  { %1385 = vst.msk [vmem:[#allocation2] sm:$0x3] %vm2492_vm11, %v1383_v60 }
0x1320   :  { %v1388_v30 = vpop.permute.xlu0 %1387 }
0x1321   :  { %1390 = vst.msk [vmem:[#allocation3] sm:$0x3] %vm2493_vm14, %v1388_v30 }
0x1328   :  { %v1393_v0 = vpop.permute.xlu0 %1392 }
0x1329   :  { %1395 = vst.msk [vmem:[#allocation4] sm:$0x3] %vm2494_vm15, %v1393_v0 }
0x1330   :  { %v1398_v45 = vpop.permute.xlu0 %1397 }
0x1331   :  { %1400 = vst.msk [vmem:[#allocation5] sm:$0x3] %vm2495_vm5, %v1398_v45 }
0x1333   :  { %v1369_v54 = vpop.xlane.xlu1 %1368 }
0x1334   :  { %1526 = vst.msk [vmem:[%s2449_s6 + $0xe] sm:$0x3] %vm276_vm2, %v1369_v54 }
0x136c   :  { %v1379_v21 = vpop.xlane.xlu2 %1378 }
0x136d   :  { %1380 = vst.msk [vmem:[%s2450_s7] sm:$0x3] %vm276_vm2, %v1379_v21 }

</bundles_post_ra>
